<compile_context>
chip_gen: v7x
topology: tpu7x:2x2x1
jax: 0.10.0
libtpu: 0.0.40
codegen_flags: <defaults>
</compile_context>

<pallas_src>
import functools
import math

import jax
import jax.numpy as jnp
from jax.experimental import pallas as pl
from jax.experimental.pallas import tpu as pltpu


def nextpow2(x):
    return int(math.ceil(math.log2(x)))


# ---------------------------------------------------------------------------
# Kernel 1: power spectrogram (windowed DFT via a single stacked MXU matmul)
#           + per-(batch, frequency) mean/std standardization over time
#           (torch unbiased std), fully lane-dense on (FP, B*T) and
#           sublane-aligned end to end.
# ---------------------------------------------------------------------------
def _spec_kernel(f_valid, unbiased, frames_ref, basis_ref, g_ref, s_ref, out_ref):
    ft = frames_ref[...]                                                  # (n_fft, B*T)
    # Stacked [cos; -sin] basis -> one MXU pass. Rows [0:FP) = real part,
    # rows [FP:2FP) = imag part; FP is a sublane multiple so the split is an
    # aligned slice (no vreg re-layout).
    ri = jnp.dot(basis_ref[...], ft, preferred_element_type=jnp.float32)  # (2FP, B*T)
    fp = ri.shape[0] // 2
    re = ri[:fp]
    im = ri[fp:]
    p = re * re + im * im                                                 # (FP, B*T)

    # Per-batch mean over time via skinny rank-B factors:
    #   mean = (p @ G) @ S  with G:(BT,BP) = (1/T)*block indicator and
    #   S:(BP,BT) the one-hot broadcast back — no dense (BT,BT) matmul.
    g = g_ref[...]
    s = s_ref[...]
    mean = jnp.dot(jnp.dot(p, g, preferred_element_type=jnp.float32), s,
                   preferred_element_type=jnp.float32)
    c = p - mean
    var = jnp.dot(jnp.dot(c * c, g, preferred_element_type=jnp.float32), s,
                  preferred_element_type=jnp.float32) * unbiased
    # NOTE: no epsilon, matching torch.std semantics — a zero-variance
    # (silent) frequency bin yields inf/nan, exactly like the reference.
    z = c * jax.lax.rsqrt(var)
    # Zero the FP-F padded frequency rows (they have var==0 -> 0*inf NaN
    # otherwise) so they can be fed directly into the backbone's pad-to-288.
    row = jax.lax.broadcasted_iota(jnp.int32, z.shape, 0)
    z = jnp.where(row < f_valid, z, 0.0)
    out_ref[...] = z.astype(out_ref.dtype)


def spectrogram(signal, basis, n_fft, hop_length, F, FP):
    """Standardized power spectrogram, returned as (B, FP, T) bfloat16 with
    frequency rows >= F zeroed (FP = F rounded up to a sublane multiple)."""
    B, L = signal.shape
    T = 1 + L // hop_length
    assert T > 1, "unbiased std requires at least 2 STFT frames"
    BT = B * T

    # glue: torch.stft(center=True) reflect padding + frame gather (data
    # dependent, stays per call; tiny at this problem size).
    pad = n_fft // 2
    padded = jnp.pad(signal, ((0, 0), (pad, pad)), mode="reflect")
    idx = jnp.arange(T)[:, None] * hop_length + jnp.arange(n_fft)[None, :]
    frames = padded[:, idx]                                # (B, T, n_fft)
    frames_lane = frames.reshape(BT, n_fft).T              # (n_fft, B*T), col = b*T + t

    # Skinny per-batch averaging factors (padded to 8 "batch lanes" for clean
    # tiling; constant-folded under jit since they depend only on shapes).
    BP = ((B + 7) // 8) * 8
    col_batch = jnp.arange(BT) // T
    batches = jnp.arange(BP)
    G = (col_batch[:, None] == batches[None, :]).astype(jnp.float32) / T   # (BT, BP)
    S = (batches[:, None] == col_batch[None, :]).astype(jnp.float32)       # (BP, BT)

    out = pl.pallas_call(
        functools.partial(_spec_kernel, F, T / (T - 1.0)),  # unbiased-variance factor
        out_shape=jax.ShapeDtypeStruct((FP, BT), jnp.bfloat16),
        in_specs=[pl.BlockSpec(memory_space=pltpu.MemorySpace.VMEM)] * 4,
        out_specs=pl.BlockSpec(memory_space=pltpu.MemorySpace.VMEM),
    )(frames_lane, basis, G, S)

    # (FP, B*T) -> (B, FP, T): small bf16 XLA reshape/transpose between kernels.
    return jnp.transpose(out.reshape(FP, B, T), (1, 0, 2))


# ---------------------------------------------------------------------------
# Kernel 2 (fused backbone patch-embedding + head).
#   Per N-tile j:   y       = A @ W[:, j] + bias[j]        (M, tn)  bf16 MXU, f32 acc
#                   feat    = Hmat @ y                      (B, tn)  fc(9,1)+avgpool fold
#                   part[j] = feat @ cls_wT[j]              (B, nc)  partial classifier
#   Each tile writes its own partial-logit block (parallel grid axis, so both
#   v7x TensorCores split the weight DMA); the tiny (nt,B,nc) sum + folded
#   bias happens outside the kernel.
# ---------------------------------------------------------------------------
def _backbone_head_kernel(a_ref, b_ref, bias_ref, hmat_ref, wct_ref, part_ref):
    y = (jnp.dot(a_ref[...], b_ref[...], preferred_element_type=jnp.float32)
         + bias_ref[...])                                                 # (M, tn) f32
    feat = jnp.dot(hmat_ref[...], y, preferred_element_type=jnp.float32)  # (B, tn)
    part_ref[...] = jnp.dot(feat, wct_ref[...], preferred_element_type=jnp.float32)


def backbone_head(a, w_eff, bias2, hmat, cls_wT, *, tn=1024):
    # Single K pass, A resident across N tiles; weight DMA dominates, so M is
    # deliberately not tiled at this size (see review).
    M, K = a.shape
    K2, N = w_eff.shape
    assert K == K2
    Bsz, M2 = hmat.shape
    assert M2 == M
    nc = cls_wT.shape[1]
    tn = min(tn, N)
    assert N % tn == 0
    nt = N // tn
    partials = pl.pallas_call(
        _backbone_head_kernel,
        out_shape=jax.ShapeDtypeStruct((nt, Bsz, nc), jnp.float32),
        grid=(nt,),
        in_specs=[
            pl.BlockSpec((M, K), lambda j: (0, 0)),        # A resident, fetched once
            pl.BlockSpec((K, tn), lambda j: (0, j)),       # weight tile (the big DMA)
            pl.BlockSpec((1, tn), lambda j: (0, j)),
            pl.BlockSpec((Bsz, M), lambda j: (0, 0)),      # Hmat resident
            pl.BlockSpec((tn, nc), lambda j: (j, 0)),
        ],
        out_specs=pl.BlockSpec((None, Bsz, nc), lambda j: (j, 0, 0)),
        compiler_params=pltpu.CompilerParams(dimension_semantics=("parallel",)),
    )(a, w_eff, bias2, hmat, cls_wT)
    return partials.sum(axis=0)                            # (B, nc): tiny XLA reduce


def backbone_standin_and_head(spec_bft, params):
    # TODO(synk): the pretrained ResNet-50 trunk is not reproduced; stand-in is
    # a single deterministic stride-32 patch-embedding conv (3 -> 2048 ch).
    # The module's 3 input channels are exact copies of the spectrogram, so the
    # channel axis was pre-summed into w_eff at init (numerically identical,
    # 3x fewer MXU FLOPs, no (B,3,257,T) materialization).
    B, HP, W = spec_bft.shape                              # HP = FP (padded rows are zero)
    P = 32
    Hp, Wp = pl.cdiv(HP, P), pl.cdiv(W, P)
    x = jnp.pad(spec_bft, ((0, 0), (0, Hp * P - HP), (0, Wp * P - W)))
    x = (x.reshape(B, Hp, P, Wp, P)
          .transpose(0, 1, 3, 2, 4)
          .reshape(B * Hp * Wp, P * P))                    # (M, 1024) bf16

    # Fold "Linear(9,1) over H then mean over W" into one (B, M) left factor.
    assert params["fc_w"].size == Hp
    hww = jnp.repeat(params["fc_w"].reshape(-1), Wp) / Wp            # (Hp*Wp,)
    hmat = jnp.kron(jnp.eye(B, dtype=jnp.float32), hww[None, :])     # (B, B*Hp*Wp)

    logits = backbone_head(x, params["w_eff"], params["b_patch2"], hmat,
                           params["cls_wT"])
    return logits + params["head_bias"]                   # folded fc_b/cls_b bias


# ---------------------------------------------------------------------------
# Parameter construction — all heavy derived tensors are built ONCE here
# (hoisted out of the forward path per the performance review).
# ---------------------------------------------------------------------------
def make_params(key, num_classes, n_fft, win_length):
    F = n_fft // 2 + 1
    FP = ((F + 7) // 8) * 8
    C_feat = 2048
    P = 32
    patch_dim = 3 * P * P

    k_wp, k_fc, k_cls = jax.random.split(key, 3)

    # torch.hamming_window(win_length) default: periodic, alpha=0.54, beta=0.46
    nwin = jnp.arange(win_length, dtype=jnp.float32)
    window = 0.54 - 0.46 * jnp.cos(2.0 * jnp.pi * nwin / win_length)

    # Centered zero-padded window folded into the stacked [cos; -sin] DFT basis.
    left = (n_fft - win_length) // 2
    win_p = jnp.zeros((n_fft,), jnp.float32).at[left:left + win_length].set(window)
    f = jnp.arange(F, dtype=jnp.float32)[:, None]
    n = jnp.arange(n_fft, dtype=jnp.float32)[None, :]
    ang = 2.0 * jnp.pi * f * n / n_fft
    cos_b = win_p[None, :] * jnp.cos(ang)                  # (F, n_fft)
    sin_b = -win_p[None, :] * jnp.sin(ang)                 # (F, n_fft)
    basis = (jnp.zeros((2 * FP, n_fft), jnp.float32)
             .at[:F].set(cos_b)
             .at[FP:FP + F].set(sin_b))

    # Stand-in backbone / head weights (deterministic).
    w_patch = jax.random.normal(k_wp, (patch_dim, C_feat), jnp.float32) * 0.02
    b_patch = jnp.zeros((C_feat,), jnp.float32)
    fc_w = jax.random.normal(k_fc, (1, 9), jnp.float32) * 0.3          # nn.Linear(9, 1)
    fc_b = jnp.zeros((1,), jnp.float32)
    cls_w = jax.random.normal(k_cls, (num_classes, C_feat), jnp.float32) * 0.02
    cls_b = jnp.zeros((num_classes,), jnp.float32)                      # nn.Linear(2048, nc)

    # Hoisted derived tensors:
    #  * channel pre-sum (3 identical spectrogram channels) -> K 3072 -> 1024.
    #    NOTE: summing in f32 then casting to bf16 reorders rounding slightly
    #    vs three separate bf16 matmuls with f32 accumulation (tiny drift).
    w_eff = w_patch.reshape(3, P * P, C_feat).sum(0).astype(jnp.bfloat16)   # (1024, 2048)
    b_patch2 = b_patch.reshape(1, C_feat).astype(jnp.float32)
    cls_wT = cls_w.T.astype(jnp.float32)                                    # (2048, nc)
    # fc bias contributes fc_b * cls_w.sum(1) after the classifier fold.
    head_bias = (cls_b + fc_b[0] * cls_w.sum(axis=1)).reshape(1, num_classes)

    return dict(basis=basis, w_eff=w_eff, b_patch2=b_patch2, fc_w=fc_w,
                cls_wT=cls_wT, head_bias=head_bias)


# ---------------------------------------------------------------------------
# Full forward
# ---------------------------------------------------------------------------
def specnet_forward(params, signal, *, n_fft, hop_length):
    F = n_fft // 2 + 1
    if F != 257:
        raise RuntimeError(f"Expected SPEC size 257, got {F}")
    FP = ((F + 7) // 8) * 8
    spec = spectrogram(signal, params["basis"], n_fft, hop_length, F, FP)
    # Original module does unsqueeze(1).repeat(1,3,1,1); the 3 identical
    # channels are folded into w_eff (see make_params / backbone stand-in).
    return backbone_standin_and_head(spec, params)


if __name__ == "__main__":
    num_classes = 10
    sf = 16000
    win_size_ms, hop_len_ms = 25, 10
    win_length = round(0.001 * win_size_ms * sf)        # 400
    hop_length = round(0.001 * hop_len_ms * sf)         # 160
    n_fft = 2 ** nextpow2(win_length)                   # 512 -> 257 freq bins

    B = 2
    T = 64                                              # STFT frames
    L = (T - 1) * hop_length                            # signal length

    key = jax.random.PRNGKey(0)
    k_sig, k_params = jax.random.split(key, 2)
    signal = jax.random.normal(k_sig, (B, L), jnp.float32)

    params = make_params(k_params, num_classes, n_fft, win_length)

    forward = jax.jit(functools.partial(specnet_forward,
                                        n_fft=n_fft, hop_length=hop_length))
    y = forward(params, signal)
    jax.block_until_ready(y)
    assert y.shape == (B, num_classes) and y.dtype == jnp.float32
    assert bool(jnp.all(jnp.isfinite(y)))
    print("KERNEL_OK")
</pallas_src>

<mosaic_0001>
module attributes {stable_mosaic.version = 11 : i64} {
  func.func @_spec_kernel(%arg0: memref<512x128xf32, #tpu.memory_space<vmem>>, %arg1: memref<528x512xf32, #tpu.memory_space<vmem>>, %arg2: memref<128x8xf32, #tpu.memory_space<vmem>>, %arg3: memref<8x128xf32, #tpu.memory_space<vmem>>, %arg4: memref<264x128xbf16, #tpu.memory_space<vmem>>) attributes {dimension_semantics = [], scalar_prefetch = 0 : i64, scratch_operands = 0 : i64, tpu.core_type = #tpu.core_type<tc>} {
    %c0 = arith.constant 0 : index
    %c0_0 = arith.constant 0 : index
    %0 = vector.load %arg0[%c0, %c0_0] : memref<512x128xf32, #tpu.memory_space<vmem>>, vector<512x128xf32>
    %c0_1 = arith.constant 0 : index
    %c0_2 = arith.constant 0 : index
    %1 = vector.load %arg1[%c0_1, %c0_2] : memref<528x512xf32, #tpu.memory_space<vmem>>, vector<528x512xf32>
    %cst = arith.constant dense<0.000000e+00> : vector<528x128xf32>
    %2 = tpu.matmul %1, %0, %cst {dimension_numbers = #tpu.dot_dimension_numbers<[1], [0], [0], [1], [0, 0, 1, 1], [], []>} : vector<528x512xf32>, vector<512x128xf32>, vector<528x128xf32> -> vector<528x128xf32>
    %3 = vector.extract_strided_slice %2 {offsets = [0, 0], sizes = [264, 128], strides = [1, 1]} : vector<528x128xf32> to vector<264x128xf32>
    %4 = vector.extract_strided_slice %2 {offsets = [264, 0], sizes = [264, 128], strides = [1, 1]} : vector<528x128xf32> to vector<264x128xf32>
    %5 = arith.mulf %3, %3 : vector<264x128xf32>
    %6 = arith.mulf %4, %4 : vector<264x128xf32>
    %7 = arith.addf %5, %6 : vector<264x128xf32>
    %c0_3 = arith.constant 0 : index
    %c0_4 = arith.constant 0 : index
    %8 = vector.load %arg2[%c0_3, %c0_4] : memref<128x8xf32, #tpu.memory_space<vmem>>, vector<128x8xf32>
    %c0_5 = arith.constant 0 : index
    %c0_6 = arith.constant 0 : index
    %9 = vector.load %arg3[%c0_5, %c0_6] : memref<8x128xf32, #tpu.memory_space<vmem>>, vector<8x128xf32>
    %cst_7 = arith.constant dense<0.000000e+00> : vector<264x8xf32>
    %10 = tpu.matmul %7, %8, %cst_7 {dimension_numbers = #tpu.dot_dimension_numbers<[1], [0], [0], [1], [0, 0, 1, 1], [], []>} : vector<264x128xf32>, vector<128x8xf32>, vector<264x8xf32> -> vector<264x8xf32>
    %cst_8 = arith.constant dense<0.000000e+00> : vector<264x128xf32>
    %11 = tpu.matmul %10, %9, %cst_8 {dimension_numbers = #tpu.dot_dimension_numbers<[1], [0], [0], [1], [0, 0, 1, 1], [], []>} : vector<264x8xf32>, vector<8x128xf32>, vector<264x128xf32> -> vector<264x128xf32>
    %12 = arith.subf %7, %11 : vector<264x128xf32>
    %13 = arith.mulf %12, %12 : vector<264x128xf32>
    %cst_9 = arith.constant dense<0.000000e+00> : vector<264x8xf32>
    %14 = tpu.matmul %13, %8, %cst_9 {dimension_numbers = #tpu.dot_dimension_numbers<[1], [0], [0], [1], [0, 0, 1, 1], [], []>} : vector<264x128xf32>, vector<128x8xf32>, vector<264x8xf32> -> vector<264x8xf32>
    %cst_10 = arith.constant dense<0.000000e+00> : vector<264x128xf32>
    %15 = tpu.matmul %14, %9, %cst_10 {dimension_numbers = #tpu.dot_dimension_numbers<[1], [0], [0], [1], [0, 0, 1, 1], [], []>} : vector<264x8xf32>, vector<8x128xf32>, vector<264x128xf32> -> vector<264x128xf32>
    %cst_11 = arith.constant 1.01587307 : f32
    %16 = vector.broadcast %cst_11 : f32 to vector<264x128xf32>
    %17 = arith.mulf %15, %16 : vector<264x128xf32>
    %18 = math.rsqrt %17 : vector<264x128xf32>
    %19 = arith.mulf %12, %18 : vector<264x128xf32>
    %20 = tpu.iota {dimensions = array<i32: 0>} : vector<264x128xi32>
    %c257_i32 = arith.constant 257 : i32
    %21 = vector.broadcast %c257_i32 : i32 to vector<264x128xi32>
    %22 = arith.cmpi slt, %20, %21 : vector<264x128xi32>
    %cst_12 = arith.constant 0.000000e+00 : f32
    %23 = vector.broadcast %cst_12 : f32 to vector<264x128xf32>
    %24 = arith.select %22, %19, %23 : vector<264x128xi1>, vector<264x128xf32>
    %25 = arith.truncf %24 : vector<264x128xf32> to vector<264x128xbf16>
    %c0_13 = arith.constant 0 : index
    %c0_14 = arith.constant 0 : index
    %26 = vector.load %arg4[%c0_13, %c0_14] : memref<264x128xbf16, #tpu.memory_space<vmem>>, vector<264x128xbf16>
    tpu.vector_store %arg4[%c0_13, %c0_14], %25 {strides = array<i32>} : memref<264x128xbf16, #tpu.memory_space<vmem>>, vector<264x128xbf16>,
    return
  }
}

module attributes {stable_mosaic.version = 11 : i64} {
  func.func @_backbone_head_kernel(%arg0: i32, %arg1: memref<36x1024xbf16, #tpu.memory_space<vmem>>, %arg2: memref<1024x1024xbf16, #tpu.memory_space<vmem>>, %arg3: memref<1x1024xf32, #tpu.memory_space<vmem>>, %arg4: memref<2x36xf32, #tpu.memory_space<vmem>>, %arg5: memref<1024x10xf32, #tpu.memory_space<vmem>>, %arg6: memref<1x2x10xf32, #tpu.memory_space<vmem>>) attributes {dimension_semantics = [#tpu.dimension_semantics<parallel>], iteration_bounds = array<i64: 2>, scalar_prefetch = 0 : i64, scratch_operands = 0 : i64, tpu.core_type = #tpu.core_type<tc>, window_params = [{pipeline_mode = #tpu.pipeline_mode<synchronous>, transform_indices = @transform_0, window_bounds = array<i64: 36, 1024>}, {transform_indices = @transform_1, window_bounds = array<i64: 1024, 1024>}, {transform_indices = @transform_2, window_bounds = array<i64: 1, 1024>}, {pipeline_mode = #tpu.pipeline_mode<synchronous>, transform_indices = @transform_3, window_bounds = array<i64: 2, 36>}, {transform_indices = @transform_4, window_bounds = array<i64: 1024, 10>}, {transform_indices = @transform_5, window_bounds = array<i64: 1, 2, 10>}]} {
    %c0 = arith.constant 0 : index
    %c0_0 = arith.constant 0 : index
    %0 = vector.load %arg1[%c0, %c0_0] : memref<36x1024xbf16, #tpu.memory_space<vmem>>, vector<36x1024xbf16>
    %c0_1 = arith.constant 0 : index
    %c0_2 = arith.constant 0 : index
    %1 = vector.load %arg2[%c0_1, %c0_2] : memref<1024x1024xbf16, #tpu.memory_space<vmem>>, vector<1024x1024xbf16>
    %cst = arith.constant dense<0.000000e+00> : vector<36x1024xf32>
    %2 = tpu.matmul %0, %1, %cst {dimension_numbers = #tpu.dot_dimension_numbers<[1], [0], [0], [1], [0, 0, 1, 1], [], []>} : vector<36x1024xbf16>, vector<1024x1024xbf16>, vector<36x1024xf32> -> vector<36x1024xf32>
    %c0_3 = arith.constant 0 : index
    %c0_4 = arith.constant 0 : index
    %3 = vector.load %arg3[%c0_3, %c0_4] : memref<1x1024xf32, #tpu.memory_space<vmem>>, vector<1x1024xf32>
    %4 = vector.broadcast %3 : vector<1x1024xf32> to vector<36x1024xf32>
    %5 = arith.addf %2, %4 : vector<36x1024xf32>
    %c0_5 = arith.constant 0 : index
    %c0_6 = arith.constant 0 : index
    %6 = vector.load %arg4[%c0_5, %c0_6] : memref<2x36xf32, #tpu.memory_space<vmem>>, vector<2x36xf32>
    %cst_7 = arith.constant dense<0.000000e+00> : vector<2x1024xf32>
    %7 = tpu.matmul %6, %5, %cst_7 {dimension_numbers = #tpu.dot_dimension_numbers<[1], [0], [0], [1], [0, 0, 1, 1], [], []>} : vector<2x36xf32>, vector<36x1024xf32>, vector<2x1024xf32> -> vector<2x1024xf32>
    %c0_8 = arith.constant 0 : index
    %c0_9 = arith.constant 0 : index
    %8 = vector.load %arg5[%c0_8, %c0_9] : memref<1024x10xf32, #tpu.memory_space<vmem>>, vector<1024x10xf32>
    %cst_10 = arith.constant dense<0.000000e+00> : vector<2x10xf32>
    %9 = tpu.matmul %7, %8, %cst_10 {dimension_numbers = #tpu.dot_dimension_numbers<[1], [0], [0], [1], [0, 0, 1, 1], [], []>} : vector<2x1024xf32>, vector<1024x10xf32>, vector<2x10xf32> -> vector<2x10xf32>
    %c0_11 = arith.constant 0 : index
    %c0_12 = arith.constant 0 : index
    %c0_13 = arith.constant 0 : index
    %10 = vector.load %arg6[%c0_11, %c0_12, %c0_13] : memref<1x2x10xf32, #tpu.memory_space<vmem>>, vector<1x2x10xf32>
    %11 = vector.shape_cast %10 : vector<1x2x10xf32> to vector<2x10xf32>
    %12 = vector.shape_cast %9 : vector<2x10xf32> to vector<1x2x10xf32>
    tpu.vector_store %arg6[%c0_11, %c0_12, %c0_13], %12 {strides = array<i32>} : memref<1x2x10xf32, #tpu.memory_space<vmem>>, vector<1x2x10xf32>,
    return
  }
  func.func @transform_0(%arg0: i32) -> (i32, i32) {
    %c0_i32 = arith.constant 0 : i32
    %c0_i32_0 = arith.constant 0 : i32
    %c0_i32_1 = arith.constant 0 : i32
    return %c0_i32, %c0_i32_0 : i32, i32
  }
  func.func @transform_1(%arg0: i32) -> (i32, i32) {
    %c0_i32 = arith.constant 0 : i32
    %c0_i32_0 = arith.constant 0 : i32
    return %c0_i32, %arg0 : i32, i32
  }
  func.func @transform_2(%arg0: i32) -> (i32, i32) {
    %c0_i32 = arith.constant 0 : i32
    %c0_i32_0 = arith.constant 0 : i32
    return %c0_i32, %arg0 : i32, i32
  }
  func.func @transform_3(%arg0: i32) -> (i32, i32) {
    %c0_i32 = arith.constant 0 : i32
    %c0_i32_0 = arith.constant 0 : i32
    %c0_i32_1 = arith.constant 0 : i32
    return %c0_i32, %c0_i32_0 : i32, i32
  }
  func.func @transform_4(%arg0: i32) -> (i32, i32) {
    %c0_i32 = arith.constant 0 : i32
    %c0_i32_0 = arith.constant 0 : i32
    return %arg0, %c0_i32 : i32, i32
  }
  func.func @transform_5(%arg0: i32) -> (i32, i32, i32) {
    %c0_i32 = arith.constant 0 : i32
    %c0_i32_0 = arith.constant 0 : i32
    %c0_i32_1 = arith.constant 0 : i32
    return %arg0, %c0_i32, %c0_i32_0 : i32, i32, i32
  }
}

</mosaic_0001>

<bundles_post_ra>
// kernel: specnet_forward.2
= control target key start
LH: loop header
LB: loop body
LE: loop exit
PB: predicated region body
PF: predicated region fallthrough
CT: control target
= control target key end

     0   :  { %v4007_v0 = vmov 0.0|0.0   ;;  %vm4008_vm0 = vmmov 0   ;;  %vm1481_vm1 = vcmask 64512   ;;  %s5966_s0 = inlined_call_operand.vmem [shape: f32[512,128], index: 0, kind: input, shape index: {}]   ;;  %s5967_s1 = inlined_call_operand.vmem [shape: f32[528,512], index: 1, kind: input, shape index: {}]   ;;  %s5968_s2 = inlined_call_operand.vmem [shape: f32[128,8], index: 2, kind: input, shape index: {}]   ;;  %s5969_s3 = inlined_call_operand.vmem [shape: f32[8,128], index: 3, kind: input, shape index: {}]   ;;  %s5970_s4 = inlined_call_operand.vmem [shape: bf16[264,128], index: 4, kind: output, shape index: {}]  }
   0x1   :  { %3662 = vmatprep.subr.bf16.mxu0 %v4007_v0  ;;  %v17_v1 = vld [vmem:[%s5966_s0] sm:$0xff]  ;;  %v18_v2 = vld [vmem:[%s5966_s0 + $0x8] sm:$0xff]  ;;  %v19_v3 = vld [vmem:[%s5966_s0 + $0x10] sm:$0xff]  ;;  %3758 = vmatprep.subr.bf16.mxu1 %v4007_v0 }
   0x2   :  { %v3663_v4 = vpack.c.bf16 %v18_v2, %v17_v1  ;;  %v20_v5 = vld [vmem:[%s5966_s0 + $0x18] sm:$0xff]  ;;  %v21_v7 = vld [vmem:[%s5966_s0 + $0x20] sm:$0xff]  ;;  %v22_v8 = vld [vmem:[%s5966_s0 + $0x28] sm:$0xff] }
   0x3   :  { %v3666_v6 = vpack.c.bf16 %v20_v5, %v19_v3  ;;  %v3669_v9 = vpack.c.bf16 %v22_v8, %v21_v7  ;;  %v23_v10 = vld [vmem:[%s5966_s0 + $0x30] sm:$0xff]  ;;  %v24_v11 = vld [vmem:[%s5966_s0 + $0x38] sm:$0xff]  ;;  %v82_v12 = vld [vmem:[%s5967_s1 + $0x8] sm:$0xff] }
   0x4   :  { %3664 = vmatpush1.bf16.msra.mxu0 %v3663_v4  ;;  %v3672_v13 = vpack.c.bf16 %v24_v11, %v23_v10  ;;  %409 = vmatprep.mubr.f32.mxu0 %v82_v12  ;;  %v25_v14 = vld [vmem:[%s5966_s0 + $0x40] sm:$0xff]  ;;  %v26_v15 = vld [vmem:[%s5966_s0 + $0x48] sm:$0xff]  ;;  %v27_v17 = vld [vmem:[%s5966_s0 + $0x50] sm:$0xff] }
   0x5   :  { %3665 = vmatprep.subr.bf16.mxu0 %v4007_v0  ;;  %v3675_v16 = vpack.c.bf16 %v26_v15, %v25_v14  ;;  %v28_v18 = vld [vmem:[%s5966_s0 + $0x58] sm:$0xff]  ;;  %v29_v20 = vld [vmem:[%s5966_s0 + $0x60] sm:$0xff]  ;;  %v30_v21 = vld [vmem:[%s5966_s0 + $0x68] sm:$0xff] }
   0x6   :  { %v3678_v19 = vpack.c.bf16 %v28_v18, %v27_v17  ;;  %v3681_v22 = vpack.c.bf16 %v30_v21, %v29_v20  ;;  %v31_v23 = vld [vmem:[%s5966_s0 + $0x70] sm:$0xff]  ;;  %v32_v24 = vld [vmem:[%s5966_s0 + $0x78] sm:$0xff]  ;;  %v33_v26 = vld [vmem:[%s5966_s0 + $0x80] sm:$0xff] }
   0x7   :  { %v3684_v25 = vpack.c.bf16 %v32_v24, %v31_v23  ;;  %v34_v27 = vld [vmem:[%s5966_s0 + $0x88] sm:$0xff]  ;;  %v35_v29 = vld [vmem:[%s5966_s0 + $0x90] sm:$0xff]  ;;  %v36_v30 = vld [vmem:[%s5966_s0 + $0x98] sm:$0xff] }
   0x8   :  { %3667 = vmatpush1.bf16.msra.mxu0 %v3666_v6  ;;  %v3687_v28 = vpack.c.bf16 %v34_v27, %v33_v26  ;;  %v3690_v31 = vpack.c.bf16 %v36_v30, %v35_v29  ;;  %v37_v32 = vld [vmem:[%s5966_s0 + $0xa0] sm:$0xff]  ;;  %v38_v33 = vld [vmem:[%s5966_s0 + $0xa8] sm:$0xff]  ;;  %v39_v35 = vld [vmem:[%s5966_s0 + $0xb0] sm:$0xff] }
   0x9   :  { %3668 = vmatprep.subr.bf16.mxu0 %v4007_v0  ;;  %v3693_v34 = vpack.c.bf16 %v38_v33, %v37_v32  ;;  %v40_v36 = vld [vmem:[%s5966_s0 + $0xb8] sm:$0xff]  ;;  %v41_v38 = vld [vmem:[%s5966_s0 + $0xc0] sm:$0xff]  ;;  %v42_v39 = vld [vmem:[%s5966_s0 + $0xc8] sm:$0xff] }
   0xa   :  { %v3696_v37 = vpack.c.bf16 %v40_v36, %v39_v35  ;;  %v3699_v40 = vpack.c.bf16 %v42_v39, %v41_v38  ;;  %v43_v41 = vld [vmem:[%s5966_s0 + $0xd0] sm:$0xff]  ;;  %v44_v42 = vld [vmem:[%s5966_s0 + $0xd8] sm:$0xff]  ;;  %v45_v44 = vld [vmem:[%s5966_s0 + $0xe0] sm:$0xff] }
   0xb   :  { %v3702_v43 = vpack.c.bf16 %v44_v42, %v43_v41  ;;  %v46_v45 = vld [vmem:[%s5966_s0 + $0xe8] sm:$0xff]  ;;  %v47_v47 = vld [vmem:[%s5966_s0 + $0xf0] sm:$0xff]  ;;  %v48_v48 = vld [vmem:[%s5966_s0 + $0xf8] sm:$0xff] }
   0xc   :  { %3670 = vmatpush1.bf16.msra.mxu0 %v3669_v9  ;;  %v3705_v46 = vpack.c.bf16 %v46_v45, %v45_v44  ;;  %v3708_v49 = vpack.c.bf16 %v48_v48, %v47_v47  ;;  %v49_v50 = vld [vmem:[%s5966_s0 + $0x100] sm:$0xff]  ;;  %v50_v51 = vld [vmem:[%s5966_s0 + $0x108] sm:$0xff]  ;;  %v51_v55 = vld [vmem:[%s5966_s0 + $0x110] sm:$0xff] }
   0xd   :  { %3671 = vmatprep.subr.bf16.mxu0 %v4007_v0  ;;  %v81_v52 = vld [vmem:[%s5967_s1] sm:$0xff]  ;;  %v3711_v53 = vpack.c.bf16 %v50_v51, %v49_v50  ;;  %v86_v54 = vld [vmem:[%s5967_s1 + $0x28] sm:$0xff]  ;;  %v52_v56 = vld [vmem:[%s5966_s0 + $0x118] sm:$0xff] }
   0xe   :  { %v85_v57 = vld [vmem:[%s5967_s1 + $0x20] sm:$0xff]  ;;  %v3714_v58 = vpack.c.bf16 %v52_v56, %v51_v55  ;;  %v90_v59 = vld [vmem:[%s5967_s1 + $0x48] sm:$0xff]  ;;  %v55_v2 = vld [vmem:[%s5966_s0 + $0x130] sm:$0xff] }
   0xf   :  { %v53_v60 = vld [vmem:[%s5966_s0 + $0x120] sm:$0xff]  ;;  %v54_v61 = vld [vmem:[%s5966_s0 + $0x128] sm:$0xff]  ;;  %v56_v3 = vld [vmem:[%s5966_s0 + $0x138] sm:$0xff] }
  0x10   :  { %3673 = vmatpush1.bf16.msra.mxu0 %v3672_v13  ;;  %v89_v62 = vld [vmem:[%s5967_s1 + $0x40] sm:$0xff]  ;;  %v3717_v63 = vpack.c.bf16 %v54_v61, %v53_v60  ;;  %v94_v1 = vld [vmem:[%s5967_s1 + $0x68] sm:$0xff]  ;;  %v3720_v5 = vpack.c.bf16 %v56_v3, %v55_v2  ;;  %v59_v12 = vld [vmem:[%s5966_s0 + $0x150] sm:$0xff] }
  0x11   :  { %3674 = vmatprep.subr.bf16.mxu0 %v4007_v0  ;;  %v93_v4 = vld [vmem:[%s5967_s1 + $0x60] sm:$0xff]  ;;  %v98_v6 = vld [vmem:[%s5967_s1 + $0x88] sm:$0xff]  ;;  %v60_v13 = vld [vmem:[%s5966_s0 + $0x158] sm:$0xff] }
  0x12   :  { %v57_v7 = vld [vmem:[%s5966_s0 + $0x140] sm:$0xff]  ;;  %v58_v8 = vld [vmem:[%s5966_s0 + $0x148] sm:$0xff]  ;;  %v3726_v15 = vpack.c.bf16 %v60_v13, %v59_v12  ;;  %v64_v23 = vld [vmem:[%s5966_s0 + $0x178] sm:$0xff] }
  0x13   :  { %v97_v9 = vld [vmem:[%s5967_s1 + $0x80] sm:$0xff]  ;;  %v3723_v10 = vpack.c.bf16 %v58_v8, %v57_v7  ;;  %v102_v11 = vld [vmem:[%s5967_s1 + $0xa8] sm:$0xff]  ;;  %v67_v32 = vld [vmem:[%s5966_s0 + $0x190] sm:$0xff] }
  0x14   :  { %3676 = vmatpush1.bf16.msra.mxu0 %v3675_v16  ;;  %v101_v14 = vld [vmem:[%s5967_s1 + $0xa0] sm:$0xff]  ;;  %v106_v16 = vld [vmem:[%s5967_s1 + $0xc8] sm:$0xff]  ;;  %v68_v33 = vld [vmem:[%s5966_s0 + $0x198] sm:$0xff] }
  0x15   :  { %3677 = vmatprep.subr.bf16.mxu0 %v4007_v0  ;;  %v61_v17 = vld [vmem:[%s5966_s0 + $0x160] sm:$0xff]  ;;  %v62_v18 = vld [vmem:[%s5966_s0 + $0x168] sm:$0xff]  ;;  %v3738_v35 = vpack.c.bf16 %v68_v33, %v67_v32  ;;  %v72_v50 = vld [vmem:[%s5966_s0 + $0x1b8] sm:$0xff] }
  0x16   :  { %v3729_v20 = vpack.c.bf16 %v62_v18, %v61_v17  ;;  %v110_v21 = vld [vmem:[%s5967_s1 + $0xe8] sm:$0xff]  ;;  %v109_v24 = vld [vmem:[%s5967_s1 + $0xe0] sm:$0xff]  ;;  %v80_v32 = vld [vmem:[%s5966_s0 + $0x1f8] sm:$0xff] }
  0x17   :  { %v114_v26 = vld [vmem:[%s5967_s1 + $0x108] sm:$0xff]  ;;  %v65_v27 = vld [vmem:[%s5966_s0 + $0x180] sm:$0xff] }
  0x18   :  { %3679 = vmatpush1.bf16.msra.mxu0 %v3678_v19  ;;  %v105_v19 = vld [vmem:[%s5967_s1 + $0xc0] sm:$0xff]  ;;  %v122_v36 = vld [vmem:[%s5967_s1 + $0x148] sm:$0xff] }
  0x19   :  { %3680 = vmatprep.subr.bf16.mxu0 %v4007_v0  ;;  %v113_v29 = vld [vmem:[%s5967_s1 + $0x100] sm:$0xff]  ;;  %v70_v38 = vld [vmem:[%s5966_s0 + $0x1a8] sm:$0xff] }
  0x1a   :  { %v121_v39 = vld [vmem:[%s5967_s1 + $0x140] sm:$0xff]  ;;  %v126_v41 = vld [vmem:[%s5967_s1 + $0x168] sm:$0xff] }
  0x1b   :  { %v125_v42 = vld [vmem:[%s5967_s1 + $0x160] sm:$0xff]  ;;  %v134_v45 = vld [vmem:[%s5967_s1 + $0x1a8] sm:$0xff] }
  0x1c   :  { %3682 = vmatpush1.bf16.msra.mxu0 %v3681_v22  ;;  %v63_v22 = vld [vmem:[%s5966_s0 + $0x170] sm:$0xff]  ;;  %v129_v44 = vld [vmem:[%s5967_s1 + $0x180] sm:$0xff]  ;;  %v138_v47 = vld [vmem:[%s5967_s1 + $0x1c8] sm:$0xff] }
  0x1d   :  { %3683 = vmatprep.subr.bf16.mxu0 %v4007_v0  ;;  %v137_v48 = vld [vmem:[%s5967_s1 + $0x1c0] sm:$0xff]  ;;  %v142_v51 = vld [vmem:[%s5967_s1 + $0x1e8] sm:$0xff] }
  0x1e   :  { %v145_v55 = vld [vmem:[%s5967_s1 + $0x200] sm:$0xff]  ;;  %v150_v56 = vld [vmem:[%s5967_s1 + $0x228] sm:$0xff] }
  0x1f   :  { %v73_v60 = vld [vmem:[%s5966_s0 + $0x1c0] sm:$0xff]  ;;  %v74_v61 = vld [vmem:[%s5966_s0 + $0x1c8] sm:$0xff] }
  0x20   :  { %3685 = vmatpush1.bf16.msra.mxu0 %v3684_v25  ;;  %v3732_v25 = vpack.c.bf16 %v64_v23, %v63_v22  ;;  %v162_v2 = vld [vmem:[%s5967_s1 + $0x288] sm:$0xff]  ;;  %v161_v3 = vld [vmem:[%s5967_s1 + $0x280] sm:$0xff] }
  0x21   :  { %3686 = vmatprep.subr.bf16.mxu0 %v4007_v0  ;;  %v169_v7 = vld [vmem:[%s5967_s1 + $0x2c0] sm:$0xff]  ;;  %v174_v8 = vld [vmem:[%s5967_s1 + $0x2e8] sm:$0xff] }
  0x22   :  { %v178_v13 = vld [vmem:[%s5967_s1 + $0x308] sm:$0xff]  ;;  %v185_v18 = vld [vmem:[%s5967_s1 + $0x340] sm:$0xff] }
  0x23   :  { %v186_v17 = vld [vmem:[%s5967_s1 + $0x348] sm:$0xff]  ;;  %v189_v22 = vld [vmem:[%s5967_s1 + $0x360] sm:$0xff] }
  0x24   :  { %3688 = vmatpush1.bf16.msra.mxu0 %v3687_v28  ;;  %v66_v28 = vld [vmem:[%s5966_s0 + $0x188] sm:$0xff]  ;;  %v205_v33 = vld [vmem:[%s5967_s1 + $0x3e0] sm:$0xff] }
  0x25   :  { %3689 = vmatprep.subr.bf16.mxu0 %v4007_v0  ;;  %v3735_v30 = vpack.c.bf16 %v66_v28, %v65_v27  ;;  %v197_v27 = vld [vmem:[%s5967_s1 + $0x3a0] sm:$0xff]  ;;  %v202_v28 = vld [vmem:[%s5967_s1 + $0x3c8] sm:$0xff] }
  0x28   :  { %3691 = vmatpush1.bf16.msra.mxu0 %v3690_v31  ;;  %v118_v31 = vld [vmem:[%s5967_s1 + $0x128] sm:$0xff] }
  0x29   :  { %3692 = vmatprep.subr.bf16.mxu0 %v4007_v0 }
  0x2c   :  { %3694 = vmatpush1.bf16.msra.mxu0 %v3693_v34  ;;  %v117_v34 = vld [vmem:[%s5967_s1 + $0x120] sm:$0xff] }
  0x2d   :  { %3695 = vmatprep.subr.bf16.mxu0 %v4007_v0 }
  0x30   :  { %3697 = vmatpush1.bf16.msra.mxu0 %v3696_v37  ;;  %v69_v37 = vld [vmem:[%s5966_s0 + $0x1a0] sm:$0xff] }
  0x31   :  { %3698 = vmatprep.subr.bf16.mxu0 %v4007_v0 }
  0x34   :  { %3700 = vmatpush1.bf16.msra.mxu0 %v3699_v40  ;;  %v3741_v40 = vpack.c.bf16 %v70_v38, %v69_v37  ;;  %v214_v37 = vld [vmem:[%s5967_s1 + $0x428] sm:$0xff]  ;;  %v213_v38 = vld [vmem:[%s5967_s1 + $0x420] sm:$0xff] }
  0x35   :  { %3701 = vmatprep.subr.bf16.mxu0 %v4007_v0 }
  0x38   :  { %3703 = vmatpush1.bf16.msra.mxu0 %v3702_v43  ;;  %v130_v43 = vld [vmem:[%s5967_s1 + $0x188] sm:$0xff] }
  0x39   :  { %3704 = vmatprep.subr.bf16.mxu0 %v4007_v0 }
  0x3c   :  { %3706 = vmatpush1.bf16.msra.mxu0 %v3705_v46  ;;  %v133_v46 = vld [vmem:[%s5967_s1 + $0x1a0] sm:$0xff] }
  0x3d   :  { %3707 = vmatprep.subr.bf16.mxu0 %v4007_v0 }
  0x40   :  { %3709 = vmatpush1.bf16.msra.mxu0 %v3708_v49  ;;  %v71_v49 = vld [vmem:[%s5966_s0 + $0x1b0] sm:$0xff] }
  0x41   :  { %3710 = vmatprep.subr.bf16.mxu0 %v4007_v0 }
  0x43   :  { %410 = vmatmul.mubr.f32.vlgmr.msra.gmra.mrb[0].mxu0 %v81_v52  ;;  %v3744_v52 = vpack.c.bf16 %v72_v50, %v71_v49  ;;  %v238_v49 = vld [vmem:[%s5967_s1 + $0x4e8] sm:$0xff]  ;;  %v237_v50 = vld [vmem:[%s5967_s1 + $0x4e0] sm:$0xff] }
  0x44   :  { %3712 = vmatpush1.bf16.msra.mxu0 %v3711_v53  ;;  %414 = vmatprep.mubr.f32.mxu0 %v86_v54  ;;  %v141_v53 = vld [vmem:[%s5967_s1 + $0x1e0] sm:$0xff]  ;;  %v146_v54 = vld [vmem:[%s5967_s1 + $0x208] sm:$0xff] }
  0x45   :  { %3713 = vmatprep.subr.bf16.mxu0 %v4007_v0 }
  0x47   :  { %415 = vmatmul.mubr.f32.gmra.mrb[2].mxu0 %v85_v57  ;;  %v149_v57 = vld [vmem:[%s5967_s1 + $0x220] sm:$0xff] }
  0x48   :  { %419 = vmatprep.mubr.f32.mxu0 %v90_v59  ;;  %3715 = vmatpush1.bf16.msra.mxu0 %v3714_v58  ;;  %v154_v58 = vld [vmem:[%s5967_s1 + $0x248] sm:$0xff]  ;;  %v153_v59 = vld [vmem:[%s5967_s1 + $0x240] sm:$0xff] }
  0x49   :  { %3716 = vmatprep.subr.bf16.mxu0 %v4007_v0 }
  0x4b   :  { %420 = vmatmul.mubr.f32.gmra.mrb[4].mxu0 %v89_v62  ;;  %v158_v62 = vld [vmem:[%s5967_s1 + $0x268] sm:$0xff] }
  0x4c   :  { %424 = vmatprep.mubr.f32.mxu0 %v94_v1  ;;  %3718 = vmatpush1.bf16.msra.mxu0 %v3717_v63  ;;  %v3747_v63 = vpack.c.bf16 %v74_v61, %v73_v60  ;;  %v157_v1 = vld [vmem:[%s5967_s1 + $0x260] sm:$0xff]  ;;  %v262_v61 = vld [vmem:[%s5967_s1 + $0x5a8] sm:$0xff] }
  0x4d   :  { %3719 = vmatprep.subr.bf16.mxu0 %v4007_v0  ;;  %v257_v60 = vld [vmem:[%s5967_s1 + $0x580] sm:$0xff] }
  0x4f   :  { %425 = vmatmul.mubr.f32.gmra.mrb[6].mxu0 %v93_v4  ;;  %v166_v4 = vld [vmem:[%s5967_s1 + $0x2a8] sm:$0xff] }
  0x50   :  { %429 = vmatprep.mubr.f32.mxu0 %v98_v6  ;;  %3721 = vmatpush1.bf16.msra.mxu0 %v3720_v5  ;;  %v165_v5 = vld [vmem:[%s5967_s1 + $0x2a0] sm:$0xff]  ;;  %v170_v6 = vld [vmem:[%s5967_s1 + $0x2c8] sm:$0xff] }
  0x51   :  { %3722 = vmatprep.subr.bf16.mxu0 %v4007_v0 }
  0x53   :  { %430 = vmatmul.mubr.f32.gmra.mrb[8].mxu0 %v97_v9  ;;  %v75_v9 = vld [vmem:[%s5966_s0 + $0x1d0] sm:$0xff] }
  0x54   :  { %434 = vmatprep.mubr.f32.mxu0 %v102_v11  ;;  %3724 = vmatpush1.bf16.msra.mxu0 %v3723_v10  ;;  %v76_v10 = vld [vmem:[%s5966_s0 + $0x1d8] sm:$0xff]  ;;  %v173_v11 = vld [vmem:[%s5967_s1 + $0x2e0] sm:$0xff] }
  0x55   :  { %3725 = vmatprep.subr.bf16.mxu0 %v4007_v0  ;;  %v3750_v12 = vpack.c.bf16 %v76_v10, %v75_v9  ;;  %v281_v9 = vld [vmem:[%s5967_s1 + $0x640] sm:$0xff]  ;;  %v286_v10 = vld [vmem:[%s5967_s1 + $0x668] sm:$0xff] }
  0x57   :  { %435 = vmatmul.mubr.f32.gmra.mrb[10].mxu0 %v101_v14  ;;  %v177_v14 = vld [vmem:[%s5967_s1 + $0x300] sm:$0xff] }
  0x58   :  { %439 = vmatprep.mubr.f32.mxu0 %v106_v16  ;;  %3727 = vmatpush1.bf16.msra.mxu0 %v3726_v15  ;;  %v182_v15 = vld [vmem:[%s5967_s1 + $0x328] sm:$0xff]  ;;  %v181_v16 = vld [vmem:[%s5967_s1 + $0x320] sm:$0xff] }
  0x59   :  { %3728 = vmatprep.subr.bf16.mxu0 %v4007_v0 }
  0x5b   :  { %440 = vmatmul.mubr.f32.gmra.mrb[12].mxu0 %v105_v19  ;;  %v190_v19 = vld [vmem:[%s5967_s1 + $0x368] sm:$0xff] }
  0x5c   :  { %444 = vmatprep.mubr.f32.mxu0 %v110_v21  ;;  %3730 = vmatpush1.bf16.msra.mxu0 %v3729_v20  ;;  %v77_v20 = vld [vmem:[%s5966_s0 + $0x1e0] sm:$0xff]  ;;  %v78_v21 = vld [vmem:[%s5966_s0 + $0x1e8] sm:$0xff] }
  0x5d   :  { %3731 = vmatprep.subr.bf16.mxu0 %v4007_v0  ;;  %v3753_v23 = vpack.c.bf16 %v78_v21, %v77_v20  ;;  %v306_v20 = vld [vmem:[%s5967_s1 + $0x708] sm:$0xff]  ;;  %v305_v21 = vld [vmem:[%s5967_s1 + $0x700] sm:$0xff] }
  0x5f   :  { %445 = vmatmul.mubr.f32.gmra.mrb[14].mxu0 %v109_v24  ;;  %v194_v24 = vld [vmem:[%s5967_s1 + $0x388] sm:$0xff] }
  0x60   :  { %449 = vmatprep.mubr.f32.mxu0 %v114_v26  ;;  %3733 = vmatpush1.bf16.msra.mxu0 %v3732_v25  ;;  %v193_v25 = vld [vmem:[%s5967_s1 + $0x380] sm:$0xff]  ;;  %v198_v26 = vld [vmem:[%s5967_s1 + $0x3a8] sm:$0xff] }
  0x61   :  { %3734 = vmatprep.subr.bf16.mxu0 %v4007_v0 }
  0x63   :  { %450 = vmatmul.mubr.f32.gmra.mrb[16].mxu0 %v113_v29  ;;  %v201_v29 = vld [vmem:[%s5967_s1 + $0x3c0] sm:$0xff] }
  0x64   :  { %454 = vmatprep.mubr.f32.mxu0 %v118_v31  ;;  %3736 = vmatpush1.bf16.msra.mxu0 %v3735_v30  ;;  %v206_v30 = vld [vmem:[%s5967_s1 + $0x3e8] sm:$0xff]  ;;  %v79_v31 = vld [vmem:[%s5966_s0 + $0x1f0] sm:$0xff] }
  0x65   :  { %3737 = vmatprep.subr.bf16.mxu0 %v4007_v0 }
  0x67   :  { %455 = vmatmul.mubr.f32.gmra.mrb[18].mxu0 %v117_v34  ;;  %v3756_v34 = vpack.c.bf16 %v80_v32, %v79_v31  ;;  %v325_v31 = vld [vmem:[%s5967_s1 + $0x7a0] sm:$0xff]  ;;  %v330_v32 = vld [vmem:[%s5967_s1 + $0x7c8] sm:$0xff] }
  0x68   :  { %459 = vmatprep.mubr.f32.mxu0 %v122_v36  ;;  %3739 = vmatpush1.bf16.msra.mxu0 %v3738_v35  ;;  %v210_v35 = vld [vmem:[%s5967_s1 + $0x408] sm:$0xff]  ;;  %v209_v36 = vld [vmem:[%s5967_s1 + $0x400] sm:$0xff] }
  0x69   :  { %3740 = vmatprep.subr.bf16.mxu0 %v4007_v0 }
  0x6b   :  { %460 = vmatmul.mubr.f32.gmra.mrb[20].mxu0 %v121_v39  ;;  %v218_v39 = vld [vmem:[%s5967_s1 + $0x448] sm:$0xff] }
  0x6c   :  { %464 = vmatprep.mubr.f32.mxu0 %v126_v41  ;;  %3742 = vmatpush1.bf16.msra.mxu0 %v3741_v40  ;;  %v217_v40 = vld [vmem:[%s5967_s1 + $0x440] sm:$0xff]  ;;  %v222_v41 = vld [vmem:[%s5967_s1 + $0x468] sm:$0xff] }
  0x6d   :  { %3743 = vmatprep.subr.bf16.mxu0 %v4007_v0 }
  0x6f   :  { %465 = vmatmul.mubr.f32.gmra.mrb[22].mxu0 %v125_v42  ;;  %v221_v42 = vld [vmem:[%s5967_s1 + $0x460] sm:$0xff] }
  0x70   :  { %469 = vmatprep.mubr.f32.mxu0 %v130_v43  ;;  %3745 = vmatpush1.bf16.msra.mxu0 %v3744_v52  ;;  %v226_v43 = vld [vmem:[%s5967_s1 + $0x488] sm:$0xff]  ;;  %v241_v52 = vld [vmem:[%s5967_s1 + $0x500] sm:$0xff] }
  0x71   :  { %3746 = vmatprep.subr.bf16.mxu0 %v4007_v0 }
  0x73   :  { %470 = vmatmul.mubr.f32.gmra.mrb[24].mxu0 %v129_v44  ;;  %v225_v44 = vld [vmem:[%s5967_s1 + $0x480] sm:$0xff] }
  0x74   :  { %474 = vmatprep.mubr.f32.mxu0 %v134_v45  ;;  %3748 = vmatpush1.bf16.msra.mxu0 %v3747_v63  ;;  %v230_v45 = vld [vmem:[%s5967_s1 + $0x4a8] sm:$0xff] }
  0x75   :  { %3749 = vmatprep.subr.bf16.mxu0 %v4007_v0  ;;  %v266_v63 = vld [vmem:[%s5967_s1 + $0x5c8] sm:$0xff] }
  0x77   :  { %475 = vmatmul.mubr.f32.gmra.mrb[26].mxu0 %v133_v46  ;;  %v229_v46 = vld [vmem:[%s5967_s1 + $0x4a0] sm:$0xff] }
  0x78   :  { %479 = vmatprep.mubr.f32.mxu0 %v138_v47  ;;  %3751 = vmatpush1.bf16.msra.mxu0 %v3750_v12  ;;  %v234_v47 = vld [vmem:[%s5967_s1 + $0x4c8] sm:$0xff] }
  0x79   :  { %3752 = vmatprep.subr.bf16.mxu0 %v4007_v0  ;;  %v290_v12 = vld [vmem:[%s5967_s1 + $0x688] sm:$0xff] }
  0x7b   :  { %480 = vmatmul.mubr.f32.gmra.mrb[28].mxu0 %v137_v48  ;;  %v233_v48 = vld [vmem:[%s5967_s1 + $0x4c0] sm:$0xff] }
  0x7c   :  { %484 = vmatprep.mubr.f32.mxu0 %v142_v51  ;;  %3754 = vmatpush1.bf16.msra.mxu0 %v3753_v23  ;;  %v242_v51 = vld [vmem:[%s5967_s1 + $0x508] sm:$0xff]  ;;  %v309_v23 = vld [vmem:[%s5967_s1 + $0x720] sm:$0xff] }
  0x7d   :  { %3755 = vmatprep.subr.bf16.mxu0 %v4007_v0 }
  0x7f   :  { %485 = vmatmul.mubr.f32.gmra.mrb[30].mxu0 %v141_v53  ;;  %v246_v53 = vld [vmem:[%s5967_s1 + $0x528] sm:$0xff] }
  0x80   :  { %489 = vmatprep.mubr.f32.mxu0 %v146_v54  ;;  %3757 = vmatpush1.bf16.msra.mxu0 %v3756_v34  ;;  %v245_v54 = vld [vmem:[%s5967_s1 + $0x520] sm:$0xff]  ;;  %v334_v34 = vld [vmem:[%s5967_s1 + $0x7e8] sm:$0xff] }
  0x83   :  { %490 = vmatmul.mubr.f32.gmra.mrb[32].mxu0 %v145_v55  ;;  %v250_v55 = vld [vmem:[%s5967_s1 + $0x548] sm:$0xff] }
  0x84   :  { %494 = vmatprep.mubr.f32.mxu0 %v150_v56  ;;  %v249_v56 = vld [vmem:[%s5967_s1 + $0x540] sm:$0xff] }
  0x87   :  { %495 = vmatmul.mubr.f32.gmra.mrb[34].mxu0 %v149_v57  ;;  %v254_v57 = vld [vmem:[%s5967_s1 + $0x568] sm:$0xff] }
  0x88   :  { %499 = vmatprep.mubr.f32.mxu0 %v154_v58  ;;  %v253_v58 = vld [vmem:[%s5967_s1 + $0x560] sm:$0xff] }
  0x8b   :  { %500 = vmatmul.mubr.f32.gmra.mrb[36].mxu0 %v153_v59  ;;  %v258_v59 = vld [vmem:[%s5967_s1 + $0x588] sm:$0xff] }
  0x8c   :  { %504 = vmatprep.mubr.f32.mxu0 %v158_v62  ;;  %v261_v62 = vld [vmem:[%s5967_s1 + $0x5a0] sm:$0xff] }
  0x8f   :  { %505 = vmatmul.mubr.f32.gmra.mrb[38].mxu0 %v157_v1  ;;  %v265_v1 = vld [vmem:[%s5967_s1 + $0x5c0] sm:$0xff] }
  0x90   :  { %509 = vmatprep.mubr.f32.mxu0 %v162_v2  ;;  %v270_v2 = vld [vmem:[%s5967_s1 + $0x5e8] sm:$0xff] }
  0x93   :  { %510 = vmatmul.mubr.f32.gmra.mrb[40].mxu0 %v161_v3  ;;  %v269_v3 = vld [vmem:[%s5967_s1 + $0x5e0] sm:$0xff] }
  0x94   :  { %514 = vmatprep.mubr.f32.mxu0 %v166_v4  ;;  %v274_v4 = vld [vmem:[%s5967_s1 + $0x608] sm:$0xff] }
  0x97   :  { %515 = vmatmul.mubr.f32.gmra.mrb[42].mxu0 %v165_v5  ;;  %v273_v5 = vld [vmem:[%s5967_s1 + $0x600] sm:$0xff] }
  0x98   :  { %519 = vmatprep.mubr.f32.mxu0 %v170_v6  ;;  %v278_v6 = vld [vmem:[%s5967_s1 + $0x628] sm:$0xff] }
  0x9b   :  { %520 = vmatmul.mubr.f32.gmra.mrb[44].mxu0 %v169_v7  ;;  %v277_v7 = vld [vmem:[%s5967_s1 + $0x620] sm:$0xff] }
  0x9c   :  { %524 = vmatprep.mubr.f32.mxu0 %v174_v8  ;;  %v282_v8 = vld [vmem:[%s5967_s1 + $0x648] sm:$0xff] }
  0x9f   :  { %525 = vmatmul.mubr.f32.gmra.mrb[46].mxu0 %v173_v11  ;;  %v285_v11 = vld [vmem:[%s5967_s1 + $0x660] sm:$0xff] }
  0xa0   :  { %529 = vmatprep.mubr.f32.mxu0 %v178_v13  ;;  %v289_v13 = vld [vmem:[%s5967_s1 + $0x680] sm:$0xff] }
  0xa3   :  { %530 = vmatmul.mubr.f32.gmra.mrb[48].mxu0 %v177_v14  ;;  %v294_v14 = vld [vmem:[%s5967_s1 + $0x6a8] sm:$0xff] }
  0xa4   :  { %534 = vmatprep.mubr.f32.mxu0 %v182_v15  ;;  %v293_v15 = vld [vmem:[%s5967_s1 + $0x6a0] sm:$0xff] }
  0xa7   :  { %535 = vmatmul.mubr.f32.gmra.mrb[50].mxu0 %v181_v16  ;;  %v298_v16 = vld [vmem:[%s5967_s1 + $0x6c8] sm:$0xff] }
  0xa8   :  { %539 = vmatprep.mubr.f32.mxu0 %v186_v17  ;;  %v297_v17 = vld [vmem:[%s5967_s1 + $0x6c0] sm:$0xff] }
  0xab   :  { %540 = vmatmul.mubr.f32.gmra.mrb[52].mxu0 %v185_v18  ;;  %v302_v18 = vld [vmem:[%s5967_s1 + $0x6e8] sm:$0xff] }
  0xac   :  { %544 = vmatprep.mubr.f32.mxu0 %v190_v19  ;;  %v301_v19 = vld [vmem:[%s5967_s1 + $0x6e0] sm:$0xff] }
  0xaf   :  { %545 = vmatmul.mubr.f32.gmra.mrb[54].mxu0 %v189_v22  ;;  %v310_v22 = vld [vmem:[%s5967_s1 + $0x728] sm:$0xff] }
  0xb0   :  { %549 = vmatprep.mubr.f32.mxu0 %v194_v24  ;;  %v314_v24 = vld [vmem:[%s5967_s1 + $0x748] sm:$0xff] }
  0xb3   :  { %550 = vmatmul.mubr.f32.gmra.mrb[56].mxu0 %v193_v25  ;;  %v313_v25 = vld [vmem:[%s5967_s1 + $0x740] sm:$0xff] }
  0xb4   :  { %554 = vmatprep.mubr.f32.mxu0 %v198_v26  ;;  %v318_v26 = vld [vmem:[%s5967_s1 + $0x768] sm:$0xff] }
  0xb7   :  { %555 = vmatmul.mubr.f32.gmra.mrb[58].mxu0 %v197_v27  ;;  %v317_v27 = vld [vmem:[%s5967_s1 + $0x760] sm:$0xff] }
  0xb8   :  { %559 = vmatprep.mubr.f32.mxu0 %v202_v28  ;;  %v322_v28 = vld [vmem:[%s5967_s1 + $0x788] sm:$0xff] }
  0xbb   :  { %560 = vmatmul.mubr.f32.gmra.mrb[60].mxu0 %v201_v29  ;;  %v321_v29 = vld [vmem:[%s5967_s1 + $0x780] sm:$0xff] }
  0xbc   :  { %564 = vmatprep.mubr.f32.mxu0 %v206_v30  ;;  %v326_v30 = vld [vmem:[%s5967_s1 + $0x7a8] sm:$0xff] }
  0xbf   :  { %565 = vmatmul.mubr.f32.gmra.mrb[62].mxu0 %v205_v33  ;;  %v329_v33 = vld [vmem:[%s5967_s1 + $0x7c0] sm:$0xff] }
  0xc0   :  { %569 = vmatprep.mubr.f32.mxu0 %v210_v35  ;;  %v333_v35 = vld [vmem:[%s5967_s1 + $0x7e0] sm:$0xff] }
  0xc3   :  { %570 = vmatmul.mubr.f32.gmra.mrb[64].mxu0 %v209_v36  ;;  %v338_v36 = vld [vmem:[%s5967_s1 + $0x808] sm:$0xff] }
  0xc4   :  { %574 = vmatprep.mubr.f32.mxu0 %v214_v37  ;;  %v337_v37 = vld [vmem:[%s5967_s1 + $0x800] sm:$0xff] }
  0xc7   :  { %575 = vmatmul.mubr.f32.gmra.mrb[66].mxu0 %v213_v38  ;;  %v342_v38 = vld [vmem:[%s5967_s1 + $0x828] sm:$0xff] }
  0xc8   :  { %579 = vmatprep.mubr.f32.mxu0 %v218_v39  ;;  %v341_v39 = vld [vmem:[%s5967_s1 + $0x820] sm:$0xff] }
  0xcb   :  { %580 = vmatmul.mubr.f32.gmra.mrb[68].mxu0 %v217_v40  ;;  %v84_v40 = vld [vmem:[%s5967_s1 + $0x18] sm:$0xff] }
  0xcc   :  { %584 = vmatprep.mubr.f32.mxu0 %v222_v41  ;;  %v83_v41 = vld [vmem:[%s5967_s1 + $0x10] sm:$0xff] }
  0xcf   :  { %585 = vmatmul.mubr.f32.gmra.mrb[70].mxu0 %v221_v42  ;;  %v88_v42 = vld [vmem:[%s5967_s1 + $0x38] sm:$0xff] }
  0xd0   :  { %589 = vmatprep.mubr.f32.mxu0 %v226_v43  ;;  %v87_v43 = vld [vmem:[%s5967_s1 + $0x30] sm:$0xff] }
  0xd3   :  { %590 = vmatmul.mubr.f32.gmra.mrb[72].mxu0 %v225_v44  ;;  %v92_v44 = vld [vmem:[%s5967_s1 + $0x58] sm:$0xff] }
  0xd4   :  { %594 = vmatprep.mubr.f32.mxu0 %v230_v45  ;;  %v91_v45 = vld [vmem:[%s5967_s1 + $0x50] sm:$0xff] }
  0xd7   :  { %595 = vmatmul.mubr.f32.gmra.mrb[74].mxu0 %v229_v46  ;;  %v96_v46 = vld [vmem:[%s5967_s1 + $0x78] sm:$0xff] }
  0xd8   :  { %599 = vmatprep.mubr.f32.mxu0 %v234_v47  ;;  %v95_v47 = vld [vmem:[%s5967_s1 + $0x70] sm:$0xff] }
  0xdb   :  { %600 = vmatmul.mubr.f32.gmra.mrb[76].mxu0 %v233_v48  ;;  %v100_v48 = vld [vmem:[%s5967_s1 + $0x98] sm:$0xff] }
  0xdc   :  { %604 = vmatprep.mubr.f32.mxu0 %v238_v49  ;;  %v99_v49 = vld [vmem:[%s5967_s1 + $0x90] sm:$0xff] }
  0xdf   :  { %605 = vmatmul.mubr.f32.gmra.mrb[78].mxu0 %v237_v50  ;;  %v104_v50 = vld [vmem:[%s5967_s1 + $0xb8] sm:$0xff] }
  0xe0   :  { %609 = vmatprep.mubr.f32.mxu0 %v242_v51  ;;  %v103_v51 = vld [vmem:[%s5967_s1 + $0xb0] sm:$0xff] }
  0xe3   :  { %610 = vmatmul.mubr.f32.gmra.mrb[80].mxu0 %v241_v52  ;;  %v108_v52 = vld [vmem:[%s5967_s1 + $0xd8] sm:$0xff] }
  0xe4   :  { %614 = vmatprep.mubr.f32.mxu0 %v246_v53  ;;  %v107_v53 = vld [vmem:[%s5967_s1 + $0xd0] sm:$0xff] }
  0xe7   :  { %615 = vmatmul.mubr.f32.gmra.mrb[82].mxu0 %v245_v54  ;;  %v112_v54 = vld [vmem:[%s5967_s1 + $0xf8] sm:$0xff] }
  0xe8   :  { %619 = vmatprep.mubr.f32.mxu0 %v250_v55  ;;  %v111_v55 = vld [vmem:[%s5967_s1 + $0xf0] sm:$0xff] }
  0xeb   :  { %620 = vmatmul.mubr.f32.gmra.mrb[84].mxu0 %v249_v56  ;;  %v116_v56 = vld [vmem:[%s5967_s1 + $0x118] sm:$0xff] }
  0xec   :  { %624 = vmatprep.mubr.f32.mxu0 %v254_v57  ;;  %v115_v57 = vld [vmem:[%s5967_s1 + $0x110] sm:$0xff] }
  0xef   :  { %625 = vmatmul.mubr.f32.gmra.mrb[86].mxu0 %v253_v58  ;;  %v120_v58 = vld [vmem:[%s5967_s1 + $0x138] sm:$0xff] }
  0xf0   :  { %629 = vmatprep.mubr.f32.mxu0 %v258_v59  ;;  %v119_v59 = vld [vmem:[%s5967_s1 + $0x130] sm:$0xff] }
  0xf3   :  { %630 = vmatmul.mubr.f32.gmra.mrb[88].mxu0 %v257_v60  ;;  %v124_v60 = vld [vmem:[%s5967_s1 + $0x158] sm:$0xff] }
  0xf4   :  { %634 = vmatprep.mubr.f32.mxu0 %v262_v61  ;;  %v123_v61 = vld [vmem:[%s5967_s1 + $0x150] sm:$0xff] }
  0xf7   :  { %635 = vmatmul.mubr.f32.gmra.mrb[90].mxu0 %v261_v62  ;;  %v128_v62 = vld [vmem:[%s5967_s1 + $0x178] sm:$0xff] }
  0xf8   :  { %639 = vmatprep.mubr.f32.mxu0 %v266_v63  ;;  %v127_v63 = vld [vmem:[%s5967_s1 + $0x170] sm:$0xff] }
  0xfb   :  { %640 = vmatmul.mubr.f32.gmra.mrb[92].mxu0 %v265_v1  ;;  %v132_v1 = vld [vmem:[%s5967_s1 + $0x198] sm:$0xff] }
  0xfc   :  { %644 = vmatprep.mubr.f32.mxu0 %v270_v2  ;;  %v131_v2 = vld [vmem:[%s5967_s1 + $0x190] sm:$0xff] }
  0xff   :  { %645 = vmatmul.mubr.f32.gmra.mrb[94].mxu0 %v269_v3  ;;  %v136_v3 = vld [vmem:[%s5967_s1 + $0x1b8] sm:$0xff] }
 0x100   :  { %649 = vmatprep.mubr.f32.mxu0 %v274_v4  ;;  %v135_v4 = vld [vmem:[%s5967_s1 + $0x1b0] sm:$0xff] }
 0x103   :  { %650 = vmatmul.mubr.f32.gmra.mrb[96].mxu0 %v273_v5  ;;  %v140_v5 = vld [vmem:[%s5967_s1 + $0x1d8] sm:$0xff] }
 0x104   :  { %654 = vmatprep.mubr.f32.mxu0 %v278_v6  ;;  %v139_v6 = vld [vmem:[%s5967_s1 + $0x1d0] sm:$0xff] }
 0x107   :  { %655 = vmatmul.mubr.f32.gmra.mrb[98].mxu0 %v277_v7  ;;  %v144_v7 = vld [vmem:[%s5967_s1 + $0x1f8] sm:$0xff] }
 0x108   :  { %659 = vmatprep.mubr.f32.mxu0 %v282_v8  ;;  %v143_v8 = vld [vmem:[%s5967_s1 + $0x1f0] sm:$0xff] }
 0x10b   :  { %660 = vmatmul.mubr.f32.gmra.mrb[100].mxu0 %v281_v9  ;;  %v148_v9 = vld [vmem:[%s5967_s1 + $0x218] sm:$0xff] }
 0x10c   :  { %664 = vmatprep.mubr.f32.mxu0 %v286_v10  ;;  %v147_v10 = vld [vmem:[%s5967_s1 + $0x210] sm:$0xff] }
 0x10f   :  { %665 = vmatmul.mubr.f32.gmra.mrb[102].mxu0 %v285_v11  ;;  %v152_v11 = vld [vmem:[%s5967_s1 + $0x238] sm:$0xff] }
 0x110   :  { %669 = vmatprep.mubr.f32.mxu0 %v290_v12  ;;  %v151_v12 = vld [vmem:[%s5967_s1 + $0x230] sm:$0xff] }
 0x113   :  { %670 = vmatmul.mubr.f32.gmra.mrb[104].mxu0 %v289_v13  ;;  %v156_v13 = vld [vmem:[%s5967_s1 + $0x258] sm:$0xff] }
 0x114   :  { %674 = vmatprep.mubr.f32.mxu0 %v294_v14  ;;  %v155_v14 = vld [vmem:[%s5967_s1 + $0x250] sm:$0xff] }
 0x117   :  { %675 = vmatmul.mubr.f32.gmra.mrb[106].mxu0 %v293_v15  ;;  %v160_v15 = vld [vmem:[%s5967_s1 + $0x278] sm:$0xff] }
 0x118   :  { %679 = vmatprep.mubr.f32.mxu0 %v298_v16  ;;  %v159_v16 = vld [vmem:[%s5967_s1 + $0x270] sm:$0xff] }
 0x11b   :  { %680 = vmatmul.mubr.f32.gmra.mrb[108].mxu0 %v297_v17  ;;  %v164_v17 = vld [vmem:[%s5967_s1 + $0x298] sm:$0xff] }
 0x11c   :  { %684 = vmatprep.mubr.f32.mxu0 %v302_v18  ;;  %v163_v18 = vld [vmem:[%s5967_s1 + $0x290] sm:$0xff] }
 0x11f   :  { %685 = vmatmul.mubr.f32.gmra.mrb[110].mxu0 %v301_v19  ;;  %v168_v19 = vld [vmem:[%s5967_s1 + $0x2b8] sm:$0xff] }
 0x120   :  { %689 = vmatprep.mubr.f32.mxu0 %v306_v20  ;;  %v167_v20 = vld [vmem:[%s5967_s1 + $0x2b0] sm:$0xff] }
 0x123   :  { %690 = vmatmul.mubr.f32.gmra.mrb[112].mxu0 %v305_v21  ;;  %v172_v21 = vld [vmem:[%s5967_s1 + $0x2d8] sm:$0xff] }
 0x124   :  { %694 = vmatprep.mubr.f32.mxu0 %v310_v22  ;;  %v171_v22 = vld [vmem:[%s5967_s1 + $0x2d0] sm:$0xff] }
 0x127   :  { %695 = vmatmul.mubr.f32.gmra.mrb[114].mxu0 %v309_v23  ;;  %v176_v23 = vld [vmem:[%s5967_s1 + $0x2f8] sm:$0xff] }
 0x128   :  { %699 = vmatprep.mubr.f32.mxu0 %v314_v24  ;;  %v175_v24 = vld [vmem:[%s5967_s1 + $0x2f0] sm:$0xff] }
 0x12b   :  { %700 = vmatmul.mubr.f32.gmra.mrb[116].mxu0 %v313_v25  ;;  %v180_v25 = vld [vmem:[%s5967_s1 + $0x318] sm:$0xff] }
 0x12c   :  { %704 = vmatprep.mubr.f32.mxu0 %v318_v26  ;;  %v179_v26 = vld [vmem:[%s5967_s1 + $0x310] sm:$0xff] }
 0x12f   :  { %705 = vmatmul.mubr.f32.gmra.mrb[118].mxu0 %v317_v27  ;;  %v184_v27 = vld [vmem:[%s5967_s1 + $0x338] sm:$0xff] }
 0x130   :  { %709 = vmatprep.mubr.f32.mxu0 %v322_v28  ;;  %v183_v28 = vld [vmem:[%s5967_s1 + $0x330] sm:$0xff] }
 0x133   :  { %710 = vmatmul.mubr.f32.gmra.mrb[120].mxu0 %v321_v29  ;;  %v188_v29 = vld [vmem:[%s5967_s1 + $0x358] sm:$0xff] }
 0x134   :  { %714 = vmatprep.mubr.f32.mxu0 %v326_v30  ;;  %v187_v30 = vld [vmem:[%s5967_s1 + $0x350] sm:$0xff] }
 0x137   :  { %715 = vmatmul.mubr.f32.gmra.mrb[122].mxu0 %v325_v31  ;;  %v192_v31 = vld [vmem:[%s5967_s1 + $0x378] sm:$0xff] }
 0x138   :  { %719 = vmatprep.mubr.f32.mxu0 %v330_v32  ;;  %v191_v32 = vld [vmem:[%s5967_s1 + $0x370] sm:$0xff] }
 0x13b   :  { %720 = vmatmul.mubr.f32.gmra.mrb[124].mxu0 %v329_v33  ;;  %v196_v33 = vld [vmem:[%s5967_s1 + $0x398] sm:$0xff] }
 0x13c   :  { %724 = vmatprep.mubr.f32.mxu0 %v334_v34  ;;  %v195_v34 = vld [vmem:[%s5967_s1 + $0x390] sm:$0xff] }
 0x13f   :  { %725 = vmatmul.mubr.f32.gmra.mrb[126].mxu0 %v333_v35  ;;  %v200_v35 = vld [vmem:[%s5967_s1 + $0x3b8] sm:$0xff] }
 0x140   :  { %729 = vmatprep.mubr.f32.mxu0 %v338_v36  ;;  %v199_v36 = vld [vmem:[%s5967_s1 + $0x3b0] sm:$0xff] }
 0x143   :  { %730 = vmatmul.mubr.f32.gmra.mrb[128].mxu0 %v337_v37  ;;  %v204_v37 = vld [vmem:[%s5967_s1 + $0x3d8] sm:$0xff] }
 0x144   :  { %734 = vmatprep.mubr.f32.mxu0 %v342_v38  ;;  %v203_v38 = vld [vmem:[%s5967_s1 + $0x3d0] sm:$0xff] }
 0x147   :  { %735 = vmatmul.mubr.f32.gmra.mrb[130].mxu0 %v341_v39  ;;  %v208_v39 = vld [vmem:[%s5967_s1 + $0x3f8] sm:$0xff] }
 0x148   :  { %804 = vmatprep.mubr.f32.mxu0 %v84_v40  ;;  %v207_v40 = vld [vmem:[%s5967_s1 + $0x3f0] sm:$0xff] }
 0x14b   :  { %805 = vmatmul.mubr.f32.vlgmr.msra.gmra.mrb[0].mxu0 %v83_v41  ;;  %v212_v41 = vld [vmem:[%s5967_s1 + $0x418] sm:$0xff] }
 0x14c   :  { %809 = vmatprep.mubr.f32.mxu0 %v88_v42  ;;  %v211_v42 = vld [vmem:[%s5967_s1 + $0x410] sm:$0xff] }
 0x14f   :  { %810 = vmatmul.mubr.f32.gmra.mrb[2].mxu0 %v87_v43  ;;  %v216_v43 = vld [vmem:[%s5967_s1 + $0x438] sm:$0xff] }
 0x150   :  { %814 = vmatprep.mubr.f32.mxu0 %v92_v44  ;;  %v215_v44 = vld [vmem:[%s5967_s1 + $0x430] sm:$0xff] }
 0x153   :  { %815 = vmatmul.mubr.f32.gmra.mrb[4].mxu0 %v91_v45  ;;  %v220_v45 = vld [vmem:[%s5967_s1 + $0x458] sm:$0xff] }
 0x154   :  { %819 = vmatprep.mubr.f32.mxu0 %v96_v46  ;;  %v219_v46 = vld [vmem:[%s5967_s1 + $0x450] sm:$0xff] }
 0x157   :  { %820 = vmatmul.mubr.f32.gmra.mrb[6].mxu0 %v95_v47  ;;  %v224_v47 = vld [vmem:[%s5967_s1 + $0x478] sm:$0xff] }
 0x158   :  { %824 = vmatprep.mubr.f32.mxu0 %v100_v48  ;;  %v223_v48 = vld [vmem:[%s5967_s1 + $0x470] sm:$0xff] }
 0x15b   :  { %825 = vmatmul.mubr.f32.gmra.mrb[8].mxu0 %v99_v49  ;;  %v228_v49 = vld [vmem:[%s5967_s1 + $0x498] sm:$0xff] }
 0x15c   :  { %829 = vmatprep.mubr.f32.mxu0 %v104_v50  ;;  %v227_v50 = vld [vmem:[%s5967_s1 + $0x490] sm:$0xff] }
 0x15f   :  { %830 = vmatmul.mubr.f32.gmra.mrb[10].mxu0 %v103_v51  ;;  %v232_v51 = vld [vmem:[%s5967_s1 + $0x4b8] sm:$0xff] }
 0x160   :  { %834 = vmatprep.mubr.f32.mxu0 %v108_v52  ;;  %v231_v52 = vld [vmem:[%s5967_s1 + $0x4b0] sm:$0xff] }
 0x163   :  { %835 = vmatmul.mubr.f32.gmra.mrb[12].mxu0 %v107_v53  ;;  %v236_v53 = vld [vmem:[%s5967_s1 + $0x4d8] sm:$0xff] }
 0x164   :  { %839 = vmatprep.mubr.f32.mxu0 %v112_v54  ;;  %v235_v54 = vld [vmem:[%s5967_s1 + $0x4d0] sm:$0xff] }
 0x167   :  { %840 = vmatmul.mubr.f32.gmra.mrb[14].mxu0 %v111_v55  ;;  %v240_v55 = vld [vmem:[%s5967_s1 + $0x4f8] sm:$0xff] }
 0x168   :  { %844 = vmatprep.mubr.f32.mxu0 %v116_v56  ;;  %v239_v56 = vld [vmem:[%s5967_s1 + $0x4f0] sm:$0xff] }
 0x16b   :  { %845 = vmatmul.mubr.f32.gmra.mrb[16].mxu0 %v115_v57  ;;  %v244_v57 = vld [vmem:[%s5967_s1 + $0x518] sm:$0xff] }
 0x16c   :  { %849 = vmatprep.mubr.f32.mxu0 %v120_v58  ;;  %v243_v58 = vld [vmem:[%s5967_s1 + $0x510] sm:$0xff] }
 0x16f   :  { %850 = vmatmul.mubr.f32.gmra.mrb[18].mxu0 %v119_v59  ;;  %v248_v59 = vld [vmem:[%s5967_s1 + $0x538] sm:$0xff] }
 0x170   :  { %854 = vmatprep.mubr.f32.mxu0 %v124_v60  ;;  %v247_v60 = vld [vmem:[%s5967_s1 + $0x530] sm:$0xff] }
 0x173   :  { %855 = vmatmul.mubr.f32.gmra.mrb[20].mxu0 %v123_v61  ;;  %v252_v61 = vld [vmem:[%s5967_s1 + $0x558] sm:$0xff] }
 0x174   :  { %859 = vmatprep.mubr.f32.mxu0 %v128_v62  ;;  %v251_v62 = vld [vmem:[%s5967_s1 + $0x550] sm:$0xff] }
 0x177   :  { %860 = vmatmul.mubr.f32.gmra.mrb[22].mxu0 %v127_v63  ;;  %v256_v63 = vld [vmem:[%s5967_s1 + $0x578] sm:$0xff] }
 0x178   :  { %864 = vmatprep.mubr.f32.mxu0 %v132_v1  ;;  %v255_v1 = vld [vmem:[%s5967_s1 + $0x570] sm:$0xff] }
 0x17b   :  { %865 = vmatmul.mubr.f32.gmra.mrb[24].mxu0 %v131_v2  ;;  %v260_v2 = vld [vmem:[%s5967_s1 + $0x598] sm:$0xff] }
 0x17c   :  { %869 = vmatprep.mubr.f32.mxu0 %v136_v3  ;;  %v259_v3 = vld [vmem:[%s5967_s1 + $0x590] sm:$0xff] }
 0x17f   :  { %870 = vmatmul.mubr.f32.gmra.mrb[26].mxu0 %v135_v4  ;;  %v264_v4 = vld [vmem:[%s5967_s1 + $0x5b8] sm:$0xff] }
 0x180   :  { %874 = vmatprep.mubr.f32.mxu0 %v140_v5  ;;  %v263_v5 = vld [vmem:[%s5967_s1 + $0x5b0] sm:$0xff] }
 0x183   :  { %875 = vmatmul.mubr.f32.gmra.mrb[28].mxu0 %v139_v6  ;;  %v268_v6 = vld [vmem:[%s5967_s1 + $0x5d8] sm:$0xff] }
 0x184   :  { %879 = vmatprep.mubr.f32.mxu0 %v144_v7  ;;  %v267_v7 = vld [vmem:[%s5967_s1 + $0x5d0] sm:$0xff] }
 0x187   :  { %880 = vmatmul.mubr.f32.gmra.mrb[30].mxu0 %v143_v8  ;;  %v272_v8 = vld [vmem:[%s5967_s1 + $0x5f8] sm:$0xff] }
 0x188   :  { %884 = vmatprep.mubr.f32.mxu0 %v148_v9  ;;  %v271_v9 = vld [vmem:[%s5967_s1 + $0x5f0] sm:$0xff] }
 0x18b   :  { %885 = vmatmul.mubr.f32.gmra.mrb[32].mxu0 %v147_v10  ;;  %v276_v10 = vld [vmem:[%s5967_s1 + $0x618] sm:$0xff] }
 0x18c   :  { %889 = vmatprep.mubr.f32.mxu0 %v152_v11  ;;  %v1234_v11 = vld [vmem:[%s5968_s2] sm:$0xff] }
 0x18f   :  { %890 = vmatmul.mubr.f32.gmra.mrb[34].mxu0 %v151_v12  ;;  %v1235_v12 = vld [vmem:[%s5968_s2 + $0x8] sm:$0xff] }
 0x190   :  { %894 = vmatprep.mubr.f32.mxu0 %v156_v13  ;;  %v4953_v13 = vpack.c.bf16 %v1235_v12, %v1234_v11  ;;  %v323_v11 = vld [vmem:[%s5967_s1 + $0x790] sm:$0xff]  ;;  %v328_v12 = vld [vmem:[%s5967_s1 + $0x7b8] sm:$0xff] }
 0x192   :  { %3760 = vmatpush3.bf16.msra.mxu1 %v4953_v13 }
 0x193   :  { %895 = vmatmul.mubr.f32.gmra.mrb[36].mxu0 %v155_v14  ;;  %v275_v14 = vld [vmem:[%s5967_s1 + $0x610] sm:$0xff]  ;;  %3761 = vmatprep.subr.bf16.mxu1 %v4007_v0 }
 0x194   :  { %899 = vmatprep.mubr.f32.mxu0 %v160_v15  ;;  %v280_v15 = vld [vmem:[%s5967_s1 + $0x638] sm:$0xff] }
 0x197   :  { %900 = vmatmul.mubr.f32.gmra.mrb[38].mxu0 %v159_v16  ;;  %v1236_v16 = vld [vmem:[%s5968_s2 + $0x10] sm:$0xff] }
 0x198   :  { %904 = vmatprep.mubr.f32.mxu0 %v164_v17  ;;  %v1237_v17 = vld [vmem:[%s5968_s2 + $0x18] sm:$0xff] }
 0x19b   :  { %905 = vmatmul.mubr.f32.gmra.mrb[40].mxu0 %v163_v18  ;;  %v4969_v18 = vpack.c.bf16 %v1237_v17, %v1236_v16  ;;  %v327_v16 = vld [vmem:[%s5967_s1 + $0x7b0] sm:$0xff]  ;;  %v332_v17 = vld [vmem:[%s5967_s1 + $0x7d8] sm:$0xff] }
 0x19c   :  { %909 = vmatprep.mubr.f32.mxu0 %v168_v19  ;;  %v279_v19 = vld [vmem:[%s5967_s1 + $0x630] sm:$0xff] }
 0x19d   :  { %3763 = vmatpush3.bf16.msra.mxu1 %v4969_v18 }
 0x19e   :  { %3764 = vmatprep.subr.bf16.mxu1 %v4007_v0 }
 0x19f   :  { %910 = vmatmul.mubr.f32.gmra.mrb[42].mxu0 %v167_v20  ;;  %v284_v20 = vld [vmem:[%s5967_s1 + $0x658] sm:$0xff] }
 0x1a0   :  { %914 = vmatprep.mubr.f32.mxu0 %v172_v21  ;;  %v1238_v21 = vld [vmem:[%s5968_s2 + $0x20] sm:$0xff] }
 0x1a3   :  { %915 = vmatmul.mubr.f32.gmra.mrb[44].mxu0 %v171_v22  ;;  %v1239_v22 = vld [vmem:[%s5968_s2 + $0x28] sm:$0xff] }
 0x1a4   :  { %919 = vmatprep.mubr.f32.mxu0 %v176_v23  ;;  %v4985_v23 = vpack.c.bf16 %v1239_v22, %v1238_v21  ;;  %v331_v21 = vld [vmem:[%s5967_s1 + $0x7d0] sm:$0xff]  ;;  %v336_v22 = vld [vmem:[%s5967_s1 + $0x7f8] sm:$0xff] }
 0x1a6   :  { %3766 = vmatpush3.bf16.msra.mxu1 %v4985_v23 }
 0x1a7   :  { %920 = vmatmul.mubr.f32.gmra.mrb[46].mxu0 %v175_v24  ;;  %v283_v24 = vld [vmem:[%s5967_s1 + $0x650] sm:$0xff]  ;;  %3767 = vmatprep.subr.bf16.mxu1 %v4007_v0 }
 0x1a8   :  { %924 = vmatprep.mubr.f32.mxu0 %v180_v25  ;;  %v288_v25 = vld [vmem:[%s5967_s1 + $0x678] sm:$0xff] }
 0x1ab   :  { %925 = vmatmul.mubr.f32.gmra.mrb[48].mxu0 %v179_v26  ;;  %v1240_v26 = vld [vmem:[%s5968_s2 + $0x30] sm:$0xff] }
 0x1ac   :  { %929 = vmatprep.mubr.f32.mxu0 %v184_v27  ;;  %v1241_v27 = vld [vmem:[%s5968_s2 + $0x38] sm:$0xff] }
 0x1af   :  { %930 = vmatmul.mubr.f32.gmra.mrb[50].mxu0 %v183_v28  ;;  %v5001_v28 = vpack.c.bf16 %v1241_v27, %v1240_v26  ;;  %v335_v26 = vld [vmem:[%s5967_s1 + $0x7f0] sm:$0xff]  ;;  %v340_v27 = vld [vmem:[%s5967_s1 + $0x818] sm:$0xff] }
 0x1b0   :  { %934 = vmatprep.mubr.f32.mxu0 %v188_v29  ;;  %v287_v29 = vld [vmem:[%s5967_s1 + $0x670] sm:$0xff] }
 0x1b1   :  { %3769 = vmatpush3.bf16.msra.mxu1 %v5001_v28 }
 0x1b2   :  { %3770 = vmatprep.subr.bf16.mxu1 %v4007_v0 }
 0x1b3   :  { %935 = vmatmul.mubr.f32.gmra.mrb[52].mxu0 %v187_v30  ;;  %v292_v30 = vld [vmem:[%s5967_s1 + $0x698] sm:$0xff] }
 0x1b4   :  { %939 = vmatprep.mubr.f32.mxu0 %v192_v31  ;;  %v1242_v31 = vld [vmem:[%s5968_s2 + $0x40] sm:$0xff] }
 0x1b7   :  { %940 = vmatmul.mubr.f32.gmra.mrb[54].mxu0 %v191_v32  ;;  %v1243_v32 = vld [vmem:[%s5968_s2 + $0x48] sm:$0xff] }
 0x1b8   :  { %944 = vmatprep.mubr.f32.mxu0 %v196_v33  ;;  %v5017_v33 = vpack.c.bf16 %v1243_v32, %v1242_v31  ;;  %v339_v31 = vld [vmem:[%s5967_s1 + $0x810] sm:$0xff]  ;;  %v344_v32 = vld [vmem:[%s5967_s1 + $0x838] sm:$0xff] }
 0x1ba   :  { %3772 = vmatpush3.bf16.msra.mxu1 %v5017_v33 }
 0x1bb   :  { %945 = vmatmul.mubr.f32.gmra.mrb[56].mxu0 %v195_v34  ;;  %v291_v34 = vld [vmem:[%s5967_s1 + $0x690] sm:$0xff]  ;;  %3773 = vmatprep.subr.bf16.mxu1 %v4007_v0 }
 0x1bc   :  { %949 = vmatprep.mubr.f32.mxu0 %v200_v35  ;;  %v296_v35 = vld [vmem:[%s5967_s1 + $0x6b8] sm:$0xff] }
 0x1bf   :  { %950 = vmatmul.mubr.f32.gmra.mrb[58].mxu0 %v199_v36  ;;  %v1244_v36 = vld [vmem:[%s5968_s2 + $0x50] sm:$0xff] }
 0x1c0   :  { %954 = vmatprep.mubr.f32.mxu0 %v204_v37  ;;  %v1245_v37 = vld [vmem:[%s5968_s2 + $0x58] sm:$0xff] }
 0x1c3   :  { %955 = vmatmul.mubr.f32.gmra.mrb[60].mxu0 %v203_v38  ;;  %v5033_v38 = vpack.c.bf16 %v1245_v37, %v1244_v36  ;;  %v343_v36 = vld [vmem:[%s5967_s1 + $0x830] sm:$0xff] }
 0x1c4   :  { %959 = vmatprep.mubr.f32.mxu0 %v208_v39  ;;  %v295_v39 = vld [vmem:[%s5967_s1 + $0x6b0] sm:$0xff] }
 0x1c5   :  { %3775 = vmatpush3.bf16.msra.mxu1 %v5033_v38 }
 0x1c6   :  { %3776 = vmatprep.subr.bf16.mxu1 %v4007_v0 }
 0x1c7   :  { %960 = vmatmul.mubr.f32.gmra.mrb[62].mxu0 %v207_v40  ;;  %v300_v40 = vld [vmem:[%s5967_s1 + $0x6d8] sm:$0xff] }
 0x1c8   :  { %964 = vmatprep.mubr.f32.mxu0 %v212_v41  ;;  %v1246_v41 = vld [vmem:[%s5968_s2 + $0x60] sm:$0xff] }
 0x1cb   :  { %965 = vmatmul.mubr.f32.gmra.mrb[64].mxu0 %v211_v42  ;;  %v1247_v42 = vld [vmem:[%s5968_s2 + $0x68] sm:$0xff] }
 0x1cc   :  { %969 = vmatprep.mubr.f32.mxu0 %v216_v43 }
 0x1cf   :  { %970 = vmatmul.mubr.f32.gmra.mrb[66].mxu0 %v215_v44  ;;  %v5051_v44 = vpack.c.bf16 %v1247_v42, %v1246_v41 }
 0x1d0   :  { %974 = vmatprep.mubr.f32.mxu0 %v220_v45 }
 0x1d1   :  { %3778 = vmatpush3.bf16.msra.mxu1 %v5051_v44 }
 0x1d2   :  { %3779 = vmatprep.subr.bf16.mxu1 %v4007_v0 }
 0x1d3   :  { %975 = vmatmul.mubr.f32.gmra.mrb[68].mxu0 %v219_v46  ;;  %v299_v46 = vld [vmem:[%s5967_s1 + $0x6d0] sm:$0xff] }
 0x1d4   :  { %979 = vmatprep.mubr.f32.mxu0 %v224_v47  ;;  %v304_v47 = vld [vmem:[%s5967_s1 + $0x6f8] sm:$0xff] }
 0x1d7   :  { %980 = vmatmul.mubr.f32.gmra.mrb[70].mxu0 %v223_v48  ;;  %v1248_v48 = vld [vmem:[%s5968_s2 + $0x70] sm:$0xff] }
 0x1d8   :  { %984 = vmatprep.mubr.f32.mxu0 %v228_v49  ;;  %v1249_v49 = vld [vmem:[%s5968_s2 + $0x78] sm:$0xff] }
 0x1db   :  { %985 = vmatmul.mubr.f32.gmra.mrb[72].mxu0 %v227_v50 }
 0x1dc   :  { %989 = vmatprep.mubr.f32.mxu0 %v232_v51  ;;  %v5069_v51 = vpack.c.bf16 %v1249_v49, %v1248_v48 }
 0x1de   :  { %3781 = vmatpush3.bf16.msra.mxu1 %v5069_v51 }
 0x1df   :  { %990 = vmatmul.mubr.f32.gmra.mrb[74].mxu0 %v231_v52 }
 0x1e0   :  { %994 = vmatprep.mubr.f32.mxu0 %v236_v53  ;;  %v303_v53 = vld [vmem:[%s5967_s1 + $0x6f0] sm:$0xff] }
 0x1e3   :  { %995 = vmatmul.mubr.f32.gmra.mrb[76].mxu0 %v235_v54  ;;  %v308_v54 = vld [vmem:[%s5967_s1 + $0x718] sm:$0xff] }
 0x1e4   :  { %999 = vmatprep.mubr.f32.mxu0 %v240_v55 }
 0x1e7   :  { %1000 = vmatmul.mubr.f32.gmra.mrb[78].mxu0 %v239_v56  ;;  %v4009_v56 = vmov 0.0  }
 0x1e8   :  { %1004 = vmatprep.mubr.f32.mxu0 %v244_v57  ;;  %3230 = vmatprep.mubr.msk.f32.mxu1 %vm4008_vm0, %v4009_v56 }
 0x1e9   :  { %3329 = vmatprep.subr.mxu1 %v4009_v56 }
 0x1eb   :  { %1005 = vmatmul.mubr.f32.gmra.mrb[80].mxu0 %v243_v58  ;;  %v307_v58 = vld [vmem:[%s5967_s1 + $0x710] sm:$0xff] }
 0x1ec   :  { %1009 = vmatprep.mubr.f32.mxu0 %v248_v59  ;;  %v312_v59 = vld [vmem:[%s5967_s1 + $0x738] sm:$0xff] }
 0x1ef   :  { %1010 = vmatmul.mubr.f32.gmra.mrb[82].mxu0 %v247_v60 }
 0x1f0   :  { %1014 = vmatprep.mubr.f32.mxu0 %v252_v61 }
 0x1f3   :  { %1015 = vmatmul.mubr.f32.gmra.mrb[84].mxu0 %v251_v62  ;;  %v311_v62 = vld [vmem:[%s5967_s1 + $0x730] sm:$0xff] }
 0x1f4   :  { %1019 = vmatprep.mubr.f32.mxu0 %v256_v63  ;;  %v316_v63 = vld [vmem:[%s5967_s1 + $0x758] sm:$0xff] }
 0x1f7   :  { %1020 = vmatmul.mubr.f32.gmra.mrb[86].mxu0 %v255_v1 }
 0x1f8   :  { %1024 = vmatprep.mubr.f32.mxu0 %v260_v2 }
 0x1fb   :  { %1025 = vmatmul.mubr.f32.gmra.mrb[88].mxu0 %v259_v3  ;;  %v315_v3 = vld [vmem:[%s5967_s1 + $0x750] sm:$0xff] }
 0x1fc   :  { %1029 = vmatprep.mubr.f32.mxu0 %v264_v4  ;;  %v320_v4 = vld [vmem:[%s5967_s1 + $0x778] sm:$0xff] }
 0x1ff   :  { %1030 = vmatmul.mubr.f32.gmra.mrb[90].mxu0 %v263_v5 }
 0x200   :  { %1034 = vmatprep.mubr.f32.mxu0 %v268_v6 }
 0x203   :  { %1035 = vmatmul.mubr.f32.gmra.mrb[92].mxu0 %v267_v7  ;;  %v319_v7 = vld [vmem:[%s5967_s1 + $0x770] sm:$0xff] }
 0x204   :  { %1039 = vmatprep.mubr.f32.mxu0 %v272_v8  ;;  %v324_v8 = vld [vmem:[%s5967_s1 + $0x798] sm:$0xff] }
 0x207   :  { %1040 = vmatmul.mubr.f32.gmra.mrb[94].mxu0 %v271_v9 }
 0x208   :  { %1044 = vmatprep.mubr.f32.mxu0 %v276_v10 }
 0x20b   :  { %1045 = vmatmul.mubr.f32.gmra.mrb[96].mxu0 %v275_v14 }
 0x20c   :  { %1049 = vmatprep.mubr.f32.mxu0 %v280_v15 }
 0x20f   :  { %1050 = vmatmul.mubr.f32.gmra.mrb[98].mxu0 %v279_v19 }
 0x210   :  { %1054 = vmatprep.mubr.f32.mxu0 %v284_v20 }
 0x213   :  { %1055 = vmatmul.mubr.f32.gmra.mrb[100].mxu0 %v283_v24 }
 0x214   :  { %1059 = vmatprep.mubr.f32.mxu0 %v288_v25 }
 0x217   :  { %1060 = vmatmul.mubr.f32.gmra.mrb[102].mxu0 %v287_v29 }
 0x218   :  { %1064 = vmatprep.mubr.f32.mxu0 %v292_v30 }
 0x21b   :  { %1065 = vmatmul.mubr.f32.gmra.mrb[104].mxu0 %v291_v34 }
 0x21c   :  { %1069 = vmatprep.mubr.f32.mxu0 %v296_v35 }
 0x21e   :  { %v5049_v43 = vpop.f32.mrb[0].mxu0 }
 0x21f   :  { %v808_v45 = vpop.f32.mrb[1].mxu0  ;;  %1070 = vmatmul.mubr.f32.gmra.mrb[106].mxu0 %v295_v39 }
 0x220   :  { %1074 = vmatprep.mubr.f32.mxu0 %v300_v40 }
 0x222   :  { %v5067_v50 = vpop.f32.mrb[2].mxu0 }
 0x223   :  { %v813_v52 = vpop.f32.mrb[3].mxu0  ;;  %1075 = vmatmul.mubr.f32.gmra.mrb[108].mxu0 %v299_v46 }
 0x224   :  { %1079 = vmatprep.mubr.f32.mxu0 %v304_v47 }
 0x226   :  { %v5078_v55 = vpop.f32.mrb[4].mxu0 }
 0x227   :  { %v818_v57 = vpop.f32.mrb[5].mxu0  ;;  %1080 = vmatmul.mubr.f32.gmra.mrb[110].mxu0 %v303_v53 }
 0x228   :  { %1084 = vmatprep.mubr.f32.mxu0 %v308_v54 }
 0x22a   :  { %v5089_v60 = vpop.f32.mrb[6].mxu0 }
 0x22b   :  { %v823_v61 = vpop.f32.mrb[7].mxu0  ;;  %1085 = vmatmul.mubr.f32.gmra.mrb[112].mxu0 %v307_v58 }
 0x22c   :  { %1089 = vmatprep.mubr.f32.mxu0 %v312_v59 }
 0x22e   :  { %v5097_v1 = vpop.f32.mrb[8].mxu0 }
 0x22f   :  { %v828_v2 = vpop.f32.mrb[9].mxu0  ;;  %1090 = vmatmul.mubr.f32.gmra.mrb[114].mxu0 %v311_v62 }
 0x230   :  { %1094 = vmatprep.mubr.f32.mxu0 %v316_v63 }
 0x232   :  { %v5105_v5 = vpop.f32.mrb[10].mxu0 }
 0x233   :  { %v833_v6 = vpop.f32.mrb[11].mxu0  ;;  %1095 = vmatmul.mubr.f32.gmra.mrb[116].mxu0 %v315_v3 }
 0x234   :  { %1099 = vmatprep.mubr.f32.mxu0 %v320_v4 }
 0x236   :  { %v5113_v9 = vpop.f32.mrb[12].mxu0 }
 0x237   :  { %v838_v10 = vpop.f32.mrb[13].mxu0  ;;  %1100 = vmatmul.mubr.f32.gmra.mrb[118].mxu0 %v319_v7 }
 0x238   :  { %1104 = vmatprep.mubr.f32.mxu0 %v324_v8 }
 0x23a   :  { %v5121_v14 = vpop.f32.mrb[14].mxu0 }
 0x23b   :  { %v843_v15 = vpop.f32.mrb[15].mxu0  ;;  %1105 = vmatmul.mubr.f32.gmra.mrb[120].mxu0 %v323_v11 }
 0x23c   :  { %1109 = vmatprep.mubr.f32.mxu0 %v328_v12 }
 0x23e   :  { %v5129_v19 = vpop.f32.mrb[16].mxu0 }
 0x23f   :  { %v848_v20 = vpop.f32.mrb[17].mxu0  ;;  %1110 = vmatmul.mubr.f32.gmra.mrb[122].mxu0 %v327_v16 }
 0x240   :  { %1114 = vmatprep.mubr.f32.mxu0 %v332_v17 }
 0x242   :  { %v5137_v24 = vpop.f32.mrb[18].mxu0 }
 0x243   :  { %v853_v25 = vpop.f32.mrb[19].mxu0  ;;  %1115 = vmatmul.mubr.f32.gmra.mrb[124].mxu0 %v331_v21 }
 0x244   :  { %1119 = vmatprep.mubr.f32.mxu0 %v336_v22 }
 0x246   :  { %v5145_v29 = vpop.f32.mrb[20].mxu0 }
 0x247   :  { %v858_v30 = vpop.f32.mrb[21].mxu0  ;;  %1120 = vmatmul.mubr.f32.gmra.mrb[126].mxu0 %v335_v26 }
 0x248   :  { %1124 = vmatprep.mubr.f32.mxu0 %v340_v27 }
 0x24a   :  { %v5153_v34 = vpop.f32.mrb[22].mxu0 }
 0x24b   :  { %v863_v35 = vpop.f32.mrb[23].mxu0  ;;  %1125 = vmatmul.mubr.f32.gmra.mrb[128].mxu0 %v339_v31 }
 0x24c   :  { %1129 = vmatprep.mubr.f32.mxu0 %v344_v32 }
 0x24e   :  { %v5158_v37 = vpop.f32.mrb[24].mxu0 }
 0x24f   :  { %v868_v39 = vpop.f32.mrb[25].mxu0  ;;  %1130 = vmatmul.mubr.f32.gmra.mrb[130].mxu0 %v343_v36 }
 0x252   :  { %v5160_v40 = vpop.f32.mrb[26].mxu0 }
 0x253   :  { %v873_v41 = vpop.f32.mrb[27].mxu0 }
 0x254   :  { %v1135_v41 = vmul.f32 %v5049_v43, %v5049_v43 }
 0x256   :  { %v5162_v42 = vpop.f32.mrb[28].mxu0 }
 0x257   :  { %v878_v45 = vpop.f32.mrb[29].mxu0 }
 0x25a   :  { %v5164_v46 = vpop.f32.mrb[30].mxu0 }
 0x25b   :  { %v883_v47 = vpop.f32.mrb[31].mxu0 }
 0x25e   :  { %v5166_v48 = vpop.f32.mrb[32].mxu0 }
 0x25f   :  { %v888_v49 = vpop.f32.mrb[33].mxu0 }
 0x262   :  { %v5168_v52 = vpop.f32.mrb[34].mxu0 }
 0x263   :  { %v893_v53 = vpop.f32.mrb[35].mxu0 }
 0x264   :  { %v5207_v53 = vld [vmem:[%s5969_s3] sm:$0xff] }
 0x266   :  { %v5170_v54 = vpop.f32.mrb[36].mxu0 }
 0x267   :  { %v898_v57 = vpop.f32.mrb[37].mxu0 }
 0x26a   :  { %v5172_v58 = vpop.f32.mrb[38].mxu0 }
 0x26b   :  { %v903_v59 = vpop.f32.mrb[39].mxu0 }
 0x26c   :  { %v1136_v59 = vmul.f32 %v5067_v50, %v5067_v50 }
 0x26e   :  { %v5174_v61 = vpop.f32.mrb[40].mxu0 }
 0x26f   :  { %v908_v62 = vpop.f32.mrb[41].mxu0 }
 0x272   :  { %v5176_v63 = vpop.f32.mrb[42].mxu0 }
 0x273   :  { %v913_v2 = vpop.f32.mrb[43].mxu0 }
 0x276   :  { %v5178_v3 = vpop.f32.mrb[44].mxu0 }
 0x277   :  { %v918_v4 = vpop.f32.mrb[45].mxu0 }
 0x27a   :  { %v5180_v6 = vpop.f32.mrb[46].mxu0 }
 0x27b   :  { %v923_v7 = vpop.f32.mrb[47].mxu0 }
 0x27c   :  { %v1137_v7 = vmul.f32 %v5078_v55, %v5078_v55 }
 0x27e   :  { %v5182_v8 = vpop.f32.mrb[48].mxu0 }
 0x27f   :  { %v928_v10 = vpop.f32.mrb[49].mxu0 }
 0x282   :  { %v5184_v11 = vpop.f32.mrb[50].mxu0 }
 0x283   :  { %v933_v12 = vpop.f32.mrb[51].mxu0 }
 0x286   :  { %v5186_v15 = vpop.f32.mrb[52].mxu0 }
 0x287   :  { %v938_v16 = vpop.f32.mrb[53].mxu0 }
 0x28a   :  { %v5188_v17 = vpop.f32.mrb[54].mxu0 }
 0x28b   :  { %v943_v20 = vpop.f32.mrb[55].mxu0 }
 0x28c   :  { %v1138_v20 = vmul.f32 %v5089_v60, %v5089_v60 }
 0x28e   :  { %v5190_v21 = vpop.f32.mrb[56].mxu0 }
 0x28f   :  { %v948_v22 = vpop.f32.mrb[57].mxu0 }
 0x292   :  { %v5192_v25 = vpop.f32.mrb[58].mxu0 }
 0x293   :  { %v953_v26 = vpop.f32.mrb[59].mxu0 }
 0x296   :  { %v5194_v27 = vpop.f32.mrb[60].mxu0 }
 0x297   :  { %v958_v30 = vpop.f32.mrb[61].mxu0 }
 0x29a   :  { %v5196_v31 = vpop.f32.mrb[62].mxu0 }
 0x29b   :  { %v963_v32 = vpop.f32.mrb[63].mxu0 }
 0x29c   :  { %v1139_v32 = vmul.f32 %v5097_v1, %v5097_v1 }
 0x29e   :  { %v5198_v35 = vpop.f32.mrb[64].mxu0 }
 0x29f   :  { %v968_v36 = vpop.f32.mrb[65].mxu0 }
 0x2a2   :  { %v971_v39 = vpop.f32.mrb[66].mxu0 }
 0x2a3   :  { %v1168_v45 = vmul.f32 %v971_v39, %v971_v39  ;;  %v973_v47 = vpop.f32.mrb[67].mxu0 }
 0x2a5   :  { %v5202_v49 = vadd.f32 %v1168_v45, %v1135_v41  ;;  %v1140_v45 = vmul.f32 %v5105_v5, %v5105_v5 }
 0x2a6   :  { %v976_v57 = vpop.f32.mrb[68].mxu0 }
 0x2a7   :  { %v1169_v62 = vmul.f32 %v976_v57, %v976_v57  ;;  %v978_v2 = vpop.f32.mrb[69].mxu0  ;;  %3231 = vmatmul.mubr.f32.vlgmr.msra.gmra.mrb[0].mxu1 %v5202_v49 }
 0x2a8   :  { %3233 = vmatprep.mubr.msk.f32.mxu1 %vm4008_vm0, %v4009_v56  ;;  %3330 = vmatpush3.msra.mxu1 %v5207_v53 }
 0x2a9   :  { %v5215_v43 = vadd.f32 %v1169_v62, %v1136_v59  ;;  %3782 = vmatprep.subr.bf16.mxu1 %v4007_v0  ;;  %v1141_v62 = vmul.f32 %v5113_v9, %v5113_v9 }
 0x2aa   :  { %v981_v4 = vpop.f32.mrb[70].mxu0 }
 0x2ab   :  { %v1170_v10 = vmul.f32 %v981_v4, %v981_v4  ;;  %v983_v12 = vpop.f32.mrb[71].mxu0  ;;  %3234 = vmatmul.mubr.f32.gmra.mrb[2].mxu1 %v5215_v43 }
 0x2ac   :  { %3236 = vmatprep.mubr.msk.f32.mxu1 %vm4008_vm0, %v4009_v56 }
 0x2ad   :  { %v5223_v50 = vadd.f32 %v1170_v10, %v1137_v7  ;;  %v1142_v10 = vmul.f32 %v5121_v14, %v5121_v14 }
 0x2ae   :  { %v986_v16 = vpop.f32.mrb[72].mxu0 }
 0x2af   :  { %v1171_v22 = vmul.f32 %v986_v16, %v986_v16  ;;  %v988_v26 = vpop.f32.mrb[73].mxu0  ;;  %3237 = vmatmul.mubr.f32.gmra.mrb[4].mxu1 %v5223_v50 }
 0x2b0   :  { %3239 = vmatprep.mubr.msk.f32.mxu1 %vm4008_vm0, %v4009_v56 }
 0x2b1   :  { %v5230_v55 = vadd.f32 %v1171_v22, %v1138_v20  ;;  %v1143_v22 = vmul.f32 %v5129_v19, %v5129_v19 }
 0x2b2   :  { %v991_v30 = vpop.f32.mrb[74].mxu0 }
 0x2b3   :  { %v1172_v36 = vmul.f32 %v991_v30, %v991_v30  ;;  %v993_v39 = vpop.f32.mrb[75].mxu0  ;;  %3240 = vmatmul.mubr.f32.gmra.mrb[6].mxu1 %v5230_v55 }
 0x2b4   :  { %3242 = vmatprep.mubr.msk.f32.mxu1 %vm4008_vm0, %v4009_v56 }
 0x2b5   :  { %v5237_v60 = vadd.f32 %v1172_v36, %v1139_v32  ;;  %v1144_v36 = vmul.f32 %v5137_v24, %v5137_v24 }
 0x2b6   :  { %v996_v41 = vpop.f32.mrb[76].mxu0 }
 0x2b7   :  { %v1173_v47 = vmul.f32 %v996_v41, %v996_v41  ;;  %v998_v57 = vpop.f32.mrb[77].mxu0  ;;  %3243 = vmatmul.mubr.f32.gmra.mrb[8].mxu1 %v5237_v60 }
 0x2b8   :  { %3245 = vmatprep.mubr.msk.f32.mxu1 %vm4008_vm0, %v4009_v56 }
 0x2b9   :  { %v5244_v1 = vadd.f32 %v1173_v47, %v1140_v45  ;;  %v1145_v47 = vmul.f32 %v5145_v29, %v5145_v29 }
 0x2ba   :  { %v1001_v59 = vpop.f32.mrb[78].mxu0 }
 0x2bb   :  { %v1174_v2 = vmul.f32 %v1001_v59, %v1001_v59  ;;  %v1003_v4 = vpop.f32.mrb[79].mxu0  ;;  %3246 = vmatmul.mubr.f32.gmra.mrb[10].mxu1 %v5244_v1 }
 0x2bc   :  { %3248 = vmatprep.mubr.msk.f32.mxu1 %vm4008_vm0, %v4009_v56 }
 0x2bd   :  { %v5251_v5 = vadd.f32 %v1174_v2, %v1141_v62  ;;  %v1146_v2 = vmul.f32 %v5153_v34, %v5153_v34 }
 0x2be   :  { %v1006_v7 = vpop.f32.mrb[80].mxu0 }
 0x2bf   :  { %v1175_v12 = vmul.f32 %v1006_v7, %v1006_v7  ;;  %v1008_v16 = vpop.f32.mrb[81].mxu0  ;;  %3249 = vmatmul.mubr.f32.gmra.mrb[12].mxu1 %v5251_v5 }
 0x2c0   :  { %3251 = vmatprep.mubr.msk.f32.mxu1 %vm4008_vm0, %v4009_v56 }
 0x2c1   :  { %v5258_v9 = vadd.f32 %v1175_v12, %v1142_v10  ;;  %v1147_v12 = vmul.f32 %v5158_v37, %v5158_v37 }
 0x2c2   :  { %v1011_v20 = vpop.f32.mrb[82].mxu0 }
 0x2c3   :  { %v1176_v26 = vmul.f32 %v1011_v20, %v1011_v20  ;;  %v1013_v30 = vpop.f32.mrb[83].mxu0  ;;  %3252 = vmatmul.mubr.f32.gmra.mrb[14].mxu1 %v5258_v9 }
 0x2c4   :  { %3254 = vmatprep.mubr.msk.f32.mxu1 %vm4008_vm0, %v4009_v56 }
 0x2c5   :  { %v5265_v14 = vadd.f32 %v1176_v26, %v1143_v22  ;;  %v1148_v26 = vmul.f32 %v5160_v40, %v5160_v40 }
 0x2c6   :  { %v1016_v32 = vpop.f32.mrb[84].mxu0 }
 0x2c7   :  { %v1177_v39 = vmul.f32 %v1016_v32, %v1016_v32  ;;  %v1018_v41 = vpop.f32.mrb[85].mxu0  ;;  %3255 = vmatmul.mubr.f32.gmra.mrb[16].mxu1 %v5265_v14 }
 0x2c8   :  { %3257 = vmatprep.mubr.msk.f32.mxu1 %vm4008_vm0, %v4009_v56 }
 0x2c9   :  { %v5272_v19 = vadd.f32 %v1177_v39, %v1144_v36  ;;  %v1149_v39 = vmul.f32 %v5162_v42, %v5162_v42 }
 0x2ca   :  { %v1021_v45 = vpop.f32.mrb[86].mxu0 }
 0x2cb   :  { %v1178_v57 = vmul.f32 %v1021_v45, %v1021_v45  ;;  %v1023_v59 = vpop.f32.mrb[87].mxu0  ;;  %3258 = vmatmul.mubr.f32.gmra.mrb[18].mxu1 %v5272_v19 }
 0x2cc   :  { %3260 = vmatprep.mubr.msk.f32.mxu1 %vm4008_vm0, %v4009_v56 }
 0x2cd   :  { %v5279_v24 = vadd.f32 %v1178_v57, %v1145_v47  ;;  %v1150_v57 = vmul.f32 %v5164_v46, %v5164_v46 }
 0x2ce   :  { %v1026_v62 = vpop.f32.mrb[88].mxu0 }
 0x2cf   :  { %v1179_v4 = vmul.f32 %v1026_v62, %v1026_v62  ;;  %v1028_v7 = vpop.f32.mrb[89].mxu0  ;;  %3261 = vmatmul.mubr.f32.gmra.mrb[20].mxu1 %v5279_v24 }
 0x2d0   :  { %3263 = vmatprep.mubr.msk.f32.mxu1 %vm4008_vm0, %v4009_v56 }
 0x2d1   :  { %v5286_v29 = vadd.f32 %v1179_v4, %v1146_v2  ;;  %v1151_v4 = vmul.f32 %v5166_v48, %v5166_v48 }
 0x2d2   :  { %v1031_v10 = vpop.f32.mrb[90].mxu0 }
 0x2d3   :  { %v1180_v16 = vmul.f32 %v1031_v10, %v1031_v10  ;;  %v1033_v20 = vpop.f32.mrb[91].mxu0  ;;  %3264 = vmatmul.mubr.f32.gmra.mrb[22].mxu1 %v5286_v29 }
 0x2d4   :  { %3266 = vmatprep.mubr.msk.f32.mxu1 %vm4008_vm0, %v4009_v56 }
 0x2d5   :  { %v5293_v34 = vadd.f32 %v1180_v16, %v1147_v12  ;;  %v1152_v16 = vmul.f32 %v5168_v52, %v5168_v52 }
 0x2d6   :  { %v1036_v22 = vpop.f32.mrb[92].mxu0 }
 0x2d7   :  { %v1181_v30 = vmul.f32 %v1036_v22, %v1036_v22  ;;  %v1038_v32 = vpop.f32.mrb[93].mxu0  ;;  %3267 = vmatmul.mubr.f32.gmra.mrb[24].mxu1 %v5293_v34 }
 0x2d8   :  { %3269 = vmatprep.mubr.msk.f32.mxu1 %vm4008_vm0, %v4009_v56 }
 0x2d9   :  { %v5300_v37 = vadd.f32 %v1181_v30, %v1148_v26  ;;  %v1153_v30 = vmul.f32 %v5170_v54, %v5170_v54 }
 0x2da   :  { %v1041_v36 = vpop.f32.mrb[94].mxu0 }
 0x2db   :  { %v1182_v41 = vmul.f32 %v1041_v36, %v1041_v36  ;;  %v1043_v45 = vpop.f32.mrb[95].mxu0  ;;  %3270 = vmatmul.mubr.f32.gmra.mrb[26].mxu1 %v5300_v37 }
 0x2dc   :  { %3272 = vmatprep.mubr.msk.f32.mxu1 %vm4008_vm0, %v4009_v56 }
 0x2dd   :  { %v5307_v40 = vadd.f32 %v1182_v41, %v1149_v39  ;;  %v1154_v41 = vmul.f32 %v5172_v58, %v5172_v58 }
 0x2de   :  { %v1046_v47 = vpop.f32.mrb[96].mxu0 }
 0x2df   :  { %v1183_v59 = vmul.f32 %v1046_v47, %v1046_v47  ;;  %v1048_v62 = vpop.f32.mrb[97].mxu0  ;;  %3273 = vmatmul.mubr.f32.gmra.mrb[28].mxu1 %v5307_v40 }
 0x2e0   :  { %3275 = vmatprep.mubr.msk.f32.mxu1 %vm4008_vm0, %v4009_v56 }
 0x2e1   :  { %v5314_v42 = vadd.f32 %v1183_v59, %v1150_v57  ;;  %v1155_v59 = vmul.f32 %v5174_v61, %v5174_v61 }
 0x2e2   :  { %v1051_v2 = vpop.f32.mrb[98].mxu0 }
 0x2e3   :  { %v1184_v7 = vmul.f32 %v1051_v2, %v1051_v2  ;;  %v1053_v10 = vpop.f32.mrb[99].mxu0  ;;  %3276 = vmatmul.mubr.f32.gmra.mrb[30].mxu1 %v5314_v42 }
 0x2e4   :  { %3278 = vmatprep.mubr.msk.f32.mxu1 %vm4008_vm0, %v4009_v56 }
 0x2e5   :  { %v5321_v46 = vadd.f32 %v1184_v7, %v1151_v4  ;;  %v1156_v7 = vmul.f32 %v5176_v63, %v5176_v63 }
 0x2e6   :  { %v1056_v12 = vpop.f32.mrb[100].mxu0 }
 0x2e7   :  { %v1185_v20 = vmul.f32 %v1056_v12, %v1056_v12  ;;  %v1058_v22 = vpop.f32.mrb[101].mxu0  ;;  %3279 = vmatmul.mubr.f32.gmra.mrb[32].mxu1 %v5321_v46 }
 0x2e8   :  { %3281 = vmatprep.mubr.msk.f32.mxu1 %vm4008_vm0, %v4009_v56 }
 0x2e9   :  { %v5328_v48 = vadd.f32 %v1185_v20, %v1152_v16  ;;  %v1157_v20 = vmul.f32 %v5178_v3, %v5178_v3 }
 0x2ea   :  { %v1061_v26 = vpop.f32.mrb[102].mxu0 }
 0x2eb   :  { %v1186_v32 = vmul.f32 %v1061_v26, %v1061_v26  ;;  %v1063_v36 = vpop.f32.mrb[103].mxu0  ;;  %3282 = vmatmul.mubr.f32.gmra.mrb[34].mxu1 %v5328_v48 }
 0x2ec   :  { %3284 = vmatprep.mubr.msk.f32.mxu1 %vm4008_vm0, %v4009_v56 }
 0x2ed   :  { %v5335_v52 = vadd.f32 %v1186_v32, %v1153_v30  ;;  %v1158_v32 = vmul.f32 %v5180_v6, %v5180_v6 }
 0x2ee   :  { %v1066_v39 = vpop.f32.mrb[104].mxu0 }
 0x2ef   :  { %v1187_v45 = vmul.f32 %v1066_v39, %v1066_v39  ;;  %v1068_v47 = vpop.f32.mrb[105].mxu0  ;;  %3285 = vmatmul.mubr.f32.gmra.mrb[36].mxu1 %v5335_v52 }
 0x2f0   :  { %3287 = vmatprep.mubr.msk.f32.mxu1 %vm4008_vm0, %v4009_v56 }
 0x2f1   :  { %v5342_v54 = vadd.f32 %v1187_v45, %v1154_v41  ;;  %v1159_v45 = vmul.f32 %v5182_v8, %v5182_v8 }
 0x2f2   :  { %v1071_v57 = vpop.f32.mrb[106].mxu0 }
 0x2f3   :  { %v1188_v62 = vmul.f32 %v1071_v57, %v1071_v57  ;;  %v1073_v2 = vpop.f32.mrb[107].mxu0  ;;  %3288 = vmatmul.mubr.f32.gmra.mrb[38].mxu1 %v5342_v54 }
 0x2f4   :  { %3290 = vmatprep.mubr.msk.f32.mxu1 %vm4008_vm0, %v4009_v56 }
 0x2f5   :  { %v5349_v58 = vadd.f32 %v1188_v62, %v1155_v59  ;;  %v1160_v62 = vmul.f32 %v5184_v11, %v5184_v11 }
 0x2f6   :  { %v1076_v4 = vpop.f32.mrb[108].mxu0 }
 0x2f7   :  { %v1189_v10 = vmul.f32 %v1076_v4, %v1076_v4  ;;  %v1078_v12 = vpop.f32.mrb[109].mxu0  ;;  %3291 = vmatmul.mubr.f32.gmra.mrb[40].mxu1 %v5349_v58 }
 0x2f8   :  { %3293 = vmatprep.mubr.msk.f32.mxu1 %vm4008_vm0, %v4009_v56 }
 0x2f9   :  { %v5356_v61 = vadd.f32 %v1189_v10, %v1156_v7  ;;  %v1161_v10 = vmul.f32 %v5186_v15, %v5186_v15 }
 0x2fa   :  { %v1081_v16 = vpop.f32.mrb[110].mxu0 }
 0x2fb   :  { %v1190_v22 = vmul.f32 %v1081_v16, %v1081_v16  ;;  %v1083_v26 = vpop.f32.mrb[111].mxu0  ;;  %3294 = vmatmul.mubr.f32.gmra.mrb[42].mxu1 %v5356_v61 }
 0x2fc   :  { %3296 = vmatprep.mubr.msk.f32.mxu1 %vm4008_vm0, %v4009_v56 }
 0x2fd   :  { %v5363_v63 = vadd.f32 %v1190_v22, %v1157_v20  ;;  %v1162_v22 = vmul.f32 %v5188_v17, %v5188_v17 }
 0x2fe   :  { %v1086_v30 = vpop.f32.mrb[112].mxu0 }
 0x2ff   :  { %v1191_v36 = vmul.f32 %v1086_v30, %v1086_v30  ;;  %v1088_v39 = vpop.f32.mrb[113].mxu0  ;;  %3297 = vmatmul.mubr.f32.gmra.mrb[44].mxu1 %v5363_v63 }
 0x300   :  { %3299 = vmatprep.mubr.msk.f32.mxu1 %vm4008_vm0, %v4009_v56 }
 0x301   :  { %v5370_v3 = vadd.f32 %v1191_v36, %v1158_v32  ;;  %v1163_v36 = vmul.f32 %v5190_v21, %v5190_v21 }
 0x302   :  { %v1091_v41 = vpop.f32.mrb[114].mxu0 }
 0x303   :  { %v1192_v47 = vmul.f32 %v1091_v41, %v1091_v41  ;;  %v1093_v57 = vpop.f32.mrb[115].mxu0  ;;  %3300 = vmatmul.mubr.f32.gmra.mrb[46].mxu1 %v5370_v3 }
 0x304   :  { %3302 = vmatprep.mubr.msk.f32.mxu1 %vm4008_vm0, %v4009_v56 }
 0x305   :  { %v5377_v6 = vadd.f32 %v1192_v47, %v1159_v45  ;;  %v1164_v47 = vmul.f32 %v5192_v25, %v5192_v25 }
 0x306   :  { %v1096_v59 = vpop.f32.mrb[116].mxu0 }
 0x307   :  { %v1193_v2 = vmul.f32 %v1096_v59, %v1096_v59  ;;  %v1098_v4 = vpop.f32.mrb[117].mxu0  ;;  %3303 = vmatmul.mubr.f32.gmra.mrb[48].mxu1 %v5377_v6 }
 0x308   :  { %3305 = vmatprep.mubr.msk.f32.mxu1 %vm4008_vm0, %v4009_v56 }
 0x309   :  { %v5384_v8 = vadd.f32 %v1193_v2, %v1160_v62  ;;  %v1165_v2 = vmul.f32 %v5194_v27, %v5194_v27 }
 0x30a   :  { %v1101_v7 = vpop.f32.mrb[118].mxu0 }
 0x30b   :  { %v1194_v12 = vmul.f32 %v1101_v7, %v1101_v7  ;;  %v1103_v16 = vpop.f32.mrb[119].mxu0  ;;  %3306 = vmatmul.mubr.f32.gmra.mrb[50].mxu1 %v5384_v8 }
 0x30c   :  { %3308 = vmatprep.mubr.msk.f32.mxu1 %vm4008_vm0, %v4009_v56 }
 0x30d   :  { %v5391_v11 = vadd.f32 %v1194_v12, %v1161_v10  ;;  %v1166_v12 = vmul.f32 %v5196_v31, %v5196_v31 }
 0x30e   :  { %v1106_v20 = vpop.f32.mrb[120].mxu0 }
 0x30f   :  { %v1195_v26 = vmul.f32 %v1106_v20, %v1106_v20  ;;  %v1108_v30 = vpop.f32.mrb[121].mxu0  ;;  %3309 = vmatmul.mubr.f32.gmra.mrb[52].mxu1 %v5391_v11 }
 0x310   :  { %3311 = vmatprep.mubr.msk.f32.mxu1 %vm4008_vm0, %v4009_v56 }
 0x311   :  { %v5398_v15 = vadd.f32 %v1195_v26, %v1162_v22  ;;  %v1167_v26 = vmul.f32 %v5198_v35, %v5198_v35 }
 0x312   :  { %v1111_v32 = vpop.f32.mrb[122].mxu0 }
 0x313   :  { %v1196_v39 = vmul.f32 %v1111_v32, %v1111_v32  ;;  %v1113_v41 = vpop.f32.mrb[123].mxu0  ;;  %3312 = vmatmul.mubr.f32.gmra.mrb[54].mxu1 %v5398_v15 }
 0x314   :  { %3314 = vmatprep.mubr.msk.f32.mxu1 %vm4008_vm0, %v4009_v56 }
 0x315   :  { %v5405_v17 = vadd.f32 %v1196_v39, %v1163_v36 }
 0x316   :  { %v1116_v45 = vpop.f32.mrb[124].mxu0 }
 0x317   :  { %v1197_v57 = vmul.f32 %v1116_v45, %v1116_v45  ;;  %v1118_v59 = vpop.f32.mrb[125].mxu0  ;;  %3315 = vmatmul.mubr.f32.gmra.mrb[56].mxu1 %v5405_v17 }
 0x318   :  { %3317 = vmatprep.mubr.msk.f32.mxu1 %vm4008_vm0, %v4009_v56 }
 0x319   :  { %v5412_v21 = vadd.f32 %v1197_v57, %v1164_v47 }
 0x31a   :  { %v1121_v62 = vpop.f32.mrb[126].mxu0 }
 0x31b   :  { %v1198_v4 = vmul.f32 %v1121_v62, %v1121_v62  ;;  %v1123_v7 = vpop.f32.mrb[127].mxu0  ;;  %3318 = vmatmul.mubr.f32.gmra.mrb[58].mxu1 %v5412_v21 }
 0x31c   :  { %3320 = vmatprep.mubr.msk.f32.mxu1 %vm4008_vm0, %v4009_v56 }
 0x31d   :  { %v5419_v25 = vadd.f32 %v1198_v4, %v1165_v2 }
 0x31e   :  { %v1126_v10 = vpop.f32.mrb[128].mxu0 }
 0x31f   :  { %v1199_v16 = vmul.f32 %v1126_v10, %v1126_v10  ;;  %v1128_v20 = vpop.f32.mrb[129].mxu0  ;;  %3321 = vmatmul.mubr.f32.gmra.mrb[60].mxu1 %v5419_v25 }
 0x320   :  { %3323 = vmatprep.mubr.msk.f32.mxu1 %vm4008_vm0, %v4009_v56 }
 0x321   :  { %v5426_v27 = vadd.f32 %v1199_v16, %v1166_v12 }
 0x322   :  { %v1131_v22 = vpop.f32.mrb[130].mxu0 }
 0x323   :  { %v1200_v30 = vmul.f32 %v1131_v22, %v1131_v22  ;;  %v1133_v32 = vpop.f32.mrb[131].mxu0  ;;  %3324 = vmatmul.mubr.f32.gmra.mrb[62].mxu1 %v5426_v27 }
 0x324   :  { %3326 = vmatprep.mubr.msk.f32.mxu1 %vm4008_vm0, %v4009_v56 }
 0x325   :  { %v5433_v31 = vadd.f32 %v1200_v30, %v1167_v26 }
 0x327   :  { %3327 = vmatmul.mubr.f32.gmra.mrb[64].mxu1 %v5433_v31 }
 0x328   :  { %3331 = vmatprep.mubr.msk.f32.mxu1 %vm4008_vm0, %v4009_v56 }
 0x37a   :  { %v1317_v36 = vpop.f32.mrb[0].mxu1 }
 0x37b   :  { %v3232_v39 = vpop.f32.mrb[1].mxu1  ;;  %3332 = vmatmul.mubr.msk.f32.vlgmr.msra.gmra.mrb[66].mxu1 %vm1481_vm1, %v1317_v36 }
 0x37c   :  { %3334 = vmatprep.mubr.msk.f32.mxu1 %vm4008_vm0, %v4009_v56  ;;  %3784 = vmatpush3.bf16.msra.mxu1 %v4953_v13 }
 0x37d   :  { %3785 = vmatprep.subr.bf16.mxu1 %v4007_v0 }
 0x37e   :  { %v1322_v35 = vpop.f32.mrb[2].mxu1 }
 0x37f   :  { %v3235_v41 = vpop.f32.mrb[3].mxu1  ;;  %3335 = vmatmul.mubr.msk.f32.gmra.mrb[68].mxu1 %vm1481_vm1, %v1322_v35 }
 0x380   :  { %3337 = vmatprep.mubr.msk.f32.mxu1 %vm4008_vm0, %v4009_v56  ;;  %3787 = vmatpush3.bf16.msra.mxu1 %v4969_v18 }
 0x381   :  { %3788 = vmatprep.subr.bf16.mxu1 %v4007_v0 }
 0x382   :  { %v1327_v45 = vpop.f32.mrb[4].mxu1 }
 0x383   :  { %v3238_v47 = vpop.f32.mrb[5].mxu1  ;;  %3338 = vmatmul.mubr.msk.f32.gmra.mrb[70].mxu1 %vm1481_vm1, %v1327_v45 }
 0x384   :  { %3340 = vmatprep.mubr.msk.f32.mxu1 %vm4008_vm0, %v4009_v56  ;;  %3790 = vmatpush3.bf16.msra.mxu1 %v4985_v23 }
 0x385   :  { %3791 = vmatprep.subr.bf16.mxu1 %v4007_v0 }
 0x386   :  { %v1332_v13 = vpop.f32.mrb[6].mxu1 }
 0x387   :  { %v3241_v57 = vpop.f32.mrb[7].mxu1  ;;  %3341 = vmatmul.mubr.msk.f32.gmra.mrb[72].mxu1 %vm1481_vm1, %v1332_v13 }
 0x388   :  { %3343 = vmatprep.mubr.msk.f32.mxu1 %vm4008_vm0, %v4009_v56  ;;  %3793 = vmatpush3.bf16.msra.mxu1 %v5001_v28 }
 0x389   :  { %3794 = vmatprep.subr.bf16.mxu1 %v4007_v0 }
 0x38a   :  { %v1337_v18 = vpop.f32.mrb[8].mxu1 }
 0x38b   :  { %v3244_v59 = vpop.f32.mrb[9].mxu1  ;;  %3344 = vmatmul.mubr.msk.f32.gmra.mrb[74].mxu1 %vm1481_vm1, %v1337_v18 }
 0x38c   :  { %3346 = vmatprep.mubr.msk.f32.mxu1 %vm4008_vm0, %v4009_v56  ;;  %3796 = vmatpush3.bf16.msra.mxu1 %v5017_v33 }
 0x38d   :  { %3797 = vmatprep.subr.bf16.mxu1 %v4007_v0 }
 0x38e   :  { %v1342_v23 = vpop.f32.mrb[10].mxu1 }
 0x38f   :  { %v3247_v62 = vpop.f32.mrb[11].mxu1  ;;  %3347 = vmatmul.mubr.msk.f32.gmra.mrb[76].mxu1 %vm1481_vm1, %v1342_v23 }
 0x390   :  { %3349 = vmatprep.mubr.msk.f32.mxu1 %vm4008_vm0, %v4009_v56  ;;  %3799 = vmatpush3.bf16.msra.mxu1 %v5033_v38 }
 0x391   :  { %3800 = vmatprep.subr.bf16.mxu1 %v4007_v0 }
 0x392   :  { %v1347_v28 = vpop.f32.mrb[12].mxu1 }
 0x393   :  { %v3250_v2 = vpop.f32.mrb[13].mxu1  ;;  %3350 = vmatmul.mubr.msk.f32.gmra.mrb[78].mxu1 %vm1481_vm1, %v1347_v28 }
 0x394   :  { %3352 = vmatprep.mubr.msk.f32.mxu1 %vm4008_vm0, %v4009_v56  ;;  %3802 = vmatpush3.bf16.msra.mxu1 %v5051_v44 }
 0x395   :  { %3803 = vmatprep.subr.bf16.mxu1 %v4007_v0 }
 0x396   :  { %v1352_v33 = vpop.f32.mrb[14].mxu1 }
 0x397   :  { %v3253_v4 = vpop.f32.mrb[15].mxu1  ;;  %3353 = vmatmul.mubr.msk.f32.gmra.mrb[80].mxu1 %vm1481_vm1, %v1352_v33 }
 0x398   :  { %3355 = vmatprep.mubr.msk.f32.mxu1 %vm4008_vm0, %v4009_v56  ;;  %3805 = vmatpush3.bf16.msra.mxu1 %v5069_v51 }
 0x399   :  { %3561 = vmatprep.subr.mxu1 %v4009_v56 }
 0x39a   :  { %v1357_v38 = vpop.f32.mrb[16].mxu1 }
 0x39b   :  { %v3256_v7 = vpop.f32.mrb[17].mxu1  ;;  %3356 = vmatmul.mubr.msk.f32.gmra.mrb[82].mxu1 %vm1481_vm1, %v1357_v38 }
 0x39c   :  { %3358 = vmatprep.mubr.msk.f32.mxu1 %vm4008_vm0, %v4009_v56 }
 0x39e   :  { %v1362_v44 = vpop.f32.mrb[18].mxu1 }
 0x39f   :  { %v3259_v0 = vpop.f32.mrb[19].mxu1  ;;  %3359 = vmatmul.mubr.msk.f32.gmra.mrb[84].mxu1 %vm1481_vm1, %v1362_v44 }
 0x3a0   :  { %3361 = vmatprep.mubr.msk.f32.mxu1 %vm4008_vm0, %v4009_v56 }
 0x3a2   :  { %v1367_v10 = vpop.f32.mrb[20].mxu1 }
 0x3a3   :  { %v3262_v12 = vpop.f32.mrb[21].mxu1  ;;  %3362 = vmatmul.mubr.msk.f32.gmra.mrb[86].mxu1 %vm1481_vm1, %v1367_v10 }
 0x3a4   :  { %3364 = vmatprep.mubr.msk.f32.mxu1 %vm4008_vm0, %v4009_v56 }
 0x3a6   :  { %v1372_v51 = vpop.f32.mrb[22].mxu1 }
 0x3a7   :  { %v3265_v16 = vpop.f32.mrb[23].mxu1  ;;  %3365 = vmatmul.mubr.msk.f32.gmra.mrb[88].mxu1 %vm1481_vm1, %v1372_v51 }
 0x3a8   :  { %3367 = vmatprep.mubr.msk.f32.mxu1 %vm4008_vm0, %v4009_v56 }
 0x3aa   :  { %v1377_v20 = vpop.f32.mrb[24].mxu1 }
 0x3ab   :  { %v3268_v22 = vpop.f32.mrb[25].mxu1  ;;  %3368 = vmatmul.mubr.msk.f32.gmra.mrb[90].mxu1 %vm1481_vm1, %v1377_v20 }
 0x3ac   :  { %3370 = vmatprep.mubr.msk.f32.mxu1 %vm4008_vm0, %v4009_v56 }
 0x3ae   :  { %v1382_v26 = vpop.f32.mrb[26].mxu1 }
 0x3af   :  { %v3271_v30 = vpop.f32.mrb[27].mxu1  ;;  %3371 = vmatmul.mubr.msk.f32.gmra.mrb[92].mxu1 %vm1481_vm1, %v1382_v26 }
 0x3b0   :  { %3373 = vmatprep.mubr.msk.f32.mxu1 %vm4008_vm0, %v4009_v56 }
 0x3b2   :  { %v1387_v32 = vpop.f32.mrb[28].mxu1 }
 0x3b3   :  { %v3274_v36 = vpop.f32.mrb[29].mxu1  ;;  %3374 = vmatmul.mubr.msk.f32.gmra.mrb[94].mxu1 %vm1481_vm1, %v1387_v32 }
 0x3b4   :  { %3376 = vmatprep.mubr.msk.f32.mxu1 %vm4008_vm0, %v4009_v56 }
 0x3b6   :  { %v1392_v39 = vpop.f32.mrb[30].mxu1 }
 0x3b7   :  { %v3277_v35 = vpop.f32.mrb[31].mxu1  ;;  %3377 = vmatmul.mubr.msk.f32.gmra.mrb[96].mxu1 %vm1481_vm1, %v1392_v39 }
 0x3b8   :  { %3379 = vmatprep.mubr.msk.f32.mxu1 %vm4008_vm0, %v4009_v56 }
 0x3ba   :  { %v1397_v41 = vpop.f32.mrb[32].mxu1 }
 0x3bb   :  { %v3280_v45 = vpop.f32.mrb[33].mxu1  ;;  %3380 = vmatmul.mubr.msk.f32.gmra.mrb[98].mxu1 %vm1481_vm1, %v1397_v41 }
 0x3bc   :  { %3382 = vmatprep.mubr.msk.f32.mxu1 %vm4008_vm0, %v4009_v56 }
 0x3be   :  { %v1402_v47 = vpop.f32.mrb[34].mxu1 }
 0x3bf   :  { %v3283_v13 = vpop.f32.mrb[35].mxu1  ;;  %3383 = vmatmul.mubr.msk.f32.gmra.mrb[100].mxu1 %vm1481_vm1, %v1402_v47 }
 0x3c0   :  { %3385 = vmatprep.mubr.msk.f32.mxu1 %vm4008_vm0, %v4009_v56 }
 0x3c2   :  { %v1407_v57 = vpop.f32.mrb[36].mxu1 }
 0x3c3   :  { %v3286_v18 = vpop.f32.mrb[37].mxu1  ;;  %3386 = vmatmul.mubr.msk.f32.gmra.mrb[102].mxu1 %vm1481_vm1, %v1407_v57 }
 0x3c4   :  { %3388 = vmatprep.mubr.msk.f32.mxu1 %vm4008_vm0, %v4009_v56 }
 0x3c6   :  { %v1412_v59 = vpop.f32.mrb[38].mxu1 }
 0x3c7   :  { %v3289_v23 = vpop.f32.mrb[39].mxu1  ;;  %3389 = vmatmul.mubr.msk.f32.gmra.mrb[104].mxu1 %vm1481_vm1, %v1412_v59 }
 0x3c8   :  { %3391 = vmatprep.mubr.msk.f32.mxu1 %vm4008_vm0, %v4009_v56 }
 0x3ca   :  { %v1417_v62 = vpop.f32.mrb[40].mxu1 }
 0x3cb   :  { %v3292_v28 = vpop.f32.mrb[41].mxu1  ;;  %3392 = vmatmul.mubr.msk.f32.gmra.mrb[106].mxu1 %vm1481_vm1, %v1417_v62 }
 0x3cc   :  { %3394 = vmatprep.mubr.msk.f32.mxu1 %vm4008_vm0, %v4009_v56 }
 0x3ce   :  { %v1422_v2 = vpop.f32.mrb[42].mxu1 }
 0x3cf   :  { %v3295_v33 = vpop.f32.mrb[43].mxu1  ;;  %3395 = vmatmul.mubr.msk.f32.gmra.mrb[108].mxu1 %vm1481_vm1, %v1422_v2 }
 0x3d0   :  { %3397 = vmatprep.mubr.msk.f32.mxu1 %vm4008_vm0, %v4009_v56 }
 0x3d2   :  { %v1427_v4 = vpop.f32.mrb[44].mxu1 }
 0x3d3   :  { %v3298_v38 = vpop.f32.mrb[45].mxu1  ;;  %3398 = vmatmul.mubr.msk.f32.gmra.mrb[110].mxu1 %vm1481_vm1, %v1427_v4 }
 0x3d4   :  { %3400 = vmatprep.mubr.msk.f32.mxu1 %vm4008_vm0, %v4009_v56 }
 0x3d6   :  { %v1432_v7 = vpop.f32.mrb[46].mxu1 }
 0x3d7   :  { %v3301_v44 = vpop.f32.mrb[47].mxu1  ;;  %3401 = vmatmul.mubr.msk.f32.gmra.mrb[112].mxu1 %vm1481_vm1, %v1432_v7 }
 0x3d8   :  { %3403 = vmatprep.mubr.msk.f32.mxu1 %vm4008_vm0, %v4009_v56 }
 0x3da   :  { %v1437_v0 = vpop.f32.mrb[48].mxu1 }
 0x3db   :  { %v3304_v10 = vpop.f32.mrb[49].mxu1  ;;  %3404 = vmatmul.mubr.msk.f32.gmra.mrb[114].mxu1 %vm1481_vm1, %v1437_v0 }
 0x3dc   :  { %3406 = vmatprep.mubr.msk.f32.mxu1 %vm4008_vm0, %v4009_v56 }
 0x3de   :  { %v1442_v12 = vpop.f32.mrb[50].mxu1 }
 0x3df   :  { %v3307_v51 = vpop.f32.mrb[51].mxu1  ;;  %3407 = vmatmul.mubr.msk.f32.gmra.mrb[116].mxu1 %vm1481_vm1, %v1442_v12 }
 0x3e0   :  { %3409 = vmatprep.mubr.msk.f32.mxu1 %vm4008_vm0, %v4009_v56 }
 0x3e2   :  { %v1447_v16 = vpop.f32.mrb[52].mxu1 }
 0x3e3   :  { %v3310_v20 = vpop.f32.mrb[53].mxu1  ;;  %3410 = vmatmul.mubr.msk.f32.gmra.mrb[118].mxu1 %vm1481_vm1, %v1447_v16 }
 0x3e4   :  { %3412 = vmatprep.mubr.msk.f32.mxu1 %vm4008_vm0, %v4009_v56 }
 0x3e6   :  { %v1452_v22 = vpop.f32.mrb[54].mxu1 }
 0x3e7   :  { %v3313_v26 = vpop.f32.mrb[55].mxu1  ;;  %3413 = vmatmul.mubr.msk.f32.gmra.mrb[120].mxu1 %vm1481_vm1, %v1452_v22 }
 0x3e8   :  { %3415 = vmatprep.mubr.msk.f32.mxu1 %vm4008_vm0, %v4009_v56 }
 0x3ea   :  { %v1457_v30 = vpop.f32.mrb[56].mxu1 }
 0x3eb   :  { %v3316_v32 = vpop.f32.mrb[57].mxu1  ;;  %3416 = vmatmul.mubr.msk.f32.gmra.mrb[122].mxu1 %vm1481_vm1, %v1457_v30 }
 0x3ec   :  { %3418 = vmatprep.mubr.msk.f32.mxu1 %vm4008_vm0, %v4009_v56 }
 0x3ee   :  { %v1462_v36 = vpop.f32.mrb[58].mxu1 }
 0x3ef   :  { %v3319_v39 = vpop.f32.mrb[59].mxu1  ;;  %3419 = vmatmul.mubr.msk.f32.gmra.mrb[124].mxu1 %vm1481_vm1, %v1462_v36 }
 0x3f0   :  { %3421 = vmatprep.mubr.msk.f32.mxu1 %vm4008_vm0, %v4009_v56 }
 0x3f2   :  { %v1467_v35 = vpop.f32.mrb[60].mxu1 }
 0x3f3   :  { %v3322_v41 = vpop.f32.mrb[61].mxu1  ;;  %3422 = vmatmul.mubr.msk.f32.gmra.mrb[126].mxu1 %vm1481_vm1, %v1467_v35 }
 0x3f4   :  { %3424 = vmatprep.mubr.msk.f32.mxu1 %vm4008_vm0, %v4009_v56 }
 0x3f6   :  { %v1472_v45 = vpop.f32.mrb[62].mxu1 }
 0x3f7   :  { %v3325_v47 = vpop.f32.mrb[63].mxu1  ;;  %3425 = vmatmul.mubr.msk.f32.gmra.mrb[128].mxu1 %vm1481_vm1, %v1472_v45 }
 0x3f8   :  { %3427 = vmatprep.mubr.msk.f32.mxu1 %vm4008_vm0, %v4009_v56 }
 0x3fa   :  { %v1477_v13 = vpop.f32.mrb[64].mxu1 }
 0x3fb   :  { %v3328_v57 = vpop.f32.mrb[65].mxu1  ;;  %3428 = vmatmul.mubr.msk.f32.gmra.mrb[130].mxu1 %vm1481_vm1, %v1477_v13 }
 0x3fc   :  { %3462 = vmatprep.mubr.msk.f32.mxu1 %vm4008_vm0, %v4009_v56 }
 0x44e   :  { %v1647_v18 = vpop.f32.mrb[66].mxu1 }
 0x44f   :  { %v5554_v59 = vsub.f32 %v5202_v49, %v1647_v18  ;;  %v3333_v23 = vpop.f32.mrb[67].mxu1 }
 0x451   :  { %v1844_v62 = vmul.f32 %v5554_v59, %v5554_v59 }
 0x452   :  { %v1652_v28 = vpop.f32.mrb[68].mxu1 }
 0x453   :  { %v5559_v2 = vsub.f32 %v5215_v43, %v1652_v28  ;;  %v3336_v33 = vpop.f32.mrb[69].mxu1  ;;  %3463 = vmatmul.mubr.f32.vlgmr.msra.gmra.mrb[132].mxu1 %v1844_v62 }
 0x454   :  { %3465 = vmatprep.mubr.msk.f32.mxu1 %vm4008_vm0, %v4009_v56  ;;  %3562 = vmatpush3.msra.mxu1 %v5207_v53 }
 0x455   :  { %v1845_v4 = vmul.f32 %v5559_v2, %v5559_v2 }
 0x456   :  { %v1657_v49 = vpop.f32.mrb[70].mxu1 }
 0x457   :  { %v5567_v38 = vsub.f32 %v5223_v50, %v1657_v49  ;;  %v3339_v7 = vpop.f32.mrb[71].mxu1  ;;  %3466 = vmatmul.mubr.f32.gmra.mrb[134].mxu1 %v1845_v4 }
 0x458   :  { %3468 = vmatprep.mubr.msk.f32.mxu1 %vm4008_vm0, %v4009_v56 }
 0x459   :  { %v1846_v43 = vmul.f32 %v5567_v38, %v5567_v38 }
 0x45a   :  { %v1662_v44 = vpop.f32.mrb[72].mxu1 }
 0x45b   :  { %v5574_v0 = vsub.f32 %v5230_v55, %v1662_v44  ;;  %v3342_v53 = vpop.f32.mrb[73].mxu1  ;;  %3469 = vmatmul.mubr.f32.gmra.mrb[136].mxu1 %v1846_v43 }
 0x45c   :  { %3471 = vmatprep.mubr.msk.f32.mxu1 %vm4008_vm0, %v4009_v56 }
 0x45d   :  { %v1847_v50 = vmul.f32 %v5574_v0, %v5574_v0 }
 0x45e   :  { %v1667_v10 = vpop.f32.mrb[74].mxu1 }
 0x45f   :  { %v5581_v12 = vsub.f32 %v5237_v60, %v1667_v10  ;;  %v3345_v51 = vpop.f32.mrb[75].mxu1  ;;  %3472 = vmatmul.mubr.f32.gmra.mrb[138].mxu1 %v1847_v50 }
 0x460   :  { %3474 = vmatprep.mubr.msk.f32.mxu1 %vm4008_vm0, %v4009_v56 }
 0x461   :  { %v1848_v55 = vmul.f32 %v5581_v12, %v5581_v12 }
 0x462   :  { %v1672_v16 = vpop.f32.mrb[76].mxu1 }
 0x463   :  { %v5588_v20 = vsub.f32 %v5244_v1, %v1672_v16  ;;  %v3348_v22 = vpop.f32.mrb[77].mxu1  ;;  %3475 = vmatmul.mubr.f32.gmra.mrb[140].mxu1 %v1848_v55 }
 0x464   :  { %3477 = vmatprep.mubr.msk.f32.mxu1 %vm4008_vm0, %v4009_v56 }
 0x465   :  { %v1849_v60 = vmul.f32 %v5588_v20, %v5588_v20 }
 0x466   :  { %v1677_v26 = vpop.f32.mrb[78].mxu1 }
 0x467   :  { %v5595_v30 = vsub.f32 %v5251_v5, %v1677_v26  ;;  %v3351_v32 = vpop.f32.mrb[79].mxu1  ;;  %3478 = vmatmul.mubr.f32.gmra.mrb[142].mxu1 %v1849_v60 }
 0x468   :  { %3480 = vmatprep.mubr.msk.f32.mxu1 %vm4008_vm0, %v4009_v56 }
 0x469   :  { %v1850_v1 = vmul.f32 %v5595_v30, %v5595_v30 }
 0x46a   :  { %v1682_v36 = vpop.f32.mrb[80].mxu1 }
 0x46b   :  { %v5602_v39 = vsub.f32 %v5258_v9, %v1682_v36  ;;  %v3354_v35 = vpop.f32.mrb[81].mxu1  ;;  %3481 = vmatmul.mubr.f32.gmra.mrb[144].mxu1 %v1850_v1 }
 0x46c   :  { %3483 = vmatprep.mubr.msk.f32.mxu1 %vm4008_vm0, %v4009_v56 }
 0x46d   :  { %v1851_v5 = vmul.f32 %v5602_v39, %v5602_v39 }
 0x46e   :  { %v1687_v41 = vpop.f32.mrb[82].mxu1 }
 0x46f   :  { %v5609_v45 = vsub.f32 %v5265_v14, %v1687_v41  ;;  %v3357_v47 = vpop.f32.mrb[83].mxu1  ;;  %3484 = vmatmul.mubr.f32.gmra.mrb[146].mxu1 %v1851_v5 }
 0x470   :  { %3486 = vmatprep.mubr.msk.f32.mxu1 %vm4008_vm0, %v4009_v56 }
 0x471   :  { %v1852_v9 = vmul.f32 %v5609_v45, %v5609_v45 }
 0x472   :  { %v1692_v13 = vpop.f32.mrb[84].mxu1 }
 0x473   :  { %v5616_v57 = vsub.f32 %v5272_v19, %v1692_v13  ;;  %v3360_v18 = vpop.f32.mrb[85].mxu1  ;;  %3487 = vmatmul.mubr.f32.gmra.mrb[148].mxu1 %v1852_v9 }
 0x474   :  { %3489 = vmatprep.mubr.msk.f32.mxu1 %vm4008_vm0, %v4009_v56 }
 0x475   :  { %v1853_v14 = vmul.f32 %v5616_v57, %v5616_v57 }
 0x476   :  { %v1697_v23 = vpop.f32.mrb[86].mxu1 }
 0x477   :  { %v5623_v62 = vsub.f32 %v5279_v24, %v1697_v23  ;;  %v3363_v28 = vpop.f32.mrb[87].mxu1  ;;  %3490 = vmatmul.mubr.f32.gmra.mrb[150].mxu1 %v1853_v14 }
 0x478   :  { %3492 = vmatprep.mubr.msk.f32.mxu1 %vm4008_vm0, %v4009_v56 }
 0x479   :  { %v1854_v19 = vmul.f32 %v5623_v62, %v5623_v62 }
 0x47a   :  { %v1702_v33 = vpop.f32.mrb[88].mxu1 }
 0x47b   :  { %v5630_v4 = vsub.f32 %v5286_v29, %v1702_v33  ;;  %v3366_v49 = vpop.f32.mrb[89].mxu1  ;;  %3493 = vmatmul.mubr.f32.gmra.mrb[152].mxu1 %v1854_v19 }
 0x47c   :  { %3495 = vmatprep.mubr.msk.f32.mxu1 %vm4008_vm0, %v4009_v56 }
 0x47d   :  { %v1855_v24 = vmul.f32 %v5630_v4, %v5630_v4 }
 0x47e   :  { %v1707_v7 = vpop.f32.mrb[90].mxu1 }
 0x47f   :  { %v5637_v43 = vsub.f32 %v5293_v34, %v1707_v7  ;;  %v3369_v44 = vpop.f32.mrb[91].mxu1  ;;  %3496 = vmatmul.mubr.f32.gmra.mrb[154].mxu1 %v1855_v24 }
 0x480   :  { %3498 = vmatprep.mubr.msk.f32.mxu1 %vm4008_vm0, %v4009_v56 }
 0x481   :  { %v1856_v29 = vmul.f32 %v5637_v43, %v5637_v43 }
 0x482   :  { %v1712_v53 = vpop.f32.mrb[92].mxu1 }
 0x483   :  { %v5644_v50 = vsub.f32 %v5300_v37, %v1712_v53  ;;  %v3372_v10 = vpop.f32.mrb[93].mxu1  ;;  %3499 = vmatmul.mubr.f32.gmra.mrb[156].mxu1 %v1856_v29 }
 0x484   :  { %3501 = vmatprep.mubr.msk.f32.mxu1 %vm4008_vm0, %v4009_v56 }
 0x485   :  { %v1857_v34 = vmul.f32 %v5644_v50, %v5644_v50 }
 0x486   :  { %v1717_v51 = vpop.f32.mrb[94].mxu1 }
 0x487   :  { %v5651_v55 = vsub.f32 %v5307_v40, %v1717_v51  ;;  %v3375_v16 = vpop.f32.mrb[95].mxu1  ;;  %3502 = vmatmul.mubr.f32.gmra.mrb[158].mxu1 %v1857_v34 }
 0x488   :  { %3504 = vmatprep.mubr.msk.f32.mxu1 %vm4008_vm0, %v4009_v56 }
 0x489   :  { %v1858_v37 = vmul.f32 %v5651_v55, %v5651_v55 }
 0x48a   :  { %v1722_v22 = vpop.f32.mrb[96].mxu1 }
 0x48b   :  { %v5658_v60 = vsub.f32 %v5314_v42, %v1722_v22  ;;  %v3378_v26 = vpop.f32.mrb[97].mxu1  ;;  %3505 = vmatmul.mubr.f32.gmra.mrb[160].mxu1 %v1858_v37 }
 0x48c   :  { %3507 = vmatprep.mubr.msk.f32.mxu1 %vm4008_vm0, %v4009_v56 }
 0x48d   :  { %v1859_v40 = vmul.f32 %v5658_v60, %v5658_v60 }
 0x48e   :  { %v1727_v32 = vpop.f32.mrb[98].mxu1 }
 0x48f   :  { %v5665_v1 = vsub.f32 %v5321_v46, %v1727_v32  ;;  %v3381_v36 = vpop.f32.mrb[99].mxu1  ;;  %3508 = vmatmul.mubr.f32.gmra.mrb[162].mxu1 %v1859_v40 }
 0x490   :  { %3510 = vmatprep.mubr.msk.f32.mxu1 %vm4008_vm0, %v4009_v56 }
 0x491   :  { %v1860_v42 = vmul.f32 %v5665_v1, %v5665_v1 }
 0x492   :  { %v1732_v35 = vpop.f32.mrb[100].mxu1 }
 0x493   :  { %v5672_v5 = vsub.f32 %v5328_v48, %v1732_v35  ;;  %v3384_v41 = vpop.f32.mrb[101].mxu1  ;;  %3511 = vmatmul.mubr.f32.gmra.mrb[164].mxu1 %v1860_v42 }
 0x494   :  { %3513 = vmatprep.mubr.msk.f32.mxu1 %vm4008_vm0, %v4009_v56 }
 0x495   :  { %v1861_v46 = vmul.f32 %v5672_v5, %v5672_v5 }
 0x496   :  { %v1737_v47 = vpop.f32.mrb[102].mxu1 }
 0x497   :  { %v5679_v9 = vsub.f32 %v5335_v52, %v1737_v47  ;;  %v3387_v13 = vpop.f32.mrb[103].mxu1  ;;  %3514 = vmatmul.mubr.f32.gmra.mrb[166].mxu1 %v1861_v46 }
 0x498   :  { %3516 = vmatprep.mubr.msk.f32.mxu1 %vm4008_vm0, %v4009_v56 }
 0x499   :  { %v1862_v48 = vmul.f32 %v5679_v9, %v5679_v9 }
 0x49a   :  { %v1742_v18 = vpop.f32.mrb[104].mxu1 }
 0x49b   :  { %v5686_v14 = vsub.f32 %v5342_v54, %v1742_v18  ;;  %v3390_v23 = vpop.f32.mrb[105].mxu1  ;;  %3517 = vmatmul.mubr.f32.gmra.mrb[168].mxu1 %v1862_v48 }
 0x49c   :  { %3519 = vmatprep.mubr.msk.f32.mxu1 %vm4008_vm0, %v4009_v56 }
 0x49d   :  { %v1863_v52 = vmul.f32 %v5686_v14, %v5686_v14 }
 0x49e   :  { %v1747_v28 = vpop.f32.mrb[106].mxu1 }
 0x49f   :  { %v5693_v19 = vsub.f32 %v5349_v58, %v1747_v28  ;;  %v3393_v33 = vpop.f32.mrb[107].mxu1  ;;  %3520 = vmatmul.mubr.f32.gmra.mrb[170].mxu1 %v1863_v52 }
 0x4a0   :  { %3522 = vmatprep.mubr.msk.f32.mxu1 %vm4008_vm0, %v4009_v56 }
 0x4a1   :  { %v1864_v54 = vmul.f32 %v5693_v19, %v5693_v19 }
 0x4a2   :  { %v1752_v49 = vpop.f32.mrb[108].mxu1 }
 0x4a3   :  { %v5700_v24 = vsub.f32 %v5356_v61, %v1752_v49  ;;  %v3396_v7 = vpop.f32.mrb[109].mxu1  ;;  %3523 = vmatmul.mubr.f32.gmra.mrb[172].mxu1 %v1864_v54 }
 0x4a4   :  { %3525 = vmatprep.mubr.msk.f32.mxu1 %vm4008_vm0, %v4009_v56 }
 0x4a5   :  { %v1865_v58 = vmul.f32 %v5700_v24, %v5700_v24 }
 0x4a6   :  { %v1757_v44 = vpop.f32.mrb[110].mxu1 }
 0x4a7   :  { %v5707_v29 = vsub.f32 %v5363_v63, %v1757_v44  ;;  %v3399_v53 = vpop.f32.mrb[111].mxu1  ;;  %3526 = vmatmul.mubr.f32.gmra.mrb[174].mxu1 %v1865_v58 }
 0x4a8   :  { %3528 = vmatprep.mubr.msk.f32.mxu1 %vm4008_vm0, %v4009_v56 }
 0x4a9   :  { %v1866_v61 = vmul.f32 %v5707_v29, %v5707_v29 }
 0x4aa   :  { %v1762_v10 = vpop.f32.mrb[112].mxu1 }
 0x4ab   :  { %v5714_v34 = vsub.f32 %v5370_v3, %v1762_v10  ;;  %v3402_v51 = vpop.f32.mrb[113].mxu1  ;;  %3529 = vmatmul.mubr.f32.gmra.mrb[176].mxu1 %v1866_v61 }
 0x4ac   :  { %3531 = vmatprep.mubr.msk.f32.mxu1 %vm4008_vm0, %v4009_v56 }
 0x4ad   :  { %v1867_v63 = vmul.f32 %v5714_v34, %v5714_v34 }
 0x4ae   :  { %v1767_v16 = vpop.f32.mrb[114].mxu1 }
 0x4af   :  { %v5721_v37 = vsub.f32 %v5377_v6, %v1767_v16  ;;  %v3405_v22 = vpop.f32.mrb[115].mxu1  ;;  %3532 = vmatmul.mubr.f32.gmra.mrb[178].mxu1 %v1867_v63 }
 0x4b0   :  { %3534 = vmatprep.mubr.msk.f32.mxu1 %vm4008_vm0, %v4009_v56 }
 0x4b1   :  { %v1868_v3 = vmul.f32 %v5721_v37, %v5721_v37 }
 0x4b2   :  { %v1772_v26 = vpop.f32.mrb[116].mxu1 }
 0x4b3   :  { %v5728_v40 = vsub.f32 %v5384_v8, %v1772_v26  ;;  %v3408_v32 = vpop.f32.mrb[117].mxu1  ;;  %3535 = vmatmul.mubr.f32.gmra.mrb[180].mxu1 %v1868_v3 }
 0x4b4   :  { %3537 = vmatprep.mubr.msk.f32.mxu1 %vm4008_vm0, %v4009_v56 }
 0x4b5   :  { %v1869_v6 = vmul.f32 %v5728_v40, %v5728_v40 }
 0x4b6   :  { %v1777_v36 = vpop.f32.mrb[118].mxu1 }
 0x4b7   :  { %v5735_v42 = vsub.f32 %v5391_v11, %v1777_v36  ;;  %v3411_v35 = vpop.f32.mrb[119].mxu1  ;;  %3538 = vmatmul.mubr.f32.gmra.mrb[182].mxu1 %v1869_v6 }
 0x4b8   :  { %3540 = vmatprep.mubr.msk.f32.mxu1 %vm4008_vm0, %v4009_v56 }
 0x4b9   :  { %v1870_v8 = vmul.f32 %v5735_v42, %v5735_v42 }
 0x4ba   :  { %v1782_v41 = vpop.f32.mrb[120].mxu1 }
 0x4bb   :  { %v5742_v46 = vsub.f32 %v5398_v15, %v1782_v41  ;;  %v3414_v47 = vpop.f32.mrb[121].mxu1  ;;  %3541 = vmatmul.mubr.f32.gmra.mrb[184].mxu1 %v1870_v8 }
 0x4bc   :  { %3543 = vmatprep.mubr.msk.f32.mxu1 %vm4008_vm0, %v4009_v56 }
 0x4bd   :  { %v1871_v11 = vmul.f32 %v5742_v46, %v5742_v46 }
 0x4be   :  { %v1787_v13 = vpop.f32.mrb[122].mxu1 }
 0x4bf   :  { %v5749_v48 = vsub.f32 %v5405_v17, %v1787_v13  ;;  %v3417_v18 = vpop.f32.mrb[123].mxu1  ;;  %3544 = vmatmul.mubr.f32.gmra.mrb[186].mxu1 %v1871_v11 }
 0x4c0   :  { %3546 = vmatprep.mubr.msk.f32.mxu1 %vm4008_vm0, %v4009_v56 }
 0x4c1   :  { %v1872_v15 = vmul.f32 %v5749_v48, %v5749_v48 }
 0x4c2   :  { %v1792_v23 = vpop.f32.mrb[124].mxu1 }
 0x4c3   :  { %v5756_v52 = vsub.f32 %v5412_v21, %v1792_v23  ;;  %v3420_v28 = vpop.f32.mrb[125].mxu1  ;;  %3547 = vmatmul.mubr.f32.gmra.mrb[188].mxu1 %v1872_v15 }
 0x4c4   :  { %3549 = vmatprep.mubr.msk.f32.mxu1 %vm4008_vm0, %v4009_v56 }
 0x4c5   :  { %v1873_v17 = vmul.f32 %v5756_v52, %v5756_v52 }
 0x4c6   :  { %v1797_v33 = vpop.f32.mrb[126].mxu1 }
 0x4c7   :  { %v5763_v54 = vsub.f32 %v5419_v25, %v1797_v33  ;;  %v3423_v49 = vpop.f32.mrb[127].mxu1  ;;  %3550 = vmatmul.mubr.f32.gmra.mrb[190].mxu1 %v1873_v17 }
 0x4c8   :  { %3552 = vmatprep.mubr.msk.f32.mxu1 %vm4008_vm0, %v4009_v56 }
 0x4c9   :  { %v1874_v21 = vmul.f32 %v5763_v54, %v5763_v54 }
 0x4ca   :  { %v1802_v7 = vpop.f32.mrb[128].mxu1 }
 0x4cb   :  { %v5770_v58 = vsub.f32 %v5426_v27, %v1802_v7  ;;  %v3426_v44 = vpop.f32.mrb[129].mxu1  ;;  %3553 = vmatmul.mubr.f32.gmra.mrb[192].mxu1 %v1874_v21 }
 0x4cc   :  { %3555 = vmatprep.mubr.msk.f32.mxu1 %vm4008_vm0, %v4009_v56 }
 0x4cd   :  { %v1875_v25 = vmul.f32 %v5770_v58, %v5770_v58 }
 0x4ce   :  { %v1807_v53 = vpop.f32.mrb[130].mxu1 }
 0x4cf   :  { %v5777_v61 = vsub.f32 %v5433_v31, %v1807_v53  ;;  %v3429_v10 = vpop.f32.mrb[131].mxu1  ;;  %3556 = vmatmul.mubr.f32.gmra.mrb[194].mxu1 %v1875_v25 }
 0x4d0   :  { %3558 = vmatprep.mubr.msk.f32.mxu1 %vm4008_vm0, %v4009_v56 }
 0x4d1   :  { %v1876_v27 = vmul.f32 %v5777_v61, %v5777_v61 }
 0x4d3   :  { %3559 = vmatmul.mubr.f32.gmra.mrb[196].mxu1 %v1876_v27 }
 0x4d4   :  { %3563 = vmatprep.mubr.msk.f32.mxu1 %vm4008_vm0, %v4009_v56 }
 0x526   :  { %v1943_v51 = vpop.f32.mrb[132].mxu1 }
 0x527   :  { %v3464_v63 = vpop.f32.mrb[133].mxu1  ;;  %3564 = vmatmul.mubr.msk.f32.vlgmr.msra.gmra.mrb[198].mxu1 %vm1481_vm1, %v1943_v51 }
 0x528   :  { %3566 = vmatprep.mubr.msk.f32.mxu1 %vm4008_vm0, %v4009_v56 }
 0x52a   :  { %v1948_v31 = vpop.f32.mrb[134].mxu1 }
 0x52b   :  { %v3467_v16 = vpop.f32.mrb[135].mxu1  ;;  %3567 = vmatmul.mubr.msk.f32.gmra.mrb[200].mxu1 %vm1481_vm1, %v1948_v31 }
 0x52c   :  { %3569 = vmatprep.mubr.msk.f32.mxu1 %vm4008_vm0, %v4009_v56 }
 0x52e   :  { %v1953_v22 = vpop.f32.mrb[136].mxu1 }
 0x52f   :  { %v3470_v3 = vpop.f32.mrb[137].mxu1  ;;  %3570 = vmatmul.mubr.msk.f32.gmra.mrb[202].mxu1 %vm1481_vm1, %v1953_v22 }
 0x530   :  { %3572 = vmatprep.mubr.msk.f32.mxu1 %vm4008_vm0, %v4009_v56 }
 0x532   :  { %v1958_v26 = vpop.f32.mrb[138].mxu1 }
 0x533   :  { %v3473_v32 = vpop.f32.mrb[139].mxu1  ;;  %3573 = vmatmul.mubr.msk.f32.gmra.mrb[204].mxu1 %vm1481_vm1, %v1958_v26 }
 0x534   :  { %3575 = vmatprep.mubr.msk.f32.mxu1 %vm4008_vm0, %v4009_v56 }
 0x536   :  { %v1963_v6 = vpop.f32.mrb[140].mxu1 }
 0x537   :  { %v3476_v36 = vpop.f32.mrb[141].mxu1  ;;  %3576 = vmatmul.mubr.msk.f32.gmra.mrb[206].mxu1 %vm1481_vm1, %v1963_v6 }
 0x538   :  { %3578 = vmatprep.mubr.msk.f32.mxu1 %vm4008_vm0, %v4009_v56 }
 0x53a   :  { %v1968_v35 = vpop.f32.mrb[142].mxu1 }
 0x53b   :  { %v3479_v8 = vpop.f32.mrb[143].mxu1  ;;  %3579 = vmatmul.mubr.msk.f32.gmra.mrb[208].mxu1 %vm1481_vm1, %v1968_v35 }
 0x53c   :  { %3581 = vmatprep.mubr.msk.f32.mxu1 %vm4008_vm0, %v4009_v56 }
 0x53e   :  { %v1973_v41 = vpop.f32.mrb[144].mxu1 }
 0x53f   :  { %v3482_v47 = vpop.f32.mrb[145].mxu1  ;;  %3582 = vmatmul.mubr.msk.f32.gmra.mrb[210].mxu1 %vm1481_vm1, %v1973_v41 }
 0x540   :  { %3584 = vmatprep.mubr.msk.f32.mxu1 %vm4008_vm0, %v4009_v56 }
 0x542   :  { %v1978_v11 = vpop.f32.mrb[146].mxu1 }
 0x543   :  { %v3485_v13 = vpop.f32.mrb[147].mxu1  ;;  %3585 = vmatmul.mubr.msk.f32.gmra.mrb[212].mxu1 %vm1481_vm1, %v1978_v11 }
 0x544   :  { %3587 = vmatprep.mubr.msk.f32.mxu1 %vm4008_vm0, %v4009_v56 }
 0x546   :  { %v1983_v18 = vpop.f32.mrb[148].mxu1 }
 0x547   :  { %v3488_v15 = vpop.f32.mrb[149].mxu1  ;;  %3588 = vmatmul.mubr.msk.f32.gmra.mrb[214].mxu1 %vm1481_vm1, %v1983_v18 }
 0x548   :  { %3590 = vmatprep.mubr.msk.f32.mxu1 %vm4008_vm0, %v4009_v56 }
 0x54a   :  { %v1988_v23 = vpop.f32.mrb[150].mxu1 }
 0x54b   :  { %v3491_v28 = vpop.f32.mrb[151].mxu1  ;;  %3591 = vmatmul.mubr.msk.f32.gmra.mrb[216].mxu1 %vm1481_vm1, %v1988_v23 }
 0x54c   :  { %3593 = vmatprep.mubr.msk.f32.mxu1 %vm4008_vm0, %v4009_v56 }
 0x54e   :  { %v1993_v17 = vpop.f32.mrb[152].mxu1 }
 0x54f   :  { %v3494_v33 = vpop.f32.mrb[153].mxu1  ;;  %3594 = vmatmul.mubr.msk.f32.gmra.mrb[218].mxu1 %vm1481_vm1, %v1993_v17 }
 0x550   :  { %3596 = vmatprep.mubr.msk.f32.mxu1 %vm4008_vm0, %v4009_v56 }
 0x552   :  { %v1998_v49 = vpop.f32.mrb[154].mxu1 }
 0x553   :  { %v3497_v21 = vpop.f32.mrb[155].mxu1  ;;  %3597 = vmatmul.mubr.msk.f32.gmra.mrb[220].mxu1 %vm1481_vm1, %v1998_v49 }
 0x554   :  { %3599 = vmatprep.mubr.msk.f32.mxu1 %vm4008_vm0, %v4009_v56 }
 0x556   :  { %v2003_v7 = vpop.f32.mrb[156].mxu1 }
 0x557   :  { %v3500_v44 = vpop.f32.mrb[157].mxu1  ;;  %3600 = vmatmul.mubr.msk.f32.gmra.mrb[222].mxu1 %vm1481_vm1, %v2003_v7 }
 0x558   :  { %3602 = vmatprep.mubr.msk.f32.mxu1 %vm4008_vm0, %v4009_v56 }
 0x55a   :  { %v2008_v25 = vpop.f32.mrb[158].mxu1 }
 0x55b   :  { %v3503_v53 = vpop.f32.mrb[159].mxu1  ;;  %3603 = vmatmul.mubr.msk.f32.gmra.mrb[224].mxu1 %vm1481_vm1, %v2008_v25 }
 0x55c   :  { %3605 = vmatprep.mubr.msk.f32.mxu1 %vm4008_vm0, %v4009_v56 }
 0x55e   :  { %v2013_v10 = vpop.f32.mrb[160].mxu1 }
 0x55f   :  { %v3506_v27 = vpop.f32.mrb[161].mxu1  ;;  %3606 = vmatmul.mubr.msk.f32.gmra.mrb[226].mxu1 %vm1481_vm1, %v2013_v10 }
 0x560   :  { %3608 = vmatprep.mubr.msk.f32.mxu1 %vm4008_vm0, %v4009_v56 }
 0x562   :  { %v2018_v51 = vpop.f32.mrb[162].mxu1 }
 0x563   :  { %v3509_v63 = vpop.f32.mrb[163].mxu1  ;;  %3609 = vmatmul.mubr.msk.f32.gmra.mrb[228].mxu1 %vm1481_vm1, %v2018_v51 }
 0x564   :  { %3611 = vmatprep.mubr.msk.f32.mxu1 %vm4008_vm0, %v4009_v56 }
 0x566   :  { %v2023_v31 = vpop.f32.mrb[164].mxu1 }
 0x567   :  { %v3512_v16 = vpop.f32.mrb[165].mxu1  ;;  %3612 = vmatmul.mubr.msk.f32.gmra.mrb[230].mxu1 %vm1481_vm1, %v2023_v31 }
 0x568   :  { %3614 = vmatprep.mubr.msk.f32.mxu1 %vm4008_vm0, %v4009_v56 }
 0x56a   :  { %v2028_v22 = vpop.f32.mrb[166].mxu1 }
 0x56b   :  { %v3515_v3 = vpop.f32.mrb[167].mxu1  ;;  %3615 = vmatmul.mubr.msk.f32.gmra.mrb[232].mxu1 %vm1481_vm1, %v2028_v22 }
 0x56c   :  { %3617 = vmatprep.mubr.msk.f32.mxu1 %vm4008_vm0, %v4009_v56 }
 0x56e   :  { %v2033_v26 = vpop.f32.mrb[168].mxu1 }
 0x56f   :  { %v3518_v32 = vpop.f32.mrb[169].mxu1  ;;  %3618 = vmatmul.mubr.msk.f32.gmra.mrb[234].mxu1 %vm1481_vm1, %v2033_v26 }
 0x570   :  { %3620 = vmatprep.mubr.msk.f32.mxu1 %vm4008_vm0, %v4009_v56 }
 0x572   :  { %v2038_v6 = vpop.f32.mrb[170].mxu1 }
 0x573   :  { %v3521_v36 = vpop.f32.mrb[171].mxu1  ;;  %3621 = vmatmul.mubr.msk.f32.gmra.mrb[236].mxu1 %vm1481_vm1, %v2038_v6 }
 0x574   :  { %3623 = vmatprep.mubr.msk.f32.mxu1 %vm4008_vm0, %v4009_v56 }
 0x576   :  { %v2043_v35 = vpop.f32.mrb[172].mxu1 }
 0x577   :  { %v3524_v8 = vpop.f32.mrb[173].mxu1  ;;  %3624 = vmatmul.mubr.msk.f32.gmra.mrb[238].mxu1 %vm1481_vm1, %v2043_v35 }
 0x578   :  { %3626 = vmatprep.mubr.msk.f32.mxu1 %vm4008_vm0, %v4009_v56 }
 0x57a   :  { %v2048_v41 = vpop.f32.mrb[174].mxu1 }
 0x57b   :  { %v3527_v47 = vpop.f32.mrb[175].mxu1  ;;  %3627 = vmatmul.mubr.msk.f32.gmra.mrb[240].mxu1 %vm1481_vm1, %v2048_v41 }
 0x57c   :  { %3629 = vmatprep.mubr.msk.f32.mxu1 %vm4008_vm0, %v4009_v56 }
 0x57e   :  { %v2053_v11 = vpop.f32.mrb[176].mxu1 }
 0x57f   :  { %v3530_v13 = vpop.f32.mrb[177].mxu1  ;;  %3630 = vmatmul.mubr.msk.f32.gmra.mrb[242].mxu1 %vm1481_vm1, %v2053_v11 }
 0x580   :  { %3632 = vmatprep.mubr.msk.f32.mxu1 %vm4008_vm0, %v4009_v56 }
 0x582   :  { %v2058_v18 = vpop.f32.mrb[178].mxu1 }
 0x583   :  { %v3533_v15 = vpop.f32.mrb[179].mxu1  ;;  %3633 = vmatmul.mubr.msk.f32.gmra.mrb[244].mxu1 %vm1481_vm1, %v2058_v18 }
 0x584   :  { %3635 = vmatprep.mubr.msk.f32.mxu1 %vm4008_vm0, %v4009_v56 }
 0x586   :  { %v2063_v23 = vpop.f32.mrb[180].mxu1 }
 0x587   :  { %v3536_v28 = vpop.f32.mrb[181].mxu1  ;;  %3636 = vmatmul.mubr.msk.f32.gmra.mrb[246].mxu1 %vm1481_vm1, %v2063_v23 }
 0x588   :  { %3638 = vmatprep.mubr.msk.f32.mxu1 %vm4008_vm0, %v4009_v56 }
 0x58a   :  { %v2068_v17 = vpop.f32.mrb[182].mxu1 }
 0x58b   :  { %v3539_v33 = vpop.f32.mrb[183].mxu1  ;;  %3639 = vmatmul.mubr.msk.f32.gmra.mrb[248].mxu1 %vm1481_vm1, %v2068_v17 }
 0x58c   :  { %3641 = vmatprep.mubr.msk.f32.mxu1 %vm4008_vm0, %v4009_v56 }
 0x58e   :  { %v2073_v49 = vpop.f32.mrb[184].mxu1 }
 0x58f   :  { %v3542_v21 = vpop.f32.mrb[185].mxu1  ;;  %3642 = vmatmul.mubr.msk.f32.gmra.mrb[250].mxu1 %vm1481_vm1, %v2073_v49 }
 0x590   :  { %3644 = vmatprep.mubr.msk.f32.mxu1 %vm4008_vm0, %v4009_v56 }
 0x592   :  { %v2078_v7 = vpop.f32.mrb[186].mxu1 }
 0x593   :  { %v3545_v44 = vpop.f32.mrb[187].mxu1  ;;  %3645 = vmatmul.mubr.msk.f32.gmra.mrb[252].mxu1 %vm1481_vm1, %v2078_v7 }
 0x594   :  { %3647 = vmatprep.mubr.msk.f32.mxu1 %vm4008_vm0, %v4009_v56 }
 0x596   :  { %v2083_v25 = vpop.f32.mrb[188].mxu1 }
 0x597   :  { %v3548_v53 = vpop.f32.mrb[189].mxu1  ;;  %3648 = vmatmul.mubr.msk.f32.gmra.mrb[254].mxu1 %vm1481_vm1, %v2083_v25 }
 0x598   :  { %3650 = vmatprep.mubr.msk.f32.mxu1 %vm4008_vm0, %v4009_v56 }
 0x59a   :  { %v2088_v10 = vpop.f32.mrb[190].mxu1 }
 0x59b   :  { %v3551_v27 = vpop.f32.mrb[191].mxu1  ;;  %3651 = vmatmul.mubr.msk.f32.gmra.mrb[0].mxu1 %vm1481_vm1, %v2088_v10 }
 0x59c   :  { %3653 = vmatprep.mubr.msk.f32.mxu1 %vm4008_vm0, %v4009_v56 }
 0x59e   :  { %v2093_v51 = vpop.f32.mrb[192].mxu1 }
 0x59f   :  { %v3554_v63 = vpop.f32.mrb[193].mxu1  ;;  %3654 = vmatmul.mubr.msk.f32.gmra.mrb[2].mxu1 %vm1481_vm1, %v2093_v51 }
 0x5a0   :  { %3656 = vmatprep.mubr.msk.f32.mxu1 %vm4008_vm0, %v4009_v56 }
 0x5a2   :  { %v2098_v31 = vpop.f32.mrb[194].mxu1 }
 0x5a3   :  { %v3557_v16 = vpop.f32.mrb[195].mxu1  ;;  %3657 = vmatmul.mubr.msk.f32.gmra.mrb[4].mxu1 %vm1481_vm1, %v2098_v31 }
 0x5a4   :  { %3659 = vmatprep.mubr.msk.f32.mxu1 %vm4008_vm0, %v4009_v56 }
 0x5a6   :  { %v2103_v22 = vpop.f32.mrb[196].mxu1 }
 0x5a7   :  { %v3560_v3 = vpop.f32.mrb[197].mxu1  ;;  %3660 = vmatmul.mubr.msk.f32.gmra.mrb[6].mxu1 %vm1481_vm1, %v2103_v22 }
 0x5fa   :  { %v2272_v26 = vpop.f32.mrb[198].mxu1 }
 0x5fb   :  { %v2436_v32 = vmul.f32 1.0158731, %v2272_v26  ;;  %v3565_v6 = vpop.f32.mrb[199].mxu1 }
 0x5fd   :  { %3941 = vrsqrt.f32 %v2436_v32 }
 0x5fe   :  { %v2277_v36 = vpop.f32.mrb[200].mxu1 }
 0x5ff   :  { %v2437_v35 = vmul.f32 1.0158731, %v2277_v36  ;;  %v3568_v8 = vpop.f32.mrb[201].mxu1 }
 0x601   :  { %3943 = vrsqrt.f32 %v2437_v35 }
 0x602   :  { %v2282_v41 = vpop.f32.mrb[202].mxu1 }
 0x603   :  { %v2438_v47 = vmul.f32 1.0158731, %v2282_v41  ;;  %v3571_v11 = vpop.f32.mrb[203].mxu1 }
 0x605   :  { %3945 = vrsqrt.f32 %v2438_v47 }
 0x606   :  { %v2287_v13 = vpop.f32.mrb[204].mxu1 }
 0x607   :  { %v2439_v18 = vmul.f32 1.0158731, %v2287_v13  ;;  %v3574_v15 = vpop.f32.mrb[205].mxu1  ;;  %v3942_v56 = vpop.eup %3941 }
 0x608   :  { %v2502_v49 = vmul.f32 %v3942_v56, %v5554_v59 }
 0x609   :  { %3947 = vrsqrt.f32 %v2439_v18 }
 0x60a   :  { %v2292_v23 = vpop.f32.mrb[206].mxu1 }
 0x60b   :  { %v3944_v28 = vpop.eup %3943  ;;  %v2440_v17 = vmul.f32 1.0158731, %v2292_v23  ;;  %v3577_v33 = vpop.f32.mrb[207].mxu1 }
 0x60c   :  { %v2503_v21 = vmul.f32 %v3944_v28, %v5559_v2 }
 0x60d   :  { %3949 = vrsqrt.f32 %v2440_v17 }
 0x60e   :  { %v2940_v7 = vpack.c.bf16 %v2503_v21, %v2502_v49  ;;  %v2297_v44 = vpop.f32.mrb[208].mxu1 }
 0x60f   :  { %v2441_v25 = vmul.f32 1.0158731, %v2297_v44  ;;  %v3580_v53 = vpop.f32.mrb[209].mxu1  ;;  %v3946_v10 = vpop.eup %3945 }
 0x610   :  { %2941 = vst [vmem:[%s5970_s4] sm:$0xff] %v2940_v7   ;;  %v2504_v16 = vmul.f32 %v3946_v10, %v5567_v38 }
 0x611   :  { %3951 = vrsqrt.f32 %v2441_v25 }
 0x612   :  { %v2302_v27 = vpop.f32.mrb[210].mxu1 }
 0x613   :  { %v3948_v51 = vpop.eup %3947  ;;  %v2442_v63 = vmul.f32 1.0158731, %v2302_v27  ;;  %v3583_v31 = vpop.f32.mrb[211].mxu1 }
 0x614   :  { %v2505_v59 = vmul.f32 %v3948_v51, %v5574_v0 }
 0x615   :  { %3953 = vrsqrt.f32 %v2442_v63 }
 0x616   :  { %v2945_v2 = vpack.c.bf16 %v2505_v59, %v2504_v16  ;;  %v2307_v22 = vpop.f32.mrb[212].mxu1 }
 0x617   :  { %v2443_v3 = vmul.f32 1.0158731, %v2307_v22  ;;  %v3586_v26 = vpop.f32.mrb[213].mxu1  ;;  %v3950_v32 = vpop.eup %3949 }
 0x618   :  { %3017 = vst [vmem:[%s5970_s4 + $0x8] sm:$0xff] %v2945_v2   ;;  %v2506_v41 = vmul.f32 %v3950_v32, %v5581_v12 }
 0x619   :  { %3955 = vrsqrt.f32 %v2443_v3 }
 0x61a   :  { %v2312_v6 = vpop.f32.mrb[214].mxu1 }
 0x61b   :  { %v3952_v36 = vpop.eup %3951  ;;  %v2444_v35 = vmul.f32 1.0158731, %v2312_v6  ;;  %v3589_v8 = vpop.f32.mrb[215].mxu1 }
 0x61c   :  { %v2507_v38 = vmul.f32 %v3952_v36, %v5588_v20 }
 0x61d   :  { %3957 = vrsqrt.f32 %v2444_v35 }
 0x61e   :  { %v2950_v0 = vpack.c.bf16 %v2507_v38, %v2506_v41  ;;  %v2317_v47 = vpop.f32.mrb[216].mxu1 }
 0x61f   :  { %v2445_v11 = vmul.f32 1.0158731, %v2317_v47  ;;  %v3592_v13 = vpop.f32.mrb[217].mxu1  ;;  %v3954_v18 = vpop.eup %3953 }
 0x620   :  { %3018 = vst [vmem:[%s5970_s4 + $0x10] sm:$0xff] %v2950_v0   ;;  %v2508_v17 = vmul.f32 %v3954_v18, %v5595_v30 }
 0x621   :  { %3959 = vrsqrt.f32 %v2445_v11 }
 0x622   :  { %v2322_v15 = vpop.f32.mrb[218].mxu1 }
 0x623   :  { %v3956_v56 = vpop.eup %3955  ;;  %v2446_v23 = vmul.f32 1.0158731, %v2322_v15  ;;  %v3595_v28 = vpop.f32.mrb[219].mxu1 }
 0x624   :  { %v2509_v12 = vmul.f32 %v3956_v56, %v5602_v39 }
 0x625   :  { %3961 = vrsqrt.f32 %v2446_v23 }
 0x626   :  { %v2955_v20 = vpack.c.bf16 %v2509_v12, %v2508_v17  ;;  %v2327_v33 = vpop.f32.mrb[220].mxu1 }
 0x627   :  { %v2447_v49 = vmul.f32 1.0158731, %v2327_v33  ;;  %v3598_v21 = vpop.f32.mrb[221].mxu1  ;;  %v3958_v7 = vpop.eup %3957 }
 0x628   :  { %3019 = vst [vmem:[%s5970_s4 + $0x18] sm:$0xff] %v2955_v20   ;;  %v2510_v27 = vmul.f32 %v3958_v7, %v5609_v45 }
 0x629   :  { %3963 = vrsqrt.f32 %v2447_v49 }
 0x62a   :  { %v2332_v44 = vpop.f32.mrb[222].mxu1 }
 0x62b   :  { %v3960_v25 = vpop.eup %3959  ;;  %v2448_v53 = vmul.f32 1.0158731, %v2332_v44  ;;  %v3601_v10 = vpop.f32.mrb[223].mxu1 }
 0x62c   :  { %v2511_v30 = vmul.f32 %v3960_v25, %v5616_v57 }
 0x62d   :  { %3965 = vrsqrt.f32 %v2448_v53 }
 0x62e   :  { %v2960_v39 = vpack.c.bf16 %v2511_v30, %v2510_v27  ;;  %v2337_v51 = vpop.f32.mrb[224].mxu1 }
 0x62f   :  { %v2449_v63 = vmul.f32 1.0158731, %v2337_v51  ;;  %v3604_v31 = vpop.f32.mrb[225].mxu1  ;;  %v3962_v16 = vpop.eup %3961 }
 0x630   :  { %3020 = vst [vmem:[%s5970_s4 + $0x20] sm:$0xff] %v2960_v39   ;;  %v2512_v26 = vmul.f32 %v3962_v16, %v5623_v62 }
 0x631   :  { %3967 = vrsqrt.f32 %v2449_v63 }
 0x632   :  { %v2342_v59 = vpop.f32.mrb[226].mxu1 }
 0x633   :  { %v3964_v2 = vpop.eup %3963  ;;  %v2450_v22 = vmul.f32 1.0158731, %v2342_v59  ;;  %v3607_v3 = vpop.f32.mrb[227].mxu1 }
 0x634   :  { %v2513_v45 = vmul.f32 %v3964_v2, %v5630_v4 }
 0x635   :  { %3969 = vrsqrt.f32 %v2450_v22 }
 0x636   :  { %v2965_v57 = vpack.c.bf16 %v2513_v45, %v2512_v26  ;;  %v2347_v32 = vpop.f32.mrb[228].mxu1 }
 0x637   :  { %v2451_v6 = vmul.f32 1.0158731, %v2347_v32  ;;  %v3610_v36 = vpop.f32.mrb[229].mxu1  ;;  %v3966_v35 = vpop.eup %3965 }
 0x638   :  { %3021 = vst [vmem:[%s5970_s4 + $0x28] sm:$0xff] %v2965_v57   ;;  %v2514_v47 = vmul.f32 %v3966_v35, %v5637_v43 }
 0x639   :  { %3971 = vrsqrt.f32 %v2451_v6 }
 0x63a   :  { %v2352_v8 = vpop.f32.mrb[230].mxu1 }
 0x63b   :  { %v3968_v41 = vpop.eup %3967  ;;  %v2452_v38 = vmul.f32 1.0158731, %v2352_v8  ;;  %v3613_v0 = vpop.f32.mrb[231].mxu1 }
 0x63c   :  { %v2515_v62 = vmul.f32 %v3968_v41, %v5644_v50 }
 0x63d   :  { %3973 = vrsqrt.f32 %v2452_v38 }
 0x63e   :  { %v2970_v4 = vpack.c.bf16 %v2515_v62, %v2514_v47  ;;  %v2357_v11 = vpop.f32.mrb[232].mxu1 }
 0x63f   :  { %v2453_v13 = vmul.f32 1.0158731, %v2357_v11  ;;  %v3616_v18 = vpop.f32.mrb[233].mxu1  ;;  %v3970_v15 = vpop.eup %3969 }
 0x640   :  { %3022 = vst [vmem:[%s5970_s4 + $0x30] sm:$0xff] %v2970_v4   ;;  %v2516_v12 = vmul.f32 %v3970_v15, %v5651_v55 }
 0x641   :  { %3975 = vrsqrt.f32 %v2453_v13 }
 0x642   :  { %v2362_v56 = vpop.f32.mrb[234].mxu1 }
 0x643   :  { %v3972_v23 = vpop.eup %3971  ;;  %v2454_v28 = vmul.f32 1.0158731, %v2362_v56  ;;  %v3619_v17 = vpop.f32.mrb[235].mxu1 }
 0x644   :  { %v2517_v43 = vmul.f32 %v3972_v23, %v5658_v60 }
 0x645   :  { %3977 = vrsqrt.f32 %v2454_v28 }
 0x646   :  { %v2975_v50 = vpack.c.bf16 %v2517_v43, %v2516_v12  ;;  %v2367_v20 = vpop.f32.mrb[236].mxu1 }
 0x647   :  { %v2455_v33 = vmul.f32 1.0158731, %v2367_v20  ;;  %v3622_v49 = vpop.f32.mrb[237].mxu1  ;;  %v3974_v21 = vpop.eup %3973 }
 0x648   :  { %3023 = vst [vmem:[%s5970_s4 + $0x38] sm:$0xff] %v2975_v50   ;;  %v2518_v10 = vmul.f32 %v3974_v21, %v5665_v1 }
 0x649   :  { %3979 = vrsqrt.f32 %v2455_v33 }
 0x64a   :  { %v2372_v7 = vpop.f32.mrb[238].mxu1 }
 0x64b   :  { %v3976_v44 = vpop.eup %3975  ;;  %v2456_v25 = vmul.f32 1.0158731, %v2372_v7  ;;  %v3625_v53 = vpop.f32.mrb[239].mxu1 }
 0x64c   :  { %v2519_v55 = vmul.f32 %v3976_v44, %v5672_v5 }
 0x64d   :  { %3981 = vrsqrt.f32 %v2456_v25 }
 0x64e   :  { %v2980_v60 = vpack.c.bf16 %v2519_v55, %v2518_v10  ;;  %v2377_v27 = vpop.f32.mrb[240].mxu1 }
 0x64f   :  { %v2457_v30 = vmul.f32 1.0158731, %v2377_v27  ;;  %v3628_v39 = vpop.f32.mrb[241].mxu1  ;;  %v3978_v51 = vpop.eup %3977 }
 0x650   :  { %3024 = vst [vmem:[%s5970_s4 + $0x40] sm:$0xff] %v2980_v60   ;;  %v2520_v2 = vmul.f32 %v3978_v51, %v5679_v9 }
 0x651   :  { %3983 = vrsqrt.f32 %v2457_v30 }
 0x652   :  { %v2382_v63 = vpop.f32.mrb[242].mxu1 }
 0x653   :  { %v3980_v31 = vpop.eup %3979  ;;  %v2458_v16 = vmul.f32 1.0158731, %v2382_v63  ;;  %v3631_v59 = vpop.f32.mrb[243].mxu1 }
 0x654   :  { %v2521_v1 = vmul.f32 %v3980_v31, %v5686_v14  ;;  %v2535_v31 = vlaneseq }
 0x655   :  { %3985 = vrsqrt.f32 %v2458_v16 }
 0x656   :  { %v2985_v5 = vpack.c.bf16 %v2521_v1, %v2520_v2  ;;  %v2387_v22 = vpop.f32.mrb[244].mxu1  ;;  %v2536_v2 = vshrl.u32 %v2535_v31, 7 }
 0x657   :  { %v2459_v3 = vmul.f32 1.0158731, %v2387_v22  ;;  %v3634_v26 = vpop.f32.mrb[245].mxu1  ;;  %v3982_v45 = vpop.eup %3981 }
 0x658   :  { %3025 = vst [vmem:[%s5970_s4 + $0x48] sm:$0xff] %v2985_v5   ;;  %v2522_v35 = vmul.f32 %v3982_v45, %v5693_v19  ;;  %v2568_v22 = vadd.s32 256, %v2536_v2 }
 0x659   :  { %3987 = vrsqrt.f32 %v2459_v3 }
 0x65a   :  { %v2392_v57 = vpop.f32.mrb[246].mxu1  ;;  %vm2601_vm2 = vcmp.lt.s32.totalorder %v2568_v22, 257 }
 0x65b   :  { %v3984_v32 = vpop.eup %3983  ;;  %v2460_v6 = vmul.f32 1.0158731, %v2392_v57  ;;  %v3637_v36 = vpop.f32.mrb[247].mxu1 }
 0x65c   :  { %v2523_v9 = vmul.f32 %v3984_v32, %v5700_v24 }
 0x65d   :  { %3989 = vrsqrt.f32 %v2460_v6 }
 0x65e   :  { %v2990_v14 = vpack.c.bf16 %v2523_v9, %v2522_v35  ;;  %v2397_v8 = vpop.f32.mrb[248].mxu1 }
 0x65f   :  { %v2461_v41 = vmul.f32 1.0158731, %v2397_v8  ;;  %v3640_v38 = vpop.f32.mrb[249].mxu1  ;;  %v3986_v0 = vpop.eup %3985 }
 0x660   :  { %3026 = vst [vmem:[%s5970_s4 + $0x50] sm:$0xff] %v2990_v14   ;;  %v2524_v13 = vmul.f32 %v3986_v0, %v5707_v29 }
 0x661   :  { %3991 = vrsqrt.f32 %v2461_v41 }
 0x662   :  { %v2402_v47 = vpop.f32.mrb[250].mxu1 }
 0x663   :  { %v3988_v62 = vpop.eup %3987  ;;  %v2462_v4 = vmul.f32 1.0158731, %v2402_v47  ;;  %v3643_v11 = vpop.f32.mrb[251].mxu1 }
 0x664   :  { %v2525_v19 = vmul.f32 %v3988_v62, %v5714_v34 }
 0x665   :  { %3993 = vrsqrt.f32 %v2462_v4 }
 0x666   :  { %v2995_v24 = vpack.c.bf16 %v2525_v19, %v2524_v13  ;;  %v2407_v18 = vpop.f32.mrb[252].mxu1 }
 0x667   :  { %v2463_v15 = vmul.f32 1.0158731, %v2407_v18  ;;  %v3646_v56 = vpop.f32.mrb[253].mxu1  ;;  %v3990_v23 = vpop.eup %3989 }
 0x668   :  { %3027 = vst [vmem:[%s5970_s4 + $0x58] sm:$0xff] %v2995_v24   ;;  %v2526_v50 = vmul.f32 %v3990_v23, %v5721_v37 }
 0x669   :  { %3995 = vrsqrt.f32 %v2463_v15 }
 0x66a   :  { %v2412_v28 = vpop.f32.mrb[254].mxu1 }
 0x66b   :  { %v3992_v17 = vpop.eup %3991  ;;  %v2464_v12 = vmul.f32 1.0158731, %v2412_v28  ;;  %v3649_v43 = vpop.f32.mrb[255].mxu1 }
 0x66c   :  { %v2527_v29 = vmul.f32 %v3992_v17, %v5728_v40 }
 0x66d   :  { %3997 = vrsqrt.f32 %v2464_v12 }
 0x66e   :  { %v3000_v34 = vpack.c.bf16 %v2527_v29, %v2526_v50  ;;  %v2417_v20 = vpop.f32.mrb[0].mxu1 }
 0x66f   :  { %v2465_v33 = vmul.f32 1.0158731, %v2417_v20  ;;  %v3652_v49 = vpop.f32.mrb[1].mxu1  ;;  %v3994_v21 = vpop.eup %3993 }
 0x670   :  { %3028 = vst [vmem:[%s5970_s4 + $0x60] sm:$0xff] %v3000_v34   ;;  %v2528_v10 = vmul.f32 %v3994_v21, %v5735_v42 }
 0x671   :  { %3999 = vrsqrt.f32 %v2465_v33 }
 0x672   :  { %v2422_v7 = vpop.f32.mrb[2].mxu1 }
 0x673   :  { %v3996_v44 = vpop.eup %3995  ;;  %v2466_v25 = vmul.f32 1.0158731, %v2422_v7  ;;  %v3655_v53 = vpop.f32.mrb[3].mxu1 }
 0x674   :  { %v2529_v37 = vmul.f32 %v3996_v44, %v5742_v46 }
 0x675   :  { %4001 = vrsqrt.f32 %v2466_v25 }
 0x676   :  { %v3005_v40 = vpack.c.bf16 %v2529_v37, %v2528_v10  ;;  %v2427_v55 = vpop.f32.mrb[4].mxu1 }
 0x677   :  { %v2467_v60 = vmul.f32 1.0158731, %v2427_v55  ;;  %v3658_v27 = vpop.f32.mrb[5].mxu1  ;;  %v3998_v30 = vpop.eup %3997 }
 0x678   :  { %3029 = vst [vmem:[%s5970_s4 + $0x68] sm:$0xff] %v3005_v40   ;;  %v2530_v42 = vmul.f32 %v3998_v30, %v5749_v48 }
 0x679   :  { %4003 = vrsqrt.f32 %v2467_v60 }
 0x67a   :  { %v2432_v39 = vpop.f32.mrb[6].mxu1 }
 0x67b   :  { %v4000_v51 = vpop.eup %3999  ;;  %v2468_v63 = vmul.f32 1.0158731, %v2432_v39  ;;  %v3661_v16 = vpop.f32.mrb[7].mxu1 }
 0x67c   :  { %v2531_v46 = vmul.f32 %v4000_v51, %v5756_v52 }
 0x67d   :  { %4005 = vrsqrt.f32 %v2468_v63 }
 0x67e   :  { %v3010_v59 = vpack.c.bf16 %v2531_v46, %v2530_v42 }
 0x67f   :  { %v4002_v1 = vpop.eup %4001 }
 0x680   :  { %3030 = vst [vmem:[%s5970_s4 + $0x70] sm:$0xff] %v3010_v59   ;;  %v2532_v3 = vmul.f32 %v4002_v1, %v5763_v54 }
 0x683   :  { %v4004_v5 = vpop.eup %4003 }
 0x684   :  { %v2533_v26 = vmul.f32 %v4004_v5, %v5770_v58 }
 0x686   :  { %v3015_v45 = vpack.c.bf16 %v2533_v26, %v2532_v3 }
 0x687   :  { %v4006_v57 = vpop.eup %4005 }
 0x688   :  { %3031 = vst [vmem:[%s5970_s4 + $0x78] sm:$0xff] %v3015_v45   ;;  %v2534_v48 = vmul.f32 %v4006_v57, %v5777_v61 }
 0x68a   :  { %v2634_v52 = vsel %vm2601_vm2, %v2534_v48, 0.0 }
 0x68b   :  { %v2936_v32 = vpack.c.bf16 %v2634_v52, %v2634_v52 }
 0x68d   :  { %2800 = vst [vmem:[%s5970_s4 + $0x80] sm:$0xf] %v2936_v32 }

// kernel: specnet_forward.3
= control target key start
LH: loop header
LB: loop body
LE: loop exit
PB: predicated region body
PF: predicated region fallthrough
CT: control target
= control target key end

     0   :  { %s7465_s18 = smov 0   ;;  %s7467_s19 = smov 0   ;;  %s9619_s0 = inlined_call_operand.vmem [shape: bf16[36,1024], index: 0, kind: input, shape index: {}]   ;;  %s9620_s1 = inlined_call_operand.vmem [shape: bf16[1024,2048], index: 1, kind: input, shape index: {}]   ;;  %s9621_s2 = inlined_call_operand.vmem [shape: f32[1,2048], index: 2, kind: input, shape index: {}]   ;;  %s9622_s3 = inlined_call_operand.vmem [shape: f32[2,36], index: 3, kind: input, shape index: {}]   ;;  %s9623_s4 = inlined_call_operand.vmem [shape: f32[2048,10], index: 4, kind: input, shape index: {}]   ;;  %s9624_s5 = inlined_call_operand.vmem [shape: f32[2,2,10], index: 5, kind: output, shape index: {}]  }
   0x1   :  { %s7469_s20 = smov 0  }
   0x2 LB: > { %s7481_s21 = sadd.s32 4294967295, %s7432_s20   ;;  %s7484_s22 = sadd.s32 1, %s7432_s20   ;;  %s7432_s20 = sphi %s7469_s20, %s9629_s20   ;;  %s7428_s19 = sphi %s7467_s19, %s9628_s19   ;;  %s7424_s18 = sphi %s7465_s18, %s9627_s18  }
   0x3   : > { %s40_s23 = ssub.s32 %s7432_s20, %s7484_s22  ;;  %s43_s24 = sadd.s32 1, %s7428_s19 }
   0x4   : > { %p41_p0 = scmp.eq.s32.totalorder %s40_s23, 0  ;;  %p50_p1 = scmp.ne.s32.totalorder %s7428_s19, %s7424_s18 }
   0x5   : > { %p51_p2 = scmp.eq.s32.totalorder %s7432_s20, 0  ;;  %p6332_p4 = scmp.ge.s32.totalorder %s7432_s20, 2 }
   0x6   : > { %s7493_s25 = scalar_select %p41_p0, %s7428_s19, %s43_s24  }
   0x7   : > { %p52_p3 = por %p51_p2, %p50_p1  ;;  %181 = sbr.rel (%p6332_p4) target bundleno = 274 (0x112), region = 24 }
   0xe   : > { %184 = sbr.rel (!%p52_p3) target bundleno = 274 (0x112), region = 28  ;;  %s186_s26 = sand.u32 (%p52_p3), 1, %s7428_s19  }
   0xf   : > { %s6892_s27 = sshll.u32 (%p52_p3), %s7432_s20, 5  ;;  %s6333_s28 = sshll.u32 (%p52_p3), %s186_s26, 12 }
  0x10   : > { %s7501_s6 = scalar_lea.vmem (%p52_p3), %s9620_s1, %s6892_s27  ;;  %s7506_s7 = scalar_lea.vmem (%p52_p3), [#allocation2], %s6333_s28 }
  0x11   : > { %v204_v0 = vld [vmem:[%s7501_s6] sm:$0xff] (%p52_p3)  ;;  %v206_v1 = vld [vmem:[%s7501_s6 + $0x8] sm:$0xff] (%p52_p3)  ;;  %v208_v2 = vld [vmem:[%s7501_s6 + $0x10] sm:$0xff] (%p52_p3) }
  0x12   : > { %205 = vst [vmem:[%s7506_s7] sm:$0xff] (%p52_p3), %v204_v0  ;;  %207 = vst [vmem:[%s7506_s7 + $0x8] sm:$0xff] (%p52_p3), %v206_v1  ;;  %v210_v3 = vld [vmem:[%s7501_s6 + $0x18] sm:$0xff] (%p52_p3)  ;;  %v212_v4 = vld [vmem:[%s7501_s6 + $0x40] sm:$0xff] (%p52_p3) }
  0x13   : > { %209 = vst [vmem:[%s7506_s7 + $0x10] sm:$0xff] (%p52_p3), %v208_v2  ;;  %v214_v5 = vld [vmem:[%s7501_s6 + $0x48] sm:$0xff] (%p52_p3)  ;;  %211 = vst [vmem:[%s7506_s7 + $0x18] sm:$0xff] (%p52_p3), %v210_v3  ;;  %v216_v6 = vld [vmem:[%s7501_s6 + $0x50] sm:$0xff] (%p52_p3) }
  0x14   : > { %213 = vst [vmem:[%s7506_s7 + $0x20] sm:$0xff] (%p52_p3), %v212_v4  ;;  %215 = vst [vmem:[%s7506_s7 + $0x28] sm:$0xff] (%p52_p3), %v214_v5  ;;  %v218_v7 = vld [vmem:[%s7501_s6 + $0x58] sm:$0xff] (%p52_p3)  ;;  %v220_v8 = vld [vmem:[%s7501_s6 + $0x80] sm:$0xff] (%p52_p3) }
  0x15   : > { %217 = vst [vmem:[%s7506_s7 + $0x30] sm:$0xff] %v216_v6  ;;  %219 = vst [vmem:[%s7506_s7 + $0x38] sm:$0xff] %v218_v7  ;;  %v222_v9 = vld [vmem:[%s7501_s6 + $0x88] sm:$0xff]  ;;  %v224_v10 = vld [vmem:[%s7501_s6 + $0x90] sm:$0xff] }
  0x16   : > { %221 = vst [vmem:[%s7506_s7 + $0x40] sm:$0xff] %v220_v8  ;;  %v226_v11 = vld [vmem:[%s7501_s6 + $0x98] sm:$0xff]  ;;  %223 = vst [vmem:[%s7506_s7 + $0x48] sm:$0xff] %v222_v9  ;;  %v228_v12 = vld [vmem:[%s7501_s6 + $0xc0] sm:$0xff] }
  0x17   : > { %225 = vst [vmem:[%s7506_s7 + $0x50] sm:$0xff] %v224_v10  ;;  %227 = vst [vmem:[%s7506_s7 + $0x58] sm:$0xff] %v226_v11  ;;  %v230_v13 = vld [vmem:[%s7501_s6 + $0xc8] sm:$0xff]  ;;  %v232_v14 = vld [vmem:[%s7501_s6 + $0xd0] sm:$0xff] }
  0x18   : > { %229 = vst [vmem:[%s7506_s7 + $0x60] sm:$0xff] %v228_v12  ;;  %231 = vst [vmem:[%s7506_s7 + $0x68] sm:$0xff] %v230_v13  ;;  %v234_v15 = vld [vmem:[%s7501_s6 + $0xd8] sm:$0xff]  ;;  %v236_v16 = vld [vmem:[%s7501_s6 + $0x100] sm:$0xff] }
  0x19   : > { %233 = vst [vmem:[%s7506_s7 + $0x70] sm:$0xff] %v232_v14  ;;  %v238_v17 = vld [vmem:[%s7501_s6 + $0x108] sm:$0xff]  ;;  %235 = vst [vmem:[%s7506_s7 + $0x78] sm:$0xff] %v234_v15  ;;  %v240_v18 = vld [vmem:[%s7501_s6 + $0x110] sm:$0xff] }
  0x1a   : > { %237 = vst [vmem:[%s7506_s7 + $0x80] sm:$0xff] %v236_v16  ;;  %239 = vst [vmem:[%s7506_s7 + $0x88] sm:$0xff] %v238_v17  ;;  %v242_v19 = vld [vmem:[%s7501_s6 + $0x118] sm:$0xff]  ;;  %v244_v20 = vld [vmem:[%s7501_s6 + $0x140] sm:$0xff] }
  0x1b   : > { %241 = vst [vmem:[%s7506_s7 + $0x90] sm:$0xff] %v240_v18  ;;  %243 = vst [vmem:[%s7506_s7 + $0x98] sm:$0xff] %v242_v19  ;;  %v246_v21 = vld [vmem:[%s7501_s6 + $0x148] sm:$0xff]  ;;  %v248_v22 = vld [vmem:[%s7501_s6 + $0x150] sm:$0xff] }
  0x1c   : > { %245 = vst [vmem:[%s7506_s7 + $0xa0] sm:$0xff] %v244_v20  ;;  %v250_v23 = vld [vmem:[%s7501_s6 + $0x158] sm:$0xff]  ;;  %247 = vst [vmem:[%s7506_s7 + $0xa8] sm:$0xff] %v246_v21  ;;  %v252_v24 = vld [vmem:[%s7501_s6 + $0x180] sm:$0xff] }
  0x1d   : > { %249 = vst [vmem:[%s7506_s7 + $0xb0] sm:$0xff] %v248_v22  ;;  %251 = vst [vmem:[%s7506_s7 + $0xb8] sm:$0xff] %v250_v23  ;;  %v254_v25 = vld [vmem:[%s7501_s6 + $0x188] sm:$0xff]  ;;  %v256_v26 = vld [vmem:[%s7501_s6 + $0x190] sm:$0xff] }
  0x1e   : > { %253 = vst [vmem:[%s7506_s7 + $0xc0] sm:$0xff] %v252_v24  ;;  %255 = vst [vmem:[%s7506_s7 + $0xc8] sm:$0xff] %v254_v25  ;;  %v258_v27 = vld [vmem:[%s7501_s6 + $0x198] sm:$0xff]  ;;  %v260_v28 = vld [vmem:[%s7501_s6 + $0x1c0] sm:$0xff] }
  0x1f   : > { %257 = vst [vmem:[%s7506_s7 + $0xd0] sm:$0xff] %v256_v26  ;;  %v262_v29 = vld [vmem:[%s7501_s6 + $0x1c8] sm:$0xff]  ;;  %259 = vst [vmem:[%s7506_s7 + $0xd8] sm:$0xff] %v258_v27  ;;  %v264_v30 = vld [vmem:[%s7501_s6 + $0x1d0] sm:$0xff] }
  0x20   : > { %261 = vst [vmem:[%s7506_s7 + $0xe0] sm:$0xff] %v260_v28  ;;  %263 = vst [vmem:[%s7506_s7 + $0xe8] sm:$0xff] %v262_v29  ;;  %v266_v31 = vld [vmem:[%s7501_s6 + $0x1d8] sm:$0xff]  ;;  %v268_v32 = vld [vmem:[%s7501_s6 + $0x200] sm:$0xff] }
  0x21   : > { %265 = vst [vmem:[%s7506_s7 + $0xf0] sm:$0xff] %v264_v30  ;;  %267 = vst [vmem:[%s7506_s7 + $0xf8] sm:$0xff] %v266_v31  ;;  %v270_v33 = vld [vmem:[%s7501_s6 + $0x208] sm:$0xff]  ;;  %v272_v34 = vld [vmem:[%s7501_s6 + $0x210] sm:$0xff] }
  0x22   : > { %269 = vst [vmem:[%s7506_s7 + $0x100] sm:$0xff] %v268_v32  ;;  %v274_v35 = vld [vmem:[%s7501_s6 + $0x218] sm:$0xff]  ;;  %271 = vst [vmem:[%s7506_s7 + $0x108] sm:$0xff] %v270_v33  ;;  %v276_v36 = vld [vmem:[%s7501_s6 + $0x240] sm:$0xff] }
  0x23   : > { %273 = vst [vmem:[%s7506_s7 + $0x110] sm:$0xff] %v272_v34  ;;  %275 = vst [vmem:[%s7506_s7 + $0x118] sm:$0xff] %v274_v35  ;;  %v278_v37 = vld [vmem:[%s7501_s6 + $0x248] sm:$0xff]  ;;  %v280_v38 = vld [vmem:[%s7501_s6 + $0x250] sm:$0xff] }
  0x24   : > { %277 = vst [vmem:[%s7506_s7 + $0x120] sm:$0xff] %v276_v36  ;;  %279 = vst [vmem:[%s7506_s7 + $0x128] sm:$0xff] %v278_v37  ;;  %v282_v39 = vld [vmem:[%s7501_s6 + $0x258] sm:$0xff]  ;;  %v284_v40 = vld [vmem:[%s7501_s6 + $0x280] sm:$0xff] }
  0x25   : > { %281 = vst [vmem:[%s7506_s7 + $0x130] sm:$0xff] %v280_v38  ;;  %v286_v41 = vld [vmem:[%s7501_s6 + $0x288] sm:$0xff]  ;;  %283 = vst [vmem:[%s7506_s7 + $0x138] sm:$0xff] %v282_v39  ;;  %v288_v42 = vld [vmem:[%s7501_s6 + $0x290] sm:$0xff] }
  0x26   : > { %285 = vst [vmem:[%s7506_s7 + $0x140] sm:$0xff] %v284_v40  ;;  %287 = vst [vmem:[%s7506_s7 + $0x148] sm:$0xff] %v286_v41  ;;  %v290_v43 = vld [vmem:[%s7501_s6 + $0x298] sm:$0xff]  ;;  %v292_v44 = vld [vmem:[%s7501_s6 + $0x2c0] sm:$0xff] }
  0x27   : > { %289 = vst [vmem:[%s7506_s7 + $0x150] sm:$0xff] %v288_v42  ;;  %291 = vst [vmem:[%s7506_s7 + $0x158] sm:$0xff] %v290_v43  ;;  %v294_v45 = vld [vmem:[%s7501_s6 + $0x2c8] sm:$0xff]  ;;  %v296_v46 = vld [vmem:[%s7501_s6 + $0x2d0] sm:$0xff] }
  0x28   : > { %293 = vst [vmem:[%s7506_s7 + $0x160] sm:$0xff] %v292_v44  ;;  %v298_v47 = vld [vmem:[%s7501_s6 + $0x2d8] sm:$0xff]  ;;  %295 = vst [vmem:[%s7506_s7 + $0x168] sm:$0xff] %v294_v45  ;;  %v300_v48 = vld [vmem:[%s7501_s6 + $0x300] sm:$0xff] }
  0x29   : > { %297 = vst [vmem:[%s7506_s7 + $0x170] sm:$0xff] %v296_v46  ;;  %299 = vst [vmem:[%s7506_s7 + $0x178] sm:$0xff] %v298_v47  ;;  %v302_v49 = vld [vmem:[%s7501_s6 + $0x308] sm:$0xff]  ;;  %v304_v50 = vld [vmem:[%s7501_s6 + $0x310] sm:$0xff] }
  0x2a   : > { %301 = vst [vmem:[%s7506_s7 + $0x180] sm:$0xff] %v300_v48  ;;  %303 = vst [vmem:[%s7506_s7 + $0x188] sm:$0xff] %v302_v49  ;;  %v306_v51 = vld [vmem:[%s7501_s6 + $0x318] sm:$0xff]  ;;  %v308_v52 = vld [vmem:[%s7501_s6 + $0x340] sm:$0xff] }
  0x2b   : > { %305 = vst [vmem:[%s7506_s7 + $0x190] sm:$0xff] %v304_v50  ;;  %v310_v53 = vld [vmem:[%s7501_s6 + $0x348] sm:$0xff]  ;;  %307 = vst [vmem:[%s7506_s7 + $0x198] sm:$0xff] %v306_v51  ;;  %v312_v54 = vld [vmem:[%s7501_s6 + $0x350] sm:$0xff] }
  0x2c   : > { %309 = vst [vmem:[%s7506_s7 + $0x1a0] sm:$0xff] %v308_v52  ;;  %311 = vst [vmem:[%s7506_s7 + $0x1a8] sm:$0xff] %v310_v53  ;;  %v314_v55 = vld [vmem:[%s7501_s6 + $0x358] sm:$0xff]  ;;  %v316_v56 = vld [vmem:[%s7501_s6 + $0x380] sm:$0xff] }
  0x2d   : > { %313 = vst [vmem:[%s7506_s7 + $0x1b0] sm:$0xff] %v312_v54  ;;  %315 = vst [vmem:[%s7506_s7 + $0x1b8] sm:$0xff] %v314_v55  ;;  %v318_v57 = vld [vmem:[%s7501_s6 + $0x388] sm:$0xff]  ;;  %v320_v58 = vld [vmem:[%s7501_s6 + $0x390] sm:$0xff] }
  0x2e   : > { %317 = vst [vmem:[%s7506_s7 + $0x1c0] sm:$0xff] %v316_v56  ;;  %v322_v59 = vld [vmem:[%s7501_s6 + $0x398] sm:$0xff]  ;;  %319 = vst [vmem:[%s7506_s7 + $0x1c8] sm:$0xff] %v318_v57  ;;  %v324_v60 = vld [vmem:[%s7501_s6 + $0x3c0] sm:$0xff] }
  0x2f   : > { %321 = vst [vmem:[%s7506_s7 + $0x1d0] sm:$0xff] %v320_v58  ;;  %323 = vst [vmem:[%s7506_s7 + $0x1d8] sm:$0xff] %v322_v59  ;;  %v326_v61 = vld [vmem:[%s7501_s6 + $0x3c8] sm:$0xff]  ;;  %v328_v62 = vld [vmem:[%s7501_s6 + $0x3d0] sm:$0xff] }
  0x30   : > { %325 = vst [vmem:[%s7506_s7 + $0x1e0] sm:$0xff] %v324_v60  ;;  %327 = vst [vmem:[%s7506_s7 + $0x1e8] sm:$0xff] %v326_v61  ;;  %v330_v63 = vld [vmem:[%s7501_s6 + $0x3d8] sm:$0xff]  ;;  %v332_v0 = vld [vmem:[%s7501_s6 + $0x400] sm:$0xff] }
  0x31   : > { %329 = vst [vmem:[%s7506_s7 + $0x1f0] sm:$0xff] %v328_v62  ;;  %v334_v1 = vld [vmem:[%s7501_s6 + $0x408] sm:$0xff]  ;;  %331 = vst [vmem:[%s7506_s7 + $0x1f8] sm:$0xff] %v330_v63  ;;  %v336_v2 = vld [vmem:[%s7501_s6 + $0x410] sm:$0xff] }
  0x32   : > { %333 = vst [vmem:[%s7506_s7 + $0x200] sm:$0xff] %v332_v0  ;;  %335 = vst [vmem:[%s7506_s7 + $0x208] sm:$0xff] %v334_v1  ;;  %v338_v3 = vld [vmem:[%s7501_s6 + $0x418] sm:$0xff]  ;;  %v340_v4 = vld [vmem:[%s7501_s6 + $0x440] sm:$0xff] }
  0x33   : > { %337 = vst [vmem:[%s7506_s7 + $0x210] sm:$0xff] %v336_v2  ;;  %339 = vst [vmem:[%s7506_s7 + $0x218] sm:$0xff] %v338_v3  ;;  %v342_v5 = vld [vmem:[%s7501_s6 + $0x448] sm:$0xff]  ;;  %v344_v6 = vld [vmem:[%s7501_s6 + $0x450] sm:$0xff] }
  0x34   : > { %341 = vst [vmem:[%s7506_s7 + $0x220] sm:$0xff] %v340_v4  ;;  %v346_v7 = vld [vmem:[%s7501_s6 + $0x458] sm:$0xff]  ;;  %343 = vst [vmem:[%s7506_s7 + $0x228] sm:$0xff] %v342_v5  ;;  %v348_v8 = vld [vmem:[%s7501_s6 + $0x480] sm:$0xff] }
  0x35   : > { %345 = vst [vmem:[%s7506_s7 + $0x230] sm:$0xff] %v344_v6  ;;  %347 = vst [vmem:[%s7506_s7 + $0x238] sm:$0xff] %v346_v7  ;;  %v350_v9 = vld [vmem:[%s7501_s6 + $0x488] sm:$0xff]  ;;  %v352_v10 = vld [vmem:[%s7501_s6 + $0x490] sm:$0xff] }
  0x36   : > { %349 = vst [vmem:[%s7506_s7 + $0x240] sm:$0xff] %v348_v8  ;;  %351 = vst [vmem:[%s7506_s7 + $0x248] sm:$0xff] %v350_v9  ;;  %v354_v11 = vld [vmem:[%s7501_s6 + $0x498] sm:$0xff]  ;;  %v356_v12 = vld [vmem:[%s7501_s6 + $0x4c0] sm:$0xff] }
  0x37   : > { %353 = vst [vmem:[%s7506_s7 + $0x250] sm:$0xff] %v352_v10  ;;  %v358_v13 = vld [vmem:[%s7501_s6 + $0x4c8] sm:$0xff]  ;;  %355 = vst [vmem:[%s7506_s7 + $0x258] sm:$0xff] %v354_v11  ;;  %v360_v14 = vld [vmem:[%s7501_s6 + $0x4d0] sm:$0xff] }
  0x38   : > { %357 = vst [vmem:[%s7506_s7 + $0x260] sm:$0xff] %v356_v12  ;;  %359 = vst [vmem:[%s7506_s7 + $0x268] sm:$0xff] %v358_v13  ;;  %v362_v15 = vld [vmem:[%s7501_s6 + $0x4d8] sm:$0xff]  ;;  %v364_v16 = vld [vmem:[%s7501_s6 + $0x500] sm:$0xff] }
  0x39   : > { %361 = vst [vmem:[%s7506_s7 + $0x270] sm:$0xff] %v360_v14  ;;  %363 = vst [vmem:[%s7506_s7 + $0x278] sm:$0xff] %v362_v15  ;;  %v366_v17 = vld [vmem:[%s7501_s6 + $0x508] sm:$0xff]  ;;  %v368_v18 = vld [vmem:[%s7501_s6 + $0x510] sm:$0xff] }
  0x3a   : > { %365 = vst [vmem:[%s7506_s7 + $0x280] sm:$0xff] %v364_v16  ;;  %v370_v19 = vld [vmem:[%s7501_s6 + $0x518] sm:$0xff]  ;;  %367 = vst [vmem:[%s7506_s7 + $0x288] sm:$0xff] %v366_v17  ;;  %v372_v20 = vld [vmem:[%s7501_s6 + $0x540] sm:$0xff] }
  0x3b   : > { %369 = vst [vmem:[%s7506_s7 + $0x290] sm:$0xff] %v368_v18  ;;  %371 = vst [vmem:[%s7506_s7 + $0x298] sm:$0xff] %v370_v19  ;;  %v374_v21 = vld [vmem:[%s7501_s6 + $0x548] sm:$0xff]  ;;  %v376_v22 = vld [vmem:[%s7501_s6 + $0x550] sm:$0xff] }
  0x3c   : > { %373 = vst [vmem:[%s7506_s7 + $0x2a0] sm:$0xff] %v372_v20  ;;  %375 = vst [vmem:[%s7506_s7 + $0x2a8] sm:$0xff] %v374_v21  ;;  %v378_v23 = vld [vmem:[%s7501_s6 + $0x558] sm:$0xff]  ;;  %v380_v24 = vld [vmem:[%s7501_s6 + $0x580] sm:$0xff] }
  0x3d   : > { %377 = vst [vmem:[%s7506_s7 + $0x2b0] sm:$0xff] %v376_v22  ;;  %v382_v25 = vld [vmem:[%s7501_s6 + $0x588] sm:$0xff]  ;;  %379 = vst [vmem:[%s7506_s7 + $0x2b8] sm:$0xff] %v378_v23  ;;  %v384_v26 = vld [vmem:[%s7501_s6 + $0x590] sm:$0xff] }
  0x3e   : > { %381 = vst [vmem:[%s7506_s7 + $0x2c0] sm:$0xff] %v380_v24  ;;  %383 = vst [vmem:[%s7506_s7 + $0x2c8] sm:$0xff] %v382_v25  ;;  %v386_v27 = vld [vmem:[%s7501_s6 + $0x598] sm:$0xff]  ;;  %v388_v28 = vld [vmem:[%s7501_s6 + $0x5c0] sm:$0xff] }
  0x3f   : > { %385 = vst [vmem:[%s7506_s7 + $0x2d0] sm:$0xff] %v384_v26  ;;  %387 = vst [vmem:[%s7506_s7 + $0x2d8] sm:$0xff] %v386_v27  ;;  %v390_v29 = vld [vmem:[%s7501_s6 + $0x5c8] sm:$0xff]  ;;  %v392_v30 = vld [vmem:[%s7501_s6 + $0x5d0] sm:$0xff] }
  0x40   : > { %389 = vst [vmem:[%s7506_s7 + $0x2e0] sm:$0xff] %v388_v28  ;;  %v394_v31 = vld [vmem:[%s7501_s6 + $0x5d8] sm:$0xff]  ;;  %391 = vst [vmem:[%s7506_s7 + $0x2e8] sm:$0xff] %v390_v29  ;;  %v396_v32 = vld [vmem:[%s7501_s6 + $0x600] sm:$0xff] }
  0x41   : > { %393 = vst [vmem:[%s7506_s7 + $0x2f0] sm:$0xff] %v392_v30  ;;  %395 = vst [vmem:[%s7506_s7 + $0x2f8] sm:$0xff] %v394_v31  ;;  %v398_v33 = vld [vmem:[%s7501_s6 + $0x608] sm:$0xff]  ;;  %v400_v34 = vld [vmem:[%s7501_s6 + $0x610] sm:$0xff] }
  0x42   : > { %397 = vst [vmem:[%s7506_s7 + $0x300] sm:$0xff] %v396_v32  ;;  %399 = vst [vmem:[%s7506_s7 + $0x308] sm:$0xff] %v398_v33  ;;  %v402_v35 = vld [vmem:[%s7501_s6 + $0x618] sm:$0xff]  ;;  %v404_v36 = vld [vmem:[%s7501_s6 + $0x640] sm:$0xff] }
  0x43   : > { %401 = vst [vmem:[%s7506_s7 + $0x310] sm:$0xff] %v400_v34  ;;  %v406_v37 = vld [vmem:[%s7501_s6 + $0x648] sm:$0xff]  ;;  %403 = vst [vmem:[%s7506_s7 + $0x318] sm:$0xff] %v402_v35  ;;  %v408_v38 = vld [vmem:[%s7501_s6 + $0x650] sm:$0xff] }
  0x44   : > { %405 = vst [vmem:[%s7506_s7 + $0x320] sm:$0xff] %v404_v36  ;;  %407 = vst [vmem:[%s7506_s7 + $0x328] sm:$0xff] %v406_v37  ;;  %v410_v39 = vld [vmem:[%s7501_s6 + $0x658] sm:$0xff]  ;;  %v412_v40 = vld [vmem:[%s7501_s6 + $0x680] sm:$0xff] }
  0x45   : > { %409 = vst [vmem:[%s7506_s7 + $0x330] sm:$0xff] %v408_v38  ;;  %411 = vst [vmem:[%s7506_s7 + $0x338] sm:$0xff] %v410_v39  ;;  %v414_v41 = vld [vmem:[%s7501_s6 + $0x688] sm:$0xff]  ;;  %v416_v42 = vld [vmem:[%s7501_s6 + $0x690] sm:$0xff] }
  0x46   : > { %413 = vst [vmem:[%s7506_s7 + $0x340] sm:$0xff] %v412_v40  ;;  %v418_v43 = vld [vmem:[%s7501_s6 + $0x698] sm:$0xff]  ;;  %415 = vst [vmem:[%s7506_s7 + $0x348] sm:$0xff] %v414_v41  ;;  %v420_v44 = vld [vmem:[%s7501_s6 + $0x6c0] sm:$0xff] }
  0x47   : > { %417 = vst [vmem:[%s7506_s7 + $0x350] sm:$0xff] %v416_v42  ;;  %419 = vst [vmem:[%s7506_s7 + $0x358] sm:$0xff] %v418_v43  ;;  %v422_v45 = vld [vmem:[%s7501_s6 + $0x6c8] sm:$0xff]  ;;  %v424_v46 = vld [vmem:[%s7501_s6 + $0x6d0] sm:$0xff] }
  0x48   : > { %421 = vst [vmem:[%s7506_s7 + $0x360] sm:$0xff] %v420_v44  ;;  %423 = vst [vmem:[%s7506_s7 + $0x368] sm:$0xff] %v422_v45  ;;  %v426_v47 = vld [vmem:[%s7501_s6 + $0x6d8] sm:$0xff]  ;;  %v428_v48 = vld [vmem:[%s7501_s6 + $0x700] sm:$0xff] }
  0x49   : > { %425 = vst [vmem:[%s7506_s7 + $0x370] sm:$0xff] %v424_v46  ;;  %v430_v49 = vld [vmem:[%s7501_s6 + $0x708] sm:$0xff]  ;;  %427 = vst [vmem:[%s7506_s7 + $0x378] sm:$0xff] %v426_v47  ;;  %v432_v50 = vld [vmem:[%s7501_s6 + $0x710] sm:$0xff] }
  0x4a   : > { %429 = vst [vmem:[%s7506_s7 + $0x380] sm:$0xff] %v428_v48  ;;  %431 = vst [vmem:[%s7506_s7 + $0x388] sm:$0xff] %v430_v49  ;;  %v434_v51 = vld [vmem:[%s7501_s6 + $0x718] sm:$0xff]  ;;  %v436_v52 = vld [vmem:[%s7501_s6 + $0x740] sm:$0xff] }
  0x4b   : > { %433 = vst [vmem:[%s7506_s7 + $0x390] sm:$0xff] %v432_v50  ;;  %435 = vst [vmem:[%s7506_s7 + $0x398] sm:$0xff] %v434_v51  ;;  %v438_v53 = vld [vmem:[%s7501_s6 + $0x748] sm:$0xff]  ;;  %v440_v54 = vld [vmem:[%s7501_s6 + $0x750] sm:$0xff] }
  0x4c   : > { %437 = vst [vmem:[%s7506_s7 + $0x3a0] sm:$0xff] %v436_v52  ;;  %v442_v55 = vld [vmem:[%s7501_s6 + $0x758] sm:$0xff]  ;;  %439 = vst [vmem:[%s7506_s7 + $0x3a8] sm:$0xff] %v438_v53  ;;  %v444_v56 = vld [vmem:[%s7501_s6 + $0x780] sm:$0xff] }
  0x4d   : > { %441 = vst [vmem:[%s7506_s7 + $0x3b0] sm:$0xff] %v440_v54  ;;  %443 = vst [vmem:[%s7506_s7 + $0x3b8] sm:$0xff] %v442_v55  ;;  %v446_v57 = vld [vmem:[%s7501_s6 + $0x788] sm:$0xff]  ;;  %v448_v58 = vld [vmem:[%s7501_s6 + $0x790] sm:$0xff] }
  0x4e   : > { %445 = vst [vmem:[%s7506_s7 + $0x3c0] sm:$0xff] %v444_v56  ;;  %447 = vst [vmem:[%s7506_s7 + $0x3c8] sm:$0xff] %v446_v57  ;;  %v450_v59 = vld [vmem:[%s7501_s6 + $0x798] sm:$0xff]  ;;  %v452_v60 = vld [vmem:[%s7501_s6 + $0x7c0] sm:$0xff] }
  0x4f   : > { %449 = vst [vmem:[%s7506_s7 + $0x3d0] sm:$0xff] %v448_v58  ;;  %v454_v61 = vld [vmem:[%s7501_s6 + $0x7c8] sm:$0xff]  ;;  %451 = vst [vmem:[%s7506_s7 + $0x3d8] sm:$0xff] %v450_v59  ;;  %v456_v62 = vld [vmem:[%s7501_s6 + $0x7d0] sm:$0xff] }
  0x50   : > { %453 = vst [vmem:[%s7506_s7 + $0x3e0] sm:$0xff] %v452_v60  ;;  %455 = vst [vmem:[%s7506_s7 + $0x3e8] sm:$0xff] %v454_v61  ;;  %v458_v63 = vld [vmem:[%s7501_s6 + $0x7d8] sm:$0xff]  ;;  %v460_v0 = vld [vmem:[%s7501_s6 + $0x800] sm:$0xff] }
  0x51   : > { %457 = vst [vmem:[%s7506_s7 + $0x3f0] sm:$0xff] %v456_v62  ;;  %459 = vst [vmem:[%s7506_s7 + $0x3f8] sm:$0xff] %v458_v63  ;;  %v462_v1 = vld [vmem:[%s7501_s6 + $0x808] sm:$0xff]  ;;  %v464_v2 = vld [vmem:[%s7501_s6 + $0x810] sm:$0xff] }
  0x52   : > { %461 = vst [vmem:[%s7506_s7 + $0x400] sm:$0xff] %v460_v0  ;;  %v466_v3 = vld [vmem:[%s7501_s6 + $0x818] sm:$0xff]  ;;  %463 = vst [vmem:[%s7506_s7 + $0x408] sm:$0xff] %v462_v1  ;;  %v468_v4 = vld [vmem:[%s7501_s6 + $0x840] sm:$0xff] }
  0x53   : > { %465 = vst [vmem:[%s7506_s7 + $0x410] sm:$0xff] %v464_v2  ;;  %467 = vst [vmem:[%s7506_s7 + $0x418] sm:$0xff] %v466_v3  ;;  %v470_v5 = vld [vmem:[%s7501_s6 + $0x848] sm:$0xff]  ;;  %v472_v6 = vld [vmem:[%s7501_s6 + $0x850] sm:$0xff] }
  0x54   : > { %469 = vst [vmem:[%s7506_s7 + $0x420] sm:$0xff] %v468_v4  ;;  %471 = vst [vmem:[%s7506_s7 + $0x428] sm:$0xff] %v470_v5  ;;  %v474_v7 = vld [vmem:[%s7501_s6 + $0x858] sm:$0xff]  ;;  %v476_v8 = vld [vmem:[%s7501_s6 + $0x880] sm:$0xff] }
  0x55   : > { %473 = vst [vmem:[%s7506_s7 + $0x430] sm:$0xff] %v472_v6  ;;  %v478_v9 = vld [vmem:[%s7501_s6 + $0x888] sm:$0xff]  ;;  %475 = vst [vmem:[%s7506_s7 + $0x438] sm:$0xff] %v474_v7  ;;  %v480_v10 = vld [vmem:[%s7501_s6 + $0x890] sm:$0xff] }
  0x56   : > { %477 = vst [vmem:[%s7506_s7 + $0x440] sm:$0xff] %v476_v8  ;;  %479 = vst [vmem:[%s7506_s7 + $0x448] sm:$0xff] %v478_v9  ;;  %v482_v11 = vld [vmem:[%s7501_s6 + $0x898] sm:$0xff]  ;;  %v484_v12 = vld [vmem:[%s7501_s6 + $0x8c0] sm:$0xff] }
  0x57   : > { %481 = vst [vmem:[%s7506_s7 + $0x450] sm:$0xff] %v480_v10  ;;  %483 = vst [vmem:[%s7506_s7 + $0x458] sm:$0xff] %v482_v11  ;;  %v486_v13 = vld [vmem:[%s7501_s6 + $0x8c8] sm:$0xff]  ;;  %v488_v14 = vld [vmem:[%s7501_s6 + $0x8d0] sm:$0xff] }
  0x58   : > { %485 = vst [vmem:[%s7506_s7 + $0x460] sm:$0xff] %v484_v12  ;;  %v490_v15 = vld [vmem:[%s7501_s6 + $0x8d8] sm:$0xff]  ;;  %487 = vst [vmem:[%s7506_s7 + $0x468] sm:$0xff] %v486_v13  ;;  %v492_v16 = vld [vmem:[%s7501_s6 + $0x900] sm:$0xff] }
  0x59   : > { %489 = vst [vmem:[%s7506_s7 + $0x470] sm:$0xff] %v488_v14  ;;  %491 = vst [vmem:[%s7506_s7 + $0x478] sm:$0xff] %v490_v15  ;;  %v494_v17 = vld [vmem:[%s7501_s6 + $0x908] sm:$0xff]  ;;  %v496_v18 = vld [vmem:[%s7501_s6 + $0x910] sm:$0xff] }
  0x5a   : > { %493 = vst [vmem:[%s7506_s7 + $0x480] sm:$0xff] %v492_v16  ;;  %495 = vst [vmem:[%s7506_s7 + $0x488] sm:$0xff] %v494_v17  ;;  %v498_v19 = vld [vmem:[%s7501_s6 + $0x918] sm:$0xff]  ;;  %v500_v20 = vld [vmem:[%s7501_s6 + $0x940] sm:$0xff] }
  0x5b   : > { %497 = vst [vmem:[%s7506_s7 + $0x490] sm:$0xff] %v496_v18  ;;  %v502_v21 = vld [vmem:[%s7501_s6 + $0x948] sm:$0xff]  ;;  %499 = vst [vmem:[%s7506_s7 + $0x498] sm:$0xff] %v498_v19  ;;  %v504_v22 = vld [vmem:[%s7501_s6 + $0x950] sm:$0xff] }
  0x5c   : > { %501 = vst [vmem:[%s7506_s7 + $0x4a0] sm:$0xff] %v500_v20  ;;  %503 = vst [vmem:[%s7506_s7 + $0x4a8] sm:$0xff] %v502_v21  ;;  %v506_v23 = vld [vmem:[%s7501_s6 + $0x958] sm:$0xff]  ;;  %v508_v24 = vld [vmem:[%s7501_s6 + $0x980] sm:$0xff] }
  0x5d   : > { %505 = vst [vmem:[%s7506_s7 + $0x4b0] sm:$0xff] %v504_v22  ;;  %507 = vst [vmem:[%s7506_s7 + $0x4b8] sm:$0xff] %v506_v23  ;;  %v510_v25 = vld [vmem:[%s7501_s6 + $0x988] sm:$0xff]  ;;  %v512_v26 = vld [vmem:[%s7501_s6 + $0x990] sm:$0xff] }
  0x5e   : > { %509 = vst [vmem:[%s7506_s7 + $0x4c0] sm:$0xff] %v508_v24  ;;  %v514_v27 = vld [vmem:[%s7501_s6 + $0x998] sm:$0xff]  ;;  %511 = vst [vmem:[%s7506_s7 + $0x4c8] sm:$0xff] %v510_v25  ;;  %v516_v28 = vld [vmem:[%s7501_s6 + $0x9c0] sm:$0xff] }
  0x5f   : > { %513 = vst [vmem:[%s7506_s7 + $0x4d0] sm:$0xff] %v512_v26  ;;  %515 = vst [vmem:[%s7506_s7 + $0x4d8] sm:$0xff] %v514_v27  ;;  %v518_v29 = vld [vmem:[%s7501_s6 + $0x9c8] sm:$0xff]  ;;  %v520_v30 = vld [vmem:[%s7501_s6 + $0x9d0] sm:$0xff] }
  0x60   : > { %517 = vst [vmem:[%s7506_s7 + $0x4e0] sm:$0xff] %v516_v28  ;;  %519 = vst [vmem:[%s7506_s7 + $0x4e8] sm:$0xff] %v518_v29  ;;  %v522_v31 = vld [vmem:[%s7501_s6 + $0x9d8] sm:$0xff]  ;;  %v524_v32 = vld [vmem:[%s7501_s6 + $0xa00] sm:$0xff] }
  0x61   : > { %521 = vst [vmem:[%s7506_s7 + $0x4f0] sm:$0xff] %v520_v30  ;;  %v526_v33 = vld [vmem:[%s7501_s6 + $0xa08] sm:$0xff]  ;;  %523 = vst [vmem:[%s7506_s7 + $0x4f8] sm:$0xff] %v522_v31  ;;  %v528_v34 = vld [vmem:[%s7501_s6 + $0xa10] sm:$0xff] }
  0x62   : > { %525 = vst [vmem:[%s7506_s7 + $0x500] sm:$0xff] %v524_v32  ;;  %527 = vst [vmem:[%s7506_s7 + $0x508] sm:$0xff] %v526_v33  ;;  %v530_v35 = vld [vmem:[%s7501_s6 + $0xa18] sm:$0xff]  ;;  %v532_v36 = vld [vmem:[%s7501_s6 + $0xa40] sm:$0xff] }
  0x63   : > { %529 = vst [vmem:[%s7506_s7 + $0x510] sm:$0xff] %v528_v34  ;;  %531 = vst [vmem:[%s7506_s7 + $0x518] sm:$0xff] %v530_v35  ;;  %v534_v37 = vld [vmem:[%s7501_s6 + $0xa48] sm:$0xff]  ;;  %v536_v38 = vld [vmem:[%s7501_s6 + $0xa50] sm:$0xff] }
  0x64   : > { %533 = vst [vmem:[%s7506_s7 + $0x520] sm:$0xff] %v532_v36  ;;  %v538_v39 = vld [vmem:[%s7501_s6 + $0xa58] sm:$0xff]  ;;  %535 = vst [vmem:[%s7506_s7 + $0x528] sm:$0xff] %v534_v37  ;;  %v540_v40 = vld [vmem:[%s7501_s6 + $0xa80] sm:$0xff] }
  0x65   : > { %537 = vst [vmem:[%s7506_s7 + $0x530] sm:$0xff] %v536_v38  ;;  %539 = vst [vmem:[%s7506_s7 + $0x538] sm:$0xff] %v538_v39  ;;  %v542_v41 = vld [vmem:[%s7501_s6 + $0xa88] sm:$0xff]  ;;  %v544_v42 = vld [vmem:[%s7501_s6 + $0xa90] sm:$0xff] }
  0x66   : > { %541 = vst [vmem:[%s7506_s7 + $0x540] sm:$0xff] %v540_v40  ;;  %543 = vst [vmem:[%s7506_s7 + $0x548] sm:$0xff] %v542_v41  ;;  %v546_v43 = vld [vmem:[%s7501_s6 + $0xa98] sm:$0xff]  ;;  %v548_v44 = vld [vmem:[%s7501_s6 + $0xac0] sm:$0xff] }
  0x67   : > { %545 = vst [vmem:[%s7506_s7 + $0x550] sm:$0xff] %v544_v42  ;;  %v550_v45 = vld [vmem:[%s7501_s6 + $0xac8] sm:$0xff]  ;;  %547 = vst [vmem:[%s7506_s7 + $0x558] sm:$0xff] %v546_v43  ;;  %v552_v46 = vld [vmem:[%s7501_s6 + $0xad0] sm:$0xff] }
  0x68   : > { %549 = vst [vmem:[%s7506_s7 + $0x560] sm:$0xff] %v548_v44  ;;  %551 = vst [vmem:[%s7506_s7 + $0x568] sm:$0xff] %v550_v45  ;;  %v554_v47 = vld [vmem:[%s7501_s6 + $0xad8] sm:$0xff]  ;;  %v556_v48 = vld [vmem:[%s7501_s6 + $0xb00] sm:$0xff] }
  0x69   : > { %553 = vst [vmem:[%s7506_s7 + $0x570] sm:$0xff] %v552_v46  ;;  %555 = vst [vmem:[%s7506_s7 + $0x578] sm:$0xff] %v554_v47  ;;  %v558_v49 = vld [vmem:[%s7501_s6 + $0xb08] sm:$0xff]  ;;  %v560_v50 = vld [vmem:[%s7501_s6 + $0xb10] sm:$0xff] }
  0x6a   : > { %557 = vst [vmem:[%s7506_s7 + $0x580] sm:$0xff] %v556_v48  ;;  %v562_v51 = vld [vmem:[%s7501_s6 + $0xb18] sm:$0xff]  ;;  %559 = vst [vmem:[%s7506_s7 + $0x588] sm:$0xff] %v558_v49  ;;  %v564_v52 = vld [vmem:[%s7501_s6 + $0xb40] sm:$0xff] }
  0x6b   : > { %561 = vst [vmem:[%s7506_s7 + $0x590] sm:$0xff] %v560_v50  ;;  %563 = vst [vmem:[%s7506_s7 + $0x598] sm:$0xff] %v562_v51  ;;  %v566_v53 = vld [vmem:[%s7501_s6 + $0xb48] sm:$0xff]  ;;  %v568_v54 = vld [vmem:[%s7501_s6 + $0xb50] sm:$0xff] }
  0x6c   : > { %565 = vst [vmem:[%s7506_s7 + $0x5a0] sm:$0xff] %v564_v52  ;;  %567 = vst [vmem:[%s7506_s7 + $0x5a8] sm:$0xff] %v566_v53  ;;  %v570_v55 = vld [vmem:[%s7501_s6 + $0xb58] sm:$0xff]  ;;  %v572_v56 = vld [vmem:[%s7501_s6 + $0xb80] sm:$0xff] }
  0x6d   : > { %569 = vst [vmem:[%s7506_s7 + $0x5b0] sm:$0xff] %v568_v54  ;;  %v574_v57 = vld [vmem:[%s7501_s6 + $0xb88] sm:$0xff]  ;;  %571 = vst [vmem:[%s7506_s7 + $0x5b8] sm:$0xff] %v570_v55  ;;  %v576_v58 = vld [vmem:[%s7501_s6 + $0xb90] sm:$0xff] }
  0x6e   : > { %573 = vst [vmem:[%s7506_s7 + $0x5c0] sm:$0xff] %v572_v56  ;;  %575 = vst [vmem:[%s7506_s7 + $0x5c8] sm:$0xff] %v574_v57  ;;  %v578_v59 = vld [vmem:[%s7501_s6 + $0xb98] sm:$0xff]  ;;  %v580_v60 = vld [vmem:[%s7501_s6 + $0xbc0] sm:$0xff] }
  0x6f   : > { %577 = vst [vmem:[%s7506_s7 + $0x5d0] sm:$0xff] %v576_v58  ;;  %579 = vst [vmem:[%s7506_s7 + $0x5d8] sm:$0xff] %v578_v59  ;;  %v582_v61 = vld [vmem:[%s7501_s6 + $0xbc8] sm:$0xff]  ;;  %v584_v62 = vld [vmem:[%s7501_s6 + $0xbd0] sm:$0xff] }
  0x70   : > { %581 = vst [vmem:[%s7506_s7 + $0x5e0] sm:$0xff] %v580_v60  ;;  %v586_v63 = vld [vmem:[%s7501_s6 + $0xbd8] sm:$0xff]  ;;  %583 = vst [vmem:[%s7506_s7 + $0x5e8] sm:$0xff] %v582_v61  ;;  %v588_v0 = vld [vmem:[%s7501_s6 + $0xc00] sm:$0xff] }
  0x71   : > { %585 = vst [vmem:[%s7506_s7 + $0x5f0] sm:$0xff] %v584_v62  ;;  %587 = vst [vmem:[%s7506_s7 + $0x5f8] sm:$0xff] %v586_v63  ;;  %v590_v1 = vld [vmem:[%s7501_s6 + $0xc08] sm:$0xff]  ;;  %v592_v2 = vld [vmem:[%s7501_s6 + $0xc10] sm:$0xff] }
  0x72   : > { %589 = vst [vmem:[%s7506_s7 + $0x600] sm:$0xff] %v588_v0  ;;  %591 = vst [vmem:[%s7506_s7 + $0x608] sm:$0xff] %v590_v1  ;;  %v594_v3 = vld [vmem:[%s7501_s6 + $0xc18] sm:$0xff]  ;;  %v596_v4 = vld [vmem:[%s7501_s6 + $0xc40] sm:$0xff] }
  0x73   : > { %593 = vst [vmem:[%s7506_s7 + $0x610] sm:$0xff] %v592_v2  ;;  %v598_v5 = vld [vmem:[%s7501_s6 + $0xc48] sm:$0xff]  ;;  %595 = vst [vmem:[%s7506_s7 + $0x618] sm:$0xff] %v594_v3  ;;  %v600_v6 = vld [vmem:[%s7501_s6 + $0xc50] sm:$0xff] }
  0x74   : > { %597 = vst [vmem:[%s7506_s7 + $0x620] sm:$0xff] %v596_v4  ;;  %599 = vst [vmem:[%s7506_s7 + $0x628] sm:$0xff] %v598_v5  ;;  %v602_v7 = vld [vmem:[%s7501_s6 + $0xc58] sm:$0xff]  ;;  %v604_v8 = vld [vmem:[%s7501_s6 + $0xc80] sm:$0xff] }
  0x75   : > { %601 = vst [vmem:[%s7506_s7 + $0x630] sm:$0xff] %v600_v6  ;;  %603 = vst [vmem:[%s7506_s7 + $0x638] sm:$0xff] %v602_v7  ;;  %v606_v9 = vld [vmem:[%s7501_s6 + $0xc88] sm:$0xff]  ;;  %v608_v10 = vld [vmem:[%s7501_s6 + $0xc90] sm:$0xff] }
  0x76   : > { %605 = vst [vmem:[%s7506_s7 + $0x640] sm:$0xff] %v604_v8  ;;  %v610_v11 = vld [vmem:[%s7501_s6 + $0xc98] sm:$0xff]  ;;  %607 = vst [vmem:[%s7506_s7 + $0x648] sm:$0xff] %v606_v9  ;;  %v612_v12 = vld [vmem:[%s7501_s6 + $0xcc0] sm:$0xff] }
  0x77   : > { %609 = vst [vmem:[%s7506_s7 + $0x650] sm:$0xff] %v608_v10  ;;  %611 = vst [vmem:[%s7506_s7 + $0x658] sm:$0xff] %v610_v11  ;;  %v614_v13 = vld [vmem:[%s7501_s6 + $0xcc8] sm:$0xff]  ;;  %v616_v14 = vld [vmem:[%s7501_s6 + $0xcd0] sm:$0xff] }
  0x78   : > { %613 = vst [vmem:[%s7506_s7 + $0x660] sm:$0xff] %v612_v12  ;;  %615 = vst [vmem:[%s7506_s7 + $0x668] sm:$0xff] %v614_v13  ;;  %v618_v15 = vld [vmem:[%s7501_s6 + $0xcd8] sm:$0xff]  ;;  %v620_v16 = vld [vmem:[%s7501_s6 + $0xd00] sm:$0xff] }
  0x79   : > { %617 = vst [vmem:[%s7506_s7 + $0x670] sm:$0xff] %v616_v14  ;;  %v622_v17 = vld [vmem:[%s7501_s6 + $0xd08] sm:$0xff]  ;;  %619 = vst [vmem:[%s7506_s7 + $0x678] sm:$0xff] %v618_v15  ;;  %v624_v18 = vld [vmem:[%s7501_s6 + $0xd10] sm:$0xff] }
  0x7a   : > { %621 = vst [vmem:[%s7506_s7 + $0x680] sm:$0xff] %v620_v16  ;;  %623 = vst [vmem:[%s7506_s7 + $0x688] sm:$0xff] %v622_v17  ;;  %v626_v19 = vld [vmem:[%s7501_s6 + $0xd18] sm:$0xff]  ;;  %v628_v20 = vld [vmem:[%s7501_s6 + $0xd40] sm:$0xff] }
  0x7b   : > { %625 = vst [vmem:[%s7506_s7 + $0x690] sm:$0xff] %v624_v18  ;;  %627 = vst [vmem:[%s7506_s7 + $0x698] sm:$0xff] %v626_v19  ;;  %v630_v21 = vld [vmem:[%s7501_s6 + $0xd48] sm:$0xff]  ;;  %v632_v22 = vld [vmem:[%s7501_s6 + $0xd50] sm:$0xff] }
  0x7c   : > { %629 = vst [vmem:[%s7506_s7 + $0x6a0] sm:$0xff] %v628_v20  ;;  %v634_v23 = vld [vmem:[%s7501_s6 + $0xd58] sm:$0xff]  ;;  %631 = vst [vmem:[%s7506_s7 + $0x6a8] sm:$0xff] %v630_v21  ;;  %v636_v24 = vld [vmem:[%s7501_s6 + $0xd80] sm:$0xff] }
  0x7d   : > { %633 = vst [vmem:[%s7506_s7 + $0x6b0] sm:$0xff] %v632_v22  ;;  %635 = vst [vmem:[%s7506_s7 + $0x6b8] sm:$0xff] %v634_v23  ;;  %v638_v25 = vld [vmem:[%s7501_s6 + $0xd88] sm:$0xff]  ;;  %v640_v26 = vld [vmem:[%s7501_s6 + $0xd90] sm:$0xff] }
  0x7e   : > { %637 = vst [vmem:[%s7506_s7 + $0x6c0] sm:$0xff] %v636_v24  ;;  %639 = vst [vmem:[%s7506_s7 + $0x6c8] sm:$0xff] %v638_v25  ;;  %v642_v27 = vld [vmem:[%s7501_s6 + $0xd98] sm:$0xff]  ;;  %v644_v28 = vld [vmem:[%s7501_s6 + $0xdc0] sm:$0xff] }
  0x7f   : > { %641 = vst [vmem:[%s7506_s7 + $0x6d0] sm:$0xff] %v640_v26  ;;  %v646_v29 = vld [vmem:[%s7501_s6 + $0xdc8] sm:$0xff]  ;;  %643 = vst [vmem:[%s7506_s7 + $0x6d8] sm:$0xff] %v642_v27  ;;  %v648_v30 = vld [vmem:[%s7501_s6 + $0xdd0] sm:$0xff] }
  0x80   : > { %645 = vst [vmem:[%s7506_s7 + $0x6e0] sm:$0xff] %v644_v28  ;;  %647 = vst [vmem:[%s7506_s7 + $0x6e8] sm:$0xff] %v646_v29  ;;  %v650_v31 = vld [vmem:[%s7501_s6 + $0xdd8] sm:$0xff]  ;;  %v652_v32 = vld [vmem:[%s7501_s6 + $0xe00] sm:$0xff] }
  0x81   : > { %649 = vst [vmem:[%s7506_s7 + $0x6f0] sm:$0xff] %v648_v30  ;;  %651 = vst [vmem:[%s7506_s7 + $0x6f8] sm:$0xff] %v650_v31  ;;  %v654_v33 = vld [vmem:[%s7501_s6 + $0xe08] sm:$0xff]  ;;  %v656_v34 = vld [vmem:[%s7501_s6 + $0xe10] sm:$0xff] }
  0x82   : > { %653 = vst [vmem:[%s7506_s7 + $0x700] sm:$0xff] %v652_v32  ;;  %v658_v35 = vld [vmem:[%s7501_s6 + $0xe18] sm:$0xff]  ;;  %655 = vst [vmem:[%s7506_s7 + $0x708] sm:$0xff] %v654_v33  ;;  %v660_v36 = vld [vmem:[%s7501_s6 + $0xe40] sm:$0xff] }
  0x83   : > { %657 = vst [vmem:[%s7506_s7 + $0x710] sm:$0xff] %v656_v34  ;;  %659 = vst [vmem:[%s7506_s7 + $0x718] sm:$0xff] %v658_v35  ;;  %v662_v37 = vld [vmem:[%s7501_s6 + $0xe48] sm:$0xff]  ;;  %v664_v38 = vld [vmem:[%s7501_s6 + $0xe50] sm:$0xff] }
  0x84   : > { %661 = vst [vmem:[%s7506_s7 + $0x720] sm:$0xff] %v660_v36  ;;  %663 = vst [vmem:[%s7506_s7 + $0x728] sm:$0xff] %v662_v37  ;;  %v666_v39 = vld [vmem:[%s7501_s6 + $0xe58] sm:$0xff]  ;;  %v668_v40 = vld [vmem:[%s7501_s6 + $0xe80] sm:$0xff] }
  0x85   : > { %665 = vst [vmem:[%s7506_s7 + $0x730] sm:$0xff] %v664_v38  ;;  %v670_v41 = vld [vmem:[%s7501_s6 + $0xe88] sm:$0xff]  ;;  %667 = vst [vmem:[%s7506_s7 + $0x738] sm:$0xff] %v666_v39  ;;  %v672_v42 = vld [vmem:[%s7501_s6 + $0xe90] sm:$0xff] }
  0x86   : > { %669 = vst [vmem:[%s7506_s7 + $0x740] sm:$0xff] %v668_v40  ;;  %671 = vst [vmem:[%s7506_s7 + $0x748] sm:$0xff] %v670_v41  ;;  %v674_v43 = vld [vmem:[%s7501_s6 + $0xe98] sm:$0xff]  ;;  %v676_v44 = vld [vmem:[%s7501_s6 + $0xec0] sm:$0xff] }
  0x87   : > { %673 = vst [vmem:[%s7506_s7 + $0x750] sm:$0xff] %v672_v42  ;;  %675 = vst [vmem:[%s7506_s7 + $0x758] sm:$0xff] %v674_v43  ;;  %v678_v45 = vld [vmem:[%s7501_s6 + $0xec8] sm:$0xff]  ;;  %v680_v46 = vld [vmem:[%s7501_s6 + $0xed0] sm:$0xff] }
  0x88   : > { %677 = vst [vmem:[%s7506_s7 + $0x760] sm:$0xff] %v676_v44  ;;  %v682_v47 = vld [vmem:[%s7501_s6 + $0xed8] sm:$0xff]  ;;  %679 = vst [vmem:[%s7506_s7 + $0x768] sm:$0xff] %v678_v45  ;;  %v684_v48 = vld [vmem:[%s7501_s6 + $0xf00] sm:$0xff] }
  0x89   : > { %681 = vst [vmem:[%s7506_s7 + $0x770] sm:$0xff] %v680_v46  ;;  %683 = vst [vmem:[%s7506_s7 + $0x778] sm:$0xff] %v682_v47  ;;  %v686_v49 = vld [vmem:[%s7501_s6 + $0xf08] sm:$0xff]  ;;  %v688_v50 = vld [vmem:[%s7501_s6 + $0xf10] sm:$0xff] }
  0x8a   : > { %685 = vst [vmem:[%s7506_s7 + $0x780] sm:$0xff] %v684_v48  ;;  %687 = vst [vmem:[%s7506_s7 + $0x788] sm:$0xff] %v686_v49  ;;  %v690_v51 = vld [vmem:[%s7501_s6 + $0xf18] sm:$0xff]  ;;  %v692_v52 = vld [vmem:[%s7501_s6 + $0xf40] sm:$0xff] }
  0x8b   : > { %689 = vst [vmem:[%s7506_s7 + $0x790] sm:$0xff] %v688_v50  ;;  %v694_v53 = vld [vmem:[%s7501_s6 + $0xf48] sm:$0xff]  ;;  %691 = vst [vmem:[%s7506_s7 + $0x798] sm:$0xff] %v690_v51  ;;  %v696_v54 = vld [vmem:[%s7501_s6 + $0xf50] sm:$0xff] }
  0x8c   : > { %693 = vst [vmem:[%s7506_s7 + $0x7a0] sm:$0xff] %v692_v52  ;;  %695 = vst [vmem:[%s7506_s7 + $0x7a8] sm:$0xff] %v694_v53  ;;  %v698_v55 = vld [vmem:[%s7501_s6 + $0xf58] sm:$0xff]  ;;  %v700_v56 = vld [vmem:[%s7501_s6 + $0xf80] sm:$0xff] }
  0x8d   : > { %697 = vst [vmem:[%s7506_s7 + $0x7b0] sm:$0xff] %v696_v54  ;;  %699 = vst [vmem:[%s7506_s7 + $0x7b8] sm:$0xff] %v698_v55  ;;  %v702_v57 = vld [vmem:[%s7501_s6 + $0xf88] sm:$0xff]  ;;  %v704_v58 = vld [vmem:[%s7501_s6 + $0xf90] sm:$0xff] }
  0x8e   : > { %701 = vst [vmem:[%s7506_s7 + $0x7c0] sm:$0xff] %v700_v56  ;;  %v706_v59 = vld [vmem:[%s7501_s6 + $0xf98] sm:$0xff]  ;;  %703 = vst [vmem:[%s7506_s7 + $0x7c8] sm:$0xff] %v702_v57  ;;  %v708_v60 = vld [vmem:[%s7501_s6 + $0xfc0] sm:$0xff] }
  0x8f   : > { %705 = vst [vmem:[%s7506_s7 + $0x7d0] sm:$0xff] %v704_v58  ;;  %707 = vst [vmem:[%s7506_s7 + $0x7d8] sm:$0xff] %v706_v59  ;;  %v710_v61 = vld [vmem:[%s7501_s6 + $0xfc8] sm:$0xff]  ;;  %v712_v62 = vld [vmem:[%s7501_s6 + $0xfd0] sm:$0xff] }
  0x90   : > { %709 = vst [vmem:[%s7506_s7 + $0x7e0] sm:$0xff] %v708_v60  ;;  %711 = vst [vmem:[%s7506_s7 + $0x7e8] sm:$0xff] %v710_v61  ;;  %v714_v63 = vld [vmem:[%s7501_s6 + $0xfd8] sm:$0xff]  ;;  %v716_v0 = vld [vmem:[%s7501_s6 + $0x1000] sm:$0xff] }
  0x91   : > { %713 = vst [vmem:[%s7506_s7 + $0x7f0] sm:$0xff] %v712_v62  ;;  %v718_v1 = vld [vmem:[%s7501_s6 + $0x1008] sm:$0xff]  ;;  %715 = vst [vmem:[%s7506_s7 + $0x7f8] sm:$0xff] %v714_v63  ;;  %v720_v2 = vld [vmem:[%s7501_s6 + $0x1010] sm:$0xff] }
  0x92   : > { %717 = vst [vmem:[%s7506_s7 + $0x800] sm:$0xff] %v716_v0  ;;  %719 = vst [vmem:[%s7506_s7 + $0x808] sm:$0xff] %v718_v1  ;;  %v722_v3 = vld [vmem:[%s7501_s6 + $0x1018] sm:$0xff]  ;;  %v724_v4 = vld [vmem:[%s7501_s6 + $0x1040] sm:$0xff] }
  0x93   : > { %721 = vst [vmem:[%s7506_s7 + $0x810] sm:$0xff] %v720_v2  ;;  %723 = vst [vmem:[%s7506_s7 + $0x818] sm:$0xff] %v722_v3  ;;  %v726_v5 = vld [vmem:[%s7501_s6 + $0x1048] sm:$0xff]  ;;  %v728_v6 = vld [vmem:[%s7501_s6 + $0x1050] sm:$0xff] }
  0x94   : > { %725 = vst [vmem:[%s7506_s7 + $0x820] sm:$0xff] %v724_v4  ;;  %v730_v7 = vld [vmem:[%s7501_s6 + $0x1058] sm:$0xff]  ;;  %727 = vst [vmem:[%s7506_s7 + $0x828] sm:$0xff] %v726_v5  ;;  %v732_v8 = vld [vmem:[%s7501_s6 + $0x1080] sm:$0xff] }
  0x95   : > { %729 = vst [vmem:[%s7506_s7 + $0x830] sm:$0xff] %v728_v6  ;;  %731 = vst [vmem:[%s7506_s7 + $0x838] sm:$0xff] %v730_v7  ;;  %v734_v9 = vld [vmem:[%s7501_s6 + $0x1088] sm:$0xff]  ;;  %v736_v10 = vld [vmem:[%s7501_s6 + $0x1090] sm:$0xff] }
  0x96   : > { %733 = vst [vmem:[%s7506_s7 + $0x840] sm:$0xff] %v732_v8  ;;  %735 = vst [vmem:[%s7506_s7 + $0x848] sm:$0xff] %v734_v9  ;;  %v738_v11 = vld [vmem:[%s7501_s6 + $0x1098] sm:$0xff]  ;;  %v740_v12 = vld [vmem:[%s7501_s6 + $0x10c0] sm:$0xff] }
  0x97   : > { %737 = vst [vmem:[%s7506_s7 + $0x850] sm:$0xff] %v736_v10  ;;  %v742_v13 = vld [vmem:[%s7501_s6 + $0x10c8] sm:$0xff]  ;;  %739 = vst [vmem:[%s7506_s7 + $0x858] sm:$0xff] %v738_v11  ;;  %v744_v14 = vld [vmem:[%s7501_s6 + $0x10d0] sm:$0xff] }
  0x98   : > { %741 = vst [vmem:[%s7506_s7 + $0x860] sm:$0xff] %v740_v12  ;;  %743 = vst [vmem:[%s7506_s7 + $0x868] sm:$0xff] %v742_v13  ;;  %v746_v15 = vld [vmem:[%s7501_s6 + $0x10d8] sm:$0xff]  ;;  %v748_v16 = vld [vmem:[%s7501_s6 + $0x1100] sm:$0xff] }
  0x99   : > { %745 = vst [vmem:[%s7506_s7 + $0x870] sm:$0xff] %v744_v14  ;;  %747 = vst [vmem:[%s7506_s7 + $0x878] sm:$0xff] %v746_v15  ;;  %v750_v17 = vld [vmem:[%s7501_s6 + $0x1108] sm:$0xff]  ;;  %v752_v18 = vld [vmem:[%s7501_s6 + $0x1110] sm:$0xff] }
  0x9a   : > { %749 = vst [vmem:[%s7506_s7 + $0x880] sm:$0xff] %v748_v16  ;;  %v754_v19 = vld [vmem:[%s7501_s6 + $0x1118] sm:$0xff]  ;;  %751 = vst [vmem:[%s7506_s7 + $0x888] sm:$0xff] %v750_v17  ;;  %v756_v20 = vld [vmem:[%s7501_s6 + $0x1140] sm:$0xff] }
  0x9b   : > { %753 = vst [vmem:[%s7506_s7 + $0x890] sm:$0xff] %v752_v18  ;;  %755 = vst [vmem:[%s7506_s7 + $0x898] sm:$0xff] %v754_v19  ;;  %v758_v21 = vld [vmem:[%s7501_s6 + $0x1148] sm:$0xff]  ;;  %v760_v22 = vld [vmem:[%s7501_s6 + $0x1150] sm:$0xff] }
  0x9c   : > { %757 = vst [vmem:[%s7506_s7 + $0x8a0] sm:$0xff] %v756_v20  ;;  %759 = vst [vmem:[%s7506_s7 + $0x8a8] sm:$0xff] %v758_v21  ;;  %v762_v23 = vld [vmem:[%s7501_s6 + $0x1158] sm:$0xff]  ;;  %v764_v24 = vld [vmem:[%s7501_s6 + $0x1180] sm:$0xff] }
  0x9d   : > { %761 = vst [vmem:[%s7506_s7 + $0x8b0] sm:$0xff] %v760_v22  ;;  %v766_v25 = vld [vmem:[%s7501_s6 + $0x1188] sm:$0xff]  ;;  %763 = vst [vmem:[%s7506_s7 + $0x8b8] sm:$0xff] %v762_v23  ;;  %v768_v26 = vld [vmem:[%s7501_s6 + $0x1190] sm:$0xff] }
  0x9e   : > { %765 = vst [vmem:[%s7506_s7 + $0x8c0] sm:$0xff] %v764_v24  ;;  %767 = vst [vmem:[%s7506_s7 + $0x8c8] sm:$0xff] %v766_v25  ;;  %v770_v27 = vld [vmem:[%s7501_s6 + $0x1198] sm:$0xff]  ;;  %v772_v28 = vld [vmem:[%s7501_s6 + $0x11c0] sm:$0xff] }
  0x9f   : > { %769 = vst [vmem:[%s7506_s7 + $0x8d0] sm:$0xff] %v768_v26  ;;  %771 = vst [vmem:[%s7506_s7 + $0x8d8] sm:$0xff] %v770_v27  ;;  %v774_v29 = vld [vmem:[%s7501_s6 + $0x11c8] sm:$0xff]  ;;  %v776_v30 = vld [vmem:[%s7501_s6 + $0x11d0] sm:$0xff] }
  0xa0   : > { %773 = vst [vmem:[%s7506_s7 + $0x8e0] sm:$0xff] %v772_v28  ;;  %v778_v31 = vld [vmem:[%s7501_s6 + $0x11d8] sm:$0xff]  ;;  %775 = vst [vmem:[%s7506_s7 + $0x8e8] sm:$0xff] %v774_v29  ;;  %v780_v32 = vld [vmem:[%s7501_s6 + $0x1200] sm:$0xff] }
  0xa1   : > { %777 = vst [vmem:[%s7506_s7 + $0x8f0] sm:$0xff] %v776_v30  ;;  %779 = vst [vmem:[%s7506_s7 + $0x8f8] sm:$0xff] %v778_v31  ;;  %v782_v33 = vld [vmem:[%s7501_s6 + $0x1208] sm:$0xff]  ;;  %v784_v34 = vld [vmem:[%s7501_s6 + $0x1210] sm:$0xff] }
  0xa2   : > { %781 = vst [vmem:[%s7506_s7 + $0x900] sm:$0xff] %v780_v32  ;;  %783 = vst [vmem:[%s7506_s7 + $0x908] sm:$0xff] %v782_v33  ;;  %v786_v35 = vld [vmem:[%s7501_s6 + $0x1218] sm:$0xff]  ;;  %v788_v36 = vld [vmem:[%s7501_s6 + $0x1240] sm:$0xff] }
  0xa3   : > { %785 = vst [vmem:[%s7506_s7 + $0x910] sm:$0xff] %v784_v34  ;;  %v790_v37 = vld [vmem:[%s7501_s6 + $0x1248] sm:$0xff]  ;;  %787 = vst [vmem:[%s7506_s7 + $0x918] sm:$0xff] %v786_v35  ;;  %v792_v38 = vld [vmem:[%s7501_s6 + $0x1250] sm:$0xff] }
  0xa4   : > { %789 = vst [vmem:[%s7506_s7 + $0x920] sm:$0xff] %v788_v36  ;;  %791 = vst [vmem:[%s7506_s7 + $0x928] sm:$0xff] %v790_v37  ;;  %v794_v39 = vld [vmem:[%s7501_s6 + $0x1258] sm:$0xff]  ;;  %v796_v40 = vld [vmem:[%s7501_s6 + $0x1280] sm:$0xff] }
  0xa5   : > { %793 = vst [vmem:[%s7506_s7 + $0x930] sm:$0xff] %v792_v38  ;;  %795 = vst [vmem:[%s7506_s7 + $0x938] sm:$0xff] %v794_v39  ;;  %v798_v41 = vld [vmem:[%s7501_s6 + $0x1288] sm:$0xff]  ;;  %v800_v42 = vld [vmem:[%s7501_s6 + $0x1290] sm:$0xff] }
  0xa6   : > { %797 = vst [vmem:[%s7506_s7 + $0x940] sm:$0xff] %v796_v40  ;;  %v802_v43 = vld [vmem:[%s7501_s6 + $0x1298] sm:$0xff]  ;;  %799 = vst [vmem:[%s7506_s7 + $0x948] sm:$0xff] %v798_v41  ;;  %v804_v44 = vld [vmem:[%s7501_s6 + $0x12c0] sm:$0xff] }
  0xa7   : > { %801 = vst [vmem:[%s7506_s7 + $0x950] sm:$0xff] %v800_v42  ;;  %803 = vst [vmem:[%s7506_s7 + $0x958] sm:$0xff] %v802_v43  ;;  %v806_v45 = vld [vmem:[%s7501_s6 + $0x12c8] sm:$0xff]  ;;  %v808_v46 = vld [vmem:[%s7501_s6 + $0x12d0] sm:$0xff] }
  0xa8   : > { %805 = vst [vmem:[%s7506_s7 + $0x960] sm:$0xff] %v804_v44  ;;  %807 = vst [vmem:[%s7506_s7 + $0x968] sm:$0xff] %v806_v45  ;;  %v810_v47 = vld [vmem:[%s7501_s6 + $0x12d8] sm:$0xff]  ;;  %v812_v48 = vld [vmem:[%s7501_s6 + $0x1300] sm:$0xff] }
  0xa9   : > { %809 = vst [vmem:[%s7506_s7 + $0x970] sm:$0xff] %v808_v46  ;;  %v814_v49 = vld [vmem:[%s7501_s6 + $0x1308] sm:$0xff]  ;;  %811 = vst [vmem:[%s7506_s7 + $0x978] sm:$0xff] %v810_v47  ;;  %v816_v50 = vld [vmem:[%s7501_s6 + $0x1310] sm:$0xff] }
  0xaa   : > { %813 = vst [vmem:[%s7506_s7 + $0x980] sm:$0xff] %v812_v48  ;;  %815 = vst [vmem:[%s7506_s7 + $0x988] sm:$0xff] %v814_v49  ;;  %v818_v51 = vld [vmem:[%s7501_s6 + $0x1318] sm:$0xff]  ;;  %v820_v52 = vld [vmem:[%s7501_s6 + $0x1340] sm:$0xff] }
  0xab   : > { %817 = vst [vmem:[%s7506_s7 + $0x990] sm:$0xff] %v816_v50  ;;  %819 = vst [vmem:[%s7506_s7 + $0x998] sm:$0xff] %v818_v51  ;;  %v822_v53 = vld [vmem:[%s7501_s6 + $0x1348] sm:$0xff]  ;;  %v824_v54 = vld [vmem:[%s7501_s6 + $0x1350] sm:$0xff] }
  0xac   : > { %821 = vst [vmem:[%s7506_s7 + $0x9a0] sm:$0xff] %v820_v52  ;;  %v826_v55 = vld [vmem:[%s7501_s6 + $0x1358] sm:$0xff]  ;;  %823 = vst [vmem:[%s7506_s7 + $0x9a8] sm:$0xff] %v822_v53  ;;  %v828_v56 = vld [vmem:[%s7501_s6 + $0x1380] sm:$0xff] }
  0xad   : > { %825 = vst [vmem:[%s7506_s7 + $0x9b0] sm:$0xff] %v824_v54  ;;  %827 = vst [vmem:[%s7506_s7 + $0x9b8] sm:$0xff] %v826_v55  ;;  %v830_v57 = vld [vmem:[%s7501_s6 + $0x1388] sm:$0xff]  ;;  %v832_v58 = vld [vmem:[%s7501_s6 + $0x1390] sm:$0xff] }
  0xae   : > { %829 = vst [vmem:[%s7506_s7 + $0x9c0] sm:$0xff] %v828_v56  ;;  %831 = vst [vmem:[%s7506_s7 + $0x9c8] sm:$0xff] %v830_v57  ;;  %v834_v59 = vld [vmem:[%s7501_s6 + $0x1398] sm:$0xff]  ;;  %v836_v60 = vld [vmem:[%s7501_s6 + $0x13c0] sm:$0xff] }
  0xaf   : > { %833 = vst [vmem:[%s7506_s7 + $0x9d0] sm:$0xff] %v832_v58  ;;  %v838_v61 = vld [vmem:[%s7501_s6 + $0x13c8] sm:$0xff]  ;;  %835 = vst [vmem:[%s7506_s7 + $0x9d8] sm:$0xff] %v834_v59  ;;  %v840_v62 = vld [vmem:[%s7501_s6 + $0x13d0] sm:$0xff] }
  0xb0   : > { %837 = vst [vmem:[%s7506_s7 + $0x9e0] sm:$0xff] %v836_v60  ;;  %839 = vst [vmem:[%s7506_s7 + $0x9e8] sm:$0xff] %v838_v61  ;;  %v842_v63 = vld [vmem:[%s7501_s6 + $0x13d8] sm:$0xff]  ;;  %v844_v0 = vld [vmem:[%s7501_s6 + $0x1400] sm:$0xff] }
  0xb1   : > { %841 = vst [vmem:[%s7506_s7 + $0x9f0] sm:$0xff] %v840_v62  ;;  %843 = vst [vmem:[%s7506_s7 + $0x9f8] sm:$0xff] %v842_v63  ;;  %v846_v1 = vld [vmem:[%s7501_s6 + $0x1408] sm:$0xff]  ;;  %v848_v2 = vld [vmem:[%s7501_s6 + $0x1410] sm:$0xff] }
  0xb2   : > { %845 = vst [vmem:[%s7506_s7 + $0xa00] sm:$0xff] %v844_v0  ;;  %v850_v3 = vld [vmem:[%s7501_s6 + $0x1418] sm:$0xff]  ;;  %847 = vst [vmem:[%s7506_s7 + $0xa08] sm:$0xff] %v846_v1  ;;  %v852_v4 = vld [vmem:[%s7501_s6 + $0x1440] sm:$0xff] }
  0xb3   : > { %849 = vst [vmem:[%s7506_s7 + $0xa10] sm:$0xff] %v848_v2  ;;  %851 = vst [vmem:[%s7506_s7 + $0xa18] sm:$0xff] %v850_v3  ;;  %v854_v5 = vld [vmem:[%s7501_s6 + $0x1448] sm:$0xff]  ;;  %v856_v6 = vld [vmem:[%s7501_s6 + $0x1450] sm:$0xff] }
  0xb4   : > { %853 = vst [vmem:[%s7506_s7 + $0xa20] sm:$0xff] %v852_v4  ;;  %855 = vst [vmem:[%s7506_s7 + $0xa28] sm:$0xff] %v854_v5  ;;  %v858_v7 = vld [vmem:[%s7501_s6 + $0x1458] sm:$0xff]  ;;  %v860_v8 = vld [vmem:[%s7501_s6 + $0x1480] sm:$0xff] }
  0xb5   : > { %857 = vst [vmem:[%s7506_s7 + $0xa30] sm:$0xff] %v856_v6  ;;  %v862_v9 = vld [vmem:[%s7501_s6 + $0x1488] sm:$0xff]  ;;  %859 = vst [vmem:[%s7506_s7 + $0xa38] sm:$0xff] %v858_v7  ;;  %v864_v10 = vld [vmem:[%s7501_s6 + $0x1490] sm:$0xff] }
  0xb6   : > { %861 = vst [vmem:[%s7506_s7 + $0xa40] sm:$0xff] %v860_v8  ;;  %863 = vst [vmem:[%s7506_s7 + $0xa48] sm:$0xff] %v862_v9  ;;  %v866_v11 = vld [vmem:[%s7501_s6 + $0x1498] sm:$0xff]  ;;  %v868_v12 = vld [vmem:[%s7501_s6 + $0x14c0] sm:$0xff] }
  0xb7   : > { %865 = vst [vmem:[%s7506_s7 + $0xa50] sm:$0xff] %v864_v10  ;;  %867 = vst [vmem:[%s7506_s7 + $0xa58] sm:$0xff] %v866_v11  ;;  %v870_v13 = vld [vmem:[%s7501_s6 + $0x14c8] sm:$0xff]  ;;  %v872_v14 = vld [vmem:[%s7501_s6 + $0x14d0] sm:$0xff] }
  0xb8   : > { %869 = vst [vmem:[%s7506_s7 + $0xa60] sm:$0xff] %v868_v12  ;;  %v874_v15 = vld [vmem:[%s7501_s6 + $0x14d8] sm:$0xff]  ;;  %871 = vst [vmem:[%s7506_s7 + $0xa68] sm:$0xff] %v870_v13  ;;  %v876_v16 = vld [vmem:[%s7501_s6 + $0x1500] sm:$0xff] }
  0xb9   : > { %873 = vst [vmem:[%s7506_s7 + $0xa70] sm:$0xff] %v872_v14  ;;  %875 = vst [vmem:[%s7506_s7 + $0xa78] sm:$0xff] %v874_v15  ;;  %v878_v17 = vld [vmem:[%s7501_s6 + $0x1508] sm:$0xff]  ;;  %v880_v18 = vld [vmem:[%s7501_s6 + $0x1510] sm:$0xff] }
  0xba   : > { %877 = vst [vmem:[%s7506_s7 + $0xa80] sm:$0xff] %v876_v16  ;;  %879 = vst [vmem:[%s7506_s7 + $0xa88] sm:$0xff] %v878_v17  ;;  %v882_v19 = vld [vmem:[%s7501_s6 + $0x1518] sm:$0xff]  ;;  %v884_v20 = vld [vmem:[%s7501_s6 + $0x1540] sm:$0xff] }
  0xbb   : > { %881 = vst [vmem:[%s7506_s7 + $0xa90] sm:$0xff] %v880_v18  ;;  %v886_v21 = vld [vmem:[%s7501_s6 + $0x1548] sm:$0xff]  ;;  %883 = vst [vmem:[%s7506_s7 + $0xa98] sm:$0xff] %v882_v19  ;;  %v888_v22 = vld [vmem:[%s7501_s6 + $0x1550] sm:$0xff] }
  0xbc   : > { %885 = vst [vmem:[%s7506_s7 + $0xaa0] sm:$0xff] %v884_v20  ;;  %887 = vst [vmem:[%s7506_s7 + $0xaa8] sm:$0xff] %v886_v21  ;;  %v890_v23 = vld [vmem:[%s7501_s6 + $0x1558] sm:$0xff]  ;;  %v892_v24 = vld [vmem:[%s7501_s6 + $0x1580] sm:$0xff] }
  0xbd   : > { %889 = vst [vmem:[%s7506_s7 + $0xab0] sm:$0xff] %v888_v22  ;;  %891 = vst [vmem:[%s7506_s7 + $0xab8] sm:$0xff] %v890_v23  ;;  %v894_v25 = vld [vmem:[%s7501_s6 + $0x1588] sm:$0xff]  ;;  %v896_v26 = vld [vmem:[%s7501_s6 + $0x1590] sm:$0xff] }
  0xbe   : > { %893 = vst [vmem:[%s7506_s7 + $0xac0] sm:$0xff] %v892_v24  ;;  %v898_v27 = vld [vmem:[%s7501_s6 + $0x1598] sm:$0xff]  ;;  %895 = vst [vmem:[%s7506_s7 + $0xac8] sm:$0xff] %v894_v25  ;;  %v900_v28 = vld [vmem:[%s7501_s6 + $0x15c0] sm:$0xff] }
  0xbf   : > { %897 = vst [vmem:[%s7506_s7 + $0xad0] sm:$0xff] %v896_v26  ;;  %899 = vst [vmem:[%s7506_s7 + $0xad8] sm:$0xff] %v898_v27  ;;  %v902_v29 = vld [vmem:[%s7501_s6 + $0x15c8] sm:$0xff]  ;;  %v904_v30 = vld [vmem:[%s7501_s6 + $0x15d0] sm:$0xff] }
  0xc0   : > { %901 = vst [vmem:[%s7506_s7 + $0xae0] sm:$0xff] %v900_v28  ;;  %903 = vst [vmem:[%s7506_s7 + $0xae8] sm:$0xff] %v902_v29  ;;  %v906_v31 = vld [vmem:[%s7501_s6 + $0x15d8] sm:$0xff]  ;;  %v908_v32 = vld [vmem:[%s7501_s6 + $0x1600] sm:$0xff] }
  0xc1   : > { %905 = vst [vmem:[%s7506_s7 + $0xaf0] sm:$0xff] %v904_v30  ;;  %v910_v33 = vld [vmem:[%s7501_s6 + $0x1608] sm:$0xff]  ;;  %907 = vst [vmem:[%s7506_s7 + $0xaf8] sm:$0xff] %v906_v31  ;;  %v912_v34 = vld [vmem:[%s7501_s6 + $0x1610] sm:$0xff] }
  0xc2   : > { %909 = vst [vmem:[%s7506_s7 + $0xb00] sm:$0xff] %v908_v32  ;;  %911 = vst [vmem:[%s7506_s7 + $0xb08] sm:$0xff] %v910_v33  ;;  %v914_v35 = vld [vmem:[%s7501_s6 + $0x1618] sm:$0xff]  ;;  %v916_v36 = vld [vmem:[%s7501_s6 + $0x1640] sm:$0xff] }
  0xc3   : > { %913 = vst [vmem:[%s7506_s7 + $0xb10] sm:$0xff] %v912_v34  ;;  %915 = vst [vmem:[%s7506_s7 + $0xb18] sm:$0xff] %v914_v35  ;;  %v918_v37 = vld [vmem:[%s7501_s6 + $0x1648] sm:$0xff]  ;;  %v920_v38 = vld [vmem:[%s7501_s6 + $0x1650] sm:$0xff] }
  0xc4   : > { %917 = vst [vmem:[%s7506_s7 + $0xb20] sm:$0xff] %v916_v36  ;;  %v922_v39 = vld [vmem:[%s7501_s6 + $0x1658] sm:$0xff]  ;;  %919 = vst [vmem:[%s7506_s7 + $0xb28] sm:$0xff] %v918_v37  ;;  %v924_v40 = vld [vmem:[%s7501_s6 + $0x1680] sm:$0xff] }
  0xc5   : > { %921 = vst [vmem:[%s7506_s7 + $0xb30] sm:$0xff] %v920_v38  ;;  %923 = vst [vmem:[%s7506_s7 + $0xb38] sm:$0xff] %v922_v39  ;;  %v926_v41 = vld [vmem:[%s7501_s6 + $0x1688] sm:$0xff]  ;;  %v928_v42 = vld [vmem:[%s7501_s6 + $0x1690] sm:$0xff] }
  0xc6   : > { %925 = vst [vmem:[%s7506_s7 + $0xb40] sm:$0xff] %v924_v40  ;;  %927 = vst [vmem:[%s7506_s7 + $0xb48] sm:$0xff] %v926_v41  ;;  %v930_v43 = vld [vmem:[%s7501_s6 + $0x1698] sm:$0xff]  ;;  %v932_v44 = vld [vmem:[%s7501_s6 + $0x16c0] sm:$0xff] }
  0xc7   : > { %929 = vst [vmem:[%s7506_s7 + $0xb50] sm:$0xff] %v928_v42  ;;  %v934_v45 = vld [vmem:[%s7501_s6 + $0x16c8] sm:$0xff]  ;;  %931 = vst [vmem:[%s7506_s7 + $0xb58] sm:$0xff] %v930_v43  ;;  %v936_v46 = vld [vmem:[%s7501_s6 + $0x16d0] sm:$0xff] }
  0xc8   : > { %933 = vst [vmem:[%s7506_s7 + $0xb60] sm:$0xff] %v932_v44  ;;  %935 = vst [vmem:[%s7506_s7 + $0xb68] sm:$0xff] %v934_v45  ;;  %v938_v47 = vld [vmem:[%s7501_s6 + $0x16d8] sm:$0xff]  ;;  %v940_v48 = vld [vmem:[%s7501_s6 + $0x1700] sm:$0xff] }
  0xc9   : > { %937 = vst [vmem:[%s7506_s7 + $0xb70] sm:$0xff] %v936_v46  ;;  %939 = vst [vmem:[%s7506_s7 + $0xb78] sm:$0xff] %v938_v47  ;;  %v942_v49 = vld [vmem:[%s7501_s6 + $0x1708] sm:$0xff]  ;;  %v944_v50 = vld [vmem:[%s7501_s6 + $0x1710] sm:$0xff] }
  0xca   : > { %941 = vst [vmem:[%s7506_s7 + $0xb80] sm:$0xff] %v940_v48  ;;  %v946_v51 = vld [vmem:[%s7501_s6 + $0x1718] sm:$0xff]  ;;  %943 = vst [vmem:[%s7506_s7 + $0xb88] sm:$0xff] %v942_v49  ;;  %v948_v52 = vld [vmem:[%s7501_s6 + $0x1740] sm:$0xff] }
  0xcb   : > { %945 = vst [vmem:[%s7506_s7 + $0xb90] sm:$0xff] %v944_v50  ;;  %947 = vst [vmem:[%s7506_s7 + $0xb98] sm:$0xff] %v946_v51  ;;  %v950_v53 = vld [vmem:[%s7501_s6 + $0x1748] sm:$0xff]  ;;  %v952_v54 = vld [vmem:[%s7501_s6 + $0x1750] sm:$0xff] }
  0xcc   : > { %949 = vst [vmem:[%s7506_s7 + $0xba0] sm:$0xff] %v948_v52  ;;  %951 = vst [vmem:[%s7506_s7 + $0xba8] sm:$0xff] %v950_v53  ;;  %v954_v55 = vld [vmem:[%s7501_s6 + $0x1758] sm:$0xff]  ;;  %v956_v56 = vld [vmem:[%s7501_s6 + $0x1780] sm:$0xff] }
  0xcd   : > { %953 = vst [vmem:[%s7506_s7 + $0xbb0] sm:$0xff] %v952_v54  ;;  %v958_v57 = vld [vmem:[%s7501_s6 + $0x1788] sm:$0xff]  ;;  %955 = vst [vmem:[%s7506_s7 + $0xbb8] sm:$0xff] %v954_v55  ;;  %v960_v58 = vld [vmem:[%s7501_s6 + $0x1790] sm:$0xff] }
  0xce   : > { %957 = vst [vmem:[%s7506_s7 + $0xbc0] sm:$0xff] %v956_v56  ;;  %959 = vst [vmem:[%s7506_s7 + $0xbc8] sm:$0xff] %v958_v57  ;;  %v962_v59 = vld [vmem:[%s7501_s6 + $0x1798] sm:$0xff]  ;;  %v964_v60 = vld [vmem:[%s7501_s6 + $0x17c0] sm:$0xff] }
  0xcf   : > { %961 = vst [vmem:[%s7506_s7 + $0xbd0] sm:$0xff] %v960_v58  ;;  %963 = vst [vmem:[%s7506_s7 + $0xbd8] sm:$0xff] %v962_v59  ;;  %v966_v61 = vld [vmem:[%s7501_s6 + $0x17c8] sm:$0xff]  ;;  %v968_v62 = vld [vmem:[%s7501_s6 + $0x17d0] sm:$0xff] }
  0xd0   : > { %965 = vst [vmem:[%s7506_s7 + $0xbe0] sm:$0xff] %v964_v60  ;;  %v970_v63 = vld [vmem:[%s7501_s6 + $0x17d8] sm:$0xff]  ;;  %967 = vst [vmem:[%s7506_s7 + $0xbe8] sm:$0xff] %v966_v61  ;;  %v972_v0 = vld [vmem:[%s7501_s6 + $0x1800] sm:$0xff] }
  0xd1   : > { %969 = vst [vmem:[%s7506_s7 + $0xbf0] sm:$0xff] %v968_v62  ;;  %971 = vst [vmem:[%s7506_s7 + $0xbf8] sm:$0xff] %v970_v63  ;;  %v974_v1 = vld [vmem:[%s7501_s6 + $0x1808] sm:$0xff]  ;;  %v976_v2 = vld [vmem:[%s7501_s6 + $0x1810] sm:$0xff] }
  0xd2   : > { %973 = vst [vmem:[%s7506_s7 + $0xc00] sm:$0xff] %v972_v0  ;;  %975 = vst [vmem:[%s7506_s7 + $0xc08] sm:$0xff] %v974_v1  ;;  %v978_v3 = vld [vmem:[%s7501_s6 + $0x1818] sm:$0xff]  ;;  %v980_v4 = vld [vmem:[%s7501_s6 + $0x1840] sm:$0xff] }
  0xd3   : > { %977 = vst [vmem:[%s7506_s7 + $0xc10] sm:$0xff] %v976_v2  ;;  %v982_v5 = vld [vmem:[%s7501_s6 + $0x1848] sm:$0xff]  ;;  %979 = vst [vmem:[%s7506_s7 + $0xc18] sm:$0xff] %v978_v3  ;;  %v984_v6 = vld [vmem:[%s7501_s6 + $0x1850] sm:$0xff] }
  0xd4   : > { %981 = vst [vmem:[%s7506_s7 + $0xc20] sm:$0xff] %v980_v4  ;;  %983 = vst [vmem:[%s7506_s7 + $0xc28] sm:$0xff] %v982_v5  ;;  %v986_v7 = vld [vmem:[%s7501_s6 + $0x1858] sm:$0xff]  ;;  %v988_v8 = vld [vmem:[%s7501_s6 + $0x1880] sm:$0xff] }
  0xd5   : > { %985 = vst [vmem:[%s7506_s7 + $0xc30] sm:$0xff] %v984_v6  ;;  %987 = vst [vmem:[%s7506_s7 + $0xc38] sm:$0xff] %v986_v7  ;;  %v990_v9 = vld [vmem:[%s7501_s6 + $0x1888] sm:$0xff]  ;;  %v992_v10 = vld [vmem:[%s7501_s6 + $0x1890] sm:$0xff] }
  0xd6   : > { %989 = vst [vmem:[%s7506_s7 + $0xc40] sm:$0xff] %v988_v8  ;;  %v994_v11 = vld [vmem:[%s7501_s6 + $0x1898] sm:$0xff]  ;;  %991 = vst [vmem:[%s7506_s7 + $0xc48] sm:$0xff] %v990_v9  ;;  %v996_v12 = vld [vmem:[%s7501_s6 + $0x18c0] sm:$0xff] }
  0xd7   : > { %993 = vst [vmem:[%s7506_s7 + $0xc50] sm:$0xff] %v992_v10  ;;  %995 = vst [vmem:[%s7506_s7 + $0xc58] sm:$0xff] %v994_v11  ;;  %v998_v13 = vld [vmem:[%s7501_s6 + $0x18c8] sm:$0xff]  ;;  %v1000_v14 = vld [vmem:[%s7501_s6 + $0x18d0] sm:$0xff] }
  0xd8   : > { %997 = vst [vmem:[%s7506_s7 + $0xc60] sm:$0xff] %v996_v12  ;;  %999 = vst [vmem:[%s7506_s7 + $0xc68] sm:$0xff] %v998_v13  ;;  %v1002_v15 = vld [vmem:[%s7501_s6 + $0x18d8] sm:$0xff]  ;;  %v1004_v16 = vld [vmem:[%s7501_s6 + $0x1900] sm:$0xff] }
  0xd9   : > { %1001 = vst [vmem:[%s7506_s7 + $0xc70] sm:$0xff] %v1000_v14  ;;  %v1006_v17 = vld [vmem:[%s7501_s6 + $0x1908] sm:$0xff]  ;;  %1003 = vst [vmem:[%s7506_s7 + $0xc78] sm:$0xff] %v1002_v15  ;;  %v1008_v18 = vld [vmem:[%s7501_s6 + $0x1910] sm:$0xff] }
  0xda   : > { %1005 = vst [vmem:[%s7506_s7 + $0xc80] sm:$0xff] %v1004_v16  ;;  %1007 = vst [vmem:[%s7506_s7 + $0xc88] sm:$0xff] %v1006_v17  ;;  %v1010_v19 = vld [vmem:[%s7501_s6 + $0x1918] sm:$0xff]  ;;  %v1012_v20 = vld [vmem:[%s7501_s6 + $0x1940] sm:$0xff] }
  0xdb   : > { %1009 = vst [vmem:[%s7506_s7 + $0xc90] sm:$0xff] %v1008_v18  ;;  %1011 = vst [vmem:[%s7506_s7 + $0xc98] sm:$0xff] %v1010_v19  ;;  %v1014_v21 = vld [vmem:[%s7501_s6 + $0x1948] sm:$0xff]  ;;  %v1016_v22 = vld [vmem:[%s7501_s6 + $0x1950] sm:$0xff] }
  0xdc   : > { %1013 = vst [vmem:[%s7506_s7 + $0xca0] sm:$0xff] %v1012_v20  ;;  %v1018_v23 = vld [vmem:[%s7501_s6 + $0x1958] sm:$0xff]  ;;  %1015 = vst [vmem:[%s7506_s7 + $0xca8] sm:$0xff] %v1014_v21  ;;  %v1020_v24 = vld [vmem:[%s7501_s6 + $0x1980] sm:$0xff] }
  0xdd   : > { %1017 = vst [vmem:[%s7506_s7 + $0xcb0] sm:$0xff] %v1016_v22  ;;  %1019 = vst [vmem:[%s7506_s7 + $0xcb8] sm:$0xff] %v1018_v23  ;;  %v1022_v25 = vld [vmem:[%s7501_s6 + $0x1988] sm:$0xff]  ;;  %v1024_v26 = vld [vmem:[%s7501_s6 + $0x1990] sm:$0xff] }
  0xde   : > { %1021 = vst [vmem:[%s7506_s7 + $0xcc0] sm:$0xff] %v1020_v24  ;;  %1023 = vst [vmem:[%s7506_s7 + $0xcc8] sm:$0xff] %v1022_v25  ;;  %v1026_v27 = vld [vmem:[%s7501_s6 + $0x1998] sm:$0xff]  ;;  %v1028_v28 = vld [vmem:[%s7501_s6 + $0x19c0] sm:$0xff] }
  0xdf   : > { %1025 = vst [vmem:[%s7506_s7 + $0xcd0] sm:$0xff] %v1024_v26  ;;  %v1030_v29 = vld [vmem:[%s7501_s6 + $0x19c8] sm:$0xff]  ;;  %1027 = vst [vmem:[%s7506_s7 + $0xcd8] sm:$0xff] %v1026_v27  ;;  %v1032_v30 = vld [vmem:[%s7501_s6 + $0x19d0] sm:$0xff] }
  0xe0   : > { %1029 = vst [vmem:[%s7506_s7 + $0xce0] sm:$0xff] %v1028_v28  ;;  %1031 = vst [vmem:[%s7506_s7 + $0xce8] sm:$0xff] %v1030_v29  ;;  %v1034_v31 = vld [vmem:[%s7501_s6 + $0x19d8] sm:$0xff]  ;;  %v1036_v32 = vld [vmem:[%s7501_s6 + $0x1a00] sm:$0xff] }
  0xe1   : > { %1033 = vst [vmem:[%s7506_s7 + $0xcf0] sm:$0xff] %v1032_v30  ;;  %1035 = vst [vmem:[%s7506_s7 + $0xcf8] sm:$0xff] %v1034_v31  ;;  %v1038_v33 = vld [vmem:[%s7501_s6 + $0x1a08] sm:$0xff]  ;;  %v1040_v34 = vld [vmem:[%s7501_s6 + $0x1a10] sm:$0xff] }
  0xe2   : > { %1037 = vst [vmem:[%s7506_s7 + $0xd00] sm:$0xff] %v1036_v32  ;;  %v1042_v35 = vld [vmem:[%s7501_s6 + $0x1a18] sm:$0xff]  ;;  %1039 = vst [vmem:[%s7506_s7 + $0xd08] sm:$0xff] %v1038_v33  ;;  %v1044_v36 = vld [vmem:[%s7501_s6 + $0x1a40] sm:$0xff] }
  0xe3   : > { %1041 = vst [vmem:[%s7506_s7 + $0xd10] sm:$0xff] %v1040_v34  ;;  %1043 = vst [vmem:[%s7506_s7 + $0xd18] sm:$0xff] %v1042_v35  ;;  %v1046_v37 = vld [vmem:[%s7501_s6 + $0x1a48] sm:$0xff]  ;;  %v1048_v38 = vld [vmem:[%s7501_s6 + $0x1a50] sm:$0xff] }
  0xe4   : > { %1045 = vst [vmem:[%s7506_s7 + $0xd20] sm:$0xff] %v1044_v36  ;;  %1047 = vst [vmem:[%s7506_s7 + $0xd28] sm:$0xff] %v1046_v37  ;;  %v1050_v39 = vld [vmem:[%s7501_s6 + $0x1a58] sm:$0xff]  ;;  %v1052_v40 = vld [vmem:[%s7501_s6 + $0x1a80] sm:$0xff] }
  0xe5   : > { %1049 = vst [vmem:[%s7506_s7 + $0xd30] sm:$0xff] %v1048_v38  ;;  %v1054_v41 = vld [vmem:[%s7501_s6 + $0x1a88] sm:$0xff]  ;;  %1051 = vst [vmem:[%s7506_s7 + $0xd38] sm:$0xff] %v1050_v39  ;;  %v1056_v42 = vld [vmem:[%s7501_s6 + $0x1a90] sm:$0xff] }
  0xe6   : > { %1053 = vst [vmem:[%s7506_s7 + $0xd40] sm:$0xff] %v1052_v40  ;;  %1055 = vst [vmem:[%s7506_s7 + $0xd48] sm:$0xff] %v1054_v41  ;;  %v1058_v43 = vld [vmem:[%s7501_s6 + $0x1a98] sm:$0xff]  ;;  %v1060_v44 = vld [vmem:[%s7501_s6 + $0x1ac0] sm:$0xff] }
  0xe7   : > { %1057 = vst [vmem:[%s7506_s7 + $0xd50] sm:$0xff] %v1056_v42  ;;  %1059 = vst [vmem:[%s7506_s7 + $0xd58] sm:$0xff] %v1058_v43  ;;  %v1062_v45 = vld [vmem:[%s7501_s6 + $0x1ac8] sm:$0xff]  ;;  %v1064_v46 = vld [vmem:[%s7501_s6 + $0x1ad0] sm:$0xff] }
  0xe8   : > { %1061 = vst [vmem:[%s7506_s7 + $0xd60] sm:$0xff] %v1060_v44  ;;  %v1066_v47 = vld [vmem:[%s7501_s6 + $0x1ad8] sm:$0xff]  ;;  %1063 = vst [vmem:[%s7506_s7 + $0xd68] sm:$0xff] %v1062_v45  ;;  %v1068_v48 = vld [vmem:[%s7501_s6 + $0x1b00] sm:$0xff] }
  0xe9   : > { %1065 = vst [vmem:[%s7506_s7 + $0xd70] sm:$0xff] %v1064_v46  ;;  %1067 = vst [vmem:[%s7506_s7 + $0xd78] sm:$0xff] %v1066_v47  ;;  %v1070_v49 = vld [vmem:[%s7501_s6 + $0x1b08] sm:$0xff]  ;;  %v1072_v50 = vld [vmem:[%s7501_s6 + $0x1b10] sm:$0xff] }
  0xea   : > { %1069 = vst [vmem:[%s7506_s7 + $0xd80] sm:$0xff] %v1068_v48  ;;  %1071 = vst [vmem:[%s7506_s7 + $0xd88] sm:$0xff] %v1070_v49  ;;  %v1074_v51 = vld [vmem:[%s7501_s6 + $0x1b18] sm:$0xff]  ;;  %v1076_v52 = vld [vmem:[%s7501_s6 + $0x1b40] sm:$0xff] }
  0xeb   : > { %1073 = vst [vmem:[%s7506_s7 + $0xd90] sm:$0xff] %v1072_v50  ;;  %v1078_v53 = vld [vmem:[%s7501_s6 + $0x1b48] sm:$0xff]  ;;  %1075 = vst [vmem:[%s7506_s7 + $0xd98] sm:$0xff] %v1074_v51  ;;  %v1080_v54 = vld [vmem:[%s7501_s6 + $0x1b50] sm:$0xff] }
  0xec   : > { %1077 = vst [vmem:[%s7506_s7 + $0xda0] sm:$0xff] %v1076_v52  ;;  %1079 = vst [vmem:[%s7506_s7 + $0xda8] sm:$0xff] %v1078_v53  ;;  %v1082_v55 = vld [vmem:[%s7501_s6 + $0x1b58] sm:$0xff]  ;;  %v1084_v56 = vld [vmem:[%s7501_s6 + $0x1b80] sm:$0xff] }
  0xed   : > { %1081 = vst [vmem:[%s7506_s7 + $0xdb0] sm:$0xff] %v1080_v54  ;;  %1083 = vst [vmem:[%s7506_s7 + $0xdb8] sm:$0xff] %v1082_v55  ;;  %v1086_v57 = vld [vmem:[%s7501_s6 + $0x1b88] sm:$0xff]  ;;  %v1088_v58 = vld [vmem:[%s7501_s6 + $0x1b90] sm:$0xff] }
  0xee   : > { %1085 = vst [vmem:[%s7506_s7 + $0xdc0] sm:$0xff] %v1084_v56  ;;  %v1090_v59 = vld [vmem:[%s7501_s6 + $0x1b98] sm:$0xff]  ;;  %1087 = vst [vmem:[%s7506_s7 + $0xdc8] sm:$0xff] %v1086_v57  ;;  %v1092_v60 = vld [vmem:[%s7501_s6 + $0x1bc0] sm:$0xff] }
  0xef   : > { %1089 = vst [vmem:[%s7506_s7 + $0xdd0] sm:$0xff] %v1088_v58  ;;  %1091 = vst [vmem:[%s7506_s7 + $0xdd8] sm:$0xff] %v1090_v59  ;;  %v1094_v61 = vld [vmem:[%s7501_s6 + $0x1bc8] sm:$0xff]  ;;  %v1096_v62 = vld [vmem:[%s7501_s6 + $0x1bd0] sm:$0xff] }
  0xf0   : > { %1093 = vst [vmem:[%s7506_s7 + $0xde0] sm:$0xff] %v1092_v60  ;;  %1095 = vst [vmem:[%s7506_s7 + $0xde8] sm:$0xff] %v1094_v61  ;;  %v1098_v63 = vld [vmem:[%s7501_s6 + $0x1bd8] sm:$0xff]  ;;  %v1100_v0 = vld [vmem:[%s7501_s6 + $0x1c00] sm:$0xff] }
  0xf1   : > { %1097 = vst [vmem:[%s7506_s7 + $0xdf0] sm:$0xff] %v1096_v62  ;;  %v1102_v1 = vld [vmem:[%s7501_s6 + $0x1c08] sm:$0xff]  ;;  %1099 = vst [vmem:[%s7506_s7 + $0xdf8] sm:$0xff] %v1098_v63  ;;  %v1104_v2 = vld [vmem:[%s7501_s6 + $0x1c10] sm:$0xff] }
  0xf2   : > { %1101 = vst [vmem:[%s7506_s7 + $0xe00] sm:$0xff] %v1100_v0  ;;  %1103 = vst [vmem:[%s7506_s7 + $0xe08] sm:$0xff] %v1102_v1  ;;  %v1106_v3 = vld [vmem:[%s7501_s6 + $0x1c18] sm:$0xff]  ;;  %v1108_v4 = vld [vmem:[%s7501_s6 + $0x1c40] sm:$0xff] }
  0xf3   : > { %1105 = vst [vmem:[%s7506_s7 + $0xe10] sm:$0xff] %v1104_v2  ;;  %1107 = vst [vmem:[%s7506_s7 + $0xe18] sm:$0xff] %v1106_v3  ;;  %v1110_v5 = vld [vmem:[%s7501_s6 + $0x1c48] sm:$0xff]  ;;  %v1112_v6 = vld [vmem:[%s7501_s6 + $0x1c50] sm:$0xff] }
  0xf4   : > { %1109 = vst [vmem:[%s7506_s7 + $0xe20] sm:$0xff] %v1108_v4  ;;  %v1114_v7 = vld [vmem:[%s7501_s6 + $0x1c58] sm:$0xff]  ;;  %1111 = vst [vmem:[%s7506_s7 + $0xe28] sm:$0xff] %v1110_v5  ;;  %v1116_v8 = vld [vmem:[%s7501_s6 + $0x1c80] sm:$0xff] }
  0xf5   : > { %1113 = vst [vmem:[%s7506_s7 + $0xe30] sm:$0xff] %v1112_v6  ;;  %1115 = vst [vmem:[%s7506_s7 + $0xe38] sm:$0xff] %v1114_v7  ;;  %v1118_v9 = vld [vmem:[%s7501_s6 + $0x1c88] sm:$0xff]  ;;  %v1120_v10 = vld [vmem:[%s7501_s6 + $0x1c90] sm:$0xff] }
  0xf6   : > { %1117 = vst [vmem:[%s7506_s7 + $0xe40] sm:$0xff] %v1116_v8  ;;  %1119 = vst [vmem:[%s7506_s7 + $0xe48] sm:$0xff] %v1118_v9  ;;  %v1122_v11 = vld [vmem:[%s7501_s6 + $0x1c98] sm:$0xff]  ;;  %v1124_v12 = vld [vmem:[%s7501_s6 + $0x1cc0] sm:$0xff] }
  0xf7   : > { %1121 = vst [vmem:[%s7506_s7 + $0xe50] sm:$0xff] %v1120_v10  ;;  %v1126_v13 = vld [vmem:[%s7501_s6 + $0x1cc8] sm:$0xff]  ;;  %1123 = vst [vmem:[%s7506_s7 + $0xe58] sm:$0xff] %v1122_v11  ;;  %v1128_v14 = vld [vmem:[%s7501_s6 + $0x1cd0] sm:$0xff] }
  0xf8   : > { %1125 = vst [vmem:[%s7506_s7 + $0xe60] sm:$0xff] %v1124_v12  ;;  %1127 = vst [vmem:[%s7506_s7 + $0xe68] sm:$0xff] %v1126_v13  ;;  %v1130_v15 = vld [vmem:[%s7501_s6 + $0x1cd8] sm:$0xff]  ;;  %v1132_v16 = vld [vmem:[%s7501_s6 + $0x1d00] sm:$0xff] }
  0xf9   : > { %1129 = vst [vmem:[%s7506_s7 + $0xe70] sm:$0xff] %v1128_v14  ;;  %1131 = vst [vmem:[%s7506_s7 + $0xe78] sm:$0xff] %v1130_v15  ;;  %v1134_v17 = vld [vmem:[%s7501_s6 + $0x1d08] sm:$0xff]  ;;  %v1136_v18 = vld [vmem:[%s7501_s6 + $0x1d10] sm:$0xff] }
  0xfa   : > { %1133 = vst [vmem:[%s7506_s7 + $0xe80] sm:$0xff] %v1132_v16  ;;  %v1138_v19 = vld [vmem:[%s7501_s6 + $0x1d18] sm:$0xff]  ;;  %1135 = vst [vmem:[%s7506_s7 + $0xe88] sm:$0xff] %v1134_v17  ;;  %v1140_v20 = vld [vmem:[%s7501_s6 + $0x1d40] sm:$0xff] }
  0xfb   : > { %1137 = vst [vmem:[%s7506_s7 + $0xe90] sm:$0xff] %v1136_v18  ;;  %1139 = vst [vmem:[%s7506_s7 + $0xe98] sm:$0xff] %v1138_v19  ;;  %v1142_v21 = vld [vmem:[%s7501_s6 + $0x1d48] sm:$0xff]  ;;  %v1144_v22 = vld [vmem:[%s7501_s6 + $0x1d50] sm:$0xff] }
  0xfc   : > { %1141 = vst [vmem:[%s7506_s7 + $0xea0] sm:$0xff] %v1140_v20  ;;  %1143 = vst [vmem:[%s7506_s7 + $0xea8] sm:$0xff] %v1142_v21  ;;  %v1146_v23 = vld [vmem:[%s7501_s6 + $0x1d58] sm:$0xff]  ;;  %v1148_v24 = vld [vmem:[%s7501_s6 + $0x1d80] sm:$0xff] }
  0xfd   : > { %1145 = vst [vmem:[%s7506_s7 + $0xeb0] sm:$0xff] %v1144_v22  ;;  %v1150_v25 = vld [vmem:[%s7501_s6 + $0x1d88] sm:$0xff]  ;;  %1147 = vst [vmem:[%s7506_s7 + $0xeb8] sm:$0xff] %v1146_v23  ;;  %v1152_v26 = vld [vmem:[%s7501_s6 + $0x1d90] sm:$0xff] }
  0xfe   : > { %1149 = vst [vmem:[%s7506_s7 + $0xec0] sm:$0xff] %v1148_v24  ;;  %1151 = vst [vmem:[%s7506_s7 + $0xec8] sm:$0xff] %v1150_v25  ;;  %v1154_v27 = vld [vmem:[%s7501_s6 + $0x1d98] sm:$0xff]  ;;  %v1156_v28 = vld [vmem:[%s7501_s6 + $0x1dc0] sm:$0xff] }
  0xff   : > { %1153 = vst [vmem:[%s7506_s7 + $0xed0] sm:$0xff] %v1152_v26  ;;  %1155 = vst [vmem:[%s7506_s7 + $0xed8] sm:$0xff] %v1154_v27  ;;  %v1158_v29 = vld [vmem:[%s7501_s6 + $0x1dc8] sm:$0xff]  ;;  %v1160_v30 = vld [vmem:[%s7501_s6 + $0x1dd0] sm:$0xff] }
 0x100   : > { %1157 = vst [vmem:[%s7506_s7 + $0xee0] sm:$0xff] %v1156_v28  ;;  %v1162_v31 = vld [vmem:[%s7501_s6 + $0x1dd8] sm:$0xff]  ;;  %1159 = vst [vmem:[%s7506_s7 + $0xee8] sm:$0xff] %v1158_v29  ;;  %v1164_v32 = vld [vmem:[%s7501_s6 + $0x1e00] sm:$0xff] }
 0x101   : > { %1161 = vst [vmem:[%s7506_s7 + $0xef0] sm:$0xff] %v1160_v30  ;;  %1163 = vst [vmem:[%s7506_s7 + $0xef8] sm:$0xff] %v1162_v31  ;;  %v1166_v33 = vld [vmem:[%s7501_s6 + $0x1e08] sm:$0xff]  ;;  %v1168_v34 = vld [vmem:[%s7501_s6 + $0x1e10] sm:$0xff] }
 0x102   : > { %1165 = vst [vmem:[%s7506_s7 + $0xf00] sm:$0xff] %v1164_v32  ;;  %1167 = vst [vmem:[%s7506_s7 + $0xf08] sm:$0xff] %v1166_v33  ;;  %v1170_v35 = vld [vmem:[%s7501_s6 + $0x1e18] sm:$0xff]  ;;  %v1172_v36 = vld [vmem:[%s7501_s6 + $0x1e40] sm:$0xff] }
 0x103   : > { %1169 = vst [vmem:[%s7506_s7 + $0xf10] sm:$0xff] %v1168_v34  ;;  %v1174_v37 = vld [vmem:[%s7501_s6 + $0x1e48] sm:$0xff]  ;;  %1171 = vst [vmem:[%s7506_s7 + $0xf18] sm:$0xff] %v1170_v35  ;;  %v1176_v38 = vld [vmem:[%s7501_s6 + $0x1e50] sm:$0xff] }
 0x104   : > { %1173 = vst [vmem:[%s7506_s7 + $0xf20] sm:$0xff] %v1172_v36  ;;  %1175 = vst [vmem:[%s7506_s7 + $0xf28] sm:$0xff] %v1174_v37  ;;  %v1178_v39 = vld [vmem:[%s7501_s6 + $0x1e58] sm:$0xff]  ;;  %v1180_v40 = vld [vmem:[%s7501_s6 + $0x1e80] sm:$0xff] }
 0x105   : > { %1177 = vst [vmem:[%s7506_s7 + $0xf30] sm:$0xff] %v1176_v38  ;;  %1179 = vst [vmem:[%s7506_s7 + $0xf38] sm:$0xff] %v1178_v39  ;;  %v1182_v41 = vld [vmem:[%s7501_s6 + $0x1e88] sm:$0xff]  ;;  %v1184_v42 = vld [vmem:[%s7501_s6 + $0x1e90] sm:$0xff] }
 0x106   : > { %1181 = vst [vmem:[%s7506_s7 + $0xf40] sm:$0xff] %v1180_v40  ;;  %v1186_v43 = vld [vmem:[%s7501_s6 + $0x1e98] sm:$0xff]  ;;  %1183 = vst [vmem:[%s7506_s7 + $0xf48] sm:$0xff] %v1182_v41  ;;  %v1188_v44 = vld [vmem:[%s7501_s6 + $0x1ec0] sm:$0xff] }
 0x107   : > { %1185 = vst [vmem:[%s7506_s7 + $0xf50] sm:$0xff] %v1184_v42  ;;  %1187 = vst [vmem:[%s7506_s7 + $0xf58] sm:$0xff] %v1186_v43  ;;  %v1190_v45 = vld [vmem:[%s7501_s6 + $0x1ec8] sm:$0xff]  ;;  %v1192_v46 = vld [vmem:[%s7501_s6 + $0x1ed0] sm:$0xff] }
 0x108   : > { %1189 = vst [vmem:[%s7506_s7 + $0xf60] sm:$0xff] %v1188_v44  ;;  %1191 = vst [vmem:[%s7506_s7 + $0xf68] sm:$0xff] %v1190_v45  ;;  %v1194_v47 = vld [vmem:[%s7501_s6 + $0x1ed8] sm:$0xff]  ;;  %v1196_v48 = vld [vmem:[%s7501_s6 + $0x1f00] sm:$0xff] }
 0x109   : > { %1193 = vst [vmem:[%s7506_s7 + $0xf70] sm:$0xff] %v1192_v46  ;;  %v1198_v49 = vld [vmem:[%s7501_s6 + $0x1f08] sm:$0xff]  ;;  %1195 = vst [vmem:[%s7506_s7 + $0xf78] sm:$0xff] %v1194_v47  ;;  %v1200_v50 = vld [vmem:[%s7501_s6 + $0x1f10] sm:$0xff] }
 0x10a   : > { %1197 = vst [vmem:[%s7506_s7 + $0xf80] sm:$0xff] %v1196_v48  ;;  %1199 = vst [vmem:[%s7506_s7 + $0xf88] sm:$0xff] %v1198_v49  ;;  %v1202_v51 = vld [vmem:[%s7501_s6 + $0x1f18] sm:$0xff]  ;;  %v1204_v52 = vld [vmem:[%s7501_s6 + $0x1f40] sm:$0xff] }
 0x10b   : > { %1201 = vst [vmem:[%s7506_s7 + $0xf90] sm:$0xff] %v1200_v50  ;;  %1203 = vst [vmem:[%s7506_s7 + $0xf98] sm:$0xff] %v1202_v51  ;;  %v1206_v53 = vld [vmem:[%s7501_s6 + $0x1f48] sm:$0xff]  ;;  %v1208_v54 = vld [vmem:[%s7501_s6 + $0x1f50] sm:$0xff] }
 0x10c   : > { %1205 = vst [vmem:[%s7506_s7 + $0xfa0] sm:$0xff] %v1204_v52  ;;  %v1210_v55 = vld [vmem:[%s7501_s6 + $0x1f58] sm:$0xff]  ;;  %1207 = vst [vmem:[%s7506_s7 + $0xfa8] sm:$0xff] %v1206_v53  ;;  %v1212_v56 = vld [vmem:[%s7501_s6 + $0x1f80] sm:$0xff] }
 0x10d   : > { %1209 = vst [vmem:[%s7506_s7 + $0xfb0] sm:$0xff] %v1208_v54  ;;  %1211 = vst [vmem:[%s7506_s7 + $0xfb8] sm:$0xff] %v1210_v55  ;;  %v1214_v57 = vld [vmem:[%s7501_s6 + $0x1f88] sm:$0xff]  ;;  %v1216_v58 = vld [vmem:[%s7501_s6 + $0x1f90] sm:$0xff] }
 0x10e   : > { %1213 = vst [vmem:[%s7506_s7 + $0xfc0] sm:$0xff] %v1212_v56  ;;  %1215 = vst [vmem:[%s7506_s7 + $0xfc8] sm:$0xff] %v1214_v57  ;;  %v1218_v59 = vld [vmem:[%s7501_s6 + $0x1f98] sm:$0xff]  ;;  %v1220_v60 = vld [vmem:[%s7501_s6 + $0x1fc0] sm:$0xff] }
 0x10f   : > { %1217 = vst [vmem:[%s7506_s7 + $0xfd0] sm:$0xff] %v1216_v58  ;;  %v1222_v61 = vld [vmem:[%s7501_s6 + $0x1fc8] sm:$0xff]  ;;  %1219 = vst [vmem:[%s7506_s7 + $0xfd8] sm:$0xff] %v1218_v59  ;;  %v1224_v62 = vld [vmem:[%s7501_s6 + $0x1fd0] sm:$0xff] }
 0x110   : > { %1221 = vst [vmem:[%s7506_s7 + $0xfe0] sm:$0xff] %v1220_v60  ;;  %1223 = vst [vmem:[%s7506_s7 + $0xfe8] sm:$0xff] %v1222_v61  ;;  %v1226_v63 = vld [vmem:[%s7501_s6 + $0x1fd8] sm:$0xff] }
 0x111   : > { %1225 = vst [vmem:[%s7506_s7 + $0xff0] sm:$0xff] %v1224_v62  ;;  %1227 = vst [vmem:[%s7506_s7 + $0xff8] sm:$0xff] %v1226_v63 }
 0x112 PF: > { %p6336_p5 = scmp.ge.s32.totalorder %s7432_s20, 1  ;;  %p1249_p6 = scmp.lt.s32.totalorder %s7432_s20, 3 }
 0x114   : > { %p1250_p7 = pnand %p6336_p5, %p1249_p6 }
 0x115   : > { %s1256_s8 = sand.u32 (!%p1250_p7), 1, %s7424_s18   ;;  %v1307_v0 = vld [vmem:[%s9619_s0] sm:$0xff] (!%p1250_p7)  ;;  %s6338_s10 = sshll.u32 (!%p1250_p7), %s7481_s21, 3  ;;  %vm5530_vm0 = vcmask (!%p1250_p7), 1043456   ;;  %vm5526_vm1 = vcmask (!%p1250_p7), 293888   ;;  %vm6247_vm2 = vcmask (!%p1250_p7), 74752  }
 0x116   : > { %1253 = sbr.rel (%p1250_p7) target bundleno = 1463 (0x5b7), region = 59  ;;  %v1311_v1 = vld [vmem:[%s9619_s0 + $0x20] sm:$0xff] (!%p1250_p7)  ;;  %s6337_s13 = sshll.u32 (!%p1250_p7), %s1256_s8, 12 }
 0x117   : > { %v8538_v2 = vcombine.high (!%p1250_p7), %v1307_v0, %v1311_v1  ;;  %v8540_v3 = vcombine.low (!%p1250_p7), %v1307_v0, %v1311_v1  ;;  %s8542_s14 = scalar_lea.vmem (!%p1250_p7), [#allocation2], %s6337_s13  ;;  %p9208_p8 = scmp.lt.s32.totalorder (!%p1250_p7), %s6338_s10, 15 }
 0x118   : > { %v1327_v4 = vld [vmem:[%s8542_s14] sm:$0xff] (!%p1250_p7)  ;;  %v1328_v6 = vld [vmem:[%s8542_s14 + $0x8] sm:$0xff] (!%p1250_p7)  ;;  %s6339_s17 = sshll.u32 (!%p1250_p7), %s7481_s21, 7  ;;  %p1303_p10 = scmp.lt.s32.totalorder (!%p1250_p7), %s7481_s21, 1 }
 0x119   : > { %v1331_v5 = vld [vmem:[%s8542_s14 + $0x20] sm:$0xff] (!%p1250_p7)  ;;  %4581 = vmatprep.mubr.bf16.mxu0 (!%p1250_p7), %v8538_v2  ;;  %4825 = vmatprep.mubr.bf16.mxu1 (!%p1250_p7), %v8538_v2  ;;  %v1332_v8 = vld [vmem:[%s8542_s14 + $0x28] sm:$0xff] (!%p1250_p7)  ;;  %p9436_p9 = scmp.lt.s32.totalorder (!%p1250_p7), %s6339_s17, 255 }
 0x11a   : > { %v6367_v7 = vcombine.high (!%p1250_p7), %v1327_v4, %v1331_v5  ;;  %v6366_v9 = vcombine.low (!%p1250_p7), %v1327_v4, %v1331_v5  ;;  %v1335_v10 = vld [vmem:[%s8542_s14 + $0x40] sm:$0xff] (!%p1250_p7)  ;;  %v6369_v12 = vcombine.high (!%p1250_p7), %v1328_v6, %v1332_v8  ;;  %v6368_v13 = vcombine.low (!%p1250_p7), %v1328_v6, %v1332_v8  ;;  %v1336_v15 = vld [vmem:[%s8542_s14 + $0x48] sm:$0xff] (!%p1250_p7) }
 0x11b   : > { %v1339_v11 = vld [vmem:[%s8542_s14 + $0x60] sm:$0xff] (!%p1250_p7)  ;;  %v1340_v16 = vld [vmem:[%s8542_s14 + $0x68] sm:$0xff] (!%p1250_p7) }
 0x11c   : > { %v6375_v14 = vcombine.high (!%p1250_p7), %v1335_v10, %v1339_v11  ;;  %v1343_v17 = vld [vmem:[%s8542_s14 + $0x80] sm:$0xff] (!%p1250_p7)  ;;  %4549 = vmatprep.subr.bf16.mxu0 (!%p1250_p7), %v6367_v7  ;;  %v6377_v18 = vcombine.high (!%p1250_p7), %v1336_v15, %v1340_v16  ;;  %v1344_v20 = vld [vmem:[%s8542_s14 + $0x88] sm:$0xff] (!%p1250_p7)  ;;  %4793 = vmatprep.subr.bf16.mxu1 (!%p1250_p7), %v6369_v12  ;;  %v6374_v22 = vcombine.low (!%p1250_p7), %v1335_v10, %v1339_v11 }
 0x11d   : > { %v1347_v19 = vld [vmem:[%s8542_s14 + $0xa0] sm:$0xff]  ;;  %v1348_v21 = vld [vmem:[%s8542_s14 + $0xa8] sm:$0xff]  ;;  %4550 = vmatpush1.bf16.msra.mxu0 %v6366_v9  ;;  %4794 = vmatpush1.bf16.msra.mxu1 %v6368_v13  ;;  %v6376_v23 = vcombine.low %v1336_v15, %v1340_v16  ;;  %s9631_s10 = smov (!%p9208_p8, %s6338_s10), 15  ;;  %s9633_s17 = smov (!%p9436_p9, %s6339_s17), 255 }
 0x11e   : > { %4551 = vmatprep.subr.bf16.mxu0 %v6375_v14  ;;  %v6383_v24 = vcombine.high %v1343_v17, %v1347_v19  ;;  %4795 = vmatprep.subr.bf16.mxu1 %v6377_v18  ;;  %v6385_v25 = vcombine.high %v1344_v20, %v1348_v21  ;;  %v1351_v26 = vld [vmem:[%s8542_s14 + $0xc0] sm:$0xff]  ;;  %v1352_v28 = vld [vmem:[%s8542_s14 + $0xc8] sm:$0xff]  ;;  %v6382_v30 = vcombine.low %v1343_v17, %v1347_v19  ;;  %s1295_s15 = scalar_lea.vmem %s9621_s2, %s9631_s10  ;;  %s6340_s20 = sshll.u32 %s9633_s17, 3 }
 0x11f   : > { %v1355_v27 = vld [vmem:[%s8542_s14 + $0xe0] sm:$0xff]  ;;  %v1356_v29 = vld [vmem:[%s8542_s14 + $0xe8] sm:$0xff]  ;;  %v6384_v31 = vcombine.low %v1344_v20, %v1348_v21  ;;  %s9455_s26 = scalar_lea.vmem %s9623_s4, %s6340_s20  ;;  %s9635_s21 = smov (!%p1303_p10, %s7481_s21), 1 }
 0x120   : > { %v6391_v32 = vcombine.high %v1351_v26, %v1355_v27  ;;  %v6393_v33 = vcombine.high %v1352_v28, %v1356_v29  ;;  %v1359_v34 = vld [vmem:[%s8542_s14 + $0x100] sm:$0xff]  ;;  %v1360_v36 = vld [vmem:[%s8542_s14 + $0x108] sm:$0xff]  ;;  %v6390_v38 = vcombine.low %v1351_v26, %v1355_v27  ;;  %v6392_v39 = vcombine.low %v1352_v28, %v1356_v29  ;;  %s6341_s27 = sshll.u32 %s9635_s21, 1 }
 0x121   : > { %4552 = vmatpush1.bf16.msra.mxu0 %v6374_v22  ;;  %4796 = vmatpush1.bf16.msra.mxu1 %v6376_v23  ;;  %v1363_v35 = vld [vmem:[%s8542_s14 + $0x120] sm:$0xff]  ;;  %v1364_v37 = vld [vmem:[%s8542_s14 + $0x128] sm:$0xff]  ;;  %s1306_s30 = scalar_lea.vmem %s9624_s5, %s6341_s27 }
 0x122   : > { %4553 = vmatprep.subr.bf16.mxu0 %v6383_v24  ;;  %4797 = vmatprep.subr.bf16.mxu1 %v6385_v25  ;;  %v6399_v40 = vcombine.high %v1359_v34, %v1363_v35  ;;  %v6401_v41 = vcombine.high %v1360_v36, %v1364_v37  ;;  %v1367_v42 = vld [vmem:[%s8542_s14 + $0x140] sm:$0xff]  ;;  %v1368_v44 = vld [vmem:[%s8542_s14 + $0x148] sm:$0xff]  ;;  %v6398_v46 = vcombine.low %v1359_v34, %v1363_v35 }
 0x123   : > { %v1371_v43 = vld [vmem:[%s8542_s14 + $0x160] sm:$0xff]  ;;  %v1372_v45 = vld [vmem:[%s8542_s14 + $0x168] sm:$0xff]  ;;  %v6400_v47 = vcombine.low %v1360_v36, %v1364_v37 }
 0x124   : > { %v6407_v48 = vcombine.high %v1367_v42, %v1371_v43  ;;  %v6409_v49 = vcombine.high %v1368_v44, %v1372_v45  ;;  %v1375_v50 = vld [vmem:[%s8542_s14 + $0x180] sm:$0xff]  ;;  %v1376_v52 = vld [vmem:[%s8542_s14 + $0x188] sm:$0xff]  ;;  %v6406_v54 = vcombine.low %v1367_v42, %v1371_v43  ;;  %v6408_v55 = vcombine.low %v1368_v44, %v1372_v45 }
 0x125   : > { %4554 = vmatpush1.bf16.msra.mxu0 %v6382_v30  ;;  %4798 = vmatpush1.bf16.msra.mxu1 %v6384_v31  ;;  %v1379_v51 = vld [vmem:[%s8542_s14 + $0x1a0] sm:$0xff]  ;;  %v1380_v53 = vld [vmem:[%s8542_s14 + $0x1a8] sm:$0xff] }
 0x126   : > { %4555 = vmatprep.subr.bf16.mxu0 %v6391_v32  ;;  %4799 = vmatprep.subr.bf16.mxu1 %v6393_v33  ;;  %v6415_v56 = vcombine.high %v1375_v50, %v1379_v51  ;;  %v6417_v57 = vcombine.high %v1376_v52, %v1380_v53  ;;  %v1383_v58 = vld [vmem:[%s8542_s14 + $0x1c0] sm:$0xff]  ;;  %v1384_v60 = vld [vmem:[%s8542_s14 + $0x1c8] sm:$0xff]  ;;  %v6414_v62 = vcombine.low %v1375_v50, %v1379_v51 }
 0x127   : > { %v1387_v59 = vld [vmem:[%s8542_s14 + $0x1e0] sm:$0xff]  ;;  %v1388_v61 = vld [vmem:[%s8542_s14 + $0x1e8] sm:$0xff]  ;;  %v6416_v63 = vcombine.low %v1376_v52, %v1380_v53 }
 0x128   : > { %v6423_v0 = vcombine.high %v1383_v58, %v1387_v59  ;;  %v6425_v1 = vcombine.high %v1384_v60, %v1388_v61  ;;  %v1391_v4 = vld [vmem:[%s8542_s14 + $0x200] sm:$0xff]  ;;  %v1392_v6 = vld [vmem:[%s8542_s14 + $0x208] sm:$0xff]  ;;  %v6422_v8 = vcombine.low %v1383_v58, %v1387_v59  ;;  %v6424_v9 = vcombine.low %v1384_v60, %v1388_v61 }
 0x129   : > { %4556 = vmatpush1.bf16.msra.mxu0 %v6390_v38  ;;  %4800 = vmatpush1.bf16.msra.mxu1 %v6392_v39  ;;  %v1395_v5 = vld [vmem:[%s8542_s14 + $0x220] sm:$0xff]  ;;  %v1396_v7 = vld [vmem:[%s8542_s14 + $0x228] sm:$0xff] }
 0x12a   : > { %4557 = vmatprep.subr.bf16.mxu0 %v6399_v40  ;;  %4801 = vmatprep.subr.bf16.mxu1 %v6401_v41  ;;  %v6431_v10 = vcombine.high %v1391_v4, %v1395_v5  ;;  %v6433_v11 = vcombine.high %v1392_v6, %v1396_v7  ;;  %v1399_v12 = vld [vmem:[%s8542_s14 + $0x240] sm:$0xff]  ;;  %v1400_v14 = vld [vmem:[%s8542_s14 + $0x248] sm:$0xff]  ;;  %v6430_v16 = vcombine.low %v1391_v4, %v1395_v5 }
 0x12b   : > { %v1403_v13 = vld [vmem:[%s8542_s14 + $0x260] sm:$0xff]  ;;  %v1404_v15 = vld [vmem:[%s8542_s14 + $0x268] sm:$0xff]  ;;  %v6432_v17 = vcombine.low %v1392_v6, %v1396_v7 }
 0x12c   : > { %v6439_v18 = vcombine.high %v1399_v12, %v1403_v13  ;;  %v6441_v19 = vcombine.high %v1400_v14, %v1404_v15  ;;  %v1407_v20 = vld [vmem:[%s8542_s14 + $0x280] sm:$0xff]  ;;  %v1408_v22 = vld [vmem:[%s8542_s14 + $0x288] sm:$0xff]  ;;  %v6438_v24 = vcombine.low %v1399_v12, %v1403_v13  ;;  %v6440_v25 = vcombine.low %v1400_v14, %v1404_v15 }
 0x12d   : > { %4558 = vmatpush1.bf16.msra.mxu0 %v6398_v46  ;;  %4802 = vmatpush1.bf16.msra.mxu1 %v6400_v47  ;;  %v1411_v21 = vld [vmem:[%s8542_s14 + $0x2a0] sm:$0xff]  ;;  %v1412_v23 = vld [vmem:[%s8542_s14 + $0x2a8] sm:$0xff] }
 0x12e   : > { %4559 = vmatprep.subr.bf16.mxu0 %v6407_v48  ;;  %4803 = vmatprep.subr.bf16.mxu1 %v6409_v49  ;;  %v6447_v26 = vcombine.high %v1407_v20, %v1411_v21  ;;  %v6449_v27 = vcombine.high %v1408_v22, %v1412_v23  ;;  %v1415_v28 = vld [vmem:[%s8542_s14 + $0x2c0] sm:$0xff]  ;;  %v1416_v30 = vld [vmem:[%s8542_s14 + $0x2c8] sm:$0xff]  ;;  %v6446_v32 = vcombine.low %v1407_v20, %v1411_v21 }
 0x12f   : > { %v1419_v29 = vld [vmem:[%s8542_s14 + $0x2e0] sm:$0xff]  ;;  %v1420_v31 = vld [vmem:[%s8542_s14 + $0x2e8] sm:$0xff]  ;;  %v6448_v33 = vcombine.low %v1408_v22, %v1412_v23 }
 0x130   : > { %v6455_v34 = vcombine.high %v1415_v28, %v1419_v29  ;;  %v6457_v35 = vcombine.high %v1416_v30, %v1420_v31  ;;  %v1423_v36 = vld [vmem:[%s8542_s14 + $0x300] sm:$0xff]  ;;  %v1424_v38 = vld [vmem:[%s8542_s14 + $0x308] sm:$0xff]  ;;  %v6454_v40 = vcombine.low %v1415_v28, %v1419_v29  ;;  %v6456_v41 = vcombine.low %v1416_v30, %v1420_v31 }
 0x131   : > { %4560 = vmatpush1.bf16.msra.mxu0 %v6406_v54  ;;  %4804 = vmatpush1.bf16.msra.mxu1 %v6408_v55  ;;  %v1427_v37 = vld [vmem:[%s8542_s14 + $0x320] sm:$0xff]  ;;  %v1428_v39 = vld [vmem:[%s8542_s14 + $0x328] sm:$0xff] }
 0x132   : > { %4561 = vmatprep.subr.bf16.mxu0 %v6415_v56  ;;  %4805 = vmatprep.subr.bf16.mxu1 %v6417_v57  ;;  %v6463_v42 = vcombine.high %v1423_v36, %v1427_v37  ;;  %v6465_v43 = vcombine.high %v1424_v38, %v1428_v39  ;;  %v1431_v44 = vld [vmem:[%s8542_s14 + $0x340] sm:$0xff]  ;;  %v1432_v46 = vld [vmem:[%s8542_s14 + $0x348] sm:$0xff]  ;;  %v6462_v48 = vcombine.low %v1423_v36, %v1427_v37 }
 0x133   : > { %v1435_v45 = vld [vmem:[%s8542_s14 + $0x360] sm:$0xff]  ;;  %v1436_v47 = vld [vmem:[%s8542_s14 + $0x368] sm:$0xff]  ;;  %v6464_v49 = vcombine.low %v1424_v38, %v1428_v39 }
 0x134   : > { %v6471_v50 = vcombine.high %v1431_v44, %v1435_v45  ;;  %v6473_v51 = vcombine.high %v1432_v46, %v1436_v47  ;;  %v1439_v52 = vld [vmem:[%s8542_s14 + $0x380] sm:$0xff]  ;;  %v1440_v54 = vld [vmem:[%s8542_s14 + $0x388] sm:$0xff]  ;;  %v6470_v56 = vcombine.low %v1431_v44, %v1435_v45  ;;  %v6472_v57 = vcombine.low %v1432_v46, %v1436_v47 }
 0x135   : > { %4562 = vmatpush1.bf16.msra.mxu0 %v6414_v62  ;;  %4806 = vmatpush1.bf16.msra.mxu1 %v6416_v63  ;;  %v1443_v53 = vld [vmem:[%s8542_s14 + $0x3a0] sm:$0xff]  ;;  %v1444_v55 = vld [vmem:[%s8542_s14 + $0x3a8] sm:$0xff] }
 0x136   : > { %4563 = vmatprep.subr.bf16.mxu0 %v6423_v0  ;;  %4807 = vmatprep.subr.bf16.mxu1 %v6425_v1  ;;  %v6479_v58 = vcombine.high %v1439_v52, %v1443_v53  ;;  %v6481_v59 = vcombine.high %v1440_v54, %v1444_v55  ;;  %v1447_v60 = vld [vmem:[%s8542_s14 + $0x3c0] sm:$0xff]  ;;  %v1448_v62 = vld [vmem:[%s8542_s14 + $0x3c8] sm:$0xff]  ;;  %v6478_v0 = vcombine.low %v1439_v52, %v1443_v53 }
 0x137   : > { %v1451_v61 = vld [vmem:[%s8542_s14 + $0x3e0] sm:$0xff]  ;;  %v1452_v63 = vld [vmem:[%s8542_s14 + $0x3e8] sm:$0xff]  ;;  %v6480_v1 = vcombine.low %v1440_v54, %v1444_v55 }
 0x138   : > { %v6487_v4 = vcombine.high %v1447_v60, %v1451_v61  ;;  %v6489_v5 = vcombine.high %v1448_v62, %v1452_v63  ;;  %v1455_v6 = vld [vmem:[%s8542_s14 + $0x400] sm:$0xff]  ;;  %v1476_v28 = vld [vmem:[%s8542_s14 + $0x4a8] sm:$0xff] }
 0x139   : > { %4564 = vmatpush1.bf16.msra.mxu0 %v6422_v8  ;;  %4808 = vmatpush1.bf16.msra.mxu1 %v6424_v9  ;;  %v1459_v7 = vld [vmem:[%s8542_s14 + $0x420] sm:$0xff]  ;;  %v1456_v8 = vld [vmem:[%s8542_s14 + $0x408] sm:$0xff] }
 0x13a   : > { %4565 = vmatprep.subr.bf16.mxu0 %v6431_v10  ;;  %4809 = vmatprep.subr.bf16.mxu1 %v6433_v11  ;;  %v1460_v9 = vld [vmem:[%s8542_s14 + $0x428] sm:$0xff]  ;;  %v6486_v10 = vcombine.low %v1447_v60, %v1451_v61  ;;  %v6488_v11 = vcombine.low %v1448_v62, %v1452_v63  ;;  %v6495_v12 = vcombine.high %v1455_v6, %v1459_v7  ;;  %v1463_v14 = vld [vmem:[%s8542_s14 + $0x440] sm:$0xff] }
 0x13b   : > { %v6497_v13 = vcombine.high %v1456_v8, %v1460_v9  ;;  %v1467_v15 = vld [vmem:[%s8542_s14 + $0x460] sm:$0xff]  ;;  %v6494_v20 = vcombine.low %v1455_v6, %v1459_v7  ;;  %v6496_v21 = vcombine.low %v1456_v8, %v1460_v9  ;;  %v1484_v36 = vld [vmem:[%s8542_s14 + $0x4e8] sm:$0xff] }
 0x13c   : > { %v6503_v22 = vcombine.high %v1463_v14, %v1467_v15  ;;  %v6502_v29 = vcombine.low %v1463_v14, %v1467_v15  ;;  %v1323_v38 = vld [vmem:[%s9619_s0 + $0x80] sm:$0x33]  ;;  %v1488_v46 = vld [vmem:[%s8542_s14 + $0x508] sm:$0xff] }
 0x13d   : > { %4566 = vmatpush1.bf16.msra.mxu0 %v6430_v16  ;;  %4810 = vmatpush1.bf16.msra.mxu1 %v6432_v17  ;;  %v1315_v16 = vld [vmem:[%s9619_s0 + $0x40] sm:$0xff]  ;;  %v1464_v17 = vld [vmem:[%s8542_s14 + $0x448] sm:$0xff]  ;;  %v8645_v45 = vcombine.high %v1323_v38, %v1323_v38 }
 0x13e   : > { %4567 = vmatprep.subr.bf16.mxu0 %v6439_v18  ;;  %4811 = vmatprep.subr.bf16.mxu1 %v6441_v19  ;;  %v1468_v18 = vld [vmem:[%s8542_s14 + $0x468] sm:$0xff]  ;;  %v1319_v19 = vld [vmem:[%s9619_s0 + $0x60] sm:$0xff] }
 0x13f   : > { %v6505_v23 = vcombine.high %v1464_v17, %v1468_v18  ;;  %v6504_v30 = vcombine.low %v1464_v17, %v1468_v18  ;;  %v8638_v37 = vcombine.low %v1315_v16, %v1319_v19  ;;  %v1491_v44 = vld [vmem:[%s8542_s14 + $0x520] sm:$0xff]  ;;  %v1492_v47 = vld [vmem:[%s8542_s14 + $0x528] sm:$0xff] }
 0x140   : > { %v1495_v52 = vld [vmem:[%s8542_s14 + $0x540] sm:$0xff]  ;;  %v1496_v54 = vld [vmem:[%s8542_s14 + $0x548] sm:$0xff]  ;;  %v6528_v60 = vcombine.low %v1488_v46, %v1492_v47 }
 0x141   : > { %4568 = vmatpush1.bf16.msra.mxu0 %v6438_v24  ;;  %4812 = vmatpush1.bf16.msra.mxu1 %v6440_v25  ;;  %v1471_v24 = vld [vmem:[%s8542_s14 + $0x480] sm:$0xff]  ;;  %v1500_v55 = vld [vmem:[%s8542_s14 + $0x568] sm:$0xff] }
 0x142   : > { %4569 = vmatprep.subr.bf16.mxu0 %v6447_v26  ;;  %4813 = vmatprep.subr.bf16.mxu1 %v6449_v27  ;;  %v1475_v25 = vld [vmem:[%s8542_s14 + $0x4a0] sm:$0xff]  ;;  %v8626_v26 = vcombine.high %v1315_v16, %v1319_v19  ;;  %v1472_v27 = vld [vmem:[%s8542_s14 + $0x488] sm:$0xff]  ;;  %v6537_v62 = vcombine.high %v1496_v54, %v1500_v55  ;;  %v6536_v7 = vcombine.low %v1496_v54, %v1500_v55 }
 0x143   : > { %v6511_v31 = vcombine.high %v1471_v24, %v1475_v25  ;;  %v6510_v39 = vcombine.low %v1471_v24, %v1475_v25  ;;  %v1499_v53 = vld [vmem:[%s8542_s14 + $0x560] sm:$0xff]  ;;  %v1552_v55 = vld [vmem:[%s8542_s14 + $0x708] sm:$0xff] }
 0x144   : > { %v6535_v61 = vcombine.high %v1495_v52, %v1499_v53  ;;  %v1503_v63 = vld [vmem:[%s8542_s14 + $0x580] sm:$0xff]  ;;  %v6534_v6 = vcombine.low %v1495_v52, %v1499_v53 }
 0x145   : > { %4570 = vmatpush1.bf16.msra.mxu0 %v6446_v32  ;;  %4814 = vmatpush1.bf16.msra.mxu1 %v6448_v33  ;;  %v6513_v32 = vcombine.high %v1472_v27, %v1476_v28  ;;  %v1479_v33 = vld [vmem:[%s8542_s14 + $0x4c0] sm:$0xff] }
 0x146   : > { %4571 = vmatprep.subr.bf16.mxu0 %v6455_v34  ;;  %4815 = vmatprep.subr.bf16.mxu1 %v6457_v35  ;;  %v1483_v34 = vld [vmem:[%s8542_s14 + $0x4e0] sm:$0xff]  ;;  %v1480_v35 = vld [vmem:[%s8542_s14 + $0x4c8] sm:$0xff] }
 0x147   : > { %v1519_v18 = vld [vmem:[%s8542_s14 + $0x600] sm:$0xff] }
 0x148   : > { %v1523_v19 = vld [vmem:[%s8542_s14 + $0x620] sm:$0xff] }
 0x149   : > { %4572 = vmatpush1.bf16.msra.mxu0 %v6454_v40  ;;  %4816 = vmatpush1.bf16.msra.mxu1 %v6456_v41  ;;  %v6512_v40 = vcombine.low %v1472_v27, %v1476_v28  ;;  %v6519_v41 = vcombine.high %v1479_v33, %v1483_v34  ;;  %v6559_v24 = vcombine.high %v1519_v18, %v1523_v19  ;;  %v1527_v27 = vld [vmem:[%s8542_s14 + $0x640] sm:$0xff] }
 0x14a   : > { %4573 = vmatprep.subr.bf16.mxu0 %v6463_v42  ;;  %4817 = vmatprep.subr.bf16.mxu1 %v6465_v43  ;;  %v6521_v42 = vcombine.high %v1480_v35, %v1484_v36  ;;  %v1487_v43 = vld [vmem:[%s8542_s14 + $0x500] sm:$0xff] }
 0x14b   : > { %v1531_v28 = vld [vmem:[%s8542_s14 + $0x660] sm:$0xff] }
 0x14c   : > { %v1551_v53 = vld [vmem:[%s8542_s14 + $0x700] sm:$0xff] }
 0x14d   : > { %4574 = vmatpush1.bf16.msra.mxu0 %v6462_v48  ;;  %4818 = vmatpush1.bf16.msra.mxu1 %v6464_v49  ;;  %v6518_v48 = vcombine.low %v1479_v33, %v1483_v34  ;;  %v6520_v49 = vcombine.low %v1480_v35, %v1484_v36  ;;  %v6567_v33 = vcombine.high %v1527_v27, %v1531_v28  ;;  %v1535_v35 = vld [vmem:[%s8542_s14 + $0x680] sm:$0xff] }
 0x14e   : > { %4575 = vmatprep.subr.bf16.mxu0 %v6471_v50  ;;  %4819 = vmatprep.subr.bf16.mxu1 %v6473_v51  ;;  %v6527_v50 = vcombine.high %v1487_v43, %v1491_v44  ;;  %v6529_v51 = vcombine.high %v1488_v46, %v1492_v47  ;;  %v1539_v36 = vld [vmem:[%s8542_s14 + $0x6a0] sm:$0xff]  ;;  %v1544_v47 = vld [vmem:[%s8542_s14 + $0x6c8] sm:$0xff] }
 0x14f   : > { %v1547_v46 = vld [vmem:[%s8542_s14 + $0x6e0] sm:$0xff] }
 0x150   : > { %v1555_v54 = vld [vmem:[%s8542_s14 + $0x720] sm:$0xff] }
 0x151   : > { %4576 = vmatpush1.bf16.msra.mxu0 %v6470_v56  ;;  %4820 = vmatpush1.bf16.msra.mxu1 %v6472_v57  ;;  %v8657_v56 = vcombine.low %v1323_v38, %v1323_v38  ;;  %v8662_v57 = vld [vmem:[%s9619_s0 + $0x8] sm:$0xff] }
 0x152   : > { %4577 = vmatprep.subr.bf16.mxu0 %v6479_v58  ;;  %4821 = vmatprep.subr.bf16.mxu1 %v6481_v59  ;;  %v8667_v58 = vld [vmem:[%s9619_s0 + $0x28] sm:$0xff]  ;;  %v6526_v59 = vcombine.low %v1487_v43, %v1491_v44  ;;  %v1543_v44 = vld [vmem:[%s8542_s14 + $0x6c0] sm:$0xff] }
 0x153   : > { %v1536_v38 = vld [vmem:[%s8542_s14 + $0x688] sm:$0xff] }
 0x155   : > { %4578 = vmatpush1.bf16.msra.mxu0 %v6478_v0  ;;  %4822 = vmatpush1.bf16.msra.mxu1 %v6480_v1  ;;  %v1507_v0 = vld [vmem:[%s8542_s14 + $0x5a0] sm:$0xff]  ;;  %v8673_v1 = vcombine.high %v8662_v57, %v8667_v58 }
 0x156   : > { %4579 = vmatprep.subr.bf16.mxu0 %v6487_v4  ;;  %4823 = vmatprep.subr.bf16.mxu1 %v6489_v5  ;;  %v1504_v4 = vld [vmem:[%s8542_s14 + $0x588] sm:$0xff]  ;;  %v6543_v8 = vcombine.high %v1503_v63, %v1507_v0  ;;  %v6542_v14 = vcombine.low %v1503_v63, %v1507_v0  ;;  %v1559_v0 = vld [vmem:[%s8542_s14 + $0x740] sm:$0xff] }
 0x157   : > { %v1508_v5 = vld [vmem:[%s8542_s14 + $0x5a8] sm:$0xff] }
 0x158   : > { %v6545_v9 = vcombine.high %v1504_v4, %v1508_v5  ;;  %v6544_v15 = vcombine.low %v1504_v4, %v1508_v5  ;;  %v1563_v4 = vld [vmem:[%s8542_s14 + $0x760] sm:$0xff]  ;;  %v1560_v5 = vld [vmem:[%s8542_s14 + $0x748] sm:$0xff] }
 0x159   : > { %4580 = vmatpush1.bf16.msra.mxu0 %v6486_v10  ;;  %4824 = vmatpush1.bf16.msra.mxu1 %v6488_v11  ;;  %v1511_v10 = vld [vmem:[%s8542_s14 + $0x5c0] sm:$0xff] }
 0x15a   : > { %4610 = vmatprep.subr.bf16.mxu0 %v6495_v12  ;;  %4854 = vmatprep.subr.bf16.mxu1 %v6497_v13  ;;  %v1515_v11 = vld [vmem:[%s8542_s14 + $0x5e0] sm:$0xff]  ;;  %v1512_v12 = vld [vmem:[%s8542_s14 + $0x5c8] sm:$0xff] }
 0x15b   : > { %v1516_v13 = vld [vmem:[%s8542_s14 + $0x5e8] sm:$0xff]  ;;  %v6551_v16 = vcombine.high %v1511_v10, %v1515_v11 }
 0x15c   : > { %4582 = vmatmul.mubr.bf16.vlgmr.msra.gmra.mrb[0].mxu0 %v8540_v3  ;;  %4826 = vmatmul.mubr.bf16.vlgmr.msra.gmra.mrb[0].mxu1 %v8540_v3  ;;  %v6553_v17 = vcombine.high %v1512_v12, %v1516_v13 }
 0x15d   : > { %4611 = vmatpush1.bf16.msra.mxu0 %v6494_v20  ;;  %4855 = vmatpush1.bf16.msra.mxu1 %v6496_v21  ;;  %v1520_v20 = vld [vmem:[%s8542_s14 + $0x608] sm:$0xff] }
 0x15e   : > { %4612 = vmatprep.subr.bf16.mxu0 %v6503_v22  ;;  %4856 = vmatprep.subr.bf16.mxu1 %v6505_v23  ;;  %v1524_v21 = vld [vmem:[%s8542_s14 + $0x628] sm:$0xff]  ;;  %v6550_v22 = vcombine.low %v1511_v10, %v1515_v11  ;;  %v6552_v23 = vcombine.low %v1512_v12, %v1516_v13  ;;  %v1567_v11 = vld [vmem:[%s8542_s14 + $0x780] sm:$0xff] }
 0x15f   : > { %4591 = vmatprep.mubr.bf16.mxu0 %v8626_v26  ;;  %4835 = vmatprep.mubr.bf16.mxu1 %v8626_v26  ;;  %v6561_v25 = vcombine.high %v1520_v20, %v1524_v21  ;;  %v1571_v12 = vld [vmem:[%s8542_s14 + $0x7a0] sm:$0xff]  ;;  %v1568_v13 = vld [vmem:[%s8542_s14 + $0x788] sm:$0xff] }
 0x161   : > { %4613 = vmatpush1.bf16.msra.mxu0 %v6502_v29  ;;  %4857 = vmatpush1.bf16.msra.mxu1 %v6504_v30  ;;  %v1528_v29 = vld [vmem:[%s8542_s14 + $0x648] sm:$0xff] }
 0x162   : > { %4614 = vmatprep.subr.bf16.mxu0 %v6511_v31  ;;  %4858 = vmatprep.subr.bf16.mxu1 %v6513_v32  ;;  %v1532_v30 = vld [vmem:[%s8542_s14 + $0x668] sm:$0xff]  ;;  %v6558_v31 = vcombine.low %v1519_v18, %v1523_v19  ;;  %v6560_v32 = vcombine.low %v1520_v20, %v1524_v21  ;;  %v1575_v19 = vld [vmem:[%s8542_s14 + $0x7c0] sm:$0xff] }
 0x163   : > { %v6569_v34 = vcombine.high %v1528_v29, %v1532_v30  ;;  %v1579_v20 = vld [vmem:[%s8542_s14 + $0x7e0] sm:$0xff]  ;;  %v1576_v21 = vld [vmem:[%s8542_s14 + $0x7c8] sm:$0xff] }
 0x164   : > { %4592 = vmatmul.mubr.bf16.gmra.mrb[4].mxu0 %v8638_v37  ;;  %4836 = vmatmul.mubr.bf16.gmra.mrb[4].mxu1 %v8638_v37 }
 0x165   : > { %4615 = vmatpush1.bf16.msra.mxu0 %v6510_v39  ;;  %4859 = vmatpush1.bf16.msra.mxu1 %v6512_v40  ;;  %v1540_v39 = vld [vmem:[%s8542_s14 + $0x6a8] sm:$0xff]  ;;  %v6566_v40 = vcombine.low %v1527_v27, %v1531_v28  ;;  %v1583_v28 = vld [vmem:[%s8542_s14 + $0x800] sm:$0xff] }
 0x166   : > { %4616 = vmatprep.subr.bf16.mxu0 %v6519_v41  ;;  %4860 = vmatprep.subr.bf16.mxu1 %v6521_v42  ;;  %v6568_v41 = vcombine.low %v1528_v29, %v1532_v30  ;;  %v6575_v42 = vcombine.high %v1535_v35, %v1539_v36  ;;  %v6577_v43 = vcombine.high %v1536_v38, %v1540_v39  ;;  %v1587_v29 = vld [vmem:[%s8542_s14 + $0x820] sm:$0xff]  ;;  %v1584_v30 = vld [vmem:[%s8542_s14 + $0x808] sm:$0xff] }
 0x167   : > { %4601 = vmatprep.mubr.bf16.mxu0 %v8645_v45  ;;  %4845 = vmatprep.mubr.bf16.mxu1 %v8645_v45 }
 0x169   : > { %4617 = vmatpush1.bf16.msra.mxu0 %v6518_v48  ;;  %4861 = vmatpush1.bf16.msra.mxu1 %v6520_v49  ;;  %v1548_v48 = vld [vmem:[%s8542_s14 + $0x6e8] sm:$0xff]  ;;  %v6574_v49 = vcombine.low %v1535_v35, %v1539_v36  ;;  %v1591_v36 = vld [vmem:[%s8542_s14 + $0x840] sm:$0xff] }
 0x16a   : > { %4618 = vmatprep.subr.bf16.mxu0 %v6527_v50  ;;  %4862 = vmatprep.subr.bf16.mxu1 %v6529_v51  ;;  %v6576_v50 = vcombine.low %v1536_v38, %v1540_v39  ;;  %v6583_v51 = vcombine.high %v1543_v44, %v1547_v46  ;;  %v6585_v52 = vcombine.high %v1544_v47, %v1548_v48  ;;  %v1595_v38 = vld [vmem:[%s8542_s14 + $0x860] sm:$0xff]  ;;  %v1592_v39 = vld [vmem:[%s8542_s14 + $0x848] sm:$0xff] }
 0x16c   : > { %4602 = vmatmul.mubr.bf16.gmra.mrb[8].mxu0 %v8657_v56  ;;  %4846 = vmatmul.mubr.bf16.gmra.mrb[8].mxu1 %v8657_v56 }
 0x16d   : > { %4619 = vmatpush1.bf16.msra.mxu0 %v6526_v59  ;;  %4863 = vmatpush1.bf16.msra.mxu1 %v6528_v60  ;;  %v1556_v59 = vld [vmem:[%s8542_s14 + $0x728] sm:$0xff]  ;;  %v6582_v60 = vcombine.low %v1543_v44, %v1547_v46  ;;  %v6622_v44 = vcombine.low %v1583_v28, %v1587_v29 }
 0x16e   : > { %4620 = vmatprep.subr.bf16.mxu0 %v6535_v61  ;;  %4864 = vmatprep.subr.bf16.mxu1 %v6537_v62  ;;  %v6584_v61 = vcombine.low %v1544_v47, %v1548_v48  ;;  %v6591_v62 = vcombine.high %v1551_v53, %v1555_v54  ;;  %v6593_v63 = vcombine.high %v1552_v55, %v1556_v59  ;;  %v1603_v48 = vld [vmem:[%s8542_s14 + $0x8a0] sm:$0xff] }
 0x16f   : > { %4642 = vmatprep.mubr.bf16.mxu0 %v8673_v1  ;;  %4886 = vmatprep.mubr.bf16.mxu1 %v8673_v1  ;;  %v6631_v47 = vcombine.high %v1591_v36, %v1595_v38 }
 0x171   : > { %4621 = vmatpush1.bf16.msra.mxu0 %v6534_v6  ;;  %4865 = vmatpush1.bf16.msra.mxu1 %v6536_v7  ;;  %v1564_v6 = vld [vmem:[%s8542_s14 + $0x768] sm:$0xff]  ;;  %v6590_v7 = vcombine.low %v1551_v53, %v1555_v54 }
 0x172   : > { %4622 = vmatprep.subr.bf16.mxu0 %v6543_v8  ;;  %4866 = vmatprep.subr.bf16.mxu1 %v6545_v9  ;;  %v6592_v8 = vcombine.low %v1552_v55, %v1556_v59  ;;  %v6599_v9 = vcombine.high %v1559_v0, %v1563_v4  ;;  %v6601_v10 = vcombine.high %v1560_v5, %v1564_v6  ;;  %v1607_v59 = vld [vmem:[%s8542_s14 + $0x8c0] sm:$0xff] }
 0x175   : > { %4623 = vmatpush1.bf16.msra.mxu0 %v6542_v14  ;;  %4867 = vmatpush1.bf16.msra.mxu1 %v6544_v15  ;;  %v1572_v14 = vld [vmem:[%s8542_s14 + $0x7a8] sm:$0xff]  ;;  %v6598_v15 = vcombine.low %v1559_v0, %v1563_v4 }
 0x176   : > { %4624 = vmatprep.subr.bf16.mxu0 %v6551_v16  ;;  %4868 = vmatprep.subr.bf16.mxu1 %v6553_v17  ;;  %v6600_v16 = vcombine.low %v1560_v5, %v1564_v6  ;;  %v6607_v17 = vcombine.high %v1567_v11, %v1571_v12  ;;  %v6609_v18 = vcombine.high %v1568_v13, %v1572_v14  ;;  %v1324_v0 = vld [vmem:[%s9619_s0 + $0x88] sm:$0x33] }
 0x179   : > { %4625 = vmatpush1.bf16.msra.mxu0 %v6550_v22  ;;  %4869 = vmatpush1.bf16.msra.mxu1 %v6552_v23  ;;  %v1580_v22 = vld [vmem:[%s8542_s14 + $0x7e8] sm:$0xff]  ;;  %v6606_v23 = vcombine.low %v1567_v11, %v1571_v12 }
 0x17a   : > { %4626 = vmatprep.subr.bf16.mxu0 %v6559_v24  ;;  %4870 = vmatprep.subr.bf16.mxu1 %v6561_v25  ;;  %v6608_v24 = vcombine.low %v1568_v13, %v1572_v14  ;;  %v6615_v25 = vcombine.high %v1575_v19, %v1579_v20  ;;  %v6617_v27 = vcombine.high %v1576_v21, %v1580_v22  ;;  %v1616_v11 = vld [vmem:[%s8542_s14 + $0x908] sm:$0xff] }
 0x17b   : > { %v1620_v12 = vld [vmem:[%s8542_s14 + $0x928] sm:$0xff] }
 0x17d   : > { %4627 = vmatpush1.bf16.msra.mxu0 %v6558_v31  ;;  %4871 = vmatpush1.bf16.msra.mxu1 %v6560_v32  ;;  %v1588_v31 = vld [vmem:[%s8542_s14 + $0x828] sm:$0xff]  ;;  %v6614_v32 = vcombine.low %v1575_v19, %v1579_v20 }
 0x17e   : > { %4628 = vmatprep.subr.bf16.mxu0 %v6567_v33  ;;  %4872 = vmatprep.subr.bf16.mxu1 %v6569_v34  ;;  %v6616_v33 = vcombine.low %v1576_v21, %v1580_v22  ;;  %v6623_v34 = vcombine.high %v1583_v28, %v1587_v29  ;;  %v6625_v35 = vcombine.high %v1584_v30, %v1588_v31  ;;  %v1624_v19 = vld [vmem:[%s8542_s14 + $0x948] sm:$0xff]  ;;  %v8773_v22 = vld [vmem:[%s9619_s0 + $0x10] sm:$0xff]  ;;  %v1631_v29 = vld [vmem:[%s8542_s14 + $0x980] sm:$0xff] }
 0x17f   : > { %v6624_v46 = vcombine.low %v1584_v30, %v1588_v31  ;;  %v1628_v20 = vld [vmem:[%s8542_s14 + $0x968] sm:$0xff]  ;;  %v8768_v21 = vcombine.low %v1324_v0, %v1324_v0  ;;  %v1635_v30 = vld [vmem:[%s8542_s14 + $0x9a0] sm:$0xff] }
 0x180   : > { %v6665_v28 = vcombine.high %v1624_v19, %v1628_v20 }
 0x181   : > { %4629 = vmatpush1.bf16.msra.mxu0 %v6566_v40  ;;  %4873 = vmatpush1.bf16.msra.mxu1 %v6568_v41  ;;  %v8726_v40 = vcombine.low %v8662_v57, %v8667_v58  ;;  %v1596_v41 = vld [vmem:[%s8542_s14 + $0x868] sm:$0xff]  ;;  %v1599_v58 = vld [vmem:[%s8542_s14 + $0x880] sm:$0xff] }
 0x182   : > { %4630 = vmatprep.subr.bf16.mxu0 %v6575_v42  ;;  %4874 = vmatprep.subr.bf16.mxu1 %v6577_v43  ;;  %v1316_v42 = vld [vmem:[%s9619_s0 + $0x48] sm:$0xff]  ;;  %v6633_v57 = vcombine.high %v1592_v39, %v1596_v41  ;;  %v6632_v53 = vcombine.low %v1592_v39, %v1596_v41  ;;  %v6639_v54 = vcombine.high %v1599_v58, %v1603_v48  ;;  %v1639_v39 = vld [vmem:[%s8542_s14 + $0x9c0] sm:$0xff] }
 0x183   : > { %v1320_v43 = vld [vmem:[%s9619_s0 + $0x68] sm:$0xff]  ;;  %v6638_v4 = vcombine.low %v1599_v58, %v1603_v48  ;;  %v1643_v41 = vld [vmem:[%s8542_s14 + $0x9e0] sm:$0xff] }
 0x184   : > { %v1647_v58 = vld [vmem:[%s8542_s14 + $0xa00] sm:$0xff] }
 0x185   : > { %4631 = vmatpush1.bf16.msra.mxu0 %v6574_v49  ;;  %4875 = vmatpush1.bf16.msra.mxu1 %v6576_v50  ;;  %v8737_v49 = vcombine.high %v1316_v42, %v1320_v43  ;;  %v1600_v50 = vld [vmem:[%s8542_s14 + $0x888] sm:$0xff]  ;;  %v1651_v48 = vld [vmem:[%s8542_s14 + $0xa20] sm:$0xff] }
 0x186   : > { %4632 = vmatprep.subr.bf16.mxu0 %v6583_v51  ;;  %4876 = vmatprep.subr.bf16.mxu1 %v6585_v52  ;;  %v1604_v51 = vld [vmem:[%s8542_s14 + $0x8a8] sm:$0xff]  ;;  %v6630_v52 = vcombine.low %v1591_v36, %v1595_v38  ;;  %v6671_v36 = vcombine.high %v1631_v29, %v1635_v30 }
 0x187   : > { %v6641_v55 = vcombine.high %v1600_v50, %v1604_v51  ;;  %v6640_v5 = vcombine.low %v1600_v50, %v1604_v51  ;;  %v1648_v50 = vld [vmem:[%s8542_s14 + $0xa08] sm:$0xff] }
 0x188   : > { %v1652_v51 = vld [vmem:[%s8542_s14 + $0xa28] sm:$0xff] }
 0x189   : > { %4633 = vmatpush1.bf16.msra.mxu0 %v6582_v60  ;;  %4877 = vmatpush1.bf16.msra.mxu1 %v6584_v61  ;;  %v1611_v60 = vld [vmem:[%s8542_s14 + $0x8e0] sm:$0xff]  ;;  %v1608_v61 = vld [vmem:[%s8542_s14 + $0x8c8] sm:$0xff] }
 0x18a   : > { %4634 = vmatprep.subr.bf16.mxu0 %v6591_v62  ;;  %4878 = vmatprep.subr.bf16.mxu1 %v6593_v63  ;;  %v1612_v62 = vld [vmem:[%s8542_s14 + $0x8e8] sm:$0xff]  ;;  %v8749_v63 = vcombine.low %v1316_v42, %v1320_v43  ;;  %v6647_v6 = vcombine.high %v1607_v59, %v1611_v60  ;;  %v6646_v13 = vcombine.low %v1607_v59, %v1611_v60  ;;  %v1655_v59 = vld [vmem:[%s8542_s14 + $0xa40] sm:$0xff] }
 0x18b   : > { %v6648_v14 = vcombine.low %v1608_v61, %v1612_v62  ;;  %v1640_v42 = vld [vmem:[%s8542_s14 + $0x9c8] sm:$0xff]  ;;  %v1659_v60 = vld [vmem:[%s8542_s14 + $0xa60] sm:$0xff] }
 0x18c   : > { %v1644_v43 = vld [vmem:[%s8542_s14 + $0x9e8] sm:$0xff] }
 0x18d   : > { %4635 = vmatpush1.bf16.msra.mxu0 %v6590_v7  ;;  %4879 = vmatpush1.bf16.msra.mxu1 %v6592_v8  ;;  %v6649_v7 = vcombine.high %v1608_v61, %v1612_v62  ;;  %v1615_v8 = vld [vmem:[%s8542_s14 + $0x900] sm:$0xff]  ;;  %v1656_v61 = vld [vmem:[%s8542_s14 + $0xa48] sm:$0xff] }
 0x18e   : > { %4636 = vmatprep.subr.bf16.mxu0 %v6599_v9  ;;  %4880 = vmatprep.subr.bf16.mxu1 %v6601_v10  ;;  %v1619_v9 = vld [vmem:[%s8542_s14 + $0x920] sm:$0xff]  ;;  %v8756_v10 = vcombine.high %v1324_v0, %v1324_v0  ;;  %v1660_v62 = vld [vmem:[%s8542_s14 + $0xa68] sm:$0xff]  ;;  %v6686_v0 = vcombine.low %v1647_v58, %v1651_v48 }
 0x191   : > { %4637 = vmatpush1.bf16.msra.mxu0 %v6598_v15  ;;  %4881 = vmatpush1.bf16.msra.mxu1 %v6600_v16  ;;  %v6655_v15 = vcombine.high %v1615_v8, %v1619_v9  ;;  %v6657_v16 = vcombine.high %v1616_v11, %v1620_v12 }
 0x192   : > { %4638 = vmatprep.subr.bf16.mxu0 %v6607_v17  ;;  %4882 = vmatprep.subr.bf16.mxu1 %v6609_v18  ;;  %v1623_v17 = vld [vmem:[%s8542_s14 + $0x940] sm:$0xff] }
 0x193   : > { %v1627_v18 = vld [vmem:[%s8542_s14 + $0x960] sm:$0xff] }
 0x195   : > { %4639 = vmatpush1.bf16.msra.mxu0 %v6606_v23  ;;  %4883 = vmatpush1.bf16.msra.mxu1 %v6608_v24  ;;  %v8778_v23 = vld [vmem:[%s9619_s0 + $0x30] sm:$0xff]  ;;  %v6654_v24 = vcombine.low %v1615_v8, %v1619_v9  ;;  %v1667_v8 = vld [vmem:[%s8542_s14 + $0xaa0] sm:$0xff]  ;;  %v1664_v9 = vld [vmem:[%s8542_s14 + $0xa88] sm:$0xff] }
 0x196   : > { %4640 = vmatprep.subr.bf16.mxu0 %v6615_v25  ;;  %4884 = vmatprep.subr.bf16.mxu1 %v6617_v27  ;;  %v6656_v25 = vcombine.low %v1616_v11, %v1620_v12  ;;  %v6663_v27 = vcombine.high %v1623_v17, %v1627_v18  ;;  %v8784_v31 = vcombine.high %v8773_v22, %v8778_v23  ;;  %v1668_v11 = vld [vmem:[%s8542_s14 + $0xaa8] sm:$0xff] }
 0x197   : > { %v6694_v12 = vcombine.low %v1655_v59, %v1659_v60 }
 0x199   : > { %4641 = vmatpush1.bf16.msra.mxu0 %v6614_v32  ;;  %4885 = vmatpush1.bf16.msra.mxu1 %v6616_v33  ;;  %v1632_v32 = vld [vmem:[%s8542_s14 + $0x988] sm:$0xff] }
 0x19a   : > { %4671 = vmatprep.subr.bf16.mxu0 %v6623_v34  ;;  %4915 = vmatprep.subr.bf16.mxu1 %v6625_v35  ;;  %v1636_v33 = vld [vmem:[%s8542_s14 + $0x9a8] sm:$0xff]  ;;  %v6662_v34 = vcombine.low %v1623_v17, %v1627_v18  ;;  %v6664_v35 = vcombine.low %v1624_v19, %v1628_v20  ;;  %v1675_v17 = vld [vmem:[%s8542_s14 + $0xae0] sm:$0xff] }
 0x19b   : > { %v6673_v38 = vcombine.high %v1632_v32, %v1636_v33  ;;  %v1672_v18 = vld [vmem:[%s8542_s14 + $0xac8] sm:$0xff] }
 0x19c   : > { %4643 = vmatmul.mubr.bf16.vlgmr.msra.gmra.mrb[0].mxu0 %v8726_v40  ;;  %4887 = vmatmul.mubr.bf16.vlgmr.msra.gmra.mrb[0].mxu1 %v8726_v40  ;;  %v1676_v19 = vld [vmem:[%s8542_s14 + $0xae8] sm:$0xff] }
 0x19d   : > { %4672 = vmatpush1.bf16.msra.mxu0 %v6622_v44  ;;  %4916 = vmatpush1.bf16.msra.mxu1 %v6624_v46  ;;  %v6670_v44 = vcombine.low %v1631_v29, %v1635_v30  ;;  %v6672_v46 = vcombine.low %v1632_v32, %v1636_v33  ;;  %v1683_v29 = vld [vmem:[%s8542_s14 + $0xb20] sm:$0xff]  ;;  %v1680_v30 = vld [vmem:[%s8542_s14 + $0xb08] sm:$0xff] }
 0x19e   : > { %4673 = vmatprep.subr.bf16.mxu0 %v6631_v47  ;;  %4917 = vmatprep.subr.bf16.mxu1 %v6633_v57  ;;  %v6679_v47 = vcombine.high %v1639_v39, %v1643_v41  ;;  %v6681_v57 = vcombine.high %v1640_v42, %v1644_v43  ;;  %v1684_v32 = vld [vmem:[%s8542_s14 + $0xb28] sm:$0xff] }
 0x19f   : > { %4652 = vmatprep.mubr.bf16.mxu0 %v8737_v49  ;;  %4896 = vmatprep.mubr.bf16.mxu1 %v8737_v49 }
 0x1a1   : > { %4674 = vmatpush1.bf16.msra.mxu0 %v6630_v52  ;;  %4918 = vmatpush1.bf16.msra.mxu1 %v6632_v53  ;;  %v6678_v52 = vcombine.low %v1639_v39, %v1643_v41  ;;  %v6680_v53 = vcombine.low %v1640_v42, %v1644_v43  ;;  %v1691_v39 = vld [vmem:[%s8542_s14 + $0xb60] sm:$0xff]  ;;  %v1688_v41 = vld [vmem:[%s8542_s14 + $0xb48] sm:$0xff] }
 0x1a2   : > { %4675 = vmatprep.subr.bf16.mxu0 %v6639_v54  ;;  %4919 = vmatprep.subr.bf16.mxu1 %v6641_v55  ;;  %v6687_v54 = vcombine.high %v1647_v58, %v1651_v48  ;;  %v6689_v55 = vcombine.high %v1648_v50, %v1652_v51  ;;  %v1692_v42 = vld [vmem:[%s8542_s14 + $0xb68] sm:$0xff]  ;;  %v1699_v58 = vld [vmem:[%s8542_s14 + $0xba0] sm:$0xff] }
 0x1a3   : > { %v1696_v48 = vld [vmem:[%s8542_s14 + $0xb88] sm:$0xff] }
 0x1a4   : > { %4653 = vmatmul.mubr.bf16.gmra.mrb[4].mxu0 %v8749_v63  ;;  %4897 = vmatmul.mubr.bf16.gmra.mrb[4].mxu1 %v8749_v63 }
 0x1a5   : > { %4676 = vmatpush1.bf16.msra.mxu0 %v6638_v4  ;;  %4920 = vmatpush1.bf16.msra.mxu1 %v6640_v5  ;;  %v6688_v4 = vcombine.low %v1648_v50, %v1652_v51  ;;  %v6695_v5 = vcombine.high %v1655_v59, %v1659_v60  ;;  %v1700_v50 = vld [vmem:[%s8542_s14 + $0xba8] sm:$0xff]  ;;  %v1707_v59 = vld [vmem:[%s8542_s14 + $0xbe0] sm:$0xff] }
 0x1a6   : > { %4677 = vmatprep.subr.bf16.mxu0 %v6647_v6  ;;  %4921 = vmatprep.subr.bf16.mxu1 %v6649_v7  ;;  %v6697_v6 = vcombine.high %v1656_v61, %v1660_v62  ;;  %v1663_v7 = vld [vmem:[%s8542_s14 + $0xa80] sm:$0xff]  ;;  %v1704_v60 = vld [vmem:[%s8542_s14 + $0xbc8] sm:$0xff] }
 0x1a7   : > { %4662 = vmatprep.mubr.bf16.mxu0 %v8756_v10  ;;  %4906 = vmatprep.mubr.bf16.mxu1 %v8756_v10  ;;  %v6702_v20 = vcombine.low %v1663_v7, %v1667_v8 }
 0x1a9   : > { %4678 = vmatpush1.bf16.msra.mxu0 %v6646_v13  ;;  %4922 = vmatpush1.bf16.msra.mxu1 %v6648_v14  ;;  %v6696_v13 = vcombine.low %v1656_v61, %v1660_v62  ;;  %v6703_v14 = vcombine.high %v1663_v7, %v1667_v8  ;;  %v1708_v61 = vld [vmem:[%s8542_s14 + $0xbe8] sm:$0xff]  ;;  %v1715_v7 = vld [vmem:[%s8542_s14 + $0xc20] sm:$0xff] }
 0x1aa   : > { %4679 = vmatprep.subr.bf16.mxu0 %v6655_v15  ;;  %4923 = vmatprep.subr.bf16.mxu1 %v6657_v16  ;;  %v6705_v15 = vcombine.high %v1664_v9, %v1668_v11  ;;  %v1671_v16 = vld [vmem:[%s8542_s14 + $0xac0] sm:$0xff]  ;;  %v1712_v8 = vld [vmem:[%s8542_s14 + $0xc08] sm:$0xff] }
 0x1ab   : > { %v6710_v33 = vcombine.low %v1671_v16, %v1675_v17 }
 0x1ac   : > { %4663 = vmatmul.mubr.bf16.gmra.mrb[8].mxu0 %v8768_v21  ;;  %4907 = vmatmul.mubr.bf16.gmra.mrb[8].mxu1 %v8768_v21 }
 0x1ad   : > { %4680 = vmatpush1.bf16.msra.mxu0 %v6654_v24  ;;  %4924 = vmatpush1.bf16.msra.mxu1 %v6656_v25  ;;  %v6704_v24 = vcombine.low %v1664_v9, %v1668_v11  ;;  %v6711_v25 = vcombine.high %v1671_v16, %v1675_v17  ;;  %v1716_v9 = vld [vmem:[%s8542_s14 + $0xc28] sm:$0xff]  ;;  %v1723_v16 = vld [vmem:[%s8542_s14 + $0xc60] sm:$0xff] }
 0x1ae   : > { %4681 = vmatprep.subr.bf16.mxu0 %v6663_v27  ;;  %4925 = vmatprep.subr.bf16.mxu1 %v6665_v28  ;;  %v6713_v27 = vcombine.high %v1672_v18, %v1676_v19  ;;  %v1679_v28 = vld [vmem:[%s8542_s14 + $0xb00] sm:$0xff]  ;;  %v1720_v17 = vld [vmem:[%s8542_s14 + $0xc48] sm:$0xff] }
 0x1af   : > { %4703 = vmatprep.mubr.bf16.mxu0 %v8784_v31  ;;  %4947 = vmatprep.mubr.bf16.mxu1 %v8784_v31  ;;  %v6718_v43 = vcombine.low %v1679_v28, %v1683_v29 }
 0x1b1   : > { %4682 = vmatpush1.bf16.msra.mxu0 %v6662_v34  ;;  %4926 = vmatpush1.bf16.msra.mxu1 %v6664_v35  ;;  %v6712_v34 = vcombine.low %v1672_v18, %v1676_v19  ;;  %v6719_v35 = vcombine.high %v1679_v28, %v1683_v29  ;;  %v8837_v18 = vcombine.low %v8773_v22, %v8778_v23  ;;  %v1724_v19 = vld [vmem:[%s8542_s14 + $0xc68] sm:$0xff]  ;;  %v1727_v23 = vld [vmem:[%s8542_s14 + $0xc80] sm:$0xff] }
 0x1b2   : > { %4683 = vmatprep.subr.bf16.mxu0 %v6671_v36  ;;  %4927 = vmatprep.subr.bf16.mxu1 %v6673_v38  ;;  %v6721_v36 = vcombine.high %v1680_v30, %v1684_v32  ;;  %v1687_v38 = vld [vmem:[%s8542_s14 + $0xb40] sm:$0xff]  ;;  %v6761_v22 = vcombine.high %v1720_v17, %v1724_v19 }
 0x1b3   : > { %v6726_v51 = vcombine.low %v1687_v38, %v1691_v39  ;;  %v1731_v29 = vld [vmem:[%s8542_s14 + $0xca0] sm:$0xff] }
 0x1b5   : > { %4684 = vmatpush1.bf16.msra.mxu0 %v6670_v44  ;;  %4928 = vmatpush1.bf16.msra.mxu1 %v6672_v46  ;;  %v6720_v44 = vcombine.low %v1680_v30, %v1684_v32  ;;  %v6727_v46 = vcombine.high %v1687_v38, %v1691_v39  ;;  %v1728_v32 = vld [vmem:[%s8542_s14 + $0xc88] sm:$0xff]  ;;  %v1735_v39 = vld [vmem:[%s8542_s14 + $0xcc0] sm:$0xff] }
 0x1b6   : > { %4685 = vmatprep.subr.bf16.mxu0 %v6679_v47  ;;  %4929 = vmatprep.subr.bf16.mxu1 %v6681_v57  ;;  %v6729_v47 = vcombine.high %v1688_v41, %v1692_v42  ;;  %v1695_v57 = vld [vmem:[%s8542_s14 + $0xb80] sm:$0xff] }
 0x1b7   : > { %v6734_v62 = vcombine.low %v1695_v57, %v1699_v58 }
 0x1b9   : > { %4686 = vmatpush1.bf16.msra.mxu0 %v6678_v52  ;;  %4930 = vmatpush1.bf16.msra.mxu1 %v6680_v53  ;;  %v6728_v52 = vcombine.low %v1688_v41, %v1692_v42  ;;  %v6735_v53 = vcombine.high %v1695_v57, %v1699_v58  ;;  %v1739_v41 = vld [vmem:[%s8542_s14 + $0xce0] sm:$0xff]  ;;  %v1736_v42 = vld [vmem:[%s8542_s14 + $0xcc8] sm:$0xff] }
 0x1ba   : > { %4687 = vmatprep.subr.bf16.mxu0 %v6687_v54  ;;  %4931 = vmatprep.subr.bf16.mxu1 %v6689_v55  ;;  %v6737_v54 = vcombine.high %v1696_v48, %v1700_v50  ;;  %v1703_v55 = vld [vmem:[%s8542_s14 + $0xbc0] sm:$0xff]  ;;  %v6775_v58 = vcombine.high %v1735_v39, %v1739_v41 }
 0x1bb   : > { %v6742_v11 = vcombine.low %v1703_v55, %v1707_v59 }
 0x1bd   : > { %4688 = vmatpush1.bf16.msra.mxu0 %v6686_v0  ;;  %4932 = vmatpush1.bf16.msra.mxu1 %v6688_v4  ;;  %v6736_v0 = vcombine.low %v1696_v48, %v1700_v50  ;;  %v6743_v4 = vcombine.high %v1703_v55, %v1707_v59  ;;  %v1743_v50 = vld [vmem:[%s8542_s14 + $0xd00] sm:$0xff]  ;;  %v6774_v55 = vcombine.low %v1735_v39, %v1739_v41  ;;  %v1776_v39 = vld [vmem:[%s8542_s14 + $0xe08] sm:$0xff] }
 0x1be   : > { %4689 = vmatprep.subr.bf16.mxu0 %v6695_v5  ;;  %4933 = vmatprep.subr.bf16.mxu1 %v6697_v6  ;;  %v6745_v5 = vcombine.high %v1704_v60, %v1708_v61  ;;  %v1711_v6 = vld [vmem:[%s8542_s14 + $0xc00] sm:$0xff]  ;;  %v1780_v41 = vld [vmem:[%s8542_s14 + $0xe28] sm:$0xff] }
 0x1c1   : > { %4690 = vmatpush1.bf16.msra.mxu0 %v6694_v12  ;;  %4934 = vmatpush1.bf16.msra.mxu1 %v6696_v13  ;;  %v6744_v12 = vcombine.low %v1704_v60, %v1708_v61  ;;  %v6751_v13 = vcombine.high %v1711_v6, %v1715_v7 }
 0x1c2   : > { %4691 = vmatprep.subr.bf16.mxu0 %v6703_v14  ;;  %4935 = vmatprep.subr.bf16.mxu1 %v6705_v15  ;;  %v6753_v14 = vcombine.high %v1712_v8, %v1716_v9  ;;  %v1719_v15 = vld [vmem:[%s8542_s14 + $0xc40] sm:$0xff] }
 0x1c3   : > { %v6759_v28 = vcombine.high %v1719_v15, %v1723_v16 }
 0x1c5   : > { %4692 = vmatpush1.bf16.msra.mxu0 %v6702_v20  ;;  %4936 = vmatpush1.bf16.msra.mxu1 %v6704_v24  ;;  %v1317_v20 = vld [vmem:[%s9619_s0 + $0x50] sm:$0xff] }
 0x1c6   : > { %4693 = vmatprep.subr.bf16.mxu0 %v6711_v25  ;;  %4937 = vmatprep.subr.bf16.mxu1 %v6713_v27  ;;  %v1321_v24 = vld [vmem:[%s9619_s0 + $0x70] sm:$0xff]  ;;  %v6750_v25 = vcombine.low %v1711_v6, %v1715_v7  ;;  %v6752_v27 = vcombine.low %v1712_v8, %v1716_v9  ;;  %v8884_v7 = vld [vmem:[%s9619_s0 + $0x18] sm:$0xff] }
 0x1c7   : > { %v8848_v30 = vcombine.high %v1317_v20, %v1321_v24  ;;  %v8889_v8 = vld [vmem:[%s9619_s0 + $0x38] sm:$0xff] }
 0x1c9   : > { %4694 = vmatpush1.bf16.msra.mxu0 %v6710_v33  ;;  %4938 = vmatpush1.bf16.msra.mxu1 %v6712_v34  ;;  %v1732_v33 = vld [vmem:[%s8542_s14 + $0xca8] sm:$0xff]  ;;  %v6758_v34 = vcombine.low %v1719_v15, %v1723_v16  ;;  %v1763_v15 = vld [vmem:[%s8542_s14 + $0xda0] sm:$0xff]  ;;  %v8895_v16 = vcombine.high %v8884_v7, %v8889_v8 }
 0x1ca   : > { %4695 = vmatprep.subr.bf16.mxu0 %v6719_v35  ;;  %4939 = vmatprep.subr.bf16.mxu1 %v6721_v36  ;;  %v6760_v35 = vcombine.low %v1720_v17, %v1724_v19  ;;  %v6767_v36 = vcombine.high %v1727_v23, %v1731_v29  ;;  %v6769_v38 = vcombine.high %v1728_v32, %v1732_v33  ;;  %v1760_v17 = vld [vmem:[%s8542_s14 + $0xd88] sm:$0xff] }
 0x1cb   : > { %v6768_v57 = vcombine.low %v1728_v32, %v1732_v33  ;;  %v1764_v19 = vld [vmem:[%s8542_s14 + $0xda8] sm:$0xff] }
 0x1cc   : > { %v6800_v33 = vcombine.low %v1760_v17, %v1764_v19 }
 0x1cd   : > { %4696 = vmatpush1.bf16.msra.mxu0 %v6718_v43  ;;  %4940 = vmatpush1.bf16.msra.mxu1 %v6720_v44  ;;  %v1740_v43 = vld [vmem:[%s8542_s14 + $0xce8] sm:$0xff]  ;;  %v8860_v44 = vcombine.low %v1317_v20, %v1321_v24 }
 0x1ce   : > { %4697 = vmatprep.subr.bf16.mxu0 %v6727_v46  ;;  %4941 = vmatprep.subr.bf16.mxu1 %v6729_v47  ;;  %v1325_v46 = vld [vmem:[%s9619_s0 + $0x90] sm:$0x33]  ;;  %v6766_v47 = vcombine.low %v1727_v23, %v1731_v29  ;;  %v6777_v48 = vcombine.high %v1736_v42, %v1740_v43  ;;  %v6776_v59 = vcombine.low %v1736_v42, %v1740_v43  ;;  %v1768_v23 = vld [vmem:[%s8542_s14 + $0xdc8] sm:$0xff] }
 0x1cf   : > { %v8879_v6 = vcombine.low %v1325_v46, %v1325_v46  ;;  %v1772_v29 = vld [vmem:[%s8542_s14 + $0xde8] sm:$0xff] }
 0x1d0   : > { %v6808_v43 = vcombine.low %v1768_v23, %v1772_v29 }
 0x1d1   : > { %4698 = vmatpush1.bf16.msra.mxu0 %v6726_v51  ;;  %4942 = vmatpush1.bf16.msra.mxu1 %v6728_v52  ;;  %v1747_v51 = vld [vmem:[%s8542_s14 + $0xd20] sm:$0xff]  ;;  %v8867_v52 = vcombine.high %v1325_v46, %v1325_v46 }
 0x1d2   : > { %4699 = vmatprep.subr.bf16.mxu0 %v6735_v53  ;;  %4943 = vmatprep.subr.bf16.mxu1 %v6737_v54  ;;  %v1744_v53 = vld [vmem:[%s8542_s14 + $0xd08] sm:$0xff]  ;;  %v6783_v60 = vcombine.high %v1743_v50, %v1747_v51  ;;  %v6782_v9 = vcombine.low %v1743_v50, %v1747_v51 }
 0x1d3   : > { %v1748_v54 = vld [vmem:[%s8542_s14 + $0xd28] sm:$0xff] }
 0x1d4   : > { %v6785_v61 = vcombine.high %v1744_v53, %v1748_v54  ;;  %v1788_v50 = vld [vmem:[%s8542_s14 + $0xe68] sm:$0xff] }
 0x1d5   : > { %4700 = vmatpush1.bf16.msra.mxu0 %v6734_v62  ;;  %4944 = vmatpush1.bf16.msra.mxu1 %v6736_v0  ;;  %v1751_v62 = vld [vmem:[%s8542_s14 + $0xd40] sm:$0xff] }
 0x1d6   : > { %4701 = vmatprep.subr.bf16.mxu0 %v6743_v4  ;;  %4945 = vmatprep.subr.bf16.mxu1 %v6745_v5  ;;  %v1755_v0 = vld [vmem:[%s8542_s14 + $0xd60] sm:$0xff]  ;;  %v1752_v4 = vld [vmem:[%s8542_s14 + $0xd48] sm:$0xff] }
 0x1d7   : > { %v1756_v5 = vld [vmem:[%s8542_s14 + $0xd68] sm:$0xff]  ;;  %v6790_v20 = vcombine.low %v1751_v62, %v1755_v0 }
 0x1d8   : > { %v6792_v24 = vcombine.low %v1752_v4, %v1756_v5 }
 0x1d9   : > { %4702 = vmatpush1.bf16.msra.mxu0 %v6742_v11  ;;  %4946 = vmatpush1.bf16.msra.mxu1 %v6744_v12  ;;  %v6784_v11 = vcombine.low %v1744_v53, %v1748_v54  ;;  %v6791_v12 = vcombine.high %v1751_v62, %v1755_v0  ;;  %v6816_v53 = vcombine.low %v1776_v39, %v1780_v41  ;;  %v1796_v62 = vld [vmem:[%s8542_s14 + $0xea8] sm:$0xff] }
 0x1da   : > { %4732 = vmatprep.subr.bf16.mxu0 %v6751_v13  ;;  %4976 = vmatprep.subr.bf16.mxu1 %v6753_v14  ;;  %v6793_v13 = vcombine.high %v1752_v4, %v1756_v5  ;;  %v1759_v14 = vld [vmem:[%s8542_s14 + $0xd80] sm:$0xff] }
 0x1db   : > { %v6798_v32 = vcombine.low %v1759_v14, %v1763_v15 }
 0x1dc   : > { %4704 = vmatmul.mubr.bf16.vlgmr.msra.gmra.mrb[0].mxu0 %v8837_v18  ;;  %4948 = vmatmul.mubr.bf16.vlgmr.msra.gmra.mrb[0].mxu1 %v8837_v18 }
 0x1dd   : > { %4733 = vmatpush1.bf16.msra.mxu0 %v6750_v25  ;;  %4977 = vmatpush1.bf16.msra.mxu1 %v6752_v27  ;;  %v6799_v25 = vcombine.high %v1759_v14, %v1763_v15  ;;  %v6801_v27 = vcombine.high %v1760_v17, %v1764_v19  ;;  %v1804_v14 = vld [vmem:[%s8542_s14 + $0xee8] sm:$0xff] }
 0x1de   : > { %4734 = vmatprep.subr.bf16.mxu0 %v6759_v28  ;;  %4978 = vmatprep.subr.bf16.mxu1 %v6761_v22  ;;  %v1767_v28 = vld [vmem:[%s8542_s14 + $0xdc0] sm:$0xff] }
 0x1df   : > { %4713 = vmatprep.mubr.bf16.mxu0 %v8848_v30  ;;  %4957 = vmatprep.mubr.bf16.mxu1 %v8848_v30  ;;  %v1771_v22 = vld [vmem:[%s8542_s14 + $0xde0] sm:$0xff] }
 0x1e0   : > { %v6806_v42 = vcombine.low %v1767_v28, %v1771_v22 }
 0x1e1   : > { %4735 = vmatpush1.bf16.msra.mxu0 %v6758_v34  ;;  %4979 = vmatpush1.bf16.msra.mxu1 %v6760_v35  ;;  %v6807_v34 = vcombine.high %v1767_v28, %v1771_v22  ;;  %v6809_v35 = vcombine.high %v1768_v23, %v1772_v29  ;;  %v1812_v28 = vld [vmem:[%s8542_s14 + $0xf28] sm:$0xff] }
 0x1e2   : > { %4736 = vmatprep.subr.bf16.mxu0 %v6767_v36  ;;  %4980 = vmatprep.subr.bf16.mxu1 %v6769_v38  ;;  %v1775_v36 = vld [vmem:[%s8542_s14 + $0xe00] sm:$0xff] }
 0x1e3   : > { %v1779_v38 = vld [vmem:[%s8542_s14 + $0xe20] sm:$0xff] }
 0x1e4   : > { %4714 = vmatmul.mubr.bf16.gmra.mrb[4].mxu0 %v8860_v44  ;;  %4958 = vmatmul.mubr.bf16.gmra.mrb[4].mxu1 %v8860_v44  ;;  %v6815_v46 = vcombine.high %v1775_v36, %v1779_v38  ;;  %v6814_v51 = vcombine.low %v1775_v36, %v1779_v38  ;;  %v1820_v36 = vld [vmem:[%s8542_s14 + $0xf68] sm:$0xff] }
 0x1e5   : > { %4737 = vmatpush1.bf16.msra.mxu0 %v6766_v47  ;;  %4981 = vmatpush1.bf16.msra.mxu1 %v6768_v57  ;;  %v6817_v47 = vcombine.high %v1776_v39, %v1780_v41  ;;  %v1783_v57 = vld [vmem:[%s8542_s14 + $0xe40] sm:$0xff] }
 0x1e6   : > { %4738 = vmatprep.subr.bf16.mxu0 %v6775_v58  ;;  %4982 = vmatprep.subr.bf16.mxu1 %v6777_v48  ;;  %v1787_v58 = vld [vmem:[%s8542_s14 + $0xe60] sm:$0xff]  ;;  %v1784_v48 = vld [vmem:[%s8542_s14 + $0xe48] sm:$0xff] }
 0x1e7   : > { %4723 = vmatprep.mubr.bf16.mxu0 %v8867_v52  ;;  %4967 = vmatprep.mubr.bf16.mxu1 %v8867_v52  ;;  %v6823_v54 = vcombine.high %v1783_v57, %v1787_v58  ;;  %v6822_v0 = vcombine.low %v1783_v57, %v1787_v58  ;;  %v6824_v4 = vcombine.low %v1784_v48, %v1788_v50  ;;  %v1828_v57 = vld [vmem:[%s8542_s14 + $0xfa8] sm:$0xff] }
 0x1e9   : > { %4739 = vmatpush1.bf16.msra.mxu0 %v6774_v55  ;;  %4983 = vmatpush1.bf16.msra.mxu1 %v6776_v59  ;;  %v6825_v55 = vcombine.high %v1784_v48, %v1788_v50  ;;  %v1791_v59 = vld [vmem:[%s8542_s14 + $0xe80] sm:$0xff] }
 0x1ea   : > { %4740 = vmatprep.subr.bf16.mxu0 %v6783_v60  ;;  %4984 = vmatprep.subr.bf16.mxu1 %v6785_v61  ;;  %v1795_v60 = vld [vmem:[%s8542_s14 + $0xea0] sm:$0xff]  ;;  %v1792_v61 = vld [vmem:[%s8542_s14 + $0xe88] sm:$0xff] }
 0x1eb   : > { %v6831_v5 = vcombine.high %v1791_v59, %v1795_v60  ;;  %v6830_v15 = vcombine.low %v1791_v59, %v1795_v60  ;;  %v6832_v17 = vcombine.low %v1792_v61, %v1796_v62  ;;  %v1836_v59 = vld [vmem:[%s8542_s14 + $0xfe8] sm:$0xff] }
 0x1ec   : > { %4724 = vmatmul.mubr.bf16.gmra.mrb[8].mxu0 %v8879_v6  ;;  %4968 = vmatmul.mubr.bf16.gmra.mrb[8].mxu1 %v8879_v6 }
 0x1ed   : > { %4741 = vmatpush1.bf16.msra.mxu0 %v6782_v9  ;;  %4985 = vmatpush1.bf16.msra.mxu1 %v6784_v11  ;;  %v6833_v9 = vcombine.high %v1792_v61, %v1796_v62  ;;  %v1799_v11 = vld [vmem:[%s8542_s14 + $0xec0] sm:$0xff] }
 0x1ee   : > { %4742 = vmatprep.subr.bf16.mxu0 %v6791_v12  ;;  %4986 = vmatprep.subr.bf16.mxu1 %v6793_v13  ;;  %v1803_v12 = vld [vmem:[%s8542_s14 + $0xee0] sm:$0xff]  ;;  %v1800_v13 = vld [vmem:[%s8542_s14 + $0xec8] sm:$0xff] }
 0x1ef   : > { %4764 = vmatprep.mubr.bf16.mxu0 %v8895_v16  ;;  %5008 = vmatprep.mubr.bf16.mxu1 %v8895_v16  ;;  %v6839_v19 = vcombine.high %v1799_v11, %v1803_v12  ;;  %v6838_v22 = vcombine.low %v1799_v11, %v1803_v12  ;;  %v6840_v23 = vcombine.low %v1800_v13, %v1804_v14  ;;  %v1334_v11 = vld [vmem:[%s8542_s14 + $0x38] sm:$0xff] }
 0x1f1   : > { %4743 = vmatpush1.bf16.msra.mxu0 %v6790_v20  ;;  %4987 = vmatpush1.bf16.msra.mxu1 %v6792_v24  ;;  %v6841_v20 = vcombine.high %v1800_v13, %v1804_v14  ;;  %v1807_v24 = vld [vmem:[%s8542_s14 + $0xf00] sm:$0xff] }
 0x1f2   : > { %4744 = vmatprep.subr.bf16.mxu0 %v6799_v25  ;;  %4988 = vmatprep.subr.bf16.mxu1 %v6801_v27  ;;  %v1811_v25 = vld [vmem:[%s8542_s14 + $0xf20] sm:$0xff]  ;;  %v1808_v27 = vld [vmem:[%s8542_s14 + $0xf08] sm:$0xff] }
 0x1f3   : > { %v6847_v29 = vcombine.high %v1807_v24, %v1811_v25  ;;  %v6846_v38 = vcombine.low %v1807_v24, %v1811_v25  ;;  %v6848_v39 = vcombine.low %v1808_v27, %v1812_v28  ;;  %v8948_v24 = vcombine.low %v8884_v7, %v8889_v8  ;;  %v1342_v25 = vld [vmem:[%s8542_s14 + $0x78] sm:$0xff] }
 0x1f5   : > { %4745 = vmatpush1.bf16.msra.mxu0 %v6798_v32  ;;  %4989 = vmatpush1.bf16.msra.mxu1 %v6800_v33  ;;  %v6849_v32 = vcombine.high %v1808_v27, %v1812_v28  ;;  %v1815_v33 = vld [vmem:[%s8542_s14 + $0xf40] sm:$0xff]  ;;  %v1318_v27 = vld [vmem:[%s9619_s0 + $0x58] sm:$0xff] }
 0x1f6   : > { %4746 = vmatprep.subr.bf16.mxu0 %v6807_v34  ;;  %4990 = vmatprep.subr.bf16.mxu1 %v6809_v35  ;;  %v1819_v34 = vld [vmem:[%s8542_s14 + $0xf60] sm:$0xff]  ;;  %v1816_v35 = vld [vmem:[%s8542_s14 + $0xf48] sm:$0xff]  ;;  %v1322_v28 = vld [vmem:[%s9619_s0 + $0x78] sm:$0xff] }
 0x1f7   : > { %v6855_v41 = vcombine.high %v1815_v33, %v1819_v34  ;;  %v6854_v58 = vcombine.low %v1815_v33, %v1819_v34  ;;  %v6856_v48 = vcombine.low %v1816_v35, %v1820_v36  ;;  %v8957_v8 = vcombine.high %v1318_v27, %v1322_v28  ;;  %v1349_v33 = vld [vmem:[%s8542_s14 + $0xb0] sm:$0xff]  ;;  %v1346_v34 = vld [vmem:[%s8542_s14 + $0x98] sm:$0xff] }
 0x1f9   : > { %4747 = vmatpush1.bf16.msra.mxu0 %v6806_v42  ;;  %4991 = vmatpush1.bf16.msra.mxu1 %v6808_v43  ;;  %v6857_v42 = vcombine.high %v1816_v35, %v1820_v36  ;;  %v1823_v43 = vld [vmem:[%s8542_s14 + $0xf80] sm:$0xff]  ;;  %v1350_v35 = vld [vmem:[%s8542_s14 + $0xb8] sm:$0xff] }
 0x1fa   : > { %4748 = vmatprep.subr.bf16.mxu0 %v6815_v46  ;;  %4992 = vmatprep.subr.bf16.mxu1 %v6817_v47  ;;  %v1827_v46 = vld [vmem:[%s8542_s14 + $0xfa0] sm:$0xff]  ;;  %v1824_v47 = vld [vmem:[%s8542_s14 + $0xf88] sm:$0xff] }
 0x1fb   : > { %v6863_v50 = vcombine.high %v1823_v43, %v1827_v46  ;;  %v6862_v60 = vcombine.low %v1823_v43, %v1827_v46  ;;  %v6864_v61 = vcombine.low %v1824_v47, %v1828_v57  ;;  %v1357_v43 = vld [vmem:[%s8542_s14 + $0xf0] sm:$0xff]  ;;  %v8969_v46 = vcombine.low %v1318_v27, %v1322_v28  ;;  %v1378_v28 = vld [vmem:[%s8542_s14 + $0x198] sm:$0xff] }
 0x1fc   : > { %v1381_v27 = vld [vmem:[%s8542_s14 + $0x1b0] sm:$0xff] }
 0x1fd   : > { %4749 = vmatpush1.bf16.msra.mxu0 %v6814_v51  ;;  %4993 = vmatpush1.bf16.msra.mxu1 %v6816_v53  ;;  %v6865_v51 = vcombine.high %v1824_v47, %v1828_v57  ;;  %v1831_v53 = vld [vmem:[%s8542_s14 + $0xfc0] sm:$0xff]  ;;  %v1354_v47 = vld [vmem:[%s8542_s14 + $0xd8] sm:$0xff] }
 0x1fe   : > { %4750 = vmatprep.subr.bf16.mxu0 %v6823_v54  ;;  %4994 = vmatprep.subr.bf16.mxu1 %v6825_v55  ;;  %v1835_v54 = vld [vmem:[%s8542_s14 + $0xfe0] sm:$0xff]  ;;  %v1832_v55 = vld [vmem:[%s8542_s14 + $0xfc8] sm:$0xff]  ;;  %v1358_v57 = vld [vmem:[%s8542_s14 + $0xf8] sm:$0xff] }
 0x1ff   : > { %v6871_v62 = vcombine.high %v1831_v53, %v1835_v54  ;;  %v6870_v12 = vcombine.low %v1831_v53, %v1835_v54  ;;  %v6872_v13 = vcombine.low %v1832_v55, %v1836_v59  ;;  %v6397_v53 = vcombine.high %v1354_v47, %v1358_v57 }
 0x201   : > { %4751 = vmatpush1.bf16.msra.mxu0 %v6822_v0  ;;  %4995 = vmatpush1.bf16.msra.mxu1 %v6824_v4  ;;  %v6873_v0 = vcombine.high %v1832_v55, %v1836_v59  ;;  %v1329_v4 = vld [vmem:[%s8542_s14 + $0x10] sm:$0xff] }
 0x202   : > { %4752 = vmatprep.subr.bf16.mxu0 %v6831_v5  ;;  %4996 = vmatprep.subr.bf16.mxu1 %v6833_v9  ;;  %v1333_v5 = vld [vmem:[%s8542_s14 + $0x30] sm:$0xff]  ;;  %v1330_v9 = vld [vmem:[%s8542_s14 + $0x18] sm:$0xff] }
 0x203   : > { %v6371_v14 = vcombine.high %v1329_v4, %v1333_v5  ;;  %v1361_v55 = vld [vmem:[%s8542_s14 + $0x110] sm:$0xff] }
 0x204   : > { %v1365_v59 = vld [vmem:[%s8542_s14 + $0x130] sm:$0xff] }
 0x205   : > { %4753 = vmatpush1.bf16.msra.mxu0 %v6830_v15  ;;  %4997 = vmatpush1.bf16.msra.mxu1 %v6832_v17  ;;  %v6373_v15 = vcombine.high %v1330_v9, %v1334_v11  ;;  %v1337_v17 = vld [vmem:[%s8542_s14 + $0x50] sm:$0xff] }
 0x206   : > { %4754 = vmatprep.subr.bf16.mxu0 %v6839_v19  ;;  %4998 = vmatprep.subr.bf16.mxu1 %v6841_v20  ;;  %v1341_v19 = vld [vmem:[%s8542_s14 + $0x70] sm:$0xff]  ;;  %v1338_v20 = vld [vmem:[%s8542_s14 + $0x58] sm:$0xff] }
 0x207   : > { %v6381_v7 = vcombine.high %v1338_v20, %v1342_v25  ;;  %v6378_v36 = vcombine.low %v1337_v17, %v1341_v19 }
 0x209   : > { %4755 = vmatpush1.bf16.msra.mxu0 %v6838_v22  ;;  %4999 = vmatpush1.bf16.msra.mxu1 %v6840_v23  ;;  %v6370_v22 = vcombine.low %v1329_v4, %v1333_v5  ;;  %v6372_v23 = vcombine.low %v1330_v9, %v1334_v11  ;;  %v6403_v4 = vcombine.high %v1361_v55, %v1365_v59  ;;  %v1369_v9 = vld [vmem:[%s8542_s14 + $0x150] sm:$0xff] }
 0x20a   : > { %4756 = vmatprep.subr.bf16.mxu0 %v6847_v29  ;;  %5000 = vmatprep.subr.bf16.mxu1 %v6849_v32  ;;  %v6379_v29 = vcombine.high %v1337_v17, %v1341_v19  ;;  %v1345_v32 = vld [vmem:[%s8542_s14 + $0x90] sm:$0xff] }
 0x20b   : > { %v1373_v11 = vld [vmem:[%s8542_s14 + $0x170] sm:$0xff] }
 0x20c   : > { %v6411_v19 = vcombine.high %v1369_v9, %v1373_v11 }
 0x20d   : > { %4757 = vmatpush1.bf16.msra.mxu0 %v6846_v38  ;;  %5001 = vmatpush1.bf16.msra.mxu1 %v6848_v39  ;;  %v6380_v38 = vcombine.low %v1338_v20, %v1342_v25  ;;  %v6387_v39 = vcombine.high %v1345_v32, %v1349_v33  ;;  %v1377_v25 = vld [vmem:[%s8542_s14 + $0x190] sm:$0xff] }
 0x20e   : > { %4758 = vmatprep.subr.bf16.mxu0 %v6855_v41  ;;  %5002 = vmatprep.subr.bf16.mxu1 %v6857_v42  ;;  %v6389_v41 = vcombine.high %v1346_v34, %v1350_v35  ;;  %v1353_v42 = vld [vmem:[%s8542_s14 + $0xd0] sm:$0xff] }
 0x211   : > { %4759 = vmatpush1.bf16.msra.mxu0 %v6854_v58  ;;  %5003 = vmatpush1.bf16.msra.mxu1 %v6856_v48  ;;  %v1326_v58 = vld [vmem:[%s9619_s0 + $0x98] sm:$0x33]  ;;  %v6386_v48 = vcombine.low %v1345_v32, %v1349_v33  ;;  %v1385_v33 = vld [vmem:[%s8542_s14 + $0x1d0] sm:$0xff] }
 0x212   : > { %4760 = vmatprep.subr.bf16.mxu0 %v6863_v50  ;;  %5004 = vmatprep.subr.bf16.mxu1 %v6865_v51  ;;  %v6388_v50 = vcombine.low %v1346_v34, %v1350_v35  ;;  %v6395_v51 = vcombine.high %v1353_v42, %v1357_v43  ;;  %v8976_v54 = vcombine.high %v1326_v58, %v1326_v58  ;;  %v1389_v34 = vld [vmem:[%s8542_s14 + $0x1f0] sm:$0xff]  ;;  %v1386_v35 = vld [vmem:[%s8542_s14 + $0x1d8] sm:$0xff] }
 0x215   : > { %4761 = vmatpush1.bf16.msra.mxu0 %v6862_v60  ;;  %5005 = vmatpush1.bf16.msra.mxu1 %v6864_v61  ;;  %v1362_v60 = vld [vmem:[%s8542_s14 + $0x118] sm:$0xff] }
 0x216   : > { %4762 = vmatprep.subr.bf16.mxu0 %v6871_v62  ;;  %5006 = vmatprep.subr.bf16.mxu1 %v6873_v0  ;;  %v1366_v61 = vld [vmem:[%s8542_s14 + $0x138] sm:$0xff]  ;;  %v6394_v62 = vcombine.low %v1353_v42, %v1357_v43  ;;  %v6396_v0 = vcombine.low %v1354_v47, %v1358_v57  ;;  %v1393_v43 = vld [vmem:[%s8542_s14 + $0x210] sm:$0xff] }
 0x217   : > { %v6405_v5 = vcombine.high %v1362_v60, %v1366_v61  ;;  %v6404_v17 = vcombine.low %v1362_v60, %v1366_v61  ;;  %v1397_v47 = vld [vmem:[%s8542_s14 + $0x230] sm:$0xff]  ;;  %v1394_v57 = vld [vmem:[%s8542_s14 + $0x218] sm:$0xff] }
 0x218   : > { %v1406_v60 = vld [vmem:[%s8542_s14 + $0x278] sm:$0xff]  ;;  %v6434_v61 = vcombine.low %v1393_v43, %v1397_v47 }
 0x219   : > { %4763 = vmatpush1.bf16.msra.mxu0 %v6870_v12  ;;  %5007 = vmatpush1.bf16.msra.mxu1 %v6872_v13  ;;  %v8988_v12 = vcombine.low %v1326_v58, %v1326_v58  ;;  %v1370_v13 = vld [vmem:[%s8542_s14 + $0x158] sm:$0xff] }
 0x21a   : > { %5037 = vmatprep.subr.bf16.mxu0 %v6371_v14  ;;  %5281 = vmatprep.subr.bf16.mxu1 %v6373_v15  ;;  %v1374_v14 = vld [vmem:[%s8542_s14 + $0x178] sm:$0xff]  ;;  %v6402_v15 = vcombine.low %v1361_v55, %v1365_v59  ;;  %v1405_v55 = vld [vmem:[%s8542_s14 + $0x270] sm:$0xff] }
 0x21b   : > { %v6413_v20 = vcombine.high %v1370_v13, %v1374_v14  ;;  %v1398_v58 = vld [vmem:[%s8542_s14 + $0x238] sm:$0xff] }
 0x21c   : > { %4765 = vmatmul.mubr.bf16.vlgmr.msra.gmra.mrb[0].mxu0 %v8948_v24  ;;  %5009 = vmatmul.mubr.bf16.vlgmr.msra.gmra.mrb[0].mxu1 %v8948_v24  ;;  %v1402_v59 = vld [vmem:[%s8542_s14 + $0x258] sm:$0xff] }
 0x21d   : > { %5038 = vmatpush1.bf16.msra.mxu0 %v6370_v22  ;;  %5282 = vmatpush1.bf16.msra.mxu1 %v6372_v23  ;;  %v1382_v22 = vld [vmem:[%s8542_s14 + $0x1b8] sm:$0xff]  ;;  %v6410_v23 = vcombine.low %v1369_v9, %v1373_v11  ;;  %v1413_v9 = vld [vmem:[%s8542_s14 + $0x2b0] sm:$0xff] }
 0x21e   : > { %5039 = vmatprep.subr.bf16.mxu0 %v6379_v29  ;;  %5283 = vmatprep.subr.bf16.mxu1 %v6381_v7  ;;  %v6412_v29 = vcombine.low %v1370_v13, %v1374_v14  ;;  %v6419_v7 = vcombine.high %v1377_v25, %v1381_v27  ;;  %v6421_v32 = vcombine.high %v1378_v28, %v1382_v22  ;;  %v1410_v11 = vld [vmem:[%s8542_s14 + $0x298] sm:$0xff] }
 0x21f   : > { %4774 = vmatprep.mubr.bf16.mxu0 %v8957_v8  ;;  %5018 = vmatprep.mubr.bf16.mxu1 %v8957_v8  ;;  %v1414_v13 = vld [vmem:[%s8542_s14 + $0x2b8] sm:$0xff] }
 0x221   : > { %5040 = vmatpush1.bf16.msra.mxu0 %v6378_v36  ;;  %5284 = vmatpush1.bf16.msra.mxu1 %v6380_v38  ;;  %v1390_v36 = vld [vmem:[%s8542_s14 + $0x1f8] sm:$0xff]  ;;  %v6418_v38 = vcombine.low %v1377_v25, %v1381_v27  ;;  %v1421_v25 = vld [vmem:[%s8542_s14 + $0x2f0] sm:$0xff] }
 0x222   : > { %5041 = vmatprep.subr.bf16.mxu0 %v6387_v39  ;;  %5285 = vmatprep.subr.bf16.mxu1 %v6389_v41  ;;  %v6420_v39 = vcombine.low %v1378_v28, %v1382_v22  ;;  %v6427_v41 = vcombine.high %v1385_v33, %v1389_v34  ;;  %v6429_v42 = vcombine.high %v1386_v35, %v1390_v36  ;;  %v1418_v27 = vld [vmem:[%s8542_s14 + $0x2d8] sm:$0xff] }
 0x223   : > { %v1422_v28 = vld [vmem:[%s8542_s14 + $0x2f8] sm:$0xff] }
 0x224   : > { %4775 = vmatmul.mubr.bf16.gmra.mrb[4].mxu0 %v8969_v46  ;;  %5019 = vmatmul.mubr.bf16.gmra.mrb[4].mxu1 %v8969_v46 }
 0x225   : > { %5042 = vmatpush1.bf16.msra.mxu0 %v6386_v48  ;;  %5286 = vmatpush1.bf16.msra.mxu1 %v6388_v50  ;;  %v6426_v48 = vcombine.low %v1385_v33, %v1389_v34  ;;  %v6435_v50 = vcombine.high %v1393_v43, %v1397_v47  ;;  %v1429_v33 = vld [vmem:[%s8542_s14 + $0x330] sm:$0xff]  ;;  %v1426_v34 = vld [vmem:[%s8542_s14 + $0x318] sm:$0xff] }
 0x226   : > { %5043 = vmatprep.subr.bf16.mxu0 %v6395_v51  ;;  %5287 = vmatprep.subr.bf16.mxu1 %v6397_v53  ;;  %v6437_v51 = vcombine.high %v1394_v57, %v1398_v58  ;;  %v1401_v53 = vld [vmem:[%s8542_s14 + $0x250] sm:$0xff]  ;;  %v1434_v47 = vld [vmem:[%s8542_s14 + $0x358] sm:$0xff] }
 0x227   : > { %4784 = vmatprep.mubr.bf16.mxu0 %v8976_v54  ;;  %5028 = vmatprep.mubr.bf16.mxu1 %v8976_v54  ;;  %v6442_v14 = vcombine.low %v1401_v53, %v1405_v55  ;;  %v1437_v43 = vld [vmem:[%s8542_s14 + $0x370] sm:$0xff] }
 0x229   : > { %5044 = vmatpush1.bf16.msra.mxu0 %v6394_v62  ;;  %5288 = vmatpush1.bf16.msra.mxu1 %v6396_v0  ;;  %v6436_v62 = vcombine.low %v1394_v57, %v1398_v58  ;;  %v6443_v0 = vcombine.high %v1401_v53, %v1405_v55  ;;  %v1438_v57 = vld [vmem:[%s8542_s14 + $0x378] sm:$0xff]  ;;  %v1445_v53 = vld [vmem:[%s8542_s14 + $0x3b0] sm:$0xff] }
 0x22a   : > { %5045 = vmatprep.subr.bf16.mxu0 %v6403_v4  ;;  %5289 = vmatprep.subr.bf16.mxu1 %v6405_v5  ;;  %v6445_v4 = vcombine.high %v1402_v59, %v1406_v60  ;;  %v1409_v5 = vld [vmem:[%s8542_s14 + $0x290] sm:$0xff]  ;;  %v1442_v55 = vld [vmem:[%s8542_s14 + $0x398] sm:$0xff] }
 0x22b   : > { %v6450_v22 = vcombine.low %v1409_v5, %v1413_v9 }
 0x22c   : > { %4785 = vmatmul.mubr.bf16.gmra.mrb[8].mxu0 %v8988_v12  ;;  %5029 = vmatmul.mubr.bf16.gmra.mrb[8].mxu1 %v8988_v12 }
 0x22d   : > { %5046 = vmatpush1.bf16.msra.mxu0 %v6402_v15  ;;  %5290 = vmatpush1.bf16.msra.mxu1 %v6404_v17  ;;  %v6444_v15 = vcombine.low %v1402_v59, %v1406_v60  ;;  %v6451_v17 = vcombine.high %v1409_v5, %v1413_v9  ;;  %v1446_v59 = vld [vmem:[%s8542_s14 + $0x3b8] sm:$0xff]  ;;  %v1453_v5 = vld [vmem:[%s8542_s14 + $0x3f0] sm:$0xff] }
 0x22e   : > { %5047 = vmatprep.subr.bf16.mxu0 %v6411_v19  ;;  %5291 = vmatprep.subr.bf16.mxu1 %v6413_v20  ;;  %v6453_v19 = vcombine.high %v1410_v11, %v1414_v13  ;;  %v1417_v20 = vld [vmem:[%s8542_s14 + $0x2d0] sm:$0xff]  ;;  %v1450_v9 = vld [vmem:[%s8542_s14 + $0x3d8] sm:$0xff] }
 0x22f   : > { %5069 = vmatprep.mubr.bf16.mxu0 %v8538_v2  ;;  %5313 = vmatprep.mubr.bf16.mxu1 %v8538_v2  ;;  %v6428_v2 = vcombine.low %v1386_v35, %v1390_v36  ;;  %v1430_v35 = vld [vmem:[%s8542_s14 + $0x338] sm:$0xff]  ;;  %v6458_v36 = vcombine.low %v1417_v20, %v1421_v25 }
 0x231   : > { %5048 = vmatpush1.bf16.msra.mxu0 %v6410_v23  ;;  %5292 = vmatpush1.bf16.msra.mxu1 %v6412_v29  ;;  %v6452_v23 = vcombine.low %v1410_v11, %v1414_v13  ;;  %v6459_v29 = vcombine.high %v1417_v20, %v1421_v25  ;;  %v1454_v11 = vld [vmem:[%s8542_s14 + $0x3f8] sm:$0xff]  ;;  %v1461_v20 = vld [vmem:[%s8542_s14 + $0x430] sm:$0xff] }
 0x232   : > { %5049 = vmatprep.subr.bf16.mxu0 %v6419_v7  ;;  %5293 = vmatprep.subr.bf16.mxu1 %v6421_v32  ;;  %v6461_v7 = vcombine.high %v1418_v27, %v1422_v28  ;;  %v1425_v32 = vld [vmem:[%s8542_s14 + $0x310] sm:$0xff]  ;;  %v1458_v25 = vld [vmem:[%s8542_s14 + $0x418] sm:$0xff] }
 0x233   : > { %v6466_v58 = vcombine.low %v1425_v32, %v1429_v33 }
 0x235   : > { %5050 = vmatpush1.bf16.msra.mxu0 %v6418_v38  ;;  %5294 = vmatpush1.bf16.msra.mxu1 %v6420_v39  ;;  %v6460_v38 = vcombine.low %v1418_v27, %v1422_v28  ;;  %v6467_v39 = vcombine.high %v1425_v32, %v1429_v33  ;;  %v1462_v27 = vld [vmem:[%s8542_s14 + $0x438] sm:$0xff]  ;;  %v1469_v32 = vld [vmem:[%s8542_s14 + $0x470] sm:$0xff] }
 0x236   : > { %5051 = vmatprep.subr.bf16.mxu0 %v6427_v41  ;;  %5295 = vmatprep.subr.bf16.mxu1 %v6429_v42  ;;  %v6469_v41 = vcombine.high %v1426_v34, %v1430_v35  ;;  %v1433_v42 = vld [vmem:[%s8542_s14 + $0x350] sm:$0xff]  ;;  %v1466_v33 = vld [vmem:[%s8542_s14 + $0x458] sm:$0xff] }
 0x237   : > { %v6474_v60 = vcombine.low %v1433_v42, %v1437_v43 }
 0x239   : > { %5052 = vmatpush1.bf16.msra.mxu0 %v6426_v48  ;;  %5296 = vmatpush1.bf16.msra.mxu1 %v6428_v2  ;;  %v6468_v48 = vcombine.low %v1426_v34, %v1430_v35  ;;  %v6475_v2 = vcombine.high %v1433_v42, %v1437_v43  ;;  %v1470_v34 = vld [vmem:[%s8542_s14 + $0x478] sm:$0xff]  ;;  %v1477_v42 = vld [vmem:[%s8542_s14 + $0x4b0] sm:$0xff] }
 0x23a   : > { %5053 = vmatprep.subr.bf16.mxu0 %v6435_v50  ;;  %5297 = vmatprep.subr.bf16.mxu1 %v6437_v51  ;;  %v6477_v50 = vcombine.high %v1434_v47, %v1438_v57  ;;  %v1441_v51 = vld [vmem:[%s8542_s14 + $0x390] sm:$0xff]  ;;  %v1474_v43 = vld [vmem:[%s8542_s14 + $0x498] sm:$0xff] }
 0x23b   : > { %v6482_v13 = vcombine.low %v1441_v51, %v1445_v53 }
 0x23d   : > { %5054 = vmatpush1.bf16.msra.mxu0 %v6434_v61  ;;  %5298 = vmatpush1.bf16.msra.mxu1 %v6436_v62  ;;  %v6476_v61 = vcombine.low %v1434_v47, %v1438_v57  ;;  %v6483_v62 = vcombine.high %v1441_v51, %v1445_v53  ;;  %v1478_v47 = vld [vmem:[%s8542_s14 + $0x4b8] sm:$0xff]  ;;  %v1485_v51 = vld [vmem:[%s8542_s14 + $0x4f0] sm:$0xff] }
 0x23e   : > { %5055 = vmatprep.subr.bf16.mxu0 %v6443_v0  ;;  %5299 = vmatprep.subr.bf16.mxu1 %v6445_v4  ;;  %v6485_v0 = vcombine.high %v1442_v55, %v1446_v59  ;;  %v1449_v4 = vld [vmem:[%s8542_s14 + $0x3d0] sm:$0xff]  ;;  %v1482_v53 = vld [vmem:[%s8542_s14 + $0x4d8] sm:$0xff] }
 0x23f   : > { %v6490_v28 = vcombine.low %v1449_v4, %v1453_v5 }
 0x241   : > { %5056 = vmatpush1.bf16.msra.mxu0 %v6442_v14  ;;  %5300 = vmatpush1.bf16.msra.mxu1 %v6444_v15  ;;  %v6484_v14 = vcombine.low %v1442_v55, %v1446_v59  ;;  %v6491_v15 = vcombine.high %v1449_v4, %v1453_v5  ;;  %v1486_v55 = vld [vmem:[%s8542_s14 + $0x4f8] sm:$0xff]  ;;  %v6516_v59 = vcombine.low %v1474_v43, %v1478_v47 }
 0x242   : > { %5057 = vmatprep.subr.bf16.mxu0 %v6451_v17  ;;  %5301 = vmatprep.subr.bf16.mxu1 %v6453_v19  ;;  %v6493_v17 = vcombine.high %v1450_v9, %v1454_v11  ;;  %v1457_v19 = vld [vmem:[%s8542_s14 + $0x410] sm:$0xff]  ;;  %v1490_v4 = vld [vmem:[%s8542_s14 + $0x518] sm:$0xff] }
 0x243   : > { %v6498_v35 = vcombine.low %v1457_v19, %v1461_v20  ;;  %v1494_v5 = vld [vmem:[%s8542_s14 + $0x538] sm:$0xff] }
 0x245   : > { %5058 = vmatpush1.bf16.msra.mxu0 %v6450_v22  ;;  %5302 = vmatpush1.bf16.msra.mxu1 %v6452_v23  ;;  %v6492_v22 = vcombine.low %v1450_v9, %v1454_v11  ;;  %v6499_v23 = vcombine.high %v1457_v19, %v1461_v20  ;;  %v6524_v9 = vcombine.low %v1482_v53, %v1486_v55  ;;  %v1502_v19 = vld [vmem:[%s8542_s14 + $0x578] sm:$0xff] }
 0x246   : > { %5059 = vmatprep.subr.bf16.mxu0 %v6459_v29  ;;  %5303 = vmatprep.subr.bf16.mxu1 %v6461_v7  ;;  %v6501_v29 = vcombine.high %v1458_v25, %v1462_v27  ;;  %v1465_v7 = vld [vmem:[%s8542_s14 + $0x450] sm:$0xff]  ;;  %v6532_v20 = vcombine.low %v1490_v4, %v1494_v5 }
 0x247   : > { %v6506_v57 = vcombine.low %v1465_v7, %v1469_v32 }
 0x249   : > { %5060 = vmatpush1.bf16.msra.mxu0 %v6458_v36  ;;  %5304 = vmatpush1.bf16.msra.mxu1 %v6460_v38  ;;  %v6500_v36 = vcombine.low %v1458_v25, %v1462_v27  ;;  %v6507_v38 = vcombine.high %v1465_v7, %v1469_v32 }
 0x24a   : > { %5061 = vmatprep.subr.bf16.mxu0 %v6467_v39  ;;  %5305 = vmatprep.subr.bf16.mxu1 %v6469_v41  ;;  %v6509_v39 = vcombine.high %v1466_v33, %v1470_v34  ;;  %v1473_v41 = vld [vmem:[%s8542_s14 + $0x490] sm:$0xff] }
 0x24d   : > { %5062 = vmatpush1.bf16.msra.mxu0 %v6466_v58  ;;  %5306 = vmatpush1.bf16.msra.mxu1 %v6468_v48  ;;  %v6508_v58 = vcombine.low %v1466_v33, %v1470_v34  ;;  %v6515_v48 = vcombine.high %v1473_v41, %v1477_v42  ;;  %v1513_v34 = vld [vmem:[%s8542_s14 + $0x5d0] sm:$0xff] }
 0x24e   : > { %5063 = vmatprep.subr.bf16.mxu0 %v6475_v2  ;;  %5307 = vmatprep.subr.bf16.mxu1 %v6477_v50  ;;  %v6517_v2 = vcombine.high %v1474_v43, %v1478_v47  ;;  %v1481_v50 = vld [vmem:[%s8542_s14 + $0x4d0] sm:$0xff] }
 0x24f   : > { %v1521_v43 = vld [vmem:[%s8542_s14 + $0x610] sm:$0xff] }
 0x250   : > { %v1525_v47 = vld [vmem:[%s8542_s14 + $0x630] sm:$0xff] }
 0x251   : > { %5064 = vmatpush1.bf16.msra.mxu0 %v6474_v60  ;;  %5308 = vmatpush1.bf16.msra.mxu1 %v6476_v61  ;;  %v6523_v60 = vcombine.high %v1481_v50, %v1485_v51  ;;  %v6525_v61 = vcombine.high %v1482_v53, %v1486_v55  ;;  %v1533_v53 = vld [vmem:[%s8542_s14 + $0x670] sm:$0xff]  ;;  %v1530_v55 = vld [vmem:[%s8542_s14 + $0x658] sm:$0xff] }
 0x252   : > { %5065 = vmatprep.subr.bf16.mxu0 %v6483_v62  ;;  %5309 = vmatprep.subr.bf16.mxu1 %v6485_v0  ;;  %v1489_v62 = vld [vmem:[%s8542_s14 + $0x510] sm:$0xff] }
 0x253   : > { %v1493_v0 = vld [vmem:[%s8542_s14 + $0x530] sm:$0xff] }
 0x254   : > { %v6531_v11 = vcombine.high %v1489_v62, %v1493_v0 }
 0x255   : > { %5066 = vmatpush1.bf16.msra.mxu0 %v6482_v13  ;;  %5310 = vmatpush1.bf16.msra.mxu1 %v6484_v14  ;;  %v6533_v13 = vcombine.high %v1490_v4, %v1494_v5  ;;  %v1497_v14 = vld [vmem:[%s8542_s14 + $0x550] sm:$0xff]  ;;  %v1538_v5 = vld [vmem:[%s8542_s14 + $0x698] sm:$0xff] }
 0x256   : > { %5067 = vmatprep.subr.bf16.mxu0 %v6491_v15  ;;  %5311 = vmatprep.subr.bf16.mxu1 %v6493_v17  ;;  %v1501_v15 = vld [vmem:[%s8542_s14 + $0x570] sm:$0xff]  ;;  %v1498_v17 = vld [vmem:[%s8542_s14 + $0x558] sm:$0xff] }
 0x257   : > { %v6539_v25 = vcombine.high %v1497_v14, %v1501_v15  ;;  %v6541_v27 = vcombine.high %v1498_v17, %v1502_v19  ;;  %v6540_v7 = vcombine.low %v1498_v17, %v1502_v19  ;;  %v1541_v4 = vld [vmem:[%s8542_s14 + $0x6b0] sm:$0xff]  ;;  %v1546_v19 = vld [vmem:[%s8542_s14 + $0x6d8] sm:$0xff] }
 0x258   : > { %v1549_v17 = vld [vmem:[%s8542_s14 + $0x6f0] sm:$0xff] }
 0x259   : > { %5068 = vmatpush1.bf16.msra.mxu0 %v6490_v28  ;;  %5312 = vmatpush1.bf16.msra.mxu1 %v6492_v22  ;;  %v1505_v28 = vld [vmem:[%s8542_s14 + $0x590] sm:$0xff] }
 0x25a   : > { %5098 = vmatprep.subr.bf16.mxu0 %v6499_v23  ;;  %5342 = vmatprep.subr.bf16.mxu1 %v6501_v29  ;;  %v1509_v22 = vld [vmem:[%s8542_s14 + $0x5b0] sm:$0xff]  ;;  %v1506_v23 = vld [vmem:[%s8542_s14 + $0x598] sm:$0xff] }
 0x25b   : > { %v1510_v29 = vld [vmem:[%s8542_s14 + $0x5b8] sm:$0xff]  ;;  %v6547_v32 = vcombine.high %v1505_v28, %v1509_v22 }
 0x25c   : > { %5070 = vmatmul.mubr.bf16.vlgmr.msra.gmra.mrb[12].mxu0 %v8540_v3  ;;  %5314 = vmatmul.mubr.bf16.vlgmr.msra.gmra.mrb[12].mxu1 %v8540_v3  ;;  %v6514_v3 = vcombine.low %v1473_v41, %v1477_v42  ;;  %v6549_v33 = vcombine.high %v1506_v23, %v1510_v29 }
 0x25d   : > { %5099 = vmatpush1.bf16.msra.mxu0 %v6498_v35  ;;  %5343 = vmatpush1.bf16.msra.mxu1 %v6500_v36  ;;  %v1517_v35 = vld [vmem:[%s8542_s14 + $0x5f0] sm:$0xff]  ;;  %v1514_v36 = vld [vmem:[%s8542_s14 + $0x5d8] sm:$0xff] }
 0x25e   : > { %5100 = vmatprep.subr.bf16.mxu0 %v6507_v38  ;;  %5344 = vmatprep.subr.bf16.mxu1 %v6509_v39  ;;  %v1518_v38 = vld [vmem:[%s8542_s14 + $0x5f8] sm:$0xff]  ;;  %v6548_v39 = vcombine.low %v1506_v23, %v1510_v29  ;;  %v6555_v41 = vcombine.high %v1513_v34, %v1517_v35  ;;  %v1557_v23 = vld [vmem:[%s8542_s14 + $0x730] sm:$0xff] }
 0x25f   : > { %5079 = vmatprep.mubr.bf16.mxu0 %v8626_v26  ;;  %5323 = vmatprep.mubr.bf16.mxu1 %v8626_v26  ;;  %v6522_v26 = vcombine.low %v1481_v50, %v1485_v51  ;;  %v6557_v42 = vcombine.high %v1514_v36, %v1518_v38  ;;  %v1529_v51 = vld [vmem:[%s8542_s14 + $0x650] sm:$0xff]  ;;  %v1554_v29 = vld [vmem:[%s8542_s14 + $0x718] sm:$0xff] }
 0x261   : > { %5101 = vmatpush1.bf16.msra.mxu0 %v6506_v57  ;;  %5345 = vmatpush1.bf16.msra.mxu1 %v6508_v58  ;;  %v1522_v57 = vld [vmem:[%s8542_s14 + $0x618] sm:$0xff] }
 0x262   : > { %5102 = vmatprep.subr.bf16.mxu0 %v6515_v48  ;;  %5346 = vmatprep.subr.bf16.mxu1 %v6517_v2  ;;  %v1526_v58 = vld [vmem:[%s8542_s14 + $0x638] sm:$0xff]  ;;  %v6554_v48 = vcombine.low %v1513_v34, %v1517_v35  ;;  %v6563_v2 = vcombine.high %v1521_v43, %v1525_v47  ;;  %v1561_v35 = vld [vmem:[%s8542_s14 + $0x750] sm:$0xff] }
 0x263   : > { %v6565_v50 = vcombine.high %v1522_v57, %v1526_v58 }
 0x264   : > { %5080 = vmatmul.mubr.bf16.gmra.mrb[16].mxu0 %v8638_v37  ;;  %5324 = vmatmul.mubr.bf16.gmra.mrb[16].mxu1 %v8638_v37  ;;  %v6530_v37 = vcombine.low %v1489_v62, %v1493_v0  ;;  %v1537_v0 = vld [vmem:[%s8542_s14 + $0x690] sm:$0xff] }
 0x265   : > { %5103 = vmatpush1.bf16.msra.mxu0 %v6514_v3  ;;  %5347 = vmatpush1.bf16.msra.mxu1 %v6516_v59  ;;  %v1534_v3 = vld [vmem:[%s8542_s14 + $0x678] sm:$0xff]  ;;  %v6562_v59 = vcombine.low %v1521_v43, %v1525_v47  ;;  %v1569_v47 = vld [vmem:[%s8542_s14 + $0x790] sm:$0xff] }
 0x266   : > { %5104 = vmatprep.subr.bf16.mxu0 %v6523_v60  ;;  %5348 = vmatprep.subr.bf16.mxu1 %v6525_v61  ;;  %v6564_v60 = vcombine.low %v1522_v57, %v1526_v58  ;;  %v6571_v61 = vcombine.high %v1529_v51, %v1533_v53  ;;  %v6573_v62 = vcombine.high %v1530_v55, %v1534_v3  ;;  %v1573_v57 = vld [vmem:[%s8542_s14 + $0x7b0] sm:$0xff]  ;;  %v1570_v58 = vld [vmem:[%s8542_s14 + $0x798] sm:$0xff] }
 0x267   : > { %5089 = vmatprep.mubr.bf16.mxu0 %v8645_v45  ;;  %5333 = vmatprep.mubr.bf16.mxu1 %v8645_v45  ;;  %v6538_v45 = vcombine.low %v1497_v14, %v1501_v15  ;;  %v1545_v15 = vld [vmem:[%s8542_s14 + $0x6d0] sm:$0xff] }
 0x269   : > { %5105 = vmatpush1.bf16.msra.mxu0 %v6522_v26  ;;  %5349 = vmatpush1.bf16.msra.mxu1 %v6524_v9  ;;  %v1542_v26 = vld [vmem:[%s8542_s14 + $0x6b8] sm:$0xff]  ;;  %v6570_v9 = vcombine.low %v1529_v51, %v1533_v53  ;;  %v1577_v53 = vld [vmem:[%s8542_s14 + $0x7d0] sm:$0xff] }
 0x26a   : > { %5106 = vmatprep.subr.bf16.mxu0 %v6531_v11  ;;  %5350 = vmatprep.subr.bf16.mxu1 %v6533_v13  ;;  %v6572_v11 = vcombine.low %v1530_v55, %v1534_v3  ;;  %v6579_v13 = vcombine.high %v1537_v0, %v1541_v4  ;;  %v6581_v14 = vcombine.high %v1538_v5, %v1542_v26  ;;  %v1581_v55 = vld [vmem:[%s8542_s14 + $0x7f0] sm:$0xff]  ;;  %v1578_v3 = vld [vmem:[%s8542_s14 + $0x7d8] sm:$0xff] }
 0x26c   : > { %5090 = vmatmul.mubr.bf16.gmra.mrb[20].mxu0 %v8657_v56  ;;  %5334 = vmatmul.mubr.bf16.gmra.mrb[20].mxu1 %v8657_v56  ;;  %v6546_v56 = vcombine.low %v1505_v28, %v1509_v22  ;;  %v1553_v22 = vld [vmem:[%s8542_s14 + $0x710] sm:$0xff] }
 0x26d   : > { %5107 = vmatpush1.bf16.msra.mxu0 %v6530_v37  ;;  %5351 = vmatpush1.bf16.msra.mxu1 %v6532_v20  ;;  %v1550_v37 = vld [vmem:[%s8542_s14 + $0x6f8] sm:$0xff]  ;;  %v6578_v20 = vcombine.low %v1537_v0, %v1541_v4  ;;  %v1585_v4 = vld [vmem:[%s8542_s14 + $0x810] sm:$0xff] }
 0x26e   : > { %5108 = vmatprep.subr.bf16.mxu0 %v6539_v25  ;;  %5352 = vmatprep.subr.bf16.mxu1 %v6541_v27  ;;  %v6580_v25 = vcombine.low %v1538_v5, %v1542_v26  ;;  %v6587_v27 = vcombine.high %v1545_v15, %v1549_v17  ;;  %v6589_v28 = vcombine.high %v1546_v19, %v1550_v37  ;;  %v1589_v5 = vld [vmem:[%s8542_s14 + $0x830] sm:$0xff]  ;;  %v1586_v26 = vld [vmem:[%s8542_s14 + $0x818] sm:$0xff] }
 0x26f   : > { %5130 = vmatprep.mubr.bf16.mxu0 %v8673_v1  ;;  %5374 = vmatprep.mubr.bf16.mxu1 %v8673_v1  ;;  %v6556_v1 = vcombine.low %v1514_v36, %v1518_v38  ;;  %v1565_v36 = vld [vmem:[%s8542_s14 + $0x770] sm:$0xff]  ;;  %v1562_v38 = vld [vmem:[%s8542_s14 + $0x758] sm:$0xff] }
 0x271   : > { %5109 = vmatpush1.bf16.msra.mxu0 %v6538_v45  ;;  %5353 = vmatpush1.bf16.msra.mxu1 %v6540_v7  ;;  %v1558_v45 = vld [vmem:[%s8542_s14 + $0x738] sm:$0xff]  ;;  %v6586_v7 = vcombine.low %v1545_v15, %v1549_v17  ;;  %v1593_v17 = vld [vmem:[%s8542_s14 + $0x850] sm:$0xff] }
 0x272   : > { %5110 = vmatprep.subr.bf16.mxu0 %v6547_v32  ;;  %5354 = vmatprep.subr.bf16.mxu1 %v6549_v33  ;;  %v6588_v32 = vcombine.low %v1546_v19, %v1550_v37  ;;  %v6595_v33 = vcombine.high %v1553_v22, %v1557_v23  ;;  %v6597_v34 = vcombine.high %v1554_v29, %v1558_v45  ;;  %v1597_v19 = vld [vmem:[%s8542_s14 + $0x870] sm:$0xff]  ;;  %v1594_v37 = vld [vmem:[%s8542_s14 + $0x858] sm:$0xff] }
 0x275   : > { %5111 = vmatpush1.bf16.msra.mxu0 %v6546_v56  ;;  %5355 = vmatpush1.bf16.msra.mxu1 %v6548_v39  ;;  %v1566_v56 = vld [vmem:[%s8542_s14 + $0x778] sm:$0xff]  ;;  %v6594_v39 = vcombine.low %v1553_v22, %v1557_v23  ;;  %v1601_v23 = vld [vmem:[%s8542_s14 + $0x890] sm:$0xff] }
 0x276   : > { %5112 = vmatprep.subr.bf16.mxu0 %v6555_v41  ;;  %5356 = vmatprep.subr.bf16.mxu1 %v6557_v42  ;;  %v6596_v41 = vcombine.low %v1554_v29, %v1558_v45  ;;  %v6603_v42 = vcombine.high %v1561_v35, %v1565_v36  ;;  %v6605_v43 = vcombine.high %v1562_v38, %v1566_v56  ;;  %v1605_v29 = vld [vmem:[%s8542_s14 + $0x8b0] sm:$0xff]  ;;  %v1602_v45 = vld [vmem:[%s8542_s14 + $0x898] sm:$0xff] }
 0x279   : > { %5113 = vmatpush1.bf16.msra.mxu0 %v6554_v48  ;;  %5357 = vmatpush1.bf16.msra.mxu1 %v6556_v1  ;;  %v1574_v48 = vld [vmem:[%s8542_s14 + $0x7b8] sm:$0xff]  ;;  %v6602_v1 = vcombine.low %v1561_v35, %v1565_v36  ;;  %v1609_v36 = vld [vmem:[%s8542_s14 + $0x8d0] sm:$0xff] }
 0x27a   : > { %5114 = vmatprep.subr.bf16.mxu0 %v6563_v2  ;;  %5358 = vmatprep.subr.bf16.mxu1 %v6565_v50  ;;  %v6604_v2 = vcombine.low %v1562_v38, %v1566_v56  ;;  %v6611_v50 = vcombine.high %v1569_v47, %v1573_v57  ;;  %v6613_v51 = vcombine.high %v1570_v58, %v1574_v48  ;;  %v1613_v38 = vld [vmem:[%s8542_s14 + $0x8f0] sm:$0xff]  ;;  %v1610_v56 = vld [vmem:[%s8542_s14 + $0x8d8] sm:$0xff] }
 0x27d   : > { %5115 = vmatpush1.bf16.msra.mxu0 %v6562_v59  ;;  %5359 = vmatpush1.bf16.msra.mxu1 %v6564_v60  ;;  %v1582_v59 = vld [vmem:[%s8542_s14 + $0x7f8] sm:$0xff]  ;;  %v6610_v60 = vcombine.low %v1569_v47, %v1573_v57  ;;  %v1617_v47 = vld [vmem:[%s8542_s14 + $0x910] sm:$0xff] }
 0x27e   : > { %5116 = vmatprep.subr.bf16.mxu0 %v6571_v61  ;;  %5360 = vmatprep.subr.bf16.mxu1 %v6573_v62  ;;  %v6612_v61 = vcombine.low %v1570_v58, %v1574_v48  ;;  %v6619_v62 = vcombine.high %v1577_v53, %v1581_v55  ;;  %v6621_v0 = vcombine.high %v1578_v3, %v1582_v59  ;;  %v1621_v57 = vld [vmem:[%s8542_s14 + $0x930] sm:$0xff]  ;;  %v1618_v58 = vld [vmem:[%s8542_s14 + $0x918] sm:$0xff] }
 0x27f   : > { %v1622_v48 = vld [vmem:[%s8542_s14 + $0x938] sm:$0xff] }
 0x281   : > { %5117 = vmatpush1.bf16.msra.mxu0 %v6570_v9  ;;  %5361 = vmatpush1.bf16.msra.mxu1 %v6572_v11  ;;  %v1590_v9 = vld [vmem:[%s8542_s14 + $0x838] sm:$0xff]  ;;  %v6618_v11 = vcombine.low %v1577_v53, %v1581_v55  ;;  %v1629_v53 = vld [vmem:[%s8542_s14 + $0x970] sm:$0xff] }
 0x282   : > { %5118 = vmatprep.subr.bf16.mxu0 %v6579_v13  ;;  %5362 = vmatprep.subr.bf16.mxu1 %v6581_v14  ;;  %v6620_v13 = vcombine.low %v1578_v3, %v1582_v59  ;;  %v6627_v14 = vcombine.high %v1585_v4, %v1589_v5  ;;  %v6629_v15 = vcombine.high %v1586_v26, %v1590_v9  ;;  %v1626_v55 = vld [vmem:[%s8542_s14 + $0x958] sm:$0xff] }
 0x283   : > { %v1630_v3 = vld [vmem:[%s8542_s14 + $0x978] sm:$0xff]  ;;  %v6660_v59 = vcombine.low %v1618_v58, %v1622_v48 }
 0x285   : > { %5119 = vmatpush1.bf16.msra.mxu0 %v6578_v20  ;;  %5363 = vmatpush1.bf16.msra.mxu1 %v6580_v25  ;;  %v1598_v20 = vld [vmem:[%s8542_s14 + $0x878] sm:$0xff]  ;;  %v6626_v25 = vcombine.low %v1585_v4, %v1589_v5 }
 0x286   : > { %5120 = vmatprep.subr.bf16.mxu0 %v6587_v27  ;;  %5364 = vmatprep.subr.bf16.mxu1 %v6589_v28  ;;  %v6628_v27 = vcombine.low %v1586_v26, %v1590_v9  ;;  %v6635_v28 = vcombine.high %v1593_v17, %v1597_v19  ;;  %v6637_v22 = vcombine.high %v1594_v37, %v1598_v20  ;;  %v1634_v4 = vld [vmem:[%s8542_s14 + $0x998] sm:$0xff] }
 0x287   : > { %v1638_v5 = vld [vmem:[%s8542_s14 + $0x9b8] sm:$0xff]  ;;  %v6668_v26 = vcombine.low %v1626_v55, %v1630_v3 }
 0x289   : > { %5121 = vmatpush1.bf16.msra.mxu0 %v6586_v7  ;;  %5365 = vmatpush1.bf16.msra.mxu1 %v6588_v32  ;;  %v1606_v7 = vld [vmem:[%s8542_s14 + $0x8b8] sm:$0xff]  ;;  %v6634_v32 = vcombine.low %v1593_v17, %v1597_v19  ;;  %v6676_v19 = vcombine.low %v1634_v4, %v1638_v5 }
 0x28a   : > { %5122 = vmatprep.subr.bf16.mxu0 %v6595_v33  ;;  %5366 = vmatprep.subr.bf16.mxu1 %v6597_v34  ;;  %v6636_v33 = vcombine.low %v1594_v37, %v1598_v20  ;;  %v6643_v34 = vcombine.high %v1601_v23, %v1605_v29  ;;  %v6645_v35 = vcombine.high %v1602_v45, %v1606_v7  ;;  %v1646_v17 = vld [vmem:[%s8542_s14 + $0x9f8] sm:$0xff] }
 0x28d   : > { %5123 = vmatpush1.bf16.msra.mxu0 %v6594_v39  ;;  %5367 = vmatpush1.bf16.msra.mxu1 %v6596_v41  ;;  %v1614_v39 = vld [vmem:[%s8542_s14 + $0x8f8] sm:$0xff]  ;;  %v6644_v41 = vcombine.low %v1602_v45, %v1606_v7  ;;  %v1657_v7 = vld [vmem:[%s8542_s14 + $0xa50] sm:$0xff] }
 0x28e   : > { %5124 = vmatprep.subr.bf16.mxu0 %v6603_v42  ;;  %5368 = vmatprep.subr.bf16.mxu1 %v6605_v43  ;;  %v6651_v42 = vcombine.high %v1609_v36, %v1613_v38  ;;  %v6653_v43 = vcombine.high %v1610_v56, %v1614_v39 }
 0x291   : > { %5125 = vmatpush1.bf16.msra.mxu0 %v6602_v1  ;;  %5369 = vmatpush1.bf16.msra.mxu1 %v6604_v2  ;;  %v6652_v1 = vcombine.low %v1610_v56, %v1614_v39  ;;  %v6659_v2 = vcombine.high %v1617_v47, %v1621_v57  ;;  %v1665_v39 = vld [vmem:[%s8542_s14 + $0xa90] sm:$0xff] }
 0x292   : > { %5126 = vmatprep.subr.bf16.mxu0 %v6611_v50  ;;  %5370 = vmatprep.subr.bf16.mxu1 %v6613_v51  ;;  %v6661_v50 = vcombine.high %v1618_v58, %v1622_v48  ;;  %v1625_v51 = vld [vmem:[%s8542_s14 + $0x950] sm:$0xff] }
 0x293   : > { %v1673_v48 = vld [vmem:[%s8542_s14 + $0xad0] sm:$0xff] }
 0x295   : > { %5127 = vmatpush1.bf16.msra.mxu0 %v6610_v60  ;;  %5371 = vmatpush1.bf16.msra.mxu1 %v6612_v61  ;;  %v6667_v60 = vcombine.high %v1625_v51, %v1629_v53  ;;  %v6669_v61 = vcombine.high %v1626_v55, %v1630_v3  ;;  %v1681_v3 = vld [vmem:[%s8542_s14 + $0xb10] sm:$0xff] }
 0x296   : > { %5128 = vmatprep.subr.bf16.mxu0 %v6619_v62  ;;  %5372 = vmatprep.subr.bf16.mxu1 %v6621_v0  ;;  %v1633_v62 = vld [vmem:[%s8542_s14 + $0x990] sm:$0xff] }
 0x297   : > { %v1637_v0 = vld [vmem:[%s8542_s14 + $0x9b0] sm:$0xff] }
 0x298   : > { %v6675_v9 = vcombine.high %v1633_v62, %v1637_v0 }
 0x299   : > { %5129 = vmatpush1.bf16.msra.mxu0 %v6618_v11  ;;  %5373 = vmatpush1.bf16.msra.mxu1 %v6620_v13  ;;  %v6677_v11 = vcombine.high %v1634_v4, %v1638_v5  ;;  %v1641_v13 = vld [vmem:[%s8542_s14 + $0x9d0] sm:$0xff] }
 0x29a   : > { %5159 = vmatprep.subr.bf16.mxu0 %v6627_v14  ;;  %5403 = vmatprep.subr.bf16.mxu1 %v6629_v15  ;;  %v1645_v14 = vld [vmem:[%s8542_s14 + $0x9f0] sm:$0xff]  ;;  %v1642_v15 = vld [vmem:[%s8542_s14 + $0x9d8] sm:$0xff] }
 0x29b   : > { %v6683_v37 = vcombine.high %v1641_v13, %v1645_v14  ;;  %v6685_v20 = vcombine.high %v1642_v15, %v1646_v17  ;;  %v1689_v5 = vld [vmem:[%s8542_s14 + $0xb50] sm:$0xff] }
 0x29c   : > { %5131 = vmatmul.mubr.bf16.vlgmr.msra.gmra.mrb[12].mxu0 %v8726_v40  ;;  %5375 = vmatmul.mubr.bf16.vlgmr.msra.gmra.mrb[12].mxu1 %v8726_v40  ;;  %v6642_v40 = vcombine.low %v1601_v23, %v1605_v29  ;;  %v6682_v23 = vcombine.low %v1641_v13, %v1645_v14 }
 0x29d   : > { %5160 = vmatpush1.bf16.msra.mxu0 %v6626_v25  ;;  %5404 = vmatpush1.bf16.msra.mxu1 %v6628_v27  ;;  %v1649_v25 = vld [vmem:[%s8542_s14 + $0xa10] sm:$0xff] }
 0x29e   : > { %5161 = vmatprep.subr.bf16.mxu0 %v6635_v28  ;;  %5405 = vmatprep.subr.bf16.mxu1 %v6637_v22  ;;  %v1653_v27 = vld [vmem:[%s8542_s14 + $0xa30] sm:$0xff]  ;;  %v1650_v28 = vld [vmem:[%s8542_s14 + $0xa18] sm:$0xff] }
 0x29f   : > { %5140 = vmatprep.mubr.bf16.mxu0 %v8737_v49  ;;  %5384 = vmatprep.mubr.bf16.mxu1 %v8737_v49  ;;  %v6650_v49 = vcombine.low %v1609_v36, %v1613_v38  ;;  %v1654_v22 = vld [vmem:[%s8542_s14 + $0xa38] sm:$0xff]  ;;  %v6691_v29 = vcombine.high %v1649_v25, %v1653_v27 }
 0x2a0   : > { %v6693_v45 = vcombine.high %v1650_v28, %v1654_v22  ;;  %v6692_v36 = vcombine.low %v1650_v28, %v1654_v22  ;;  %v1705_v22 = vld [vmem:[%s8542_s14 + $0xbd0] sm:$0xff] }
 0x2a1   : > { %5162 = vmatpush1.bf16.msra.mxu0 %v6634_v32  ;;  %5406 = vmatpush1.bf16.msra.mxu1 %v6636_v33  ;;  %v1661_v32 = vld [vmem:[%s8542_s14 + $0xa70] sm:$0xff]  ;;  %v1658_v33 = vld [vmem:[%s8542_s14 + $0xa58] sm:$0xff] }
 0x2a2   : > { %5163 = vmatprep.subr.bf16.mxu0 %v6643_v34  ;;  %5407 = vmatprep.subr.bf16.mxu1 %v6645_v35  ;;  %v1662_v34 = vld [vmem:[%s8542_s14 + $0xa78] sm:$0xff]  ;;  %v6690_v35 = vcombine.low %v1649_v25, %v1653_v27  ;;  %v6699_v38 = vcombine.high %v1657_v7, %v1661_v32 }
 0x2a3   : > { %v6701_v56 = vcombine.high %v1658_v33, %v1662_v34 }
 0x2a4   : > { %5141 = vmatmul.mubr.bf16.gmra.mrb[16].mxu0 %v8749_v63  ;;  %5385 = vmatmul.mubr.bf16.gmra.mrb[16].mxu1 %v8749_v63  ;;  %v6658_v63 = vcombine.low %v1617_v47, %v1621_v57  ;;  %v6700_v47 = vcombine.low %v1658_v33, %v1662_v34  ;;  %v1713_v34 = vld [vmem:[%s8542_s14 + $0xc10] sm:$0xff] }
 0x2a5   : > { %5164 = vmatpush1.bf16.msra.mxu0 %v6642_v40  ;;  %5408 = vmatpush1.bf16.msra.mxu1 %v6644_v41  ;;  %v1669_v40 = vld [vmem:[%s8542_s14 + $0xab0] sm:$0xff]  ;;  %v1666_v41 = vld [vmem:[%s8542_s14 + $0xa98] sm:$0xff] }
 0x2a6   : > { %5165 = vmatprep.subr.bf16.mxu0 %v6651_v42  ;;  %5409 = vmatprep.subr.bf16.mxu1 %v6653_v43  ;;  %v1670_v42 = vld [vmem:[%s8542_s14 + $0xab8] sm:$0xff]  ;;  %v6698_v43 = vcombine.low %v1657_v7, %v1661_v32  ;;  %v6707_v57 = vcombine.high %v1665_v39, %v1669_v40 }
 0x2a7   : > { %5150 = vmatprep.mubr.bf16.mxu0 %v8756_v10  ;;  %5394 = vmatprep.mubr.bf16.mxu1 %v8756_v10  ;;  %v6666_v10 = vcombine.low %v1625_v51, %v1629_v53  ;;  %v6709_v58 = vcombine.high %v1666_v41, %v1670_v42  ;;  %v6708_v51 = vcombine.low %v1666_v41, %v1670_v42  ;;  %v1721_v42 = vld [vmem:[%s8542_s14 + $0xc50] sm:$0xff] }
 0x2a9   : > { %5166 = vmatpush1.bf16.msra.mxu0 %v6650_v49  ;;  %5410 = vmatpush1.bf16.msra.mxu1 %v6652_v1  ;;  %v1677_v49 = vld [vmem:[%s8542_s14 + $0xaf0] sm:$0xff]  ;;  %v1674_v1 = vld [vmem:[%s8542_s14 + $0xad8] sm:$0xff] }
 0x2aa   : > { %5167 = vmatprep.subr.bf16.mxu0 %v6659_v2  ;;  %5411 = vmatprep.subr.bf16.mxu1 %v6661_v50  ;;  %v1678_v2 = vld [vmem:[%s8542_s14 + $0xaf8] sm:$0xff]  ;;  %v6706_v50 = vcombine.low %v1665_v39, %v1669_v40  ;;  %v6715_v53 = vcombine.high %v1673_v48, %v1677_v49 }
 0x2ab   : > { %v6717_v55 = vcombine.high %v1674_v1, %v1678_v2 }
 0x2ac   : > { %5151 = vmatmul.mubr.bf16.gmra.mrb[20].mxu0 %v8768_v21  ;;  %5395 = vmatmul.mubr.bf16.gmra.mrb[20].mxu1 %v8768_v21  ;;  %v6674_v21 = vcombine.low %v1633_v62, %v1637_v0  ;;  %v6716_v62 = vcombine.low %v1674_v1, %v1678_v2  ;;  %v1729_v2 = vld [vmem:[%s8542_s14 + $0xc90] sm:$0xff] }
 0x2ad   : > { %5168 = vmatpush1.bf16.msra.mxu0 %v6658_v63  ;;  %5412 = vmatpush1.bf16.msra.mxu1 %v6660_v59  ;;  %v1685_v63 = vld [vmem:[%s8542_s14 + $0xb30] sm:$0xff]  ;;  %v1682_v59 = vld [vmem:[%s8542_s14 + $0xb18] sm:$0xff] }
 0x2ae   : > { %5169 = vmatprep.subr.bf16.mxu0 %v6667_v60  ;;  %5413 = vmatprep.subr.bf16.mxu1 %v6669_v61  ;;  %v1686_v60 = vld [vmem:[%s8542_s14 + $0xb38] sm:$0xff]  ;;  %v6714_v61 = vcombine.low %v1673_v48, %v1677_v49  ;;  %v6723_v0 = vcombine.high %v1681_v3, %v1685_v63 }
 0x2af   : > { %5191 = vmatprep.mubr.bf16.mxu0 %v8784_v31  ;;  %5435 = vmatprep.mubr.bf16.mxu1 %v8784_v31  ;;  %v6684_v31 = vcombine.low %v1642_v15, %v1646_v17  ;;  %v6725_v4 = vcombine.high %v1682_v59, %v1686_v60  ;;  %v6724_v13 = vcombine.low %v1682_v59, %v1686_v60  ;;  %v1697_v17 = vld [vmem:[%s8542_s14 + $0xb90] sm:$0xff] }
 0x2b0   : > { %v1737_v60 = vld [vmem:[%s8542_s14 + $0xcd0] sm:$0xff] }
 0x2b1   : > { %5170 = vmatpush1.bf16.msra.mxu0 %v6666_v10  ;;  %5414 = vmatpush1.bf16.msra.mxu1 %v6668_v26  ;;  %v1693_v10 = vld [vmem:[%s8542_s14 + $0xb70] sm:$0xff]  ;;  %v1690_v26 = vld [vmem:[%s8542_s14 + $0xb58] sm:$0xff] }
 0x2b2   : > { %5171 = vmatprep.subr.bf16.mxu0 %v6675_v9  ;;  %5415 = vmatprep.subr.bf16.mxu1 %v6677_v11  ;;  %v1694_v9 = vld [vmem:[%s8542_s14 + $0xb78] sm:$0xff]  ;;  %v6722_v11 = vcombine.low %v1681_v3, %v1685_v63  ;;  %v6731_v14 = vcombine.high %v1689_v5, %v1693_v10 }
 0x2b3   : > { %v6733_v15 = vcombine.high %v1690_v26, %v1694_v9  ;;  %v6732_v25 = vcombine.low %v1690_v26, %v1694_v9  ;;  %v1745_v9 = vld [vmem:[%s8542_s14 + $0xd10] sm:$0xff] }
 0x2b5   : > { %5172 = vmatpush1.bf16.msra.mxu0 %v6674_v21  ;;  %5416 = vmatpush1.bf16.msra.mxu1 %v6676_v19  ;;  %v1701_v21 = vld [vmem:[%s8542_s14 + $0xbb0] sm:$0xff]  ;;  %v1698_v19 = vld [vmem:[%s8542_s14 + $0xb98] sm:$0xff] }
 0x2b6   : > { %5173 = vmatprep.subr.bf16.mxu0 %v6683_v37  ;;  %5417 = vmatprep.subr.bf16.mxu1 %v6685_v20  ;;  %v1702_v37 = vld [vmem:[%s8542_s14 + $0xbb8] sm:$0xff]  ;;  %v6730_v20 = vcombine.low %v1689_v5, %v1693_v10  ;;  %v6739_v27 = vcombine.high %v1697_v17, %v1701_v21  ;;  %v1841_v10 = vlaneseq }
 0x2b7   : > { %v6741_v28 = vcombine.high %v1698_v19, %v1702_v37  ;;  %v6740_v7 = vcombine.low %v1698_v19, %v1702_v37  ;;  %v1753_v37 = vld [vmem:[%s8542_s14 + $0xd50] sm:$0xff] }
 0x2b9   : > { %5174 = vmatpush1.bf16.msra.mxu0 %v6682_v23  ;;  %5418 = vmatpush1.bf16.msra.mxu1 %v6684_v31  ;;  %v1709_v23 = vld [vmem:[%s8542_s14 + $0xbf0] sm:$0xff]  ;;  %v1706_v31 = vld [vmem:[%s8542_s14 + $0xbd8] sm:$0xff] }
 0x2ba   : > { %5175 = vmatprep.subr.bf16.mxu0 %v6691_v29  ;;  %5419 = vmatprep.subr.bf16.mxu1 %v6693_v45  ;;  %v1710_v29 = vld [vmem:[%s8542_s14 + $0xbf8] sm:$0xff]  ;;  %v6738_v45 = vcombine.low %v1697_v17, %v1701_v21  ;;  %v6747_v32 = vcombine.high %v1705_v22, %v1709_v23  ;;  %v9221_v21 = vshrl.u32 %v1841_v10, 7  ;;  %v1781_v10 = vld [vmem:[%s8542_s14 + $0xe30] sm:$0xff] }
 0x2bb   : > { %v6749_v33 = vcombine.high %v1706_v31, %v1710_v29  ;;  %v6748_v39 = vcombine.low %v1706_v31, %v1710_v29  ;;  %v9233_v31 = vld [vmem:[%s1295_s15] sm:$0xff] }
 0x2bc   : > { %v1851_v29 = vsub.s32 2, %v9221_v21 }
 0x2bd   : > { %5176 = vmatpush1.bf16.msra.mxu0 %v6690_v35  ;;  %5420 = vmatpush1.bf16.msra.mxu1 %v6692_v36  ;;  %v1717_v35 = vld [vmem:[%s8542_s14 + $0xc30] sm:$0xff]  ;;  %v1714_v36 = vld [vmem:[%s8542_s14 + $0xc18] sm:$0xff] }
 0x2be   : > { %5177 = vmatprep.subr.bf16.mxu0 %v6699_v38  ;;  %5421 = vmatprep.subr.bf16.mxu1 %v6701_v56  ;;  %v1718_v38 = vld [vmem:[%s8542_s14 + $0xc38] sm:$0xff]  ;;  %v6746_v56 = vcombine.low %v1705_v22, %v1709_v23  ;;  %v6755_v40 = vcombine.high %v1713_v34, %v1717_v35  ;;  %v1843_v22 = vsub.s32 0, %v9221_v21 }
 0x2bf   : > { %v6757_v41 = vcombine.high %v1714_v36, %v1718_v38  ;;  %v6756_v48 = vcombine.low %v1714_v36, %v1718_v38 }
 0x2c0   : > { %v9245_v38 = vrot.slane %v9233_v31, %v1843_v22  ;;  %v1786_v22 = vld [vmem:[%s8542_s14 + $0xe58] sm:$0xff] }
 0x2c1   : > { %5178 = vmatpush1.bf16.msra.mxu0 %v6698_v43  ;;  %5422 = vmatpush1.bf16.msra.mxu1 %v6700_v47  ;;  %v1725_v43 = vld [vmem:[%s8542_s14 + $0xc70] sm:$0xff]  ;;  %v1722_v47 = vld [vmem:[%s8542_s14 + $0xc58] sm:$0xff] }
 0x2c2   : > { %5179 = vmatprep.subr.bf16.mxu0 %v6707_v57  ;;  %5423 = vmatprep.subr.bf16.mxu1 %v6709_v58  ;;  %v1726_v57 = vld [vmem:[%s8542_s14 + $0xc78] sm:$0xff]  ;;  %v6754_v58 = vcombine.low %v1713_v34, %v1717_v35  ;;  %v6763_v49 = vcombine.high %v1721_v42, %v1725_v43 }
 0x2c3   : > { %v6765_v1 = vcombine.high %v1722_v47, %v1726_v57  ;;  %v6764_v3 = vcombine.low %v1722_v47, %v1726_v57  ;;  %v1762_v34 = vld [vmem:[%s8542_s14 + $0xd98] sm:$0xff] }
 0x2c4   : > { %v1766_v35 = vld [vmem:[%s8542_s14 + $0xdb8] sm:$0xff] }
 0x2c5   : > { %5180 = vmatpush1.bf16.msra.mxu0 %v6706_v50  ;;  %5424 = vmatpush1.bf16.msra.mxu1 %v6708_v51  ;;  %v1733_v50 = vld [vmem:[%s8542_s14 + $0xcb0] sm:$0xff]  ;;  %v1730_v51 = vld [vmem:[%s8542_s14 + $0xc98] sm:$0xff]  ;;  %v6805_v57 = vcombine.high %v1762_v34, %v1766_v35 }
 0x2c6   : > { %5181 = vmatprep.subr.bf16.mxu0 %v6715_v53  ;;  %5425 = vmatprep.subr.bf16.mxu1 %v6717_v55  ;;  %v1734_v53 = vld [vmem:[%s8542_s14 + $0xcb8] sm:$0xff]  ;;  %v6762_v55 = vcombine.low %v1721_v42, %v1725_v43  ;;  %v6771_v63 = vcombine.high %v1729_v2, %v1733_v50  ;;  %v9250_v43 = vrot.slane %v9233_v31, %v1851_v29 }
 0x2c7   : > { %v6773_v59 = vcombine.high %v1730_v51, %v1734_v53 }
 0x2c9   : > { %5182 = vmatpush1.bf16.msra.mxu0 %v6714_v61  ;;  %5426 = vmatpush1.bf16.msra.mxu1 %v6716_v62  ;;  %v1741_v61 = vld [vmem:[%s8542_s14 + $0xcf0] sm:$0xff]  ;;  %v1738_v62 = vld [vmem:[%s8542_s14 + $0xcd8] sm:$0xff] }
 0x2ca   : > { %5183 = vmatprep.subr.bf16.mxu0 %v6723_v0  ;;  %5427 = vmatprep.subr.bf16.mxu1 %v6725_v4  ;;  %v1742_v0 = vld [vmem:[%s8542_s14 + $0xcf8] sm:$0xff]  ;;  %v6772_v4 = vcombine.low %v1730_v51, %v1734_v53  ;;  %v6779_v5 = vcombine.high %v1737_v60, %v1741_v61  ;;  %v6804_v53 = vcombine.low %v1762_v34, %v1766_v35 }
 0x2cb   : > { %v6781_v26 = vcombine.high %v1738_v62, %v1742_v0 }
 0x2cd   : > { %5184 = vmatpush1.bf16.msra.mxu0 %v6722_v11  ;;  %5428 = vmatpush1.bf16.msra.mxu1 %v6724_v13  ;;  %v1749_v11 = vld [vmem:[%s8542_s14 + $0xd30] sm:$0xff]  ;;  %v1746_v13 = vld [vmem:[%s8542_s14 + $0xd18] sm:$0xff] }
 0x2ce   : > { %5185 = vmatprep.subr.bf16.mxu0 %v6731_v14  ;;  %5429 = vmatprep.subr.bf16.mxu1 %v6733_v15  ;;  %v1750_v14 = vld [vmem:[%s8542_s14 + $0xd38] sm:$0xff]  ;;  %v6780_v15 = vcombine.low %v1738_v62, %v1742_v0  ;;  %v6787_v17 = vcombine.high %v1745_v9, %v1749_v11 }
 0x2cf   : > { %v6789_v19 = vcombine.high %v1746_v13, %v1750_v14 }
 0x2d1   : > { %5186 = vmatpush1.bf16.msra.mxu0 %v6730_v20  ;;  %5430 = vmatpush1.bf16.msra.mxu1 %v6732_v25  ;;  %v1757_v20 = vld [vmem:[%s8542_s14 + $0xd70] sm:$0xff]  ;;  %v1754_v25 = vld [vmem:[%s8542_s14 + $0xd58] sm:$0xff] }
 0x2d2   : > { %5187 = vmatprep.subr.bf16.mxu0 %v6739_v27  ;;  %5431 = vmatprep.subr.bf16.mxu1 %v6741_v28  ;;  %v6786_v27 = vcombine.low %v1745_v9, %v1749_v11  ;;  %v6788_v28 = vcombine.low %v1746_v13, %v1750_v14  ;;  %v6795_v23 = vcombine.high %v1753_v37, %v1757_v20  ;;  %v1778_v13 = vld [vmem:[%s8542_s14 + $0xe18] sm:$0xff] }
 0x2d3   : > { %v6794_v36 = vcombine.low %v1753_v37, %v1757_v20  ;;  %v1782_v14 = vld [vmem:[%s8542_s14 + $0xe38] sm:$0xff] }
 0x2d5   : > { %5188 = vmatpush1.bf16.msra.mxu0 %v6738_v45  ;;  %5432 = vmatpush1.bf16.msra.mxu1 %v6740_v7  ;;  %v1847_v45 = vsub.s32 1, %v9221_v21 }
 0x2d6   : > { %5189 = vmatprep.subr.bf16.mxu0 %v6747_v32  ;;  %5433 = vmatprep.subr.bf16.mxu1 %v6749_v33  ;;  %v1765_v32 = vld [vmem:[%s8542_s14 + $0xdb0] sm:$0xff]  ;;  %v1855_v33 = vsub.s32 3, %v9221_v21 }
 0x2d7   : > { %v9253_v47 = vrot.slane %v9233_v31, %v1847_v45 }
 0x2d9   : > { %5190 = vmatpush1.bf16.msra.mxu0 %v6746_v56  ;;  %5434 = vmatpush1.bf16.msra.mxu1 %v6748_v39 }
 0x2da   : > { %5220 = vmatprep.subr.bf16.mxu0 %v6755_v40  ;;  %5464 = vmatprep.subr.bf16.mxu1 %v6757_v41  ;;  %v1769_v40 = vld [vmem:[%s8542_s14 + $0xdd0] sm:$0xff] }
 0x2db   : > { %v1773_v41 = vld [vmem:[%s8542_s14 + $0xdf0] sm:$0xff] }
 0x2dc   : > { %5192 = vmatmul.mubr.bf16.vlgmr.msra.gmra.mrb[12].mxu0 %v8837_v18  ;;  %5436 = vmatmul.mubr.bf16.vlgmr.msra.gmra.mrb[12].mxu1 %v8837_v18  ;;  %v6770_v18 = vcombine.low %v1729_v2, %v1733_v50 }
 0x2dd   : > { %5221 = vmatpush1.bf16.msra.mxu0 %v6754_v58  ;;  %5465 = vmatpush1.bf16.msra.mxu1 %v6756_v48  ;;  %v1770_v58 = vld [vmem:[%s8542_s14 + $0xdd8] sm:$0xff] }
 0x2de   : > { %5222 = vmatprep.subr.bf16.mxu0 %v6763_v49  ;;  %5466 = vmatprep.subr.bf16.mxu1 %v6765_v1  ;;  %v9259_v1 = vrot.slane %v9233_v31, %v1855_v33  ;;  %v6820_v33 = vcombine.low %v1778_v13, %v1782_v14 }
 0x2df   : > { %5201 = vmatprep.mubr.bf16.mxu0 %v8848_v30  ;;  %5445 = vmatprep.mubr.bf16.mxu1 %v8848_v30  ;;  %v6778_v30 = vcombine.low %v1737_v60, %v1741_v61 }
 0x2e1   : > { %5223 = vmatpush1.bf16.msra.mxu0 %v6762_v55  ;;  %5467 = vmatpush1.bf16.msra.mxu1 %v6764_v3  ;;  %v6811_v55 = vcombine.high %v1769_v40, %v1773_v41 }
 0x2e2   : > { %5224 = vmatprep.subr.bf16.mxu0 %v6771_v63  ;;  %5468 = vmatprep.subr.bf16.mxu1 %v6773_v59 }
 0x2e4   : > { %5202 = vmatmul.mubr.bf16.gmra.mrb[16].mxu0 %v8860_v44  ;;  %5446 = vmatmul.mubr.bf16.gmra.mrb[16].mxu1 %v8860_v44  ;;  %v1758_v44 = vld [vmem:[%s8542_s14 + $0xd78] sm:$0xff] }
 0x2e5   : > { %5225 = vmatpush1.bf16.msra.mxu0 %v6770_v18  ;;  %5469 = vmatpush1.bf16.msra.mxu1 %v6772_v4  ;;  %v6797_v7 = vcombine.high %v1754_v25, %v1758_v44  ;;  %v6796_v56 = vcombine.low %v1754_v25, %v1758_v44  ;;  %v1785_v25 = vld [vmem:[%s8542_s14 + $0xe50] sm:$0xff] }
 0x2e6   : > { %5226 = vmatprep.subr.bf16.mxu0 %v6779_v5  ;;  %5470 = vmatprep.subr.bf16.mxu1 %v6781_v26  ;;  %v1777_v5 = vld [vmem:[%s8542_s14 + $0xe10] sm:$0xff] }
 0x2e7   : > { %5211 = vmatprep.mubr.bf16.mxu0 %v8867_v52  ;;  %5455 = vmatprep.mubr.bf16.mxu1 %v8867_v52  ;;  %v1761_v52 = vld [vmem:[%s8542_s14 + $0xd90] sm:$0xff]  ;;  %v6819_v20 = vcombine.high %v1777_v5, %v1781_v10 }
 0x2e8   : > { %v6803_v39 = vcombine.high %v1761_v52, %v1765_v32  ;;  %v6802_v51 = vcombine.low %v1761_v52, %v1765_v32  ;;  %v1789_v44 = vld [vmem:[%s8542_s14 + $0xe70] sm:$0xff]  ;;  %v6818_v32 = vcombine.low %v1777_v5, %v1781_v10 }
 0x2e9   : > { %5227 = vmatpush1.bf16.msra.mxu0 %v6778_v30  ;;  %5471 = vmatpush1.bf16.msra.mxu1 %v6780_v15  ;;  %v6827_v34 = vcombine.high %v1785_v25, %v1789_v44 }
 0x2ea   : > { %5228 = vmatprep.subr.bf16.mxu0 %v6787_v17  ;;  %5472 = vmatprep.subr.bf16.mxu1 %v6789_v19  ;;  %v6810_v17 = vcombine.low %v1769_v40, %v1773_v41 }
 0x2ec   : > { %5212 = vmatmul.mubr.bf16.gmra.mrb[20].mxu0 %v8879_v6  ;;  %5456 = vmatmul.mubr.bf16.gmra.mrb[20].mxu1 %v8879_v6  ;;  %v1774_v6 = vld [vmem:[%s8542_s14 + $0xdf8] sm:$0xff] }
 0x2ed   : > { %5229 = vmatpush1.bf16.msra.mxu0 %v6786_v27  ;;  %5473 = vmatpush1.bf16.msra.mxu1 %v6788_v28  ;;  %v6812_v37 = vcombine.low %v1770_v58, %v1774_v6  ;;  %v6821_v28 = vcombine.high %v1778_v13, %v1782_v14 }
 0x2ee   : > { %5230 = vmatprep.subr.bf16.mxu0 %v6795_v23  ;;  %5474 = vmatprep.subr.bf16.mxu1 %v6797_v7  ;;  %v1790_v23 = vld [vmem:[%s8542_s14 + $0xe78] sm:$0xff] }
 0x2ef   : > { %v4766_v42 = vpop.f32.mrb[0].mxu0  ;;  %5252 = vmatprep.mubr.bf16.mxu0 %v8895_v16  ;;  %v5010_v48 = vpop.f32.mrb[0].mxu1  ;;  %5496 = vmatprep.mubr.bf16.mxu1 %v8895_v16  ;;  %v6813_v16 = vcombine.high %v1770_v58, %v1774_v6  ;;  %v6829_v40 = vcombine.high %v1786_v22, %v1790_v23  ;;  %v6828_v5 = vcombine.low %v1786_v22, %v1790_v23 }
 0x2f0   : > { %v4768_v49 = vpop.f32.mrb[1].mxu0  ;;  %v5012_v2 = vpop.f32.mrb[1].mxu1  ;;  %v9263_v3 = vadd.f32 %v4766_v42, %v9245_v38  ;;  %v9269_v61 = vadd.f32 %v5010_v48, %v9250_v43  ;;  %v1793_v48 = vld [vmem:[%s8542_s14 + $0xe90] sm:$0xff] }
 0x2f1   : > { %v4770_v50 = vpop.f32.mrb[2].mxu0  ;;  %5231 = vmatpush1.bf16.msra.mxu0 %v6794_v36  ;;  %v5014_v59 = vpop.f32.mrb[2].mxu1  ;;  %5475 = vmatpush1.bf16.msra.mxu1 %v6796_v56  ;;  %v9272_v62 = vadd.f32 %v4768_v49, %v9253_v47  ;;  %v9283_v26 = vadd.f32 %v5012_v2, %v9259_v1  ;;  %v1797_v49 = vld [vmem:[%s8542_s14 + $0xeb0] sm:$0xff] }
 0x2f2   : > { %v9266_v63 = vadd.f32 %v4770_v50, %v9245_v38  ;;  %v4772_v60 = vpop.f32.mrb[3].mxu0  ;;  %5232 = vmatprep.subr.bf16.mxu0 %v6803_v39  ;;  %v9275_v0 = vadd.f32 %v5014_v59, %v9250_v43  ;;  %v5016_v4 = vpop.f32.mrb[3].mxu1  ;;  %5476 = vmatprep.subr.bf16.mxu1 %v6805_v57  ;;  %v6835_v10 = vcombine.high %v1793_v48, %v1797_v49 }
 0x2f3   : > { %v9278_v18 = vadd.f32 %v4772_v60, %v9253_v47  ;;  %v9288_v11 = vadd.f32 %v5016_v4, %v9259_v1  ;;  %v6834_v23 = vcombine.low %v1793_v48, %v1797_v49 }
 0x2f4   : > { %v7035_v9 = vpack.c.bf16 %v9266_v63, %v9263_v3  ;;  %v7043_v30 = vpack.c.bf16 %v9275_v0, %v9269_v61 }
 0x2f5   : > { %v7033_v15 = vpack.c.bf16 %v9278_v18, %v9272_v62  ;;  %5233 = vmatpush1.bf16.msra.mxu0 %v6802_v51  ;;  %v7041_v19 = vpack.c.bf16 %v9288_v11, %v9283_v26  ;;  %5477 = vmatpush1.bf16.msra.mxu1 %v6804_v53  ;;  %v1794_v53 = vld [vmem:[%s8542_s14 + $0xe98] sm:$0xff] }
 0x2f6   : > { %5234 = vmatprep.subr.bf16.mxu0 %v6811_v55  ;;  %5478 = vmatprep.subr.bf16.mxu1 %v6813_v16  ;;  %v1798_v55 = vld [vmem:[%s8542_s14 + $0xeb8] sm:$0xff]  ;;  %v6826_v16 = vcombine.low %v1785_v25, %v1789_v44 }
 0x2f7   : > { %v4776_v27 = vpop.f32.mrb[4].mxu0  ;;  %v5020_v29 = vpop.f32.mrb[4].mxu1  ;;  %v6837_v14 = vcombine.high %v1794_v53, %v1798_v55  ;;  %v1806_v25 = vld [vmem:[%s8542_s14 + $0xef8] sm:$0xff] }
 0x2f8   : > { %v4778_v45 = vpop.f32.mrb[5].mxu0  ;;  %v5022_v7 = vpop.f32.mrb[5].mxu1  ;;  %v9303_v35 = vadd.f32 %v4776_v27, %v9245_v38  ;;  %v9309_v41 = vadd.f32 %v5020_v29, %v9250_v43 }
 0x2f9   : > { %v4780_v52 = vpop.f32.mrb[6].mxu0  ;;  %5235 = vmatpush1.bf16.msra.mxu0 %v6810_v17  ;;  %v5024_v56 = vpop.f32.mrb[6].mxu1  ;;  %5479 = vmatpush1.bf16.msra.mxu1 %v6812_v37  ;;  %v9312_v42 = vadd.f32 %v4778_v45, %v9253_v47  ;;  %v9323_v2 = vadd.f32 %v5022_v7, %v9259_v1  ;;  %v1801_v17 = vld [vmem:[%s8542_s14 + $0xed0] sm:$0xff]  ;;  %v6836_v7 = vcombine.low %v1794_v53, %v1798_v55 }
 0x2fa   : > { %v9306_v36 = vadd.f32 %v4780_v52, %v9245_v38  ;;  %v4782_v39 = vpop.f32.mrb[7].mxu0  ;;  %5236 = vmatprep.subr.bf16.mxu0 %v6819_v20  ;;  %v9315_v57 = vadd.f32 %v5024_v56, %v9250_v43  ;;  %v5026_v6 = vpop.f32.mrb[7].mxu1  ;;  %5480 = vmatprep.subr.bf16.mxu1 %v6821_v28  ;;  %v1805_v37 = vld [vmem:[%s8542_s14 + $0xef0] sm:$0xff]  ;;  %v1802_v28 = vld [vmem:[%s8542_s14 + $0xed8] sm:$0xff] }
 0x2fb   : > { %v9318_v58 = vadd.f32 %v4782_v39, %v9253_v47  ;;  %v9328_v51 = vadd.f32 %v5026_v6, %v9259_v1  ;;  %v6843_v52 = vcombine.high %v1801_v17, %v1805_v37  ;;  %v1813_v56 = vld [vmem:[%s8542_s14 + $0xf30] sm:$0xff]  ;;  %v1810_v39 = vld [vmem:[%s8542_s14 + $0xf18] sm:$0xff]  ;;  %v6842_v6 = vcombine.low %v1801_v17, %v1805_v37 }
 0x2fc   : > { %v7039_v50 = vpack.c.bf16 %v9306_v36, %v9303_v35  ;;  %v7047_v59 = vpack.c.bf16 %v9315_v57, %v9309_v41  ;;  %v6844_v48 = vcombine.low %v1802_v28, %v1806_v25  ;;  %v1817_v55 = vld [vmem:[%s8542_s14 + $0xf50] sm:$0xff] }
 0x2fd   : > { %v7037_v60 = vpack.c.bf16 %v9318_v58, %v9312_v42  ;;  %5237 = vmatpush1.bf16.msra.mxu0 %v6818_v32  ;;  %v7045_v4 = vpack.c.bf16 %v9328_v51, %v9323_v2  ;;  %5481 = vmatpush1.bf16.msra.mxu1 %v6820_v33  ;;  %v6845_v33 = vcombine.high %v1802_v28, %v1806_v25  ;;  %v1825_v28 = vld [vmem:[%s8542_s14 + $0xf90] sm:$0xff] }
 0x2fe   : > { %5238 = vmatprep.subr.bf16.mxu0 %v6827_v34  ;;  %5482 = vmatprep.subr.bf16.mxu1 %v6829_v40  ;;  %v1809_v34 = vld [vmem:[%s8542_s14 + $0xf10] sm:$0xff]  ;;  %v1814_v40 = vld [vmem:[%s8542_s14 + $0xf38] sm:$0xff] }
 0x2ff   : > { %v9338_v13 = vpop.f32.mrb[8].mxu0  ;;  %v9342_v20 = vpop.f32.mrb[8].mxu1  ;;  %v6851_v49 = vcombine.high %v1809_v34, %v1813_v56  ;;  %v6853_v53 = vcombine.high %v1810_v39, %v1814_v40  ;;  %v1829_v25 = vld [vmem:[%s8542_s14 + $0xfb0] sm:$0xff] }
 0x300   : > { %v9344_v27 = vpop.f32.mrb[9].mxu0  ;;  %v9348_v44 = vpop.f32.mrb[9].mxu1  ;;  %v7201_v63 = vadd.f32 %v9338_v13, %v9245_v38  ;;  %v7434_v38 = vmov 0.0  }
 0x301   : > { %v4790_v22 = vpop.f32.mrb[10].mxu0  ;;  %5239 = vmatpush1.bf16.msra.mxu0 %v6826_v16  ;;  %v5034_v29 = vpop.f32.mrb[10].mxu1  ;;  %5483 = vmatpush1.bf16.msra.mxu1 %v6828_v5  ;;  %v1821_v16 = vld [vmem:[%s8542_s14 + $0xf70] sm:$0xff]  ;;  %v1818_v5 = vld [vmem:[%s8542_s14 + $0xf58] sm:$0xff]  ;;  %v7212_v3 = vadd.f32 %v9348_v44, %v9259_v1 }
 0x302   : > { %v4791_v45 = vpop.f32.mrb[11].mxu0  ;;  %5240 = vmatprep.subr.bf16.mxu0 %v6835_v10  ;;  %v5035_v32 = vpop.f32.mrb[11].mxu1  ;;  %5484 = vmatprep.subr.bf16.mxu1 %v6837_v14  ;;  %v1822_v10 = vld [vmem:[%s8542_s14 + $0xf78] sm:$0xff]  ;;  %v6850_v14 = vcombine.low %v1809_v34, %v1813_v56  ;;  %v6852_v22 = vcombine.low %v1810_v39, %v1814_v40  ;;  %v6859_v17 = vcombine.high %v1817_v55, %v1821_v16  ;;  %v1837_v34 = vld [vmem:[%s8542_s14 + $0xff0] sm:$0xff] }
 0x303   : > { %v6861_v37 = vcombine.high %v1818_v5, %v1822_v10  ;;  %v1830_v29 = vld [vmem:[%s8542_s14 + $0xfb8] sm:$0xff]  ;;  %v6858_v45 = vcombine.low %v1817_v55, %v1821_v16  ;;  %v6866_v40 = vcombine.low %v1825_v28, %v1829_v25 }
 0x304   : > { %v1834_v56 = vld [vmem:[%s8542_s14 + $0xfd8] sm:$0xff] }
 0x305   : > { %5241 = vmatpush1.bf16.msra.mxu0 %v6834_v23  ;;  %5485 = vmatpush1.bf16.msra.mxu1 %v6836_v7  ;;  %v1826_v23 = vld [vmem:[%s8542_s14 + $0xf98] sm:$0xff]  ;;  %v6860_v7 = vcombine.low %v1818_v5, %v1822_v10 }
 0x306   : > { %5242 = vmatprep.subr.bf16.mxu0 %v6843_v52  ;;  %5486 = vmatprep.subr.bf16.mxu1 %v6845_v33  ;;  %v6867_v52 = vcombine.high %v1825_v28, %v1829_v25  ;;  %v6869_v32 = vcombine.high %v1826_v23, %v1830_v29  ;;  %v1833_v33 = vld [vmem:[%s8542_s14 + $0xfd0] sm:$0xff]  ;;  %v1838_v39 = vld [vmem:[%s8542_s14 + $0xff8] sm:$0xff] }
 0x307   : > { %v6876_v55 = vcombine.low %v1834_v56, %v1838_v39 }
 0x309   : > { %5243 = vmatpush1.bf16.msra.mxu0 %v6842_v6  ;;  %5487 = vmatpush1.bf16.msra.mxu1 %v6844_v48  ;;  %v6868_v6 = vcombine.low %v1826_v23, %v1830_v29  ;;  %v6875_v48 = vcombine.high %v1833_v33, %v1837_v34 }
 0x30a   : > { %5244 = vmatprep.subr.bf16.mxu0 %v6851_v49  ;;  %5488 = vmatprep.subr.bf16.mxu1 %v6853_v53  ;;  %v6877_v49 = vcombine.high %v1834_v56, %v1838_v39  ;;  %v6874_v53 = vcombine.low %v1833_v33, %v1837_v34  ;;  %v5855_v33 = vld [vmem:[%s9455_s26 + $0x80] sm:$0xff]  ;;  %v5856_v56 = vld [vmem:[%s9455_s26 + $0x88] sm:$0xff] }
 0x30b   : > { %v5887_v39 = vld [vmem:[%s9455_s26 + $0x180] sm:$0xff] }
 0x30d   : > { %5245 = vmatpush1.bf16.msra.mxu0 %v6850_v14  ;;  %5489 = vmatpush1.bf16.msra.mxu1 %v6852_v22 }
 0x30e   : > { %5246 = vmatprep.subr.bf16.mxu0 %v6859_v17  ;;  %5490 = vmatprep.subr.bf16.mxu1 %v6861_v37 }
 0x311   : > { %5247 = vmatpush1.bf16.msra.mxu0 %v6858_v45  ;;  %5491 = vmatpush1.bf16.msra.mxu1 %v6860_v7 }
 0x312   : > { %5248 = vmatprep.subr.bf16.mxu0 %v6867_v52  ;;  %5492 = vmatprep.subr.bf16.mxu1 %v6869_v32 }
 0x315   : > { %5249 = vmatpush1.bf16.msra.mxu0 %v6866_v40  ;;  %5493 = vmatpush1.bf16.msra.mxu1 %v6868_v6  ;;  %v5888_v40 = vld [vmem:[%s9455_s26 + $0x188] sm:$0xff] }
 0x316   : > { %5250 = vmatprep.subr.bf16.mxu0 %v6875_v48  ;;  %5494 = vmatprep.subr.bf16.mxu1 %v6877_v49  ;;  %v5839_v49 = vld [vmem:[%s9455_s26] sm:$0xff] }
 0x319   : > { %5251 = vmatpush1.bf16.msra.mxu0 %v6874_v53  ;;  %5495 = vmatpush1.bf16.msra.mxu1 %v6876_v55  ;;  %v5840_v53 = vld [vmem:[%s9455_s26 + $0x8] sm:$0xff]  ;;  %v5871_v55 = vld [vmem:[%s9455_s26 + $0x100] sm:$0xff] }
 0x31a   : > { %7034 = vmatprep.subr.bf16.mxu0 %v7033_v15  ;;  %7042 = vmatprep.subr.bf16.mxu1 %v7041_v19 }
 0x31c   : > { %5253 = vmatmul.mubr.bf16.vlgmr.msra.gmra.mrb[12].mxu0 %v8948_v24  ;;  %5497 = vmatmul.mubr.bf16.vlgmr.msra.gmra.mrb[12].mxu1 %v8948_v24  ;;  %v7202_v24 = vadd.f32 %v9344_v27, %v9253_v47  ;;  %v1871_v47 = vsub.s32 7, %v9221_v21 }
 0x31d   : > { %7036 = vmatpush1.bf16.msra.mxu0 %v7035_v9  ;;  %7044 = vmatpush1.bf16.msra.mxu1 %v7043_v30 }
 0x31e   : > { %7038 = vmatprep.subr.bf16.mxu0 %v7037_v60  ;;  %7046 = vmatprep.subr.bf16.mxu1 %v7045_v4  ;;  %v9434_v9 = vrot.slane %v9233_v31, %v1871_v47 }
 0x31f   : > { %5262 = vmatprep.mubr.bf16.mxu0 %v8957_v8  ;;  %5506 = vmatprep.mubr.bf16.mxu1 %v8957_v8  ;;  %v7211_v8 = vadd.f32 %v9342_v20, %v9250_v43  ;;  %v1863_v43 = vsub.s32 5, %v9221_v21 }
 0x321   : > { %7040 = vmatpush1.bf16.msra.mxu0 %v7039_v50  ;;  %7048 = vmatpush1.bf16.msra.mxu1 %v7047_v59  ;;  %v1864_v0 = vrot.slane %v9233_v31, %v1863_v43 }
 0x322   : > { %6878 = vmatprep.subr.msk.mxu0 %vm5530_vm0, %v7202_v24  ;;  %6881 = vmatprep.subr.msk.mxu1 %vm5530_vm0, %v7212_v3 }
 0x324   : > { %5263 = vmatmul.mubr.bf16.gmra.mrb[16].mxu0 %v8969_v46  ;;  %5507 = vmatmul.mubr.bf16.gmra.mrb[16].mxu1 %v8969_v46  ;;  %v9415_v46 = vld [vmem:[%s9622_s3] sm:$0x3] }
 0x325   : > { %6879 = vmatpush1.msk.msra.mxu0 %vm5530_vm0, %v7201_v63  ;;  %6882 = vmatpush1.msk.msra.mxu1 %vm5530_vm0, %v7211_v8  ;;  %v5872_v8 = vld [vmem:[%s9455_s26 + $0x108] sm:$0xff] }
 0x326   : > { %5272 = vmatprep.mubr.bf16.mxu0 %v8976_v54  ;;  %5516 = vmatprep.mubr.bf16.mxu1 %v8976_v54  ;;  %v1859_v54 = vsub.s32 4, %v9221_v21 }
 0x328   : > { %v9427_v1 = vrot.slane %v9233_v31, %v1859_v54  ;;  %v5858_v54 = vld [vmem:[%s9455_s26 + $0x98] sm:$0xff] }
 0x32c   : > { %5273 = vmatmul.mubr.bf16.gmra.mrb[20].mxu0 %v8988_v12  ;;  %5517 = vmatmul.mubr.bf16.gmra.mrb[20].mxu1 %v8988_v12  ;;  %v1867_v12 = vsub.s32 6, %v9221_v21 }
 0x32d   : > { %5619 = vmatprep.mubr.f32.mxu0 %v7434_v38  ;;  %5690 = vmatprep.mubr.f32.mxu1 %v7434_v38 }
 0x32e   : > { %v9430_v62 = vrot.slane %v9233_v31, %v1867_v12 }
 0x334   : > { %6880 = vmatmul.mubr.msk.f32.vlgmr.msra.gmra.mrb[24].mxu0 %vm5526_vm1, %v9415_v46  ;;  %6883 = vmatmul.mubr.msk.f32.vlgmr.msra.gmra.mrb[24].mxu1 %vm5526_vm1, %v9415_v46 }
 0x335   : > { %5761 = vmatprep.mubr.f32.mxu0 %v7434_v38  ;;  %5832 = vmatprep.mubr.f32.mxu1 %v7434_v38  ;;  %v5857_v38 = vld [vmem:[%s9455_s26 + $0x90] sm:$0xff] }
 0x3ef   : > { %v5254_v61 = vpop.f32.mrb[12].mxu0  ;;  %v5498_v18 = vpop.f32.mrb[12].mxu1 }
 0x3f0   : > { %v5256_v26 = vpop.f32.mrb[13].mxu0  ;;  %v5500_v21 = vpop.f32.mrb[13].mxu1  ;;  %v7213_v30 = vadd.f32 %v5254_v61, %v9427_v1  ;;  %v7223_v36 = vadd.f32 %v5498_v18, %v9430_v62  ;;  %v7065_v18 = vpack.c.bf16 %v5856_v56, %v5855_v33  ;;  %v5895_v33 = vld [vmem:[%s9455_s26 + $0x1c0] sm:$0xff] }
 0x3f1   : > { %v5258_v11 = vpop.f32.mrb[14].mxu0  ;;  %v5502_v19 = vpop.f32.mrb[14].mxu1  ;;  %v7214_v41 = vadd.f32 %v5256_v26, %v1864_v0  ;;  %v7224_v58 = vadd.f32 %v5500_v21, %v9434_v9  ;;  %v5889_v26 = vld [vmem:[%s9455_s26 + $0x190] sm:$0xff]  ;;  %v5890_v21 = vld [vmem:[%s9455_s26 + $0x198] sm:$0xff] }
 0x3f2   : > { %v7215_v15 = vadd.f32 %v5258_v11, %v9427_v1  ;;  %v5260_v35 = vpop.f32.mrb[15].mxu0  ;;  %v7225_v42 = vadd.f32 %v5502_v19, %v9430_v62  ;;  %v5504_v57 = vpop.f32.mrb[15].mxu1  ;;  %v5841_v19 = vld [vmem:[%s9455_s26 + $0x10] sm:$0xff] }
 0x3f3   : > { %v7216_v31 = vadd.f32 %v5260_v35, %v1864_v0  ;;  %v7226_v50 = vadd.f32 %v5504_v57, %v9434_v9  ;;  %v5842_v35 = vld [vmem:[%s9455_s26 + $0x18] sm:$0xff]  ;;  %v5891_v57 = vld [vmem:[%s9455_s26 + $0x1a0] sm:$0xff] }
 0x3f4   : > { %v7051_v2 = vpack.c.bf16 %v7215_v15, %v7213_v30  ;;  %v7059_v51 = vpack.c.bf16 %v7225_v42, %v7223_v36  ;;  %v7097_v30 = vpack.c.bf16 %v5888_v40, %v5887_v39  ;;  %v7069_v15 = vpack.c.bf16 %v5858_v54, %v5857_v38  ;;  %v5873_v36 = vld [vmem:[%s9455_s26 + $0x110] sm:$0xff]  ;;  %v5859_v42 = vld [vmem:[%s9455_s26 + $0xa0] sm:$0xff] }
 0x3f5   : > { %v7049_v59 = vpack.c.bf16 %v7216_v31, %v7214_v41  ;;  %v7057_v60 = vpack.c.bf16 %v7226_v50, %v7224_v58  ;;  %v5874_v41 = vld [vmem:[%s9455_s26 + $0x118] sm:$0xff]  ;;  %v5860_v31 = vld [vmem:[%s9455_s26 + $0xa8] sm:$0xff] }
 0x3f6   : > { %v5892_v58 = vld [vmem:[%s9455_s26 + $0x1a8] sm:$0xff] }
 0x3f7   : > { %v5264_v4 = vpop.f32.mrb[16].mxu0  ;;  %7050 = vmatprep.subr.bf16.mxu0 %v7049_v59  ;;  %v5508_v13 = vpop.f32.mrb[16].mxu1  ;;  %7058 = vmatprep.subr.bf16.mxu1 %v7057_v60  ;;  %v7073_v59 = vpack.c.bf16 %v5860_v31, %v5859_v42  ;;  %v5843_v60 = vld [vmem:[%s9455_s26 + $0x20] sm:$0xff]  ;;  %v5869_v42 = vld [vmem:[%s9455_s26 + $0xf0] sm:$0xff]  ;;  %v5870_v31 = vld [vmem:[%s9455_s26 + $0xf8] sm:$0xff] }
 0x3f8   : > { %v5266_v20 = vpop.f32.mrb[17].mxu0  ;;  %7052 = vmatpush1.bf16.msra.mxu0 %v7051_v2  ;;  %v5510_v27 = vpop.f32.mrb[17].mxu1  ;;  %7060 = vmatpush1.bf16.msra.mxu1 %v7059_v51  ;;  %v7217_v16 = vadd.f32 %v5264_v4, %v9427_v1  ;;  %v7227_v22 = vadd.f32 %v5508_v13, %v9430_v62  ;;  %v7071_v2 = vpack.c.bf16 %v5842_v35, %v5841_v19  ;;  %v5844_v4 = vld [vmem:[%s9455_s26 + $0x28] sm:$0xff]  ;;  %v5851_v19 = vld [vmem:[%s9455_s26 + $0x60] sm:$0xff] }
 0x3f9   : > { %v5268_v44 = vpop.f32.mrb[18].mxu0  ;;  %v5512_v10 = vpop.f32.mrb[18].mxu1  ;;  %v7218_v17 = vadd.f32 %v5266_v20, %v1864_v0  ;;  %v7228_v23 = vadd.f32 %v5510_v27, %v9434_v9  ;;  %v7103_v51 = vpack.c.bf16 %v5874_v41, %v5873_v36  ;;  %v7105_v27 = vpack.c.bf16 %v5892_v58, %v5891_v57  ;;  %v5852_v35 = vld [vmem:[%s9455_s26 + $0x68] sm:$0xff]  ;;  %v5883_v36 = vld [vmem:[%s9455_s26 + $0x160] sm:$0xff]  ;;  %v5901_v57 = vld [vmem:[%s9455_s26 + $0x1f0] sm:$0xff] }
 0x3fa   : > { %v7219_v5 = vadd.f32 %v5268_v44, %v9427_v1  ;;  %v5270_v14 = vpop.f32.mrb[19].mxu0  ;;  %v7229_v37 = vadd.f32 %v5512_v10, %v9430_v62  ;;  %v5514_v25 = vpop.f32.mrb[19].mxu1  ;;  %v5876_v44 = vld [vmem:[%s9455_s26 + $0x128] sm:$0xff]  ;;  %v5902_v58 = vld [vmem:[%s9455_s26 + $0x1f8] sm:$0xff] }
 0x3fb   : > { %v7220_v28 = vadd.f32 %v5270_v14, %v1864_v0  ;;  %v7230_v45 = vadd.f32 %v5514_v25, %v9434_v9  ;;  %v5893_v14 = vld [vmem:[%s9455_s26 + $0x1b0] sm:$0xff]  ;;  %v5884_v41 = vld [vmem:[%s9455_s26 + $0x168] sm:$0xff] }
 0x3fc   : > { %v7055_v29 = vpack.c.bf16 %v7219_v5, %v7217_v16  ;;  %v7063_v7 = vpack.c.bf16 %v7229_v37, %v7227_v22  ;;  %v5861_v16 = vld [vmem:[%s9455_s26 + $0xb0] sm:$0xff]  ;;  %v5862_v5 = vld [vmem:[%s9455_s26 + $0xb8] sm:$0xff] }
 0x3fd   : > { %v7053_v52 = vpack.c.bf16 %v7220_v28, %v7218_v17  ;;  %v7061_v32 = vpack.c.bf16 %v7230_v45, %v7228_v23  ;;  %v5894_v22 = vld [vmem:[%s9455_s26 + $0x1b8] sm:$0xff]  ;;  %v7075_v17 = vpack.c.bf16 %v5844_v4, %v5843_v60  ;;  %v7077_v28 = vpack.c.bf16 %v5862_v5, %v5861_v16  ;;  %v5845_v25 = vld [vmem:[%s9455_s26 + $0x30] sm:$0xff]  ;;  %v5920_v16 = vld [vmem:[%s9455_s26 + $0x288] sm:$0xff] }
 0x3fe   : > { %v5846_v23 = vld [vmem:[%s9455_s26 + $0x38] sm:$0xff]  ;;  %v7109_v45 = vpack.c.bf16 %v5894_v22, %v5893_v14  ;;  %v5853_v60 = vld [vmem:[%s9455_s26 + $0x70] sm:$0xff]  ;;  %v5951_v5 = vld [vmem:[%s9455_s26 + $0x380] sm:$0xff] }
 0x3ff   : > { %v5274_v34 = vpop.f32.mrb[20].mxu0  ;;  %7054 = vmatprep.subr.bf16.mxu0 %v7053_v52  ;;  %v5518_v6 = vpop.f32.mrb[20].mxu1  ;;  %7062 = vmatprep.subr.bf16.mxu1 %v7061_v32  ;;  %v5863_v52 = vld [vmem:[%s9455_s26 + $0xc0] sm:$0xff]  ;;  %v5864_v32 = vld [vmem:[%s9455_s26 + $0xc8] sm:$0xff]  ;;  %v7079_v56 = vpack.c.bf16 %v5846_v23, %v5845_v25  ;;  %v5854_v4 = vld [vmem:[%s9455_s26 + $0x78] sm:$0xff] }
 0x400   : > { %v5276_v48 = vpop.f32.mrb[21].mxu0  ;;  %7056 = vmatpush1.bf16.msra.mxu0 %v7055_v29  ;;  %v5520_v3 = vpop.f32.mrb[21].mxu1  ;;  %7064 = vmatpush1.bf16.msra.mxu1 %v7063_v7  ;;  %v7221_v12 = vadd.f32 %v5274_v34, %v9427_v1  ;;  %v7067_v1 = vpack.c.bf16 %v5840_v53, %v5839_v49  ;;  %v5877_v29 = vld [vmem:[%s9455_s26 + $0x130] sm:$0xff]  ;;  %v5878_v7 = vld [vmem:[%s9455_s26 + $0x138] sm:$0xff]  ;;  %v5896_v34 = vld [vmem:[%s9455_s26 + $0x1c8] sm:$0xff]  ;;  %v7081_v40 = vpack.c.bf16 %v5864_v32, %v5863_v52 }
 0x401   : > { %v7222_v24 = vadd.f32 %v5276_v48, %v1864_v0  ;;  %v5278_v63 = vpop.f32.mrb[22].mxu0  ;;  %v7232_v43 = vadd.f32 %v5520_v3, %v9434_v9  ;;  %v5522_v47 = vpop.f32.mrb[22].mxu1  ;;  %v7231_v0 = vadd.f32 %v5518_v6, %v9430_v62  ;;  %v7099_v9 = vpack.c.bf16 %v5872_v8, %v5871_v55  ;;  %v5847_v6 = vld [vmem:[%s9455_s26 + $0x40] sm:$0xff]  ;;  %v5848_v48 = vld [vmem:[%s9455_s26 + $0x48] sm:$0xff]  ;;  %v5866_v3 = vld [vmem:[%s9455_s26 + $0xd8] sm:$0xff] }
 0x402   : > { %v5279_v61 = vpop.f32.mrb[23].mxu0  ;;  %v5523_v11 = vpop.f32.mrb[23].mxu1  ;;  %v7101_v62 = vpack.c.bf16 %v5890_v21, %v5889_v26  ;;  %v7111_v39 = vpack.c.bf16 %v5878_v7, %v5877_v29  ;;  %v5879_v49 = vld [vmem:[%s9455_s26 + $0x140] sm:$0xff]  ;;  %v7113_v53 = vpack.c.bf16 %v5896_v34, %v5895_v33  ;;  %v5880_v55 = vld [vmem:[%s9455_s26 + $0x148] sm:$0xff]  ;;  %v5897_v63 = vld [vmem:[%s9455_s26 + $0x1d0] sm:$0xff]  ;;  %v7083_v38 = vpack.c.bf16 %v5848_v48, %v5847_v6 }
 0x403   : > { %6884 = vmatprep.subr.msk.mxu0 %vm5530_vm0, %v7222_v24  ;;  %6887 = vmatprep.subr.msk.mxu1 %vm5530_vm0, %v7232_v43  ;;  %v5865_v24 = vld [vmem:[%s9455_s26 + $0xd0] sm:$0xff]  ;;  %v5898_v8 = vld [vmem:[%s9455_s26 + $0x1d8] sm:$0xff]  ;;  %v7115_v54 = vpack.c.bf16 %v5880_v55, %v5879_v49  ;;  %v5867_v21 = vld [vmem:[%s9455_s26 + $0xe0] sm:$0xff]  ;;  %v7095_v14 = vpack.c.bf16 %v5854_v4, %v5853_v60 }
 0x404   : > { %6885 = vmatpush1.msk.msra.mxu0 %vm5530_vm0, %v7221_v12  ;;  %6888 = vmatpush1.msk.msra.mxu1 %vm5530_vm0, %v7231_v0  ;;  %v7085_v12 = vpack.c.bf16 %v5866_v3, %v5865_v24  ;;  %v5849_v43 = vld [vmem:[%s9455_s26 + $0x50] sm:$0xff]  ;;  %v5850_v47 = vld [vmem:[%s9455_s26 + $0x58] sm:$0xff]  ;;  %v5868_v0 = vld [vmem:[%s9455_s26 + $0xe8] sm:$0xff] }
 0x405   : > { %6886 = vmatmul.mubr.msk.f32.vlgmr.msra.gmra.mrb[26].mxu0 %vm5526_vm1, %v9415_v46  ;;  %6889 = vmatmul.mubr.msk.f32.vlgmr.msra.gmra.mrb[26].mxu1 %vm5526_vm1, %v9415_v46  ;;  %v5875_v46 = vld [vmem:[%s9455_s26 + $0x120] sm:$0xff]  ;;  %v5881_v61 = vld [vmem:[%s9455_s26 + $0x150] sm:$0xff]  ;;  %v5882_v26 = vld [vmem:[%s9455_s26 + $0x158] sm:$0xff] }
 0x406   : > { %7066 = vmatprep.subr.bf16.mxu0 %v7065_v18  ;;  %7098 = vmatprep.subr.bf16.mxu1 %v7097_v30  ;;  %v7107_v37 = vpack.c.bf16 %v5876_v44, %v5875_v46  ;;  %v7117_v18 = vpack.c.bf16 %v5898_v8, %v5897_v63  ;;  %v5899_v11 = vld [vmem:[%s9455_s26 + $0x1e0] sm:$0xff]  ;;  %v5900_v30 = vld [vmem:[%s9455_s26 + $0x1e8] sm:$0xff]  ;;  %v5885_v46 = vld [vmem:[%s9455_s26 + $0x170] sm:$0xff] }
 0x407   : > { %7068 = vmatpush3.bf16.msra.mxu0 %v7067_v1  ;;  %v9490_v50 = vpop.f32.mrb[24].mxu0  ;;  %7100 = vmatpush3.bf16.msra.mxu1 %v7099_v9  ;;  %v9495_v13 = vpop.f32.mrb[24].mxu1  ;;  %v7087_v1 = vpack.c.bf16 %v5850_v47, %v5849_v43  ;;  %v7119_v9 = vpack.c.bf16 %v5882_v26, %v5881_v61  ;;  %v5919_v44 = vld [vmem:[%s9455_s26 + $0x280] sm:$0xff]  ;;  %v5936_v29 = vld [vmem:[%s9455_s26 + $0x308] sm:$0xff]  ;;  %v5922_v7 = vld [vmem:[%s9455_s26 + $0x298] sm:$0xff] }
 0x408   : > { %7070 = vmatprep.subr.bf16.mxu0 %v7069_v15  ;;  %v5623_v20 = vpop.f32.mrb[25].mxu0  ;;  %7102 = vmatprep.subr.bf16.mxu1 %v7101_v62  ;;  %v5694_v10 = vpop.f32.mrb[25].mxu1  ;;  %v7089_v15 = vpack.c.bf16 %v5868_v0, %v5867_v21  ;;  %v7121_v62 = vpack.c.bf16 %v5900_v30, %v5899_v11  ;;  %v5935_v25 = vld [vmem:[%s9455_s26 + $0x300] sm:$0xff]  ;;  %v5953_v52 = vld [vmem:[%s9455_s26 + $0x390] sm:$0xff]  ;;  %v5954_v32 = vld [vmem:[%s9455_s26 + $0x398] sm:$0xff] }
 0x409   : > { %6031 = vmatprep.mubr.f32.mxu0 %v5623_v20  ;;  %6101 = vmatprep.mubr.f32.mxu1 %v5694_v10  ;;  %v7125_v20 = vpack.c.bf16 %v5902_v58, %v5901_v57  ;;  %v5952_v10 = vld [vmem:[%s9455_s26 + $0x388] sm:$0xff]  ;;  %v7163_v34 = vpack.c.bf16 %v5936_v29, %v5935_v25  ;;  %v5937_v6 = vld [vmem:[%s9455_s26 + $0x310] sm:$0xff]  ;;  %v7165_v48 = vpack.c.bf16 %v5954_v32, %v5953_v52  ;;  %v5938_v49 = vld [vmem:[%s9455_s26 + $0x318] sm:$0xff] }
 0x40a   : > { %v7161_v23 = vpack.c.bf16 %v5952_v10, %v5951_v5  ;;  %v5924_v55 = vld [vmem:[%s9455_s26 + $0x2a8] sm:$0xff]  ;;  %v5955_v24 = vld [vmem:[%s9455_s26 + $0x3a0] sm:$0xff]  ;;  %v7167_v8 = vpack.c.bf16 %v5938_v49, %v5937_v6  ;;  %v5925_v61 = vld [vmem:[%s9455_s26 + $0x2b0] sm:$0xff] }
 0x40b   : > { %7072 = vmatpush3.bf16.msra.mxu0 %v7071_v2  ;;  %7104 = vmatpush3.bf16.msra.mxu1 %v7103_v51  ;;  %v7091_v2 = vpack.c.bf16 %v5852_v35, %v5851_v19  ;;  %v7123_v51 = vpack.c.bf16 %v5884_v41, %v5883_v36  ;;  %v5956_v3 = vld [vmem:[%s9455_s26 + $0x3a8] sm:$0xff]  ;;  %v5939_v43 = vld [vmem:[%s9455_s26 + $0x320] sm:$0xff]  ;;  %v5958_v26 = vld [vmem:[%s9455_s26 + $0x3b8] sm:$0xff] }
 0x40c   : > { %7074 = vmatprep.subr.bf16.mxu0 %v7073_v59  ;;  %7106 = vmatprep.subr.bf16.mxu1 %v7105_v27  ;;  %v7093_v59 = vpack.c.bf16 %v5870_v31, %v5869_v42  ;;  %v5886_v27 = vld [vmem:[%s9455_s26 + $0x178] sm:$0xff]  ;;  %v5940_v47 = vld [vmem:[%s9455_s26 + $0x328] sm:$0xff]  ;;  %v5909_v30 = vld [vmem:[%s9455_s26 + $0x230] sm:$0xff] }
 0x40d   : > { %v7127_v22 = vpack.c.bf16 %v5886_v27, %v5885_v46  ;;  %v7171_v0 = vpack.c.bf16 %v5940_v47, %v5939_v43  ;;  %v5942_v19 = vld [vmem:[%s9455_s26 + $0x338] sm:$0xff]  ;;  %v5927_v35 = vld [vmem:[%s9455_s26 + $0x2c0] sm:$0xff]  ;;  %v5928_v36 = vld [vmem:[%s9455_s26 + $0x2c8] sm:$0xff] }
 0x40e   : > { %v5960_v41 = vld [vmem:[%s9455_s26 + $0x3c8] sm:$0xff]  ;;  %v7145_v57 = vpack.c.bf16 %v5928_v36, %v5927_v35  ;;  %v5911_v58 = vld [vmem:[%s9455_s26 + $0x240] sm:$0xff]  ;;  %v5929_v4 = vld [vmem:[%s9455_s26 + $0x2d0] sm:$0xff] }
 0x40f   : > { %7076 = vmatpush3.bf16.msra.mxu0 %v7075_v17  ;;  %7108 = vmatpush3.bf16.msra.mxu1 %v7107_v37  ;;  %v7129_v17 = vpack.c.bf16 %v5920_v16, %v5919_v44  ;;  %v5903_v37 = vld [vmem:[%s9455_s26 + $0x200] sm:$0xff]  ;;  %v5944_v60 = vld [vmem:[%s9455_s26 + $0x348] sm:$0xff]  ;;  %v5930_v46 = vld [vmem:[%s9455_s26 + $0x2d8] sm:$0xff] }
 0x410   : > { %7078 = vmatprep.subr.bf16.mxu0 %v7077_v28  ;;  %7110 = vmatprep.subr.bf16.mxu1 %v7109_v45  ;;  %v5904_v28 = vld [vmem:[%s9455_s26 + $0x208] sm:$0xff]  ;;  %v5921_v45 = vld [vmem:[%s9455_s26 + $0x290] sm:$0xff]  ;;  %v5962_v27 = vld [vmem:[%s9455_s26 + $0x3d8] sm:$0xff]  ;;  %v7149_v5 = vpack.c.bf16 %v5930_v46, %v5929_v4 }
 0x411   : > { %v7131_v33 = vpack.c.bf16 %v5904_v28, %v5903_v37  ;;  %v5913_v10 = vld [vmem:[%s9455_s26 + $0x250] sm:$0xff]  ;;  %v5946_v37 = vld [vmem:[%s9455_s26 + $0x358] sm:$0xff]  ;;  %v5931_v28 = vld [vmem:[%s9455_s26 + $0x2e0] sm:$0xff] }
 0x412   : > { %v5932_v25 = vld [vmem:[%s9455_s26 + $0x2e8] sm:$0xff]  ;;  %v5915_v32 = vld [vmem:[%s9455_s26 + $0x260] sm:$0xff]  ;;  %v5934_v6 = vld [vmem:[%s9455_s26 + $0x2f8] sm:$0xff] }
 0x413   : > { %7080 = vmatpush3.bf16.msra.mxu0 %v7079_v56  ;;  %7112 = vmatpush3.bf16.msra.mxu1 %v7111_v39  ;;  %v7133_v56 = vpack.c.bf16 %v5922_v7, %v5921_v45  ;;  %v5905_v39 = vld [vmem:[%s9455_s26 + $0x210] sm:$0xff]  ;;  %v5964_v29 = vld [vmem:[%s9455_s26 + $0x3e8] sm:$0xff]  ;;  %v7153_v52 = vpack.c.bf16 %v5932_v25, %v5931_v28  ;;  %v5966_v49 = vld [vmem:[%s9455_s26 + $0x3f8] sm:$0xff] }
 0x414   : > { %7082 = vmatprep.subr.bf16.mxu0 %v7081_v40  ;;  %7114 = vmatprep.subr.bf16.mxu1 %v7113_v53  ;;  %v5906_v40 = vld [vmem:[%s9455_s26 + $0x218] sm:$0xff]  ;;  %v5923_v53 = vld [vmem:[%s9455_s26 + $0x2a0] sm:$0xff] }
 0x415   : > { %v7135_v63 = vpack.c.bf16 %v5906_v40, %v5905_v39  ;;  %v5948_v39 = vld [vmem:[%s9455_s26 + $0x368] sm:$0xff]  ;;  %v5933_v40 = vld [vmem:[%s9455_s26 + $0x2f0] sm:$0xff] }
 0x417   : > { %7084 = vmatpush3.bf16.msra.mxu0 %v7083_v38  ;;  %7116 = vmatpush3.bf16.msra.mxu1 %v7115_v54  ;;  %v7137_v38 = vpack.c.bf16 %v5924_v55, %v5923_v53  ;;  %v5907_v54 = vld [vmem:[%s9455_s26 + $0x220] sm:$0xff] }
 0x418   : > { %7086 = vmatprep.subr.bf16.mxu0 %v7085_v12  ;;  %7118 = vmatprep.subr.bf16.mxu1 %v7117_v18  ;;  %v5908_v12 = vld [vmem:[%s9455_s26 + $0x228] sm:$0xff]  ;;  %v5957_v18 = vld [vmem:[%s9455_s26 + $0x3b0] sm:$0xff] }
 0x419   : > { %v7139_v21 = vpack.c.bf16 %v5908_v12, %v5907_v54  ;;  %v5950_v12 = vld [vmem:[%s9455_s26 + $0x378] sm:$0xff] }
 0x41b   : > { %7088 = vmatpush3.bf16.msra.mxu0 %v7087_v1  ;;  %7120 = vmatpush3.bf16.msra.mxu1 %v7119_v9  ;;  %v5910_v1 = vld [vmem:[%s9455_s26 + $0x238] sm:$0xff]  ;;  %v5941_v9 = vld [vmem:[%s9455_s26 + $0x330] sm:$0xff] }
 0x41c   : > { %7090 = vmatprep.subr.bf16.mxu0 %v7089_v15  ;;  %7122 = vmatprep.subr.bf16.mxu1 %v7121_v62  ;;  %v7173_v15 = vpack.c.bf16 %v5958_v26, %v5957_v18  ;;  %v5959_v62 = vld [vmem:[%s9455_s26 + $0x3c0] sm:$0xff]  ;;  %v7143_v42 = vpack.c.bf16 %v5910_v1, %v5909_v30  ;;  %v7175_v31 = vpack.c.bf16 %v5942_v19, %v5941_v9 }
 0x41f   : > { %7092 = vmatpush3.bf16.msra.mxu0 %v7091_v2  ;;  %7124 = vmatpush3.bf16.msra.mxu1 %v7123_v51  ;;  %v5912_v2 = vld [vmem:[%s9455_s26 + $0x248] sm:$0xff]  ;;  %v5943_v51 = vld [vmem:[%s9455_s26 + $0x340] sm:$0xff] }
 0x420   : > { %7094 = vmatprep.subr.bf16.mxu0 %v7093_v59  ;;  %7126 = vmatprep.subr.bf16.mxu1 %v7125_v20  ;;  %v7177_v59 = vpack.c.bf16 %v5960_v41, %v5959_v62  ;;  %v5961_v20 = vld [vmem:[%s9455_s26 + $0x3d0] sm:$0xff]  ;;  %v7147_v44 = vpack.c.bf16 %v5912_v2, %v5911_v58  ;;  %v7179_v16 = vpack.c.bf16 %v5944_v60, %v5943_v51 }
 0x423   : > { %7096 = vmatpush3.bf16.msra.mxu0 %v7095_v14  ;;  %7128 = vmatpush3.bf16.msra.mxu1 %v7127_v22  ;;  %v5914_v14 = vld [vmem:[%s9455_s26 + $0x258] sm:$0xff]  ;;  %v5945_v22 = vld [vmem:[%s9455_s26 + $0x350] sm:$0xff] }
 0x424   : > { %7130 = vmatprep.subr.bf16.mxu0 %v7129_v17  ;;  %7162 = vmatprep.subr.bf16.mxu1 %v7161_v23  ;;  %v7181_v17 = vpack.c.bf16 %v5962_v27, %v5961_v20  ;;  %v5963_v23 = vld [vmem:[%s9455_s26 + $0x3e0] sm:$0xff]  ;;  %v7151_v45 = vpack.c.bf16 %v5914_v14, %v5913_v10  ;;  %v7183_v7 = vpack.c.bf16 %v5946_v37, %v5945_v22 }
 0x426   : > { %6032 = vmatmul.mubr.f32.vlgmr.msra.gmra.mrb[28].mxu0 %v9490_v50  ;;  %6102 = vmatmul.mubr.f32.vlgmr.msra.gmra.mrb[28].mxu1 %v9495_v13  ;;  %v7169_v50 = vpack.c.bf16 %v5956_v3, %v5955_v24  ;;  %v5926_v13 = vld [vmem:[%s9455_s26 + $0x2b8] sm:$0xff]  ;;  %v7157_v24 = vpack.c.bf16 %v5934_v6, %v5933_v40 }
 0x427   : > { %7132 = vmatpush3.bf16.msra.mxu0 %v7131_v33  ;;  %7164 = vmatpush3.bf16.msra.mxu1 %v7163_v34  ;;  %v7141_v11 = vpack.c.bf16 %v5926_v13, %v5925_v61  ;;  %v5916_v33 = vld [vmem:[%s9455_s26 + $0x268] sm:$0xff]  ;;  %v5947_v34 = vld [vmem:[%s9455_s26 + $0x360] sm:$0xff] }
 0x428   : > { %7134 = vmatprep.subr.bf16.mxu0 %v7133_v56  ;;  %7166 = vmatprep.subr.bf16.mxu1 %v7165_v48  ;;  %v7185_v56 = vpack.c.bf16 %v5964_v29, %v5963_v23  ;;  %v5965_v48 = vld [vmem:[%s9455_s26 + $0x3f0] sm:$0xff]  ;;  %v7155_v53 = vpack.c.bf16 %v5916_v33, %v5915_v32  ;;  %v7187_v55 = vpack.c.bf16 %v5948_v39, %v5947_v34 }
 0x429   : > { %v7189_v3 = vpack.c.bf16 %v5966_v49, %v5965_v48 }
 0x42b   : > { %7136 = vmatpush3.bf16.msra.mxu0 %v7135_v63  ;;  %7168 = vmatpush3.bf16.msra.mxu1 %v7167_v8  ;;  %v5917_v63 = vld [vmem:[%s9455_s26 + $0x270] sm:$0xff]  ;;  %v5918_v8 = vld [vmem:[%s9455_s26 + $0x278] sm:$0xff] }
 0x42c   : > { %7138 = vmatprep.subr.bf16.mxu0 %v7137_v38  ;;  %7170 = vmatprep.subr.bf16.mxu1 %v7169_v50  ;;  %v5949_v38 = vld [vmem:[%s9455_s26 + $0x370] sm:$0xff]  ;;  %v7159_v54 = vpack.c.bf16 %v5918_v8, %v5917_v63 }
 0x42d   : > { %v7191_v43 = vpack.c.bf16 %v5950_v12, %v5949_v38 }
 0x42f   : > { %7140 = vmatpush3.bf16.msra.mxu0 %v7139_v21  ;;  %7172 = vmatpush3.bf16.msra.mxu1 %v7171_v0 }
 0x430   : > { %7142 = vmatprep.subr.bf16.mxu0 %v7141_v11  ;;  %7174 = vmatprep.subr.bf16.mxu1 %v7173_v15 }
 0x433   : > { %7144 = vmatpush3.bf16.msra.mxu0 %v7143_v42  ;;  %7176 = vmatpush3.bf16.msra.mxu1 %v7175_v31 }
 0x434   : > { %7146 = vmatprep.subr.bf16.mxu0 %v7145_v57  ;;  %7178 = vmatprep.subr.bf16.mxu1 %v7177_v59 }
 0x437   : > { %7148 = vmatpush3.bf16.msra.mxu0 %v7147_v44  ;;  %7180 = vmatpush3.bf16.msra.mxu1 %v7179_v16 }
 0x438   : > { %7150 = vmatprep.subr.bf16.mxu0 %v7149_v5  ;;  %7182 = vmatprep.subr.bf16.mxu1 %v7181_v17 }
 0x43b   : > { %7152 = vmatpush3.bf16.msra.mxu0 %v7151_v45  ;;  %7184 = vmatpush3.bf16.msra.mxu1 %v7183_v7 }
 0x43c   : > { %7154 = vmatprep.subr.bf16.mxu0 %v7153_v52  ;;  %7186 = vmatprep.subr.bf16.mxu1 %v7185_v56 }
 0x43f   : > { %7156 = vmatpush3.bf16.msra.mxu0 %v7155_v53  ;;  %7188 = vmatpush3.bf16.msra.mxu1 %v7187_v55 }
 0x440   : > { %7158 = vmatprep.subr.bf16.mxu0 %v7157_v24  ;;  %7190 = vmatprep.subr.bf16.mxu1 %v7189_v3 }
 0x443   : > { %7160 = vmatpush3.bf16.msra.mxu0 %v7159_v54  ;;  %7192 = vmatpush3.bf16.msra.mxu1 %v7191_v43 }
 0x4d8   : > { %v5763_v50 = vpop.f32.mrb[26].mxu0  ;;  %v5834_v47 = vpop.f32.mrb[26].mxu1 }
 0x4d9   : > { %v5765_v61 = vpop.f32.mrb[27].mxu0  ;;  %v5836_v13 = vpop.f32.mrb[27].mxu1 }
 0x4da   : > { %6171 = vmatprep.mubr.f32.mxu0 %v5765_v61  ;;  %6241 = vmatprep.mubr.f32.mxu1 %v5836_v13 }
 0x4db   : > { %6172 = vmatmul.mubr.f32.vlgmr.msra.gmra.mrb[30].mxu0 %v5763_v50  ;;  %6242 = vmatmul.mubr.f32.vlgmr.msra.gmra.mrb[30].mxu1 %v5834_v47 }
 0x4f9   : > { %v6925_v18 = vpop.f32.mrb[28].mxu0  ;;  %v6960_v26 = vpop.f32.mrb[28].mxu1 }
 0x4fa   : > { %v6926_v21 = vpop.f32.mrb[29].mxu0  ;;  %v6961_v11 = vpop.f32.mrb[29].mxu1 }
 0x4fb   : > { %v6927_v0 = vadd.f32 %v6926_v21, %v6925_v18  ;;  %v6962_v30 = vadd.f32 %v6961_v11, %v6960_v26 }
 0x4fd   : > { %v6104_v1 = vadd.f32 %v6962_v30, %v6927_v0 }
 0x5ae   : > { %v6995_v9 = vpop.f32.mrb[30].mxu0  ;;  %v7030_v15 = vpop.f32.mrb[30].mxu1 }
 0x5af   : > { %v6996_v19 = vpop.f32.mrb[31].mxu0  ;;  %v7031_v36 = vpop.f32.mrb[31].mxu1 }
 0x5b0   : > { %v6997_v35 = vadd.f32 %v6996_v19, %v6995_v9  ;;  %v7032_v62 = vadd.f32 %v7031_v36, %v7030_v15 }
 0x5b2   : > { %v6174_v41 = vadd.f32 %v6997_v35, %v6104_v1 }
 0x5b4   : > { %v6244_v42 = vadd.f32 %v7032_v62, %v6174_v41 }
 0x5b6   : > { %6248 = vst.msk [vmem:[%s1306_s30] sm:$0x3] %vm6247_vm2, %v6244_v42 }
 0x5b7 PF: > { %p12_p11 = scmp.ge.s32.totalorder %s7484_s22, 4   ;;  %s9627_s18 = smov %s7428_s19 }
 0x5b8   : > { %s9628_s19 = smov %s7493_s25  ;;  %s9629_s20 = smov %s7484_s22 }
 0x5b9   :  { %14 = sbr.rel (!%p12_p11) target bundleno = 2 (0x2), region = 104 }

</bundles_post_ra>
